<compile_context>
chip_gen: v7x
topology: tpu7x:2x2x1
jax: 0.10.0
libtpu: 0.0.40
codegen_flags: <defaults>
</compile_context>

<pallas_src>
import functools

import jax
import jax.numpy as jnp
from jax import lax
from jax.experimental import pallas as pl
from jax.experimental.pallas import tpu as pltpu

# Safe on every generation: <= 64 MiB physical VMEM on v7x, well under 128 MiB on v5e/v6e,
# and above v5e's 16 MiB scoped default.
_VMEM_LIMIT_BYTES = 32 * 1024 * 1024


# ----------------------------------------------------------------------------
# Kernel 1: fused conv chain (1x1 convs, points-major) + max over points.
# Optionally runs the STN FC stack on the resident max in the last-tile epilogue.
# Grid: (batch, point-tiles); point-tile axis is the sequential ("arbitrary") axis.
# ----------------------------------------------------------------------------
def _conv_chain_max_kernel(x_ref, w1_ref, s1_ref, w2_ref, s2_ref, w3_ref, s3_ref,
                           *rest, n_last_valid, relu3, has_pad, with_fc):
    if with_fc:
        f1w, f1s, f2w, f2s, f3w, f3s = rest[:6]
        gmax_ref, trans_ref = rest[6:]
    else:
        (gmax_ref,) = rest

    n = pl.program_id(1)
    is_last = n == pl.num_programs(1) - 1

    x = x_ref[0]                                                     # (tile_n, d) bf16
    h1 = jnp.dot(x, w1_ref[0], preferred_element_type=jnp.float32) + s1_ref[...]
    h1 = jnp.maximum(h1, 0.0)                                        # relu(bn1(conv1))
    h2 = jnp.dot(h1.astype(w2_ref.dtype), w2_ref[...],
                 preferred_element_type=jnp.float32) + s2_ref[...]
    h2 = jnp.maximum(h2, 0.0)                                        # relu(bn2(conv2))
    h3 = jnp.dot(h2.astype(w3_ref.dtype), w3_ref[...],
                 preferred_element_type=jnp.float32) + s3_ref[...]   # bn3(conv3)
    if relu3:
        h3 = jnp.maximum(h3, 0.0)

    @pl.when(n == 0)
    def _():
        gmax_ref[...] = jnp.full(gmax_ref.shape, -jnp.inf, gmax_ref.dtype)
        if with_fc:
            trans_ref[...] = jnp.zeros(trans_ref.shape, trans_ref.dtype)

    if has_pad:
        # Only the last point tile can contain padded rows: mask there only.
        @pl.when(jnp.logical_not(is_last))
        def _():
            gmax_ref[0] = jnp.maximum(gmax_ref[0],
                                      jnp.max(h3, axis=0, keepdims=True))

        @pl.when(is_last)
        def _():
            row = lax.broadcasted_iota(jnp.int32, (h3.shape[0], 1), 0)
            h3m = jnp.where(row < n_last_valid, h3, -jnp.inf)
            gmax_ref[0] = jnp.maximum(gmax_ref[0],
                                      jnp.max(h3m, axis=0, keepdims=True))
    else:
        gmax_ref[0] = jnp.maximum(gmax_ref[0], jnp.max(h3, axis=0, keepdims=True))

    if with_fc:
        # STN epilogue: fc1 -> fc2 -> fc3 (+identity folded in fc3's shift) on the
        # now-complete global max, emitted directly as `trans`.
        @pl.when(is_last)
        def _():
            g = gmax_ref[0].astype(f1w.dtype)                        # (1, C3)
            h = jnp.dot(g, f1w[...], preferred_element_type=jnp.float32) + f1s[...]
            h = jnp.maximum(h, 0.0)
            h = jnp.dot(h.astype(f2w.dtype), f2w[...],
                        preferred_element_type=jnp.float32) + f2s[...]
            h = jnp.maximum(h, 0.0)
            t = jnp.dot(h.astype(f3w.dtype), f3w[...],
                        preferred_element_type=jnp.float32) + f3s[...]
            trans_ref[0] = t.astype(trans_ref.dtype)


def conv_chain_max(x_pad, w1, s1, w2, s2, w3, s3, *, n_valid, tile_n, relu3,
                   w1_per_batch, fc_params=None):
    """x_pad: (B, n_pad, d) bf16; w1: (B or 1, d, C1).

    Returns gmax (B, C3); with fc_params also returns trans_flat (B, k*k).
    """
    B, n_pad, d = x_pad.shape
    c1, c2, c3 = w1.shape[-1], w2.shape[-1], w3.shape[-1]
    n_tiles = n_pad // tile_n
    has_pad = (n_valid % tile_n) != 0
    n_last_valid = n_valid - (n_tiles - 1) * tile_n

    w1_map = (lambda b, n: (b, 0, 0)) if w1_per_batch else (lambda b, n: (0, 0, 0))
    in_specs = [
        pl.BlockSpec((1, tile_n, d), lambda b, n: (b, n, 0)),
        pl.BlockSpec((1, d, c1), w1_map),
        pl.BlockSpec((1, c1), lambda b, n: (0, 0)),
        pl.BlockSpec((c1, c2), lambda b, n: (0, 0)),
        pl.BlockSpec((1, c2), lambda b, n: (0, 0)),
        pl.BlockSpec((c2, c3), lambda b, n: (0, 0)),
        pl.BlockSpec((1, c3), lambda b, n: (0, 0)),
    ]
    operands = [x_pad, w1, s1, w2, s2, w3, s3]

    gmax_spec = pl.BlockSpec((1, 1, c3), lambda b, n: (b, 0, 0))     # resident across n
    gmax_shape = jax.ShapeDtypeStruct((B, 1, c3), jnp.float32)

    with_fc = fc_params is not None
    if with_fc:
        f1w, f1s, f2w, f2s, f3w, f3s = fc_params
        d1, d2, kk = f1w.shape[1], f2w.shape[1], f3w.shape[1]
        in_specs += [
            pl.BlockSpec((c3, d1), lambda b, n: (0, 0)),
            pl.BlockSpec((1, d1), lambda b, n: (0, 0)),
            pl.BlockSpec((d1, d2), lambda b, n: (0, 0)),
            pl.BlockSpec((1, d2), lambda b, n: (0, 0)),
            pl.BlockSpec((d2, kk), lambda b, n: (0, 0)),
            pl.BlockSpec((1, kk), lambda b, n: (0, 0)),
        ]
        operands += [f1w, f1s, f2w, f2s, f3w, f3s]
        out_specs = [gmax_spec, pl.BlockSpec((1, 1, kk), lambda b, n: (b, 0, 0))]
        out_shape = (gmax_shape, jax.ShapeDtypeStruct((B, 1, kk), jnp.float32))
    else:
        out_specs = gmax_spec
        out_shape = gmax_shape

    kernel = functools.partial(_conv_chain_max_kernel, n_last_valid=n_last_valid,
                               relu3=relu3, has_pad=has_pad, with_fc=with_fc)
    outs = pl.pallas_call(
        kernel,
        out_shape=out_shape,
        grid_spec=pltpu.PrefetchScalarGridSpec(
            num_scalar_prefetch=0,
            grid=(B, n_tiles),
            in_specs=in_specs,
            out_specs=out_specs,
        ),
        compiler_params=pltpu.CompilerParams(
            dimension_semantics=("parallel", "arbitrary"),
            vmem_limit_bytes=_VMEM_LIMIT_BYTES),
    )(*operands)

    if with_fc:
        gmax, trans = outs
        return gmax.reshape(B, c3), trans.reshape(B, -1)
    return outs.reshape(B, c3)


# ----------------------------------------------------------------------------
# Kernel 2: fused segmentation head, channels-major so the output is lane-dense.
#   h1 = relu(W1'_b @ x_b + s1)                      (pointfeat recomputed, K=d matmul)
#   h  = relu(Wp @ h1 + b1_b)  (global feature g_b folded into the per-batch bias b1_b)
#   -> conv2 -> conv3 -> conv4 -> log_softmax, stored as (k, tile_n).
# ----------------------------------------------------------------------------
def _seg_head_kernel(x_ref, w1_ref, s1_ref, wp_ref, b1_ref, w2_ref, b2_ref,
                     w3_ref, b3_ref, w4_ref, b4_ref, o_ref):
    x = x_ref[0]                                                     # (d, tile_n) bf16
    h = jnp.dot(w1_ref[0], x, preferred_element_type=jnp.float32) + s1_ref[...]
    h = jnp.maximum(h, 0.0)                                          # pointfeat (64, tile_n)
    h = jnp.dot(wp_ref[...], h.astype(wp_ref.dtype),
                preferred_element_type=jnp.float32) + b1_ref[0]
    h = jnp.maximum(h, 0.0)
    h = jnp.dot(w2_ref[...], h.astype(w2_ref.dtype),
                preferred_element_type=jnp.float32) + b2_ref[...]
    h = jnp.maximum(h, 0.0)
    h = jnp.dot(w3_ref[...], h.astype(w3_ref.dtype),
                preferred_element_type=jnp.float32) + b3_ref[...]
    h = jnp.maximum(h, 0.0)
    z = jnp.dot(w4_ref[...], h.astype(w4_ref.dtype),
                preferred_element_type=jnp.float32) + b4_ref[...]    # (k, tile_n) logits
    m = jnp.max(z, axis=0, keepdims=True)
    lse = jnp.log(jnp.sum(jnp.exp(z - m), axis=0, keepdims=True)) + m
    o_ref[0] = (z - lse).astype(o_ref.dtype)                         # lane-dense store


def seg_head(x_t, w1t, s1, wpt, b1, w2t, b2, w3t, b3, w4t, b4, *, tile_n):
    """x_t: (B, d, n_pad) bf16; w1t: (B, 64, d); b1: (B, C1, 1) -> log-probs (B, k, n_pad)."""
    B, d, n_pad = x_t.shape
    c0 = wpt.shape[1]                 # 64 pointfeat channels
    c1 = wpt.shape[0]
    c2 = w2t.shape[0]
    c3 = w3t.shape[0]
    ncls = w4t.shape[0]
    n_tiles = n_pad // tile_n
    return pl.pallas_call(
        _seg_head_kernel,
        out_shape=jax.ShapeDtypeStruct((B, ncls, n_pad), jnp.float32),
        grid_spec=pltpu.PrefetchScalarGridSpec(
            num_scalar_prefetch=0,
            grid=(B, n_tiles),
            in_specs=[
                pl.BlockSpec((1, d, tile_n), lambda b, n: (b, 0, n)),
                pl.BlockSpec((1, c0, d), lambda b, n: (b, 0, 0)),
                pl.BlockSpec((c0, 1), lambda b, n: (0, 0)),
                pl.BlockSpec((c1, c0), lambda b, n: (0, 0)),
                pl.BlockSpec((1, c1, 1), lambda b, n: (b, 0, 0)),
                pl.BlockSpec((c2, c1), lambda b, n: (0, 0)),
                pl.BlockSpec((c2, 1), lambda b, n: (0, 0)),
                pl.BlockSpec((c3, c2), lambda b, n: (0, 0)),
                pl.BlockSpec((c3, 1), lambda b, n: (0, 0)),
                pl.BlockSpec((ncls, c3), lambda b, n: (0, 0)),
                pl.BlockSpec((ncls, 1), lambda b, n: (0, 0)),
            ],
            out_specs=pl.BlockSpec((1, ncls, tile_n), lambda b, n: (b, 0, n)),
        ),
        compiler_params=pltpu.CompilerParams(
            dimension_semantics=("parallel", "parallel"),
            vmem_limit_bytes=_VMEM_LIMIT_BYTES),
    )(x_t, w1t, s1, wpt, b1, w2t, b2, w3t, b3, w4t, b4)


# ----------------------------------------------------------------------------
# Deterministic parameter construction (synthetic weights, eval-mode BN folded).
# BN scale folds into weight columns; shift = beta - mean*scale + scale*bias.
# ----------------------------------------------------------------------------
_BN_EPS = 1e-5


def _folded_layer(key, cin, cout, *, with_bn=True, extra_shift=None, dtype=jnp.bfloat16):
    ks = jax.random.split(key, 6)
    w = jax.random.normal(ks[0], (cin, cout), jnp.float32) / jnp.sqrt(float(cin))
    b = 0.1 * jax.random.normal(ks[1], (cout,), jnp.float32)
    if with_bn:
        gamma = 1.0 + 0.1 * jax.random.normal(ks[2], (cout,), jnp.float32)
        beta = 0.1 * jax.random.normal(ks[3], (cout,), jnp.float32)
        mean = 0.1 * jax.random.normal(ks[4], (cout,), jnp.float32)
        var = 1.0 + 0.1 * jax.random.uniform(ks[5], (cout,), jnp.float32)
        scale = gamma / jnp.sqrt(var + _BN_EPS)
        shift = beta - mean * scale + scale * b
        w = w * scale[None, :]                     # fold BN scale into weight columns
    else:
        shift = b
    if extra_shift is not None:
        shift = shift + extra_shift
    return w.astype(dtype), shift.reshape(1, cout).astype(jnp.float32)


def make_params(key, *, d, k, d_feat, stn_1, stn_2, stn_3, d_conv1, d_conv2, d_conv3):
    keys = jax.random.split(key, 13)
    eye_flat = jnp.eye(d, dtype=jnp.float32).reshape(d * d)
    stn = {
        "conv1": _folded_layer(keys[0], d, 64),
        "conv2": _folded_layer(keys[1], 64, 128),
        "conv3": _folded_layer(keys[2], 128, stn_1),
        "fc1": _folded_layer(keys[3], stn_1, stn_2),
        "fc2": _folded_layer(keys[4], stn_2, stn_3),
        # fc3: no BN/ReLU; the identity added to the STN output lives in its shift.
        "fc3": _folded_layer(keys[5], stn_3, d * d, with_bn=False, extra_shift=eye_flat),
    }
    # Feature trunk conv1 stays f32: it is fused per-batch with `trans` in the wrapper.
    f_c1_w, f_c1_s = _folded_layer(keys[6], d, 64, dtype=jnp.float32)
    feat = {
        "conv1_w_f32": f_c1_w,
        "conv1_shift": f_c1_s,                       # (1, 64)
        "conv2": _folded_layer(keys[7], 64, 128),
        "conv3": _folded_layer(keys[8], 128, d_feat),   # bn3, no relu
    }
    # Seg-head conv1 input channels are ordered [global d_feat ; pointfeat 64]
    # (torch.cat([global, pointfeat], 1)); split so the global part folds into a
    # per-batch bias.  All seg weights are stored transposed (channels-major kernel).
    s_c1_w, s_c1_s = _folded_layer(keys[9], d_feat + 64, d_conv1, dtype=jnp.float32)
    c2w, c2s = _folded_layer(keys[10], d_conv1, d_conv2)
    c3w, c3s = _folded_layer(keys[11], d_conv2, d_conv3)
    c4w, c4s = _folded_layer(keys[12], d_conv3, k, with_bn=False)   # no BN, no relu
    seg = {
        "conv1_wg_f32": s_c1_w[:d_feat, :],                         # (d_feat, C1), b1 fold
        "conv1_wp_T": jnp.transpose(s_c1_w[d_feat:, :]).astype(jnp.bfloat16),  # (C1, 64)
        "conv1_shift": s_c1_s,                                      # (1, C1)
        "conv2_wT": jnp.transpose(c2w), "conv2_b": c2s.reshape(-1, 1),
        "conv3_wT": jnp.transpose(c3w), "conv3_b": c3s.reshape(-1, 1),
        "conv4_wT": jnp.transpose(c4w), "conv4_b": c4s.reshape(-1, 1),
    }
    return {"stn": stn, "feat": feat, "seg": seg}


# ----------------------------------------------------------------------------
# Forward pass: three fused pallas_calls + tiny JAX glue.
# ----------------------------------------------------------------------------
def pointnet_densecls_forward(params, x, *, tile_n=512):
    """PointNetDenseCls.forward (feature_transform=False).

    x: (B, n_pts, d) exactly as the PyTorch module receives it.
    Returns (log_probs (B, n_pts, k), trans (B, d, d), trans_feat=None).
    """
    B, N, d = x.shape
    n_pad = pl.cdiv(N, tile_n) * tile_n
    x_pad = jnp.pad(x.astype(jnp.bfloat16), ((0, 0), (0, n_pad - N), (0, 0)))   # (B,n_pad,d)
    x_pad_t = jnp.transpose(x_pad, (0, 2, 1))                                    # (B,d,n_pad)

    p_stn, p_feat, p_seg = params["stn"], params["feat"], params["seg"]

    # ---- STN: conv trunk + max + FC stack fused in one kernel -> trans ----------------
    stn_w1 = p_stn["conv1"][0][None]                                 # (1, d, 64) shared
    _, trans_flat = conv_chain_max(
        x_pad, stn_w1, p_stn["conv1"][1],
        *p_stn["conv2"], *p_stn["conv3"],
        n_valid=N, tile_n=tile_n, relu3=True, w1_per_batch=False,
        fc_params=(*p_stn["fc1"], *p_stn["fc2"], *p_stn["fc3"]))
    trans = trans_flat.reshape(B, d, d)                              # (B, d, d)

    # ---- Feature trunk: bmm(x, trans) folded into per-batch conv1 weights -------------
    w1_fused = jnp.einsum("bij,jk->bik", trans, p_feat["conv1_w_f32"])    # (B, d, 64) f32
    g = conv_chain_max(
        x_pad, w1_fused.astype(jnp.bfloat16), p_feat["conv1_shift"],
        *p_feat["conv2"], *p_feat["conv3"],
        n_valid=N, tile_n=tile_n, relu3=False, w1_per_batch=True)         # (B, d_feat)

    # ---- Segmentation head: global feature folded into a per-batch bias; pointfeat ----
    # ---- recomputed in-kernel; channels-major so log-prob stores are lane-dense. ------
    b1 = (p_seg["conv1_shift"] + g @ p_seg["conv1_wg_f32"]).reshape(B, -1, 1)
    w1t_fused = jnp.transpose(w1_fused, (0, 2, 1)).astype(jnp.bfloat16)   # (B, 64, d)
    s1_col = p_feat["conv1_shift"].reshape(-1, 1)                         # (64, 1)
    logp_t = seg_head(
        x_pad_t, w1t_fused, s1_col,
        p_seg["conv1_wp_T"], b1,
        p_seg["conv2_wT"], p_seg["conv2_b"],
        p_seg["conv3_wT"], p_seg["conv3_b"],
        p_seg["conv4_wT"], p_seg["conv4_b"],
        tile_n=tile_n)                                                    # (B, k, n_pad)
    logp = jnp.transpose(logp_t[:, :, :N], (0, 2, 1))                     # (B, N, k)

    # TODO(synk): feature_transform=True branch (fstn + per-point 64x64 transform) not implemented.
    return logp, trans, None


# ----------------------------------------------------------------------------
if __name__ == "__main__":
    # Small shapes consistent with PointNetDenseCls (scaled-down hidden sizes).
    B, N, d = 2, 500, 4          # (batch, n_pts, d); N is not a tile multiple on purpose
    k = 4                        # output classes
    d_feat, stn_1, stn_2, stn_3 = 256, 256, 128, 64
    d_conv1, d_conv2, d_conv3 = 256, 128, 128

    key = jax.random.PRNGKey(0)
    pkey, xkey = jax.random.split(key)
    params = make_params(pkey, d=d, k=k, d_feat=d_feat, stn_1=stn_1, stn_2=stn_2,
                         stn_3=stn_3, d_conv1=d_conv1, d_conv2=d_conv2, d_conv3=d_conv3)
    x = jax.random.normal(xkey, (B, N, d), jnp.float32)

    fwd = jax.jit(functools.partial(pointnet_densecls_forward, tile_n=512))
    logp, trans, trans_feat = fwd(params, x)
    jax.block_until_ready(logp)
    jax.block_until_ready(trans)

    assert logp.shape == (B, N, k), logp.shape
    assert trans.shape == (B, d, d), trans.shape
    assert trans_feat is None
    assert bool(jnp.all(jnp.isfinite(logp)))
    # log_softmax sanity: per-point probabilities sum to 1.
    assert bool(jnp.allclose(jnp.exp(logp).sum(-1), 1.0, atol=1e-3))
    print("KERNEL_OK")
</pallas_src>

<mosaic_0001>
module attributes {stable_mosaic.version = 11 : i64} {
  func.func @_conv_chain_max_kernel(%arg0: i32, %arg1: i32, %arg2: memref<1x512x4xbf16, #tpu.memory_space<vmem>>, %arg3: memref<1x4x64xbf16, #tpu.memory_space<vmem>>, %arg4: memref<1x64xf32, #tpu.memory_space<vmem>>, %arg5: memref<64x128xbf16, #tpu.memory_space<vmem>>, %arg6: memref<1x128xf32, #tpu.memory_space<vmem>>, %arg7: memref<128x256xbf16, #tpu.memory_space<vmem>>, %arg8: memref<1x256xf32, #tpu.memory_space<vmem>>, %arg9: memref<256x128xbf16, #tpu.memory_space<vmem>>, %arg10: memref<1x128xf32, #tpu.memory_space<vmem>>, %arg11: memref<128x64xbf16, #tpu.memory_space<vmem>>, %arg12: memref<1x64xf32, #tpu.memory_space<vmem>>, %arg13: memref<64x16xbf16, #tpu.memory_space<vmem>>, %arg14: memref<1x16xf32, #tpu.memory_space<vmem>>, %arg15: memref<1x1x256xf32, #tpu.memory_space<vmem>>, %arg16: memref<1x1x16xf32, #tpu.memory_space<vmem>>) attributes {dimension_semantics = [#tpu.dimension_semantics<parallel>, #tpu.dimension_semantics<arbitrary>], iteration_bounds = array<i64: 2, 1>, scalar_prefetch = 0 : i64, scratch_operands = 0 : i64, tpu.core_type = #tpu.core_type<tc>, window_params = [{transform_indices = @transform_0, window_bounds = array<i64: 1, 512, 4>}, {pipeline_mode = #tpu.pipeline_mode<synchronous>, transform_indices = @transform_1, window_bounds = array<i64: 1, 4, 64>}, {pipeline_mode = #tpu.pipeline_mode<synchronous>, transform_indices = @transform_2, window_bounds = array<i64: 1, 64>}, {pipeline_mode = #tpu.pipeline_mode<synchronous>, transform_indices = @transform_3, window_bounds = array<i64: 64, 128>}, {pipeline_mode = #tpu.pipeline_mode<synchronous>, transform_indices = @transform_4, window_bounds = array<i64: 1, 128>}, {pipeline_mode = #tpu.pipeline_mode<synchronous>, transform_indices = @transform_5, window_bounds = array<i64: 128, 256>}, {pipeline_mode = #tpu.pipeline_mode<synchronous>, transform_indices = @transform_6, window_bounds = array<i64: 1, 256>}, {pipeline_mode = #tpu.pipeline_mode<synchronous>, transform_indices = @transform_7, window_bounds = array<i64: 256, 128>}, {pipeline_mode = #tpu.pipeline_mode<synchronous>, transform_indices = @transform_8, window_bounds = array<i64: 1, 128>}, {pipeline_mode = #tpu.pipeline_mode<synchronous>, transform_indices = @transform_9, window_bounds = array<i64: 128, 64>}, {pipeline_mode = #tpu.pipeline_mode<synchronous>, transform_indices = @transform_10, window_bounds = array<i64: 1, 64>}, {pipeline_mode = #tpu.pipeline_mode<synchronous>, transform_indices = @transform_11, window_bounds = array<i64: 64, 16>}, {pipeline_mode = #tpu.pipeline_mode<synchronous>, transform_indices = @transform_12, window_bounds = array<i64: 1, 16>}, {transform_indices = @transform_13, window_bounds = array<i64: 1, 1, 256>}, {transform_indices = @transform_14, window_bounds = array<i64: 1, 1, 16>}]} {
    %c0_i32 = arith.constant 0 : i32
    %0 = arith.cmpi eq, %arg1, %c0_i32 : i32
    %c0 = arith.constant 0 : index
    %c0_0 = arith.constant 0 : index
    %c0_1 = arith.constant 0 : index
    %1 = vector.load %arg2[%c0, %c0_0, %c0_1] : memref<1x512x4xbf16, #tpu.memory_space<vmem>>, vector<1x512x4xbf16>
    %2 = vector.shape_cast %1 : vector<1x512x4xbf16> to vector<512x4xbf16>
    %c0_2 = arith.constant 0 : index
    %c0_3 = arith.constant 0 : index
    %c0_4 = arith.constant 0 : index
    %3 = vector.load %arg3[%c0_2, %c0_3, %c0_4] : memref<1x4x64xbf16, #tpu.memory_space<vmem>>, vector<1x4x64xbf16>
    %4 = vector.shape_cast %3 : vector<1x4x64xbf16> to vector<4x64xbf16>
    %cst = arith.constant dense<0.000000e+00> : vector<512x64xf32>
    %5 = tpu.matmul %2, %4, %cst {dimension_numbers = #tpu.dot_dimension_numbers<[1], [0], [0], [1], [0, 0, 1, 1], [], []>} : vector<512x4xbf16>, vector<4x64xbf16>, vector<512x64xf32> -> vector<512x64xf32>
    %c0_5 = arith.constant 0 : index
    %c0_6 = arith.constant 0 : index
    %6 = vector.load %arg4[%c0_5, %c0_6] : memref<1x64xf32, #tpu.memory_space<vmem>>, vector<1x64xf32>
    %7 = vector.broadcast %6 : vector<1x64xf32> to vector<512x64xf32>
    %8 = arith.addf %5, %7 : vector<512x64xf32>
    %cst_7 = arith.constant 0.000000e+00 : f32
    %9 = vector.broadcast %cst_7 : f32 to vector<512x64xf32>
    %10 = arith.maximumf %8, %9 : vector<512x64xf32>
    %11 = arith.truncf %10 : vector<512x64xf32> to vector<512x64xbf16>
    %c0_8 = arith.constant 0 : index
    %c0_9 = arith.constant 0 : index
    %12 = vector.load %arg5[%c0_8, %c0_9] : memref<64x128xbf16, #tpu.memory_space<vmem>>, vector<64x128xbf16>
    %cst_10 = arith.constant dense<0.000000e+00> : vector<512x128xf32>
    %13 = tpu.matmul %11, %12, %cst_10 {dimension_numbers = #tpu.dot_dimension_numbers<[1], [0], [0], [1], [0, 0, 1, 1], [], []>} : vector<512x64xbf16>, vector<64x128xbf16>, vector<512x128xf32> -> vector<512x128xf32>
    %c0_11 = arith.constant 0 : index
    %c0_12 = arith.constant 0 : index
    %14 = vector.load %arg6[%c0_11, %c0_12] : memref<1x128xf32, #tpu.memory_space<vmem>>, vector<1x128xf32>
    %15 = vector.broadcast %14 : vector<1x128xf32> to vector<512x128xf32>
    %16 = arith.addf %13, %15 : vector<512x128xf32>
    %cst_13 = arith.constant 0.000000e+00 : f32
    %17 = vector.broadcast %cst_13 : f32 to vector<512x128xf32>
    %18 = arith.maximumf %16, %17 : vector<512x128xf32>
    %19 = arith.truncf %18 : vector<512x128xf32> to vector<512x128xbf16>
    %c0_14 = arith.constant 0 : index
    %c0_15 = arith.constant 0 : index
    %20 = vector.load %arg7[%c0_14, %c0_15] : memref<128x256xbf16, #tpu.memory_space<vmem>>, vector<128x256xbf16>
    %cst_16 = arith.constant dense<0.000000e+00> : vector<512x256xf32>
    %21 = tpu.matmul %19, %20, %cst_16 {dimension_numbers = #tpu.dot_dimension_numbers<[1], [0], [0], [1], [0, 0, 1, 1], [], []>} : vector<512x128xbf16>, vector<128x256xbf16>, vector<512x256xf32> -> vector<512x256xf32>
    %c0_17 = arith.constant 0 : index
    %c0_18 = arith.constant 0 : index
    %22 = vector.load %arg8[%c0_17, %c0_18] : memref<1x256xf32, #tpu.memory_space<vmem>>, vector<1x256xf32>
    %23 = vector.broadcast %22 : vector<1x256xf32> to vector<512x256xf32>
    %24 = arith.addf %21, %23 : vector<512x256xf32>
    %cst_19 = arith.constant 0.000000e+00 : f32
    %25 = vector.broadcast %cst_19 : f32 to vector<512x256xf32>
    %26 = arith.maximumf %24, %25 : vector<512x256xf32>
    %c0_i32_20 = arith.constant 0 : i32
    %27 = arith.cmpi eq, %arg1, %c0_i32_20 : i32
    %28 = arith.extui %27 : i1 to i32
    %c0_i32_21 = arith.constant 0 : i32
    %29 = arith.cmpi ne, %28, %c0_i32_21 : i32
    scf.if %29 {
      %cst_25 = arith.constant 0xFF800000 : f32
      %37 = vector.broadcast %cst_25 : f32 to vector<1x1x256xf32>
      %c0_26 = arith.constant 0 : index
      %c0_27 = arith.constant 0 : index
      %c0_28 = arith.constant 0 : index
      %38 = vector.load %arg15[%c0_26, %c0_27, %c0_28] : memref<1x1x256xf32, #tpu.memory_space<vmem>>, vector<1x1x256xf32>
      tpu.vector_store %arg15[%c0_26, %c0_27, %c0_28], %37 {strides = array<i32>} : memref<1x1x256xf32, #tpu.memory_space<vmem>>, vector<1x1x256xf32>,
      %cst_29 = arith.constant 0.000000e+00 : f32
      %39 = vector.broadcast %cst_29 : f32 to vector<1x1x16xf32>
      %c0_30 = arith.constant 0 : index
      %c0_31 = arith.constant 0 : index
      %c0_32 = arith.constant 0 : index
      %40 = vector.load %arg16[%c0_30, %c0_31, %c0_32] : memref<1x1x16xf32, #tpu.memory_space<vmem>>, vector<1x1x16xf32>
      tpu.vector_store %arg16[%c0_30, %c0_31, %c0_32], %39 {strides = array<i32>} : memref<1x1x16xf32, #tpu.memory_space<vmem>>, vector<1x1x16xf32>,
    } else {
    }
    %true = arith.constant true
    %30 = arith.xori %0, %true : i1
    %31 = arith.extui %30 : i1 to i32
    %c0_i32_22 = arith.constant 0 : i32
    %32 = arith.cmpi ne, %31, %c0_i32_22 : i32
    scf.if %32 {
      %c0_25 = arith.constant 0 : index
      %c0_26 = arith.constant 0 : index
      %c0_27 = arith.constant 0 : index
      %37 = vector.load %arg15[%c0_25, %c0_26, %c0_27] : memref<1x1x256xf32, #tpu.memory_space<vmem>>, vector<1x1x256xf32>
      %38 = vector.shape_cast %37 : vector<1x1x256xf32> to vector<1x256xf32>
      %cst_28 = arith.constant dense<0xFF800000> : vector<256xf32>
      %39 = vector.multi_reduction <maximumf>, %26, %cst_28 [0] : vector<512x256xf32> to vector<256xf32>
      %40 = vector.shape_cast %39 : vector<256xf32> to vector<1x256xf32>
      %41 = arith.maximumf %38, %40 : vector<1x256xf32>
      %c0_29 = arith.constant 0 : index
      %c0_30 = arith.constant 0 : index
      %c0_31 = arith.constant 0 : index
      %42 = vector.load %arg15[%c0_29, %c0_30, %c0_31] : memref<1x1x256xf32, #tpu.memory_space<vmem>>, vector<1x1x256xf32>
      %43 = vector.shape_cast %42 : vector<1x1x256xf32> to vector<1x256xf32>
      %44 = vector.shape_cast %41 : vector<1x256xf32> to vector<1x1x256xf32>
      tpu.vector_store %arg15[%c0_29, %c0_30, %c0_31], %44 {strides = array<i32>} : memref<1x1x256xf32, #tpu.memory_space<vmem>>, vector<1x1x256xf32>,
    } else {
    }
    %33 = arith.extui %0 : i1 to i32
    %c0_i32_23 = arith.constant 0 : i32
    %34 = arith.cmpi ne, %33, %c0_i32_23 : i32
    scf.if %34 {
      %37 = tpu.iota {dimensions = array<i32: 0>} : vector<512x1xi32>
      %c500_i32 = arith.constant 500 : i32
      %38 = vector.broadcast %c500_i32 : i32 to vector<512x1xi32>
      %39 = arith.cmpi slt, %37, %38 : vector<512x1xi32>
      %cst_25 = arith.constant 0xFF800000 : f32
      %40 = vector.shape_cast %39 : vector<512x1xi1> to vector<512x1xi1>
      %41 = vector.broadcast %40 : vector<512x1xi1> to vector<512x256xi1>
      %42 = vector.broadcast %cst_25 : f32 to vector<512x256xf32>
      %43 = arith.select %41, %26, %42 : vector<512x256xi1>, vector<512x256xf32>
      %c0_26 = arith.constant 0 : index
      %c0_27 = arith.constant 0 : index
      %c0_28 = arith.constant 0 : index
      %44 = vector.load %arg15[%c0_26, %c0_27, %c0_28] : memref<1x1x256xf32, #tpu.memory_space<vmem>>, vector<1x1x256xf32>
      %45 = vector.shape_cast %44 : vector<1x1x256xf32> to vector<1x256xf32>
      %cst_29 = arith.constant dense<0xFF800000> : vector<256xf32>
      %46 = vector.multi_reduction <maximumf>, %43, %cst_29 [0] : vector<512x256xf32> to vector<256xf32>
      %47 = vector.shape_cast %46 : vector<256xf32> to vector<1x256xf32>
      %48 = arith.maximumf %45, %47 : vector<1x256xf32>
      %c0_30 = arith.constant 0 : index
      %c0_31 = arith.constant 0 : index
      %c0_32 = arith.constant 0 : index
      %49 = vector.load %arg15[%c0_30, %c0_31, %c0_32] : memref<1x1x256xf32, #tpu.memory_space<vmem>>, vector<1x1x256xf32>
      %50 = vector.shape_cast %49 : vector<1x1x256xf32> to vector<1x256xf32>
      %51 = vector.shape_cast %48 : vector<1x256xf32> to vector<1x1x256xf32>
      tpu.vector_store %arg15[%c0_30, %c0_31, %c0_32], %51 {strides = array<i32>} : memref<1x1x256xf32, #tpu.memory_space<vmem>>, vector<1x1x256xf32>,
    } else {
    }
    %35 = arith.extui %0 : i1 to i32
    %c0_i32_24 = arith.constant 0 : i32
    %36 = arith.cmpi ne, %35, %c0_i32_24 : i32
    scf.if %36 {
      %c0_25 = arith.constant 0 : index
      %c0_26 = arith.constant 0 : index
      %c0_27 = arith.constant 0 : index
      %37 = vector.load %arg15[%c0_25, %c0_26, %c0_27] : memref<1x1x256xf32, #tpu.memory_space<vmem>>, vector<1x1x256xf32>
      %38 = vector.shape_cast %37 : vector<1x1x256xf32> to vector<1x256xf32>
      %39 = arith.truncf %38 : vector<1x256xf32> to vector<1x256xbf16>
      %c0_28 = arith.constant 0 : index
      %c0_29 = arith.constant 0 : index
      %40 = vector.load %arg9[%c0_28, %c0_29] : memref<256x128xbf16, #tpu.memory_space<vmem>>, vector<256x128xbf16>
      %cst_30 = arith.constant dense<0.000000e+00> : vector<1x128xf32>
      %41 = tpu.matmul %39, %40, %cst_30 {dimension_numbers = #tpu.dot_dimension_numbers<[1], [0], [0], [1], [0, 0, 1, 1], [], []>} : vector<1x256xbf16>, vector<256x128xbf16>, vector<1x128xf32> -> vector<1x128xf32>
      %c0_31 = arith.constant 0 : index
      %c0_32 = arith.constant 0 : index
      %42 = vector.load %arg10[%c0_31, %c0_32] : memref<1x128xf32, #tpu.memory_space<vmem>>, vector<1x128xf32>
      %43 = arith.addf %41, %42 : vector<1x128xf32>
      %cst_33 = arith.constant 0.000000e+00 : f32
      %44 = vector.broadcast %cst_33 : f32 to vector<1x128xf32>
      %45 = arith.maximumf %43, %44 : vector<1x128xf32>
      %46 = arith.truncf %45 : vector<1x128xf32> to vector<1x128xbf16>
      %c0_34 = arith.constant 0 : index
      %c0_35 = arith.constant 0 : index
      %47 = vector.load %arg11[%c0_34, %c0_35] : memref<128x64xbf16, #tpu.memory_space<vmem>>, vector<128x64xbf16>
      %cst_36 = arith.constant dense<0.000000e+00> : vector<1x64xf32>
      %48 = tpu.matmul %46, %47, %cst_36 {dimension_numbers = #tpu.dot_dimension_numbers<[1], [0], [0], [1], [0, 0, 1, 1], [], []>} : vector<1x128xbf16>, vector<128x64xbf16>, vector<1x64xf32> -> vector<1x64xf32>
      %c0_37 = arith.constant 0 : index
      %c0_38 = arith.constant 0 : index
      %49 = vector.load %arg12[%c0_37, %c0_38] : memref<1x64xf32, #tpu.memory_space<vmem>>, vector<1x64xf32>
      %50 = arith.addf %48, %49 : vector<1x64xf32>
      %cst_39 = arith.constant 0.000000e+00 : f32
      %51 = vector.broadcast %cst_39 : f32 to vector<1x64xf32>
      %52 = arith.maximumf %50, %51 : vector<1x64xf32>
      %53 = arith.truncf %52 : vector<1x64xf32> to vector<1x64xbf16>
      %c0_40 = arith.constant 0 : index
      %c0_41 = arith.constant 0 : index
      %54 = vector.load %arg13[%c0_40, %c0_41] : memref<64x16xbf16, #tpu.memory_space<vmem>>, vector<64x16xbf16>
      %cst_42 = arith.constant dense<0.000000e+00> : vector<1x16xf32>
      %55 = tpu.matmul %53, %54, %cst_42 {dimension_numbers = #tpu.dot_dimension_numbers<[1], [0], [0], [1], [0, 0, 1, 1], [], []>} : vector<1x64xbf16>, vector<64x16xbf16>, vector<1x16xf32> -> vector<1x16xf32>
      %c0_43 = arith.constant 0 : index
      %c0_44 = arith.constant 0 : index
      %56 = vector.load %arg14[%c0_43, %c0_44] : memref<1x16xf32, #tpu.memory_space<vmem>>, vector<1x16xf32>
      %57 = arith.addf %55, %56 : vector<1x16xf32>
      %c0_45 = arith.constant 0 : index
      %c0_46 = arith.constant 0 : index
      %c0_47 = arith.constant 0 : index
      %58 = vector.load %arg16[%c0_45, %c0_46, %c0_47] : memref<1x1x16xf32, #tpu.memory_space<vmem>>, vector<1x1x16xf32>
      %59 = vector.shape_cast %58 : vector<1x1x16xf32> to vector<1x16xf32>
      %60 = vector.shape_cast %57 : vector<1x16xf32> to vector<1x1x16xf32>
      tpu.vector_store %arg16[%c0_45, %c0_46, %c0_47], %60 {strides = array<i32>} : memref<1x1x16xf32, #tpu.memory_space<vmem>>, vector<1x1x16xf32>,
    } else {
    }
    return
  }
  func.func @transform_0(%arg0: i32, %arg1: i32) -> (i32, i32, i32) {
    %c0_i32 = arith.constant 0 : i32
    %c0_i32_0 = arith.constant 0 : i32
    return %arg0, %arg1, %c0_i32 : i32, i32, i32
  }
  func.func @transform_1(%arg0: i32, %arg1: i32) -> (i32, i32, i32) {
    %c0_i32 = arith.constant 0 : i32
    %c0_i32_0 = arith.constant 0 : i32
    %c0_i32_1 = arith.constant 0 : i32
    %c0_i32_2 = arith.constant 0 : i32
    return %c0_i32, %c0_i32_0, %c0_i32_1 : i32, i32, i32
  }
  func.func @transform_2(%arg0: i32, %arg1: i32) -> (i32, i32) {
    %c0_i32 = arith.constant 0 : i32
    %c0_i32_0 = arith.constant 0 : i32
    %c0_i32_1 = arith.constant 0 : i32
    return %c0_i32, %c0_i32_0 : i32, i32
  }
  func.func @transform_3(%arg0: i32, %arg1: i32) -> (i32, i32) {
    %c0_i32 = arith.constant 0 : i32
    %c0_i32_0 = arith.constant 0 : i32
    %c0_i32_1 = arith.constant 0 : i32
    return %c0_i32, %c0_i32_0 : i32, i32
  }
  func.func @transform_4(%arg0: i32, %arg1: i32) -> (i32, i32) {
    %c0_i32 = arith.constant 0 : i32
    %c0_i32_0 = arith.constant 0 : i32
    %c0_i32_1 = arith.constant 0 : i32
    return %c0_i32, %c0_i32_0 : i32, i32
  }
  func.func @transform_5(%arg0: i32, %arg1: i32) -> (i32, i32) {
    %c0_i32 = arith.constant 0 : i32
    %c0_i32_0 = arith.constant 0 : i32
    %c0_i32_1 = arith.constant 0 : i32
    return %c0_i32, %c0_i32_0 : i32, i32
  }
  func.func @transform_6(%arg0: i32, %arg1: i32) -> (i32, i32) {
    %c0_i32 = arith.constant 0 : i32
    %c0_i32_0 = arith.constant 0 : i32
    %c0_i32_1 = arith.constant 0 : i32
    return %c0_i32, %c0_i32_0 : i32, i32
  }
  func.func @transform_7(%arg0: i32, %arg1: i32) -> (i32, i32) {
    %c0_i32 = arith.constant 0 : i32
    %c0_i32_0 = arith.constant 0 : i32
    %c0_i32_1 = arith.constant 0 : i32
    return %c0_i32, %c0_i32_0 : i32, i32
  }
  func.func @transform_8(%arg0: i32, %arg1: i32) -> (i32, i32) {
    %c0_i32 = arith.constant 0 : i32
    %c0_i32_0 = arith.constant 0 : i32
    %c0_i32_1 = arith.constant 0 : i32
    return %c0_i32, %c0_i32_0 : i32, i32
  }
  func.func @transform_9(%arg0: i32, %arg1: i32) -> (i32, i32) {
    %c0_i32 = arith.constant 0 : i32
    %c0_i32_0 = arith.constant 0 : i32
    %c0_i32_1 = arith.constant 0 : i32
    return %c0_i32, %c0_i32_0 : i32, i32
  }
  func.func @transform_10(%arg0: i32, %arg1: i32) -> (i32, i32) {
    %c0_i32 = arith.constant 0 : i32
    %c0_i32_0 = arith.constant 0 : i32
    %c0_i32_1 = arith.constant 0 : i32
    return %c0_i32, %c0_i32_0 : i32, i32
  }
  func.func @transform_11(%arg0: i32, %arg1: i32) -> (i32, i32) {
    %c0_i32 = arith.constant 0 : i32
    %c0_i32_0 = arith.constant 0 : i32
    %c0_i32_1 = arith.constant 0 : i32
    return %c0_i32, %c0_i32_0 : i32, i32
  }
  func.func @transform_12(%arg0: i32, %arg1: i32) -> (i32, i32) {
    %c0_i32 = arith.constant 0 : i32
    %c0_i32_0 = arith.constant 0 : i32
    %c0_i32_1 = arith.constant 0 : i32
    return %c0_i32, %c0_i32_0 : i32, i32
  }
  func.func @transform_13(%arg0: i32, %arg1: i32) -> (i32, i32, i32) {
    %c0_i32 = arith.constant 0 : i32
    %c0_i32_0 = arith.constant 0 : i32
    %c0_i32_1 = arith.constant 0 : i32
    return %arg0, %c0_i32, %c0_i32_0 : i32, i32, i32
  }
  func.func @transform_14(%arg0: i32, %arg1: i32) -> (i32, i32, i32) {
    %c0_i32 = arith.constant 0 : i32
    %c0_i32_0 = arith.constant 0 : i32
    %c0_i32_1 = arith.constant 0 : i32
    return %arg0, %c0_i32, %c0_i32_0 : i32, i32, i32
  }
}

module attributes {stable_mosaic.version = 11 : i64} {
  func.func @_conv_chain_max_kernel(%arg0: i32, %arg1: i32, %arg2: memref<1x512x4xbf16, #tpu.memory_space<vmem>>, %arg3: memref<1x4x64xbf16, #tpu.memory_space<vmem>>, %arg4: memref<1x64xf32, #tpu.memory_space<vmem>>, %arg5: memref<64x128xbf16, #tpu.memory_space<vmem>>, %arg6: memref<1x128xf32, #tpu.memory_space<vmem>>, %arg7: memref<128x256xbf16, #tpu.memory_space<vmem>>, %arg8: memref<1x256xf32, #tpu.memory_space<vmem>>, %arg9: memref<1x1x256xf32, #tpu.memory_space<vmem>>) attributes {dimension_semantics = [#tpu.dimension_semantics<parallel>, #tpu.dimension_semantics<arbitrary>], iteration_bounds = array<i64: 2, 1>, scalar_prefetch = 0 : i64, scratch_operands = 0 : i64, tpu.core_type = #tpu.core_type<tc>, window_params = [{transform_indices = @transform_0, window_bounds = array<i64: 1, 512, 4>}, {transform_indices = @transform_1, window_bounds = array<i64: 1, 4, 64>}, {pipeline_mode = #tpu.pipeline_mode<synchronous>, transform_indices = @transform_2, window_bounds = array<i64: 1, 64>}, {pipeline_mode = #tpu.pipeline_mode<synchronous>, transform_indices = @transform_3, window_bounds = array<i64: 64, 128>}, {pipeline_mode = #tpu.pipeline_mode<synchronous>, transform_indices = @transform_4, window_bounds = array<i64: 1, 128>}, {pipeline_mode = #tpu.pipeline_mode<synchronous>, transform_indices = @transform_5, window_bounds = array<i64: 128, 256>}, {pipeline_mode = #tpu.pipeline_mode<synchronous>, transform_indices = @transform_6, window_bounds = array<i64: 1, 256>}, {transform_indices = @transform_7, window_bounds = array<i64: 1, 1, 256>}]} {
    %c0_i32 = arith.constant 0 : i32
    %0 = arith.cmpi eq, %arg1, %c0_i32 : i32
    %c0 = arith.constant 0 : index
    %c0_0 = arith.constant 0 : index
    %c0_1 = arith.constant 0 : index
    %1 = vector.load %arg2[%c0, %c0_0, %c0_1] : memref<1x512x4xbf16, #tpu.memory_space<vmem>>, vector<1x512x4xbf16>
    %2 = vector.shape_cast %1 : vector<1x512x4xbf16> to vector<512x4xbf16>
    %c0_2 = arith.constant 0 : index
    %c0_3 = arith.constant 0 : index
    %c0_4 = arith.constant 0 : index
    %3 = vector.load %arg3[%c0_2, %c0_3, %c0_4] : memref<1x4x64xbf16, #tpu.memory_space<vmem>>, vector<1x4x64xbf16>
    %4 = vector.shape_cast %3 : vector<1x4x64xbf16> to vector<4x64xbf16>
    %cst = arith.constant dense<0.000000e+00> : vector<512x64xf32>
    %5 = tpu.matmul %2, %4, %cst {dimension_numbers = #tpu.dot_dimension_numbers<[1], [0], [0], [1], [0, 0, 1, 1], [], []>} : vector<512x4xbf16>, vector<4x64xbf16>, vector<512x64xf32> -> vector<512x64xf32>
    %c0_5 = arith.constant 0 : index
    %c0_6 = arith.constant 0 : index
    %6 = vector.load %arg4[%c0_5, %c0_6] : memref<1x64xf32, #tpu.memory_space<vmem>>, vector<1x64xf32>
    %7 = vector.broadcast %6 : vector<1x64xf32> to vector<512x64xf32>
    %8 = arith.addf %5, %7 : vector<512x64xf32>
    %cst_7 = arith.constant 0.000000e+00 : f32
    %9 = vector.broadcast %cst_7 : f32 to vector<512x64xf32>
    %10 = arith.maximumf %8, %9 : vector<512x64xf32>
    %11 = arith.truncf %10 : vector<512x64xf32> to vector<512x64xbf16>
    %c0_8 = arith.constant 0 : index
    %c0_9 = arith.constant 0 : index
    %12 = vector.load %arg5[%c0_8, %c0_9] : memref<64x128xbf16, #tpu.memory_space<vmem>>, vector<64x128xbf16>
    %cst_10 = arith.constant dense<0.000000e+00> : vector<512x128xf32>
    %13 = tpu.matmul %11, %12, %cst_10 {dimension_numbers = #tpu.dot_dimension_numbers<[1], [0], [0], [1], [0, 0, 1, 1], [], []>} : vector<512x64xbf16>, vector<64x128xbf16>, vector<512x128xf32> -> vector<512x128xf32>
    %c0_11 = arith.constant 0 : index
    %c0_12 = arith.constant 0 : index
    %14 = vector.load %arg6[%c0_11, %c0_12] : memref<1x128xf32, #tpu.memory_space<vmem>>, vector<1x128xf32>
    %15 = vector.broadcast %14 : vector<1x128xf32> to vector<512x128xf32>
    %16 = arith.addf %13, %15 : vector<512x128xf32>
    %cst_13 = arith.constant 0.000000e+00 : f32
    %17 = vector.broadcast %cst_13 : f32 to vector<512x128xf32>
    %18 = arith.maximumf %16, %17 : vector<512x128xf32>
    %19 = arith.truncf %18 : vector<512x128xf32> to vector<512x128xbf16>
    %c0_14 = arith.constant 0 : index
    %c0_15 = arith.constant 0 : index
    %20 = vector.load %arg7[%c0_14, %c0_15] : memref<128x256xbf16, #tpu.memory_space<vmem>>, vector<128x256xbf16>
    %cst_16 = arith.constant dense<0.000000e+00> : vector<512x256xf32>
    %21 = tpu.matmul %19, %20, %cst_16 {dimension_numbers = #tpu.dot_dimension_numbers<[1], [0], [0], [1], [0, 0, 1, 1], [], []>} : vector<512x128xbf16>, vector<128x256xbf16>, vector<512x256xf32> -> vector<512x256xf32>
    %c0_17 = arith.constant 0 : index
    %c0_18 = arith.constant 0 : index
    %22 = vector.load %arg8[%c0_17, %c0_18] : memref<1x256xf32, #tpu.memory_space<vmem>>, vector<1x256xf32>
    %23 = vector.broadcast %22 : vector<1x256xf32> to vector<512x256xf32>
    %24 = arith.addf %21, %23 : vector<512x256xf32>
    %c0_i32_19 = arith.constant 0 : i32
    %25 = arith.cmpi eq, %arg1, %c0_i32_19 : i32
    %26 = arith.extui %25 : i1 to i32
    %c0_i32_20 = arith.constant 0 : i32
    %27 = arith.cmpi ne, %26, %c0_i32_20 : i32
    scf.if %27 {
      %cst_23 = arith.constant 0xFF800000 : f32
      %33 = vector.broadcast %cst_23 : f32 to vector<1x1x256xf32>
      %c0_24 = arith.constant 0 : index
      %c0_25 = arith.constant 0 : index
      %c0_26 = arith.constant 0 : index
      %34 = vector.load %arg9[%c0_24, %c0_25, %c0_26] : memref<1x1x256xf32, #tpu.memory_space<vmem>>, vector<1x1x256xf32>
      tpu.vector_store %arg9[%c0_24, %c0_25, %c0_26], %33 {strides = array<i32>} : memref<1x1x256xf32, #tpu.memory_space<vmem>>, vector<1x1x256xf32>,
    } else {
    }
    %true = arith.constant true
    %28 = arith.xori %0, %true : i1
    %29 = arith.extui %28 : i1 to i32
    %c0_i32_21 = arith.constant 0 : i32
    %30 = arith.cmpi ne, %29, %c0_i32_21 : i32
    scf.if %30 {
      %c0_23 = arith.constant 0 : index
      %c0_24 = arith.constant 0 : index
      %c0_25 = arith.constant 0 : index
      %33 = vector.load %arg9[%c0_23, %c0_24, %c0_25] : memref<1x1x256xf32, #tpu.memory_space<vmem>>, vector<1x1x256xf32>
      %34 = vector.shape_cast %33 : vector<1x1x256xf32> to vector<1x256xf32>
      %cst_26 = arith.constant dense<0xFF800000> : vector<256xf32>
      %35 = vector.multi_reduction <maximumf>, %24, %cst_26 [0] : vector<512x256xf32> to vector<256xf32>
      %36 = vector.shape_cast %35 : vector<256xf32> to vector<1x256xf32>
      %37 = arith.maximumf %34, %36 : vector<1x256xf32>
      %c0_27 = arith.constant 0 : index
      %c0_28 = arith.constant 0 : index
      %c0_29 = arith.constant 0 : index
      %38 = vector.load %arg9[%c0_27, %c0_28, %c0_29] : memref<1x1x256xf32, #tpu.memory_space<vmem>>, vector<1x1x256xf32>
      %39 = vector.shape_cast %38 : vector<1x1x256xf32> to vector<1x256xf32>
      %40 = vector.shape_cast %37 : vector<1x256xf32> to vector<1x1x256xf32>
      tpu.vector_store %arg9[%c0_27, %c0_28, %c0_29], %40 {strides = array<i32>} : memref<1x1x256xf32, #tpu.memory_space<vmem>>, vector<1x1x256xf32>,
    } else {
    }
    %31 = arith.extui %0 : i1 to i32
    %c0_i32_22 = arith.constant 0 : i32
    %32 = arith.cmpi ne, %31, %c0_i32_22 : i32
    scf.if %32 {
      %33 = tpu.iota {dimensions = array<i32: 0>} : vector<512x1xi32>
      %c500_i32 = arith.constant 500 : i32
      %34 = vector.broadcast %c500_i32 : i32 to vector<512x1xi32>
      %35 = arith.cmpi slt, %33, %34 : vector<512x1xi32>
      %cst_23 = arith.constant 0xFF800000 : f32
      %36 = vector.shape_cast %35 : vector<512x1xi1> to vector<512x1xi1>
      %37 = vector.broadcast %36 : vector<512x1xi1> to vector<512x256xi1>
      %38 = vector.broadcast %cst_23 : f32 to vector<512x256xf32>
      %39 = arith.select %37, %24, %38 : vector<512x256xi1>, vector<512x256xf32>
      %c0_24 = arith.constant 0 : index
      %c0_25 = arith.constant 0 : index
      %c0_26 = arith.constant 0 : index
      %40 = vector.load %arg9[%c0_24, %c0_25, %c0_26] : memref<1x1x256xf32, #tpu.memory_space<vmem>>, vector<1x1x256xf32>
      %41 = vector.shape_cast %40 : vector<1x1x256xf32> to vector<1x256xf32>
      %cst_27 = arith.constant dense<0xFF800000> : vector<256xf32>
      %42 = vector.multi_reduction <maximumf>, %39, %cst_27 [0] : vector<512x256xf32> to vector<256xf32>
      %43 = vector.shape_cast %42 : vector<256xf32> to vector<1x256xf32>
      %44 = arith.maximumf %41, %43 : vector<1x256xf32>
      %c0_28 = arith.constant 0 : index
      %c0_29 = arith.constant 0 : index
      %c0_30 = arith.constant 0 : index
      %45 = vector.load %arg9[%c0_28, %c0_29, %c0_30] : memref<1x1x256xf32, #tpu.memory_space<vmem>>, vector<1x1x256xf32>
      %46 = vector.shape_cast %45 : vector<1x1x256xf32> to vector<1x256xf32>
      %47 = vector.shape_cast %44 : vector<1x256xf32> to vector<1x1x256xf32>
      tpu.vector_store %arg9[%c0_28, %c0_29, %c0_30], %47 {strides = array<i32>} : memref<1x1x256xf32, #tpu.memory_space<vmem>>, vector<1x1x256xf32>,
    } else {
    }
    return
  }
  func.func @transform_0(%arg0: i32, %arg1: i32) -> (i32, i32, i32) {
    %c0_i32 = arith.constant 0 : i32
    %c0_i32_0 = arith.constant 0 : i32
    return %arg0, %arg1, %c0_i32 : i32, i32, i32
  }
  func.func @transform_1(%arg0: i32, %arg1: i32) -> (i32, i32, i32) {
    %c0_i32 = arith.constant 0 : i32
    %c0_i32_0 = arith.constant 0 : i32
    %c0_i32_1 = arith.constant 0 : i32
    return %arg0, %c0_i32, %c0_i32_0 : i32, i32, i32
  }
  func.func @transform_2(%arg0: i32, %arg1: i32) -> (i32, i32) {
    %c0_i32 = arith.constant 0 : i32
    %c0_i32_0 = arith.constant 0 : i32
    %c0_i32_1 = arith.constant 0 : i32
    return %c0_i32, %c0_i32_0 : i32, i32
  }
  func.func @transform_3(%arg0: i32, %arg1: i32) -> (i32, i32) {
    %c0_i32 = arith.constant 0 : i32
    %c0_i32_0 = arith.constant 0 : i32
    %c0_i32_1 = arith.constant 0 : i32
    return %c0_i32, %c0_i32_0 : i32, i32
  }
  func.func @transform_4(%arg0: i32, %arg1: i32) -> (i32, i32) {
    %c0_i32 = arith.constant 0 : i32
    %c0_i32_0 = arith.constant 0 : i32
    %c0_i32_1 = arith.constant 0 : i32
    return %c0_i32, %c0_i32_0 : i32, i32
  }
  func.func @transform_5(%arg0: i32, %arg1: i32) -> (i32, i32) {
    %c0_i32 = arith.constant 0 : i32
    %c0_i32_0 = arith.constant 0 : i32
    %c0_i32_1 = arith.constant 0 : i32
    return %c0_i32, %c0_i32_0 : i32, i32
  }
  func.func @transform_6(%arg0: i32, %arg1: i32) -> (i32, i32) {
    %c0_i32 = arith.constant 0 : i32
    %c0_i32_0 = arith.constant 0 : i32
    %c0_i32_1 = arith.constant 0 : i32
    return %c0_i32, %c0_i32_0 : i32, i32
  }
  func.func @transform_7(%arg0: i32, %arg1: i32) -> (i32, i32, i32) {
    %c0_i32 = arith.constant 0 : i32
    %c0_i32_0 = arith.constant 0 : i32
    %c0_i32_1 = arith.constant 0 : i32
    return %arg0, %c0_i32, %c0_i32_0 : i32, i32, i32
  }
}

module attributes {stable_mosaic.version = 11 : i64} {
  func.func @_seg_head_kernel(%arg0: i32, %arg1: i32, %arg2: memref<1x4x512xbf16, #tpu.memory_space<vmem>>, %arg3: memref<1x64x4xbf16, #tpu.memory_space<vmem>>, %arg4: memref<64x1xf32, #tpu.memory_space<vmem>>, %arg5: memref<256x64xbf16, #tpu.memory_space<vmem>>, %arg6: memref<1x256x1xf32, #tpu.memory_space<vmem>>, %arg7: memref<128x256xbf16, #tpu.memory_space<vmem>>, %arg8: memref<128x1xf32, #tpu.memory_space<vmem>>, %arg9: memref<128x128xbf16, #tpu.memory_space<vmem>>, %arg10: memref<128x1xf32, #tpu.memory_space<vmem>>, %arg11: memref<4x128xbf16, #tpu.memory_space<vmem>>, %arg12: memref<4x1xf32, #tpu.memory_space<vmem>>, %arg13: memref<1x4x512xf32, #tpu.memory_space<vmem>>) attributes {dimension_semantics = [#tpu.dimension_semantics<parallel>, #tpu.dimension_semantics<parallel>], iteration_bounds = array<i64: 2, 1>, scalar_prefetch = 0 : i64, scratch_operands = 0 : i64, tpu.core_type = #tpu.core_type<tc>, window_params = [{transform_indices = @transform_0, window_bounds = array<i64: 1, 4, 512>}, {transform_indices = @transform_1, window_bounds = array<i64: 1, 64, 4>}, {pipeline_mode = #tpu.pipeline_mode<synchronous>, transform_indices = @transform_2, window_bounds = array<i64: 64, 1>}, {pipeline_mode = #tpu.pipeline_mode<synchronous>, transform_indices = @transform_3, window_bounds = array<i64: 256, 64>}, {transform_indices = @transform_4, window_bounds = array<i64: 1, 256, 1>}, {pipeline_mode = #tpu.pipeline_mode<synchronous>, transform_indices = @transform_5, window_bounds = array<i64: 128, 256>}, {pipeline_mode = #tpu.pipeline_mode<synchronous>, transform_indices = @transform_6, window_bounds = array<i64: 128, 1>}, {pipeline_mode = #tpu.pipeline_mode<synchronous>, transform_indices = @transform_7, window_bounds = array<i64: 128, 128>}, {pipeline_mode = #tpu.pipeline_mode<synchronous>, transform_indices = @transform_8, window_bounds = array<i64: 128, 1>}, {pipeline_mode = #tpu.pipeline_mode<synchronous>, transform_indices = @transform_9, window_bounds = array<i64: 4, 128>}, {pipeline_mode = #tpu.pipeline_mode<synchronous>, transform_indices = @transform_10, window_bounds = array<i64: 4, 1>}, {transform_indices = @transform_11, window_bounds = array<i64: 1, 4, 512>}]} {
    %c0 = arith.constant 0 : index
    %c0_0 = arith.constant 0 : index
    %c0_1 = arith.constant 0 : index
    %0 = vector.load %arg2[%c0, %c0_0, %c0_1] : memref<1x4x512xbf16, #tpu.memory_space<vmem>>, vector<1x4x512xbf16>
    %1 = vector.shape_cast %0 : vector<1x4x512xbf16> to vector<4x512xbf16>
    %c0_2 = arith.constant 0 : index
    %c0_3 = arith.constant 0 : index
    %c0_4 = arith.constant 0 : index
    %2 = vector.load %arg3[%c0_2, %c0_3, %c0_4] : memref<1x64x4xbf16, #tpu.memory_space<vmem>>, vector<1x64x4xbf16>
    %3 = vector.shape_cast %2 : vector<1x64x4xbf16> to vector<64x4xbf16>
    %cst = arith.constant dense<0.000000e+00> : vector<64x512xf32>
    %4 = tpu.matmul %3, %1, %cst {dimension_numbers = #tpu.dot_dimension_numbers<[1], [0], [0], [1], [0, 0, 1, 1], [], []>} : vector<64x4xbf16>, vector<4x512xbf16>, vector<64x512xf32> -> vector<64x512xf32>
    %c0_5 = arith.constant 0 : index
    %c0_6 = arith.constant 0 : index
    %5 = vector.load %arg4[%c0_5, %c0_6] : memref<64x1xf32, #tpu.memory_space<vmem>>, vector<64x1xf32>
    %6 = vector.broadcast %5 : vector<64x1xf32> to vector<64x512xf32>
    %7 = arith.addf %4, %6 : vector<64x512xf32>
    %cst_7 = arith.constant 0.000000e+00 : f32
    %8 = vector.broadcast %cst_7 : f32 to vector<64x512xf32>
    %9 = arith.maximumf %7, %8 : vector<64x512xf32>
    %c0_8 = arith.constant 0 : index
    %c0_9 = arith.constant 0 : index
    %10 = vector.load %arg5[%c0_8, %c0_9] : memref<256x64xbf16, #tpu.memory_space<vmem>>, vector<256x64xbf16>
    %11 = arith.truncf %9 : vector<64x512xf32> to vector<64x512xbf16>
    %cst_10 = arith.constant dense<0.000000e+00> : vector<256x512xf32>
    %12 = tpu.matmul %10, %11, %cst_10 {dimension_numbers = #tpu.dot_dimension_numbers<[1], [0], [0], [1], [0, 0, 1, 1], [], []>} : vector<256x64xbf16>, vector<64x512xbf16>, vector<256x512xf32> -> vector<256x512xf32>
    %c0_11 = arith.constant 0 : index
    %c0_12 = arith.constant 0 : index
    %c0_13 = arith.constant 0 : index
    %13 = vector.load %arg6[%c0_11, %c0_12, %c0_13] : memref<1x256x1xf32, #tpu.memory_space<vmem>>, vector<1x256x1xf32>
    %14 = vector.shape_cast %13 : vector<1x256x1xf32> to vector<256x1xf32>
    %15 = vector.broadcast %14 : vector<256x1xf32> to vector<256x512xf32>
    %16 = arith.addf %12, %15 : vector<256x512xf32>
    %cst_14 = arith.constant 0.000000e+00 : f32
    %17 = vector.broadcast %cst_14 : f32 to vector<256x512xf32>
    %18 = arith.maximumf %16, %17 : vector<256x512xf32>
    %c0_15 = arith.constant 0 : index
    %c0_16 = arith.constant 0 : index
    %19 = vector.load %arg7[%c0_15, %c0_16] : memref<128x256xbf16, #tpu.memory_space<vmem>>, vector<128x256xbf16>
    %20 = arith.truncf %18 : vector<256x512xf32> to vector<256x512xbf16>
    %cst_17 = arith.constant dense<0.000000e+00> : vector<128x512xf32>
    %21 = tpu.matmul %19, %20, %cst_17 {dimension_numbers = #tpu.dot_dimension_numbers<[1], [0], [0], [1], [0, 0, 1, 1], [], []>} : vector<128x256xbf16>, vector<256x512xbf16>, vector<128x512xf32> -> vector<128x512xf32>
    %c0_18 = arith.constant 0 : index
    %c0_19 = arith.constant 0 : index
    %22 = vector.load %arg8[%c0_18, %c0_19] : memref<128x1xf32, #tpu.memory_space<vmem>>, vector<128x1xf32>
    %23 = vector.broadcast %22 : vector<128x1xf32> to vector<128x512xf32>
    %24 = arith.addf %21, %23 : vector<128x512xf32>
    %cst_20 = arith.constant 0.000000e+00 : f32
    %25 = vector.broadcast %cst_20 : f32 to vector<128x512xf32>
    %26 = arith.maximumf %24, %25 : vector<128x512xf32>
    %c0_21 = arith.constant 0 : index
    %c0_22 = arith.constant 0 : index
    %27 = vector.load %arg9[%c0_21, %c0_22] : memref<128x128xbf16, #tpu.memory_space<vmem>>, vector<128x128xbf16>
    %28 = arith.truncf %26 : vector<128x512xf32> to vector<128x512xbf16>
    %cst_23 = arith.constant dense<0.000000e+00> : vector<128x512xf32>
    %29 = tpu.matmul %27, %28, %cst_23 {dimension_numbers = #tpu.dot_dimension_numbers<[1], [0], [0], [1], [0, 0, 1, 1], [], []>} : vector<128x128xbf16>, vector<128x512xbf16>, vector<128x512xf32> -> vector<128x512xf32>
    %c0_24 = arith.constant 0 : index
    %c0_25 = arith.constant 0 : index
    %30 = vector.load %arg10[%c0_24, %c0_25] : memref<128x1xf32, #tpu.memory_space<vmem>>, vector<128x1xf32>
    %31 = vector.broadcast %30 : vector<128x1xf32> to vector<128x512xf32>
    %32 = arith.addf %29, %31 : vector<128x512xf32>
    %cst_26 = arith.constant 0.000000e+00 : f32
    %33 = vector.broadcast %cst_26 : f32 to vector<128x512xf32>
    %34 = arith.maximumf %32, %33 : vector<128x512xf32>
    %c0_27 = arith.constant 0 : index
    %c0_28 = arith.constant 0 : index
    %35 = vector.load %arg11[%c0_27, %c0_28] : memref<4x128xbf16, #tpu.memory_space<vmem>>, vector<4x128xbf16>
    %36 = arith.truncf %34 : vector<128x512xf32> to vector<128x512xbf16>
    %cst_29 = arith.constant dense<0.000000e+00> : vector<4x512xf32>
    %37 = tpu.matmul %35, %36, %cst_29 {dimension_numbers = #tpu.dot_dimension_numbers<[1], [0], [0], [1], [0, 0, 1, 1], [], []>} : vector<4x128xbf16>, vector<128x512xbf16>, vector<4x512xf32> -> vector<4x512xf32>
    %c0_30 = arith.constant 0 : index
    %c0_31 = arith.constant 0 : index
    %38 = vector.load %arg12[%c0_30, %c0_31] : memref<4x1xf32, #tpu.memory_space<vmem>>, vector<4x1xf32>
    %39 = vector.broadcast %38 : vector<4x1xf32> to vector<4x512xf32>
    %40 = arith.addf %37, %39 : vector<4x512xf32>
    %cst_32 = arith.constant dense<0xFF800000> : vector<512xf32>
    %41 = vector.multi_reduction <maximumf>, %40, %cst_32 [0] : vector<4x512xf32> to vector<512xf32>
    %42 = vector.shape_cast %41 : vector<512xf32> to vector<1x512xf32>
    %43 = vector.broadcast %42 : vector<1x512xf32> to vector<4x512xf32>
    %44 = arith.subf %40, %43 : vector<4x512xf32>
    %45 = math.exp %44 : vector<4x512xf32>
    %cst_33 = arith.constant dense<0.000000e+00> : vector<512xf32>
    %46 = vector.multi_reduction <add>, %45, %cst_33 [0] : vector<4x512xf32> to vector<512xf32>
    %47 = vector.shape_cast %46 : vector<512xf32> to vector<1x512xf32>
    %48 = math.log %47 : vector<1x512xf32>
    %49 = arith.addf %48, %42 : vector<1x512xf32>
    %50 = vector.broadcast %49 : vector<1x512xf32> to vector<4x512xf32>
    %51 = arith.subf %40, %50 : vector<4x512xf32>
    %c0_34 = arith.constant 0 : index
    %c0_35 = arith.constant 0 : index
    %c0_36 = arith.constant 0 : index
    %52 = vector.load %arg13[%c0_34, %c0_35, %c0_36] : memref<1x4x512xf32, #tpu.memory_space<vmem>>, vector<1x4x512xf32>
    %53 = vector.shape_cast %52 : vector<1x4x512xf32> to vector<4x512xf32>
    %54 = vector.shape_cast %51 : vector<4x512xf32> to vector<1x4x512xf32>
    tpu.vector_store %arg13[%c0_34, %c0_35, %c0_36], %54 {strides = array<i32>} : memref<1x4x512xf32, #tpu.memory_space<vmem>>, vector<1x4x512xf32>,
    return
  }
  func.func @transform_0(%arg0: i32, %arg1: i32) -> (i32, i32, i32) {
    %c0_i32 = arith.constant 0 : i32
    %c0_i32_0 = arith.constant 0 : i32
    return %arg0, %c0_i32, %arg1 : i32, i32, i32
  }
  func.func @transform_1(%arg0: i32, %arg1: i32) -> (i32, i32, i32) {
    %c0_i32 = arith.constant 0 : i32
    %c0_i32_0 = arith.constant 0 : i32
    %c0_i32_1 = arith.constant 0 : i32
    return %arg0, %c0_i32, %c0_i32_0 : i32, i32, i32
  }
  func.func @transform_2(%arg0: i32, %arg1: i32) -> (i32, i32) {
    %c0_i32 = arith.constant 0 : i32
    %c0_i32_0 = arith.constant 0 : i32
    %c0_i32_1 = arith.constant 0 : i32
    return %c0_i32, %c0_i32_0 : i32, i32
  }
  func.func @transform_3(%arg0: i32, %arg1: i32) -> (i32, i32) {
    %c0_i32 = arith.constant 0 : i32
    %c0_i32_0 = arith.constant 0 : i32
    %c0_i32_1 = arith.constant 0 : i32
    return %c0_i32, %c0_i32_0 : i32, i32
  }
  func.func @transform_4(%arg0: i32, %arg1: i32) -> (i32, i32, i32) {
    %c0_i32 = arith.constant 0 : i32
    %c0_i32_0 = arith.constant 0 : i32
    %c0_i32_1 = arith.constant 0 : i32
    return %arg0, %c0_i32, %c0_i32_0 : i32, i32, i32
  }
  func.func @transform_5(%arg0: i32, %arg1: i32) -> (i32, i32) {
    %c0_i32 = arith.constant 0 : i32
    %c0_i32_0 = arith.constant 0 : i32
    %c0_i32_1 = arith.constant 0 : i32
    return %c0_i32, %c0_i32_0 : i32, i32
  }
  func.func @transform_6(%arg0: i32, %arg1: i32) -> (i32, i32) {
    %c0_i32 = arith.constant 0 : i32
    %c0_i32_0 = arith.constant 0 : i32
    %c0_i32_1 = arith.constant 0 : i32
    return %c0_i32, %c0_i32_0 : i32, i32
  }
  func.func @transform_7(%arg0: i32, %arg1: i32) -> (i32, i32) {
    %c0_i32 = arith.constant 0 : i32
    %c0_i32_0 = arith.constant 0 : i32
    %c0_i32_1 = arith.constant 0 : i32
    return %c0_i32, %c0_i32_0 : i32, i32
  }
  func.func @transform_8(%arg0: i32, %arg1: i32) -> (i32, i32) {
    %c0_i32 = arith.constant 0 : i32
    %c0_i32_0 = arith.constant 0 : i32
    %c0_i32_1 = arith.constant 0 : i32
    return %c0_i32, %c0_i32_0 : i32, i32
  }
  func.func @transform_9(%arg0: i32, %arg1: i32) -> (i32, i32) {
    %c0_i32 = arith.constant 0 : i32
    %c0_i32_0 = arith.constant 0 : i32
    %c0_i32_1 = arith.constant 0 : i32
    return %c0_i32, %c0_i32_0 : i32, i32
  }
  func.func @transform_10(%arg0: i32, %arg1: i32) -> (i32, i32) {
    %c0_i32 = arith.constant 0 : i32
    %c0_i32_0 = arith.constant 0 : i32
    %c0_i32_1 = arith.constant 0 : i32
    return %c0_i32, %c0_i32_0 : i32, i32
  }
  func.func @transform_11(%arg0: i32, %arg1: i32) -> (i32, i32, i32) {
    %c0_i32 = arith.constant 0 : i32
    %c0_i32_0 = arith.constant 0 : i32
    return %arg0, %c0_i32, %arg1 : i32, i32, i32
  }
}

</mosaic_0001>

<bundles_post_ra>
// kernel: pointnet_densecls_forward.4
= control target key start
LH: loop header
LB: loop body
LE: loop exit
PB: predicated region body
PF: predicated region fallthrough
CT: control target
= control target key end

     0   :  { %s3337_s24 = smov 0   ;;  %s3339_s25 = smov 0   ;;  %s3915_s0 = inlined_call_operand.vmem [shape: bf16[2,512,4], index: 0, kind: input, shape index: {}]   ;;  %s3916_s1 = inlined_call_operand.vmem [shape: bf16[2,4,64], index: 1, kind: input, shape index: {}]   ;;  %s3917_s2 = inlined_call_operand.vmem [shape: f32[1,64], index: 2, kind: input, shape index: {}]   ;;  %s3918_s3 = inlined_call_operand.vmem [shape: bf16[64,128], index: 3, kind: input, shape index: {}]   ;;  %s3919_s4 = inlined_call_operand.vmem [shape: f32[1,128], index: 4, kind: input, shape index: {}]   ;;  %s3920_s5 = inlined_call_operand.vmem [shape: bf16[128,256], index: 5, kind: input, shape index: {}]   ;;  %s3921_s6 = inlined_call_operand.vmem [shape: f32[1,256], index: 6, kind: input, shape index: {}]   ;;  %s3922_s7 = inlined_call_operand.vmem [shape: f32[2,1,256], index: 7, kind: output, shape index: {}]  }
   0x1   :  { %s3341_s26 = smov 0  }
   0x2 LB: > { %s29_s27 = sadd.s32 1, %s3288_s25  ;;  %p2833_p0 = scmp.ge.s32.totalorder %s3292_s26, 1  ;;  %s3292_s26 = sphi %s3341_s26, %s17_s26   ;;  %s3288_s25 = sphi %s3339_s25, %s3926_s25   ;;  %s3284_s24 = sphi %s3337_s24, %s3925_s24  }
   0x3   : > { %p31_p1 = scmp.ge.s32.totalorder %s29_s27, 2  ;;  %p265_p2 = scmp.lt.s32.totalorder %s3292_s26, 3 }
   0x5   : > { %s3928_s27 = smov (%p31_p1, %s29_s27), 0  ;;  %p266_p3 = pnand %p2833_p0, %p265_p2 }
   0x6   : > { %p305_p4 = scmp.lt.s32.totalorder (!%p266_p3), %s3284_s24, 1  ;;  %v1581_v0 = vlaneseq (!%p266_p3)  ;;  %vm653_vm0 = vcmask (!%p266_p3), 1041408   ;;  %v3242_v2 = vld [vmem:[%s3918_s3] sm:$0xff] (!%p266_p3)   ;;  %v3243_v3 = vld [vmem:[%s3918_s3 + $0x8] sm:$0xff] (!%p266_p3)   ;;  %vm556_vm2 = vcmask (!%p266_p3), 31744   ;;  %v3294_v5 = vmov (!%p266_p3), -inf  }
   0x7   : > { %269 = sbr.rel (%p266_p3) target bundleno = 880 (0x370), region = 48  ;;  %3094 = vmatprep.subr.bf16.mxu1 (!%p266_p3), %v3242_v2  ;;  %v3244_v31 = vld [vmem:[%s3918_s3 + $0x10] sm:$0xff] (!%p266_p3)   ;;  %v3245_v33 = vld [vmem:[%s3918_s3 + $0x18] sm:$0xff] (!%p266_p3)   ;;  %v3246_v41 = vld [vmem:[%s3920_s5] ss:$8 sps:$4 sm:$0xff] (!%p266_p3)   ;;  %vm1081_vm3 = vcmask (!%p266_p3), 523264  }
   0x8   : > { %vm3356_vm1 = vcmp.lt.s32.totalorder (!%p266_p3), %v1581_v0, 256  ;;  %3095 = vmatpush3.bf16.msra.mxu1 (!%p266_p3), %v3242_v2  ;;  %v3248_v42 = vld [vmem:[%s3920_s5 + $0x4] ss:$8 sps:$4 sm:$0xff] (!%p266_p3)   ;;  %v3249_v43 = vld [vmem:[%s3920_s5 + $0x10] ss:$8 sps:$4 sm:$0xff] (!%p266_p3)  }
   0x9   : > { %3096 = vmatprep.subr.bf16.mxu1 (!%p266_p3), %v3243_v3  ;;  %v3251_v44 = vld [vmem:[%s3920_s5 + $0x14] ss:$8 sps:$4 sm:$0xff] (!%p266_p3)   ;;  %v3469_v45 = vld [vmem:[%s3920_s5 + $0x20] ss:$8 sps:$4 sm:$0xff] (!%p266_p3)   ;;  %v3254_v46 = vld [vmem:[%s3920_s5 + $0x24] ss:$8 sps:$4 sm:$0xff] (!%p266_p3)  }
   0xa   : > { %v3478_v47 = vld [vmem:[%s3917_s2] ss:$0 sm:$0xff] (!%p266_p3)  ;;  %v3483_v49 = vld [vmem:[%s3920_s5 + $0x30] ss:$8 sps:$4 sm:$0xff] (!%p266_p3)   ;;  %v3257_v50 = vld [vmem:[%s3920_s5 + $0x34] ss:$8 sps:$4 sm:$0xff] (!%p266_p3)  }
   0xb   : > { %v3495_v57 = vld [vmem:[%s3920_s5 + $0x40] ss:$8 sps:$4 sm:$0xff] (!%p266_p3)   ;;  %v3260_v58 = vld [vmem:[%s3920_s5 + $0x44] ss:$8 sps:$4 sm:$0xff] (!%p266_p3)   ;;  %v3504_v60 = vld [vmem:[%s3920_s5 + $0x54] ss:$8 sps:$4 sm:$0xff] (!%p266_p3)  }
   0xc   : > { %3097 = vmatpush3.bf16.msra.mxu1 (!%p266_p3), %v3243_v3 }
   0xd   : > { %3098 = vmatprep.subr.bf16.mxu1 (!%p266_p3), %v3244_v31 }
   0xe   : > { %s3930_s24 = smov (!%p305_p4, %s3284_s24), 1 }
   0xf   : > { %s2958_s9 = sshll.u32 %s3930_s24, 8  ;;  %s2836_s10 = sshll.u32 %s3930_s24, 1 }
  0x10   : > { %s3369_s13 = scalar_lea.vmem %s3915_s0, %s2958_s9  ;;  %s317_s16 = scalar_lea.vmem %s3916_s1, %s2836_s10  ;;  %3099 = vmatpush3.bf16.msra.mxu1 %v3244_v31 }
  0x11   : > { %s3377_s19 = scalar_lea.vmem %s3922_s7, %s2836_s10  ;;  %v388_v4 = vld [vmem:[%s317_s16] sm:$0x3]  ;;  %v3211_v8 = vld [vmem:[%s3369_s13 + $0x8] sm:$0xff]   ;;  %v3212_v9 = vld [vmem:[%s3369_s13 + $0x10] sm:$0xff]   ;;  %3100 = vmatprep.subr.bf16.mxu1 %v3245_v33 }
  0x12   : > { %3182 = vmatprep.subr.msk.bf16.mxu0 %vm653_vm0, %v388_v4  ;;  %2031 = vst.msk [vmem:[%s3377_s19] sm:$0x3] %vm3356_vm1, %v3294_v5  ;;  %v655_v6 = vsel %vm653_vm0, %v388_v4, 0  ;;  %v3210_v7 = vld [vmem:[%s3369_s13] sm:$0xff]   ;;  %v3213_v10 = vld [vmem:[%s3369_s13 + $0x18] sm:$0xff]   ;;  %v3215_v12 = vld [vmem:[%s3369_s13 + $0x28] sm:$0xff]  }
  0x13   : > { %3029 = vmatpush3.bf16.msra.mxu0 %v655_v6  ;;  %3030 = vmatprep.mubr.msk.bf16.mxu0 %vm556_vm2, %v3210_v7  ;;  %v3214_v11 = vld [vmem:[%s3369_s13 + $0x20] sm:$0xff]   ;;  %v3216_v13 = vld [vmem:[%s3369_s13 + $0x30] sm:$0xff]   ;;  %v3217_v14 = vld [vmem:[%s3369_s13 + $0x38] sm:$0xff]  }
  0x14   : > { %v3218_v15 = vld [vmem:[%s3369_s13 + $0x40] sm:$0xff]   ;;  %v3219_v16 = vld [vmem:[%s3369_s13 + $0x48] sm:$0xff]   ;;  %v3220_v17 = vld [vmem:[%s3369_s13 + $0x50] sm:$0xff]   ;;  %3101 = vmatpush3.bf16.msra.mxu1 %v3245_v33  ;;  %1671 = vmatprep.subr.bf16.mxu0 %v3248_v42 }
  0x15   : > { %v3221_v18 = vld [vmem:[%s3369_s13 + $0x58] sm:$0xff]   ;;  %v3222_v19 = vld [vmem:[%s3369_s13 + $0x60] sm:$0xff]   ;;  %v3223_v20 = vld [vmem:[%s3369_s13 + $0x68] sm:$0xff]   ;;  %3166 = vmatprep.subr.bf16.mxu1 %v3248_v42 }
  0x16   : > { %3031 = vmatmul.mubr.msk.bf16.vlgmr.msra.gmra.mrb[0].mxu0 %vm556_vm2, %v3211_v8  ;;  %v3224_v21 = vld [vmem:[%s3369_s13 + $0x70] sm:$0xff]   ;;  %v3225_v22 = vld [vmem:[%s3369_s13 + $0x78] sm:$0xff]   ;;  %v3226_v23 = vld [vmem:[%s3369_s13 + $0x80] sm:$0xff]  }
  0x17   : > { %3034 = vmatprep.mubr.msk.bf16.mxu0 %vm556_vm2, %v3212_v9  ;;  %v3227_v24 = vld [vmem:[%s3369_s13 + $0x88] sm:$0xff]   ;;  %v3228_v25 = vld [vmem:[%s3369_s13 + $0x90] sm:$0xff]   ;;  %v3229_v26 = vld [vmem:[%s3369_s13 + $0x98] sm:$0xff]   ;;  %1672 = vmatpush1.bf16.msra.mxu0 %v3246_v41 }
  0x18   : > { %v3230_v27 = vld [vmem:[%s3369_s13 + $0xa0] sm:$0xff]   ;;  %v3231_v28 = vld [vmem:[%s3369_s13 + $0xa8] sm:$0xff]   ;;  %v3232_v29 = vld [vmem:[%s3369_s13 + $0xb0] sm:$0xff]   ;;  %1673 = vmatprep.subr.bf16.mxu0 %v3251_v44 }
  0x19   : > { %v3233_v30 = vld [vmem:[%s3369_s13 + $0xb8] sm:$0xff]   ;;  %v3234_v32 = vld [vmem:[%s3369_s13 + $0xc0] sm:$0xff]   ;;  %v3235_v34 = vld [vmem:[%s3369_s13 + $0xc8] sm:$0xff]  }
  0x1a   : > { %v3236_v35 = vld [vmem:[%s3369_s13 + $0xd0] sm:$0xff]   ;;  %v3237_v36 = vld [vmem:[%s3369_s13 + $0xd8] sm:$0xff]   ;;  %v3238_v37 = vld [vmem:[%s3369_s13 + $0xe0] sm:$0xff]  }
  0x1b   : > { %v3239_v38 = vld [vmem:[%s3369_s13 + $0xe8] sm:$0xff]   ;;  %v3240_v39 = vld [vmem:[%s3369_s13 + $0xf0] sm:$0xff]   ;;  %v3241_v40 = vld [vmem:[%s3369_s13 + $0xf8] sm:$0xff]   ;;  %1674 = vmatpush1.bf16.msra.mxu0 %v3249_v43 }
  0x1c   : > { %1675 = vmatprep.subr.bf16.mxu0 %v3254_v46  ;;  %v3510_v4 = vld [vmem:[%s3920_s5 + $0x50] ss:$8 sps:$4 sm:$0xff]   ;;  %v3516_v7 = vld [vmem:[%s3920_s5 + $0x64] ss:$8 sps:$4 sm:$0xff]  }
  0x1e   : > { %3035 = vmatmul.mubr.msk.bf16.gmra.mrb[4].mxu0 %vm556_vm2, %v3213_v10 }
  0x1f   : > { %3038 = vmatprep.mubr.msk.bf16.mxu0 %vm556_vm2, %v3214_v11  ;;  %1676 = vmatpush1.bf16.msra.mxu0 %v3469_v45 }
  0x20   : > { %1677 = vmatprep.subr.bf16.mxu0 %v3257_v50 }
  0x23   : > { %1678 = vmatpush1.bf16.msra.mxu0 %v3483_v49 }
  0x24   : > { %1679 = vmatprep.subr.bf16.mxu0 %v3260_v58 }
  0x26   : > { %3039 = vmatmul.mubr.msk.bf16.gmra.mrb[8].mxu0 %vm556_vm2, %v3215_v12 }
  0x27   : > { %3042 = vmatprep.mubr.msk.bf16.mxu0 %vm556_vm2, %v3216_v13  ;;  %1680 = vmatpush1.bf16.msra.mxu0 %v3495_v57 }
  0x28   : > { %1681 = vmatprep.subr.bf16.mxu0 %v3504_v60 }
  0x2b   : > { %1682 = vmatpush1.bf16.msra.mxu0 %v3510_v4 }
  0x2c   : > { %1683 = vmatprep.subr.bf16.mxu0 %v3516_v7 }
  0x2e   : > { %3043 = vmatmul.mubr.msk.bf16.gmra.mrb[12].mxu0 %vm556_vm2, %v3217_v14  ;;  %v3527_v14 = vld [vmem:[%s3920_s5 + $0x60] ss:$8 sps:$4 sm:$0xff]  }
  0x2f   : > { %3046 = vmatprep.mubr.msk.bf16.mxu0 %vm556_vm2, %v3218_v15  ;;  %1684 = vmatpush1.bf16.msra.mxu0 %v3527_v14 }
  0x36   : > { %3047 = vmatmul.mubr.msk.bf16.gmra.mrb[16].mxu0 %vm556_vm2, %v3219_v16 }
  0x37   : > { %3050 = vmatprep.mubr.msk.bf16.mxu0 %vm556_vm2, %v3220_v17 }
  0x3e   : > { %3051 = vmatmul.mubr.msk.bf16.gmra.mrb[20].mxu0 %vm556_vm2, %v3221_v18 }
  0x3f   : > { %3054 = vmatprep.mubr.msk.bf16.mxu0 %vm556_vm2, %v3222_v19 }
  0x46   : > { %3055 = vmatmul.mubr.msk.bf16.gmra.mrb[24].mxu0 %vm556_vm2, %v3223_v20 }
  0x47   : > { %3058 = vmatprep.mubr.msk.bf16.mxu0 %vm556_vm2, %v3224_v21 }
  0x4e   : > { %3059 = vmatmul.mubr.msk.bf16.gmra.mrb[28].mxu0 %vm556_vm2, %v3225_v22 }
  0x4f   : > { %3062 = vmatprep.mubr.msk.bf16.mxu0 %vm556_vm2, %v3226_v23 }
  0x56   : > { %3063 = vmatmul.mubr.msk.bf16.gmra.mrb[32].mxu0 %vm556_vm2, %v3227_v24 }
  0x57   : > { %3066 = vmatprep.mubr.msk.bf16.mxu0 %vm556_vm2, %v3228_v25 }
  0x5e   : > { %3067 = vmatmul.mubr.msk.bf16.gmra.mrb[36].mxu0 %vm556_vm2, %v3229_v26 }
  0x5f   : > { %3070 = vmatprep.mubr.msk.bf16.mxu0 %vm556_vm2, %v3230_v27 }
  0x66   : > { %3071 = vmatmul.mubr.msk.bf16.gmra.mrb[40].mxu0 %vm556_vm2, %v3231_v28 }
  0x67   : > { %3074 = vmatprep.mubr.msk.bf16.mxu0 %vm556_vm2, %v3232_v29 }
  0x6e   : > { %3075 = vmatmul.mubr.msk.bf16.gmra.mrb[44].mxu0 %vm556_vm2, %v3233_v30 }
  0x6f   : > { %3078 = vmatprep.mubr.msk.bf16.mxu0 %vm556_vm2, %v3234_v32 }
  0x76   : > { %3079 = vmatmul.mubr.msk.bf16.gmra.mrb[48].mxu0 %vm556_vm2, %v3235_v34 }
  0x77   : > { %3082 = vmatprep.mubr.msk.bf16.mxu0 %vm556_vm2, %v3236_v35 }
  0x7e   : > { %3083 = vmatmul.mubr.msk.bf16.gmra.mrb[52].mxu0 %vm556_vm2, %v3237_v36 }
  0x7f   : > { %3086 = vmatprep.mubr.msk.bf16.mxu0 %vm556_vm2, %v3238_v37 }
  0x86   : > { %3087 = vmatmul.mubr.msk.bf16.gmra.mrb[56].mxu0 %vm556_vm2, %v3239_v38 }
  0x87   : > { %3090 = vmatprep.mubr.msk.bf16.mxu0 %vm556_vm2, %v3240_v39 }
  0x8e   : > { %3091 = vmatmul.mubr.msk.bf16.gmra.mrb[60].mxu0 %vm556_vm2, %v3241_v40 }
  0xe9   : > { %v3032_v48 = vpop.f32.mrb[0].mxu0 }
  0xea   : > { %v700_v51 = vadd.f32 %v3032_v48, %v3478_v47  ;;  %v691_v52 = vpop.f32.mrb[1].mxu0 }
  0xeb   : > { %v692_v53 = vadd.f32 %v3478_v47, %v691_v52  ;;  %v3033_v54 = vpop.f32.mrb[2].mxu0 }
  0xec   : > { %v703_v55 = vadd.f32 %v3033_v54, %v3478_v47  ;;  %v694_v56 = vpop.f32.mrb[3].mxu0  ;;  %v948_v61 = vmax.f32 %v700_v51, 0.0 }
  0xed   : > { %v695_v59 = vadd.f32 %v3478_v47, %v694_v56  ;;  %v946_v63 = vmax.f32 %v692_v53, 0.0 }
  0xee   : > { %v949_v62 = vmax.f32 %v703_v55, 0.0 }
  0xef   : > { %v947_v2 = vmax.f32 %v695_v59, 0.0 }
  0xf0   : > { %v1011_v3 = vpack.c.bf16 %v949_v62, %v948_v61 }
  0xf1   : > { %v3036_v5 = vpop.f32.mrb[4].mxu0  ;;  %v1010_v6 = vpack.c.bf16 %v947_v2, %v946_v63 }
  0xf2   : > { %v716_v8 = vadd.f32 %v3036_v5, %v3478_v47  ;;  %v707_v9 = vpop.f32.mrb[5].mxu0 }
  0xf3   : > { %v708_v10 = vadd.f32 %v3478_v47, %v707_v9  ;;  %v3037_v11 = vpop.f32.mrb[6].mxu0  ;;  %3102 = vmatprep.mubr.msk.bf16.mxu1 %vm1081_vm3, %v1010_v6 }
  0xf4   : > { %v719_v12 = vadd.f32 %v3037_v11, %v3478_v47  ;;  %v710_v13 = vpop.f32.mrb[7].mxu0  ;;  %3103 = vmatmul.mubr.msk.bf16.vlgmr.msra.gmra.mrb[0].mxu1 %vm1081_vm3, %v1011_v3  ;;  %v952_v16 = vmax.f32 %v716_v8, 0.0 }
  0xf5   : > { %v711_v15 = vadd.f32 %v3478_v47, %v710_v13  ;;  %3174 = vmatpush1.bf16.msra.mxu1 %v3246_v41  ;;  %v950_v18 = vmax.f32 %v708_v10, 0.0 }
  0xf6   : > { %v953_v17 = vmax.f32 %v719_v12, 0.0  ;;  %3167 = vmatprep.subr.bf16.mxu1 %v3251_v44 }
  0xf7   : > { %v951_v19 = vmax.f32 %v711_v15, 0.0 }
  0xf8   : > { %v1013_v20 = vpack.c.bf16 %v953_v17, %v952_v16 }
  0xf9   : > { %v1012_v21 = vpack.c.bf16 %v951_v19, %v950_v18  ;;  %v3040_v22 = vpop.f32.mrb[8].mxu0  ;;  %3175 = vmatpush1.bf16.msra.mxu1 %v3249_v43 }
  0xfa   : > { %v732_v23 = vadd.f32 %v3040_v22, %v3478_v47  ;;  %v723_v24 = vpop.f32.mrb[9].mxu0  ;;  %3168 = vmatprep.subr.bf16.mxu1 %v3254_v46 }
  0xfb   : > { %v724_v25 = vadd.f32 %v3478_v47, %v723_v24  ;;  %v3041_v26 = vpop.f32.mrb[10].mxu0  ;;  %3106 = vmatprep.mubr.msk.bf16.mxu1 %vm1081_vm3, %v1012_v21 }
  0xfc   : > { %v735_v27 = vadd.f32 %v3041_v26, %v3478_v47  ;;  %v726_v28 = vpop.f32.mrb[11].mxu0  ;;  %3107 = vmatmul.mubr.msk.bf16.gmra.mrb[4].mxu1 %vm1081_vm3, %v1013_v20  ;;  %v956_v30 = vmax.f32 %v732_v23, 0.0 }
  0xfd   : > { %v727_v29 = vadd.f32 %v3478_v47, %v726_v28  ;;  %3176 = vmatpush1.bf16.msra.mxu1 %v3469_v45  ;;  %v954_v32 = vmax.f32 %v724_v25, 0.0 }
  0xfe   : > { %v957_v31 = vmax.f32 %v735_v27, 0.0  ;;  %3169 = vmatprep.subr.bf16.mxu1 %v3257_v50 }
  0xff   : > { %v955_v33 = vmax.f32 %v727_v29, 0.0 }
 0x100   : > { %v1015_v34 = vpack.c.bf16 %v957_v31, %v956_v30 }
 0x101   : > { %v1014_v35 = vpack.c.bf16 %v955_v33, %v954_v32  ;;  %v3044_v36 = vpop.f32.mrb[12].mxu0  ;;  %3177 = vmatpush1.bf16.msra.mxu1 %v3483_v49 }
 0x102   : > { %v748_v37 = vadd.f32 %v3044_v36, %v3478_v47  ;;  %v739_v38 = vpop.f32.mrb[13].mxu0  ;;  %3170 = vmatprep.subr.bf16.mxu1 %v3260_v58 }
 0x103   : > { %v740_v39 = vadd.f32 %v3478_v47, %v739_v38  ;;  %v3045_v40 = vpop.f32.mrb[14].mxu0  ;;  %3110 = vmatprep.mubr.msk.bf16.mxu1 %vm1081_vm3, %v1014_v35 }
 0x104   : > { %v751_v41 = vadd.f32 %v3045_v40, %v3478_v47  ;;  %v742_v42 = vpop.f32.mrb[15].mxu0  ;;  %3111 = vmatmul.mubr.msk.bf16.gmra.mrb[8].mxu1 %vm1081_vm3, %v1015_v34  ;;  %v960_v44 = vmax.f32 %v748_v37, 0.0 }
 0x105   : > { %v743_v43 = vadd.f32 %v3478_v47, %v742_v42  ;;  %3178 = vmatpush1.bf16.msra.mxu1 %v3495_v57  ;;  %v958_v46 = vmax.f32 %v740_v39, 0.0 }
 0x106   : > { %v961_v45 = vmax.f32 %v751_v41, 0.0  ;;  %3171 = vmatprep.subr.bf16.mxu1 %v3504_v60 }
 0x107   : > { %v959_v48 = vmax.f32 %v743_v43, 0.0 }
 0x108   : > { %v1017_v49 = vpack.c.bf16 %v961_v45, %v960_v44 }
 0x109   : > { %v1016_v50 = vpack.c.bf16 %v959_v48, %v958_v46  ;;  %v3048_v51 = vpop.f32.mrb[16].mxu0  ;;  %3179 = vmatpush1.bf16.msra.mxu1 %v3510_v4 }
 0x10a   : > { %v764_v52 = vadd.f32 %v3048_v51, %v3478_v47  ;;  %v755_v53 = vpop.f32.mrb[17].mxu0  ;;  %3172 = vmatprep.subr.bf16.mxu1 %v3516_v7 }
 0x10b   : > { %v756_v54 = vadd.f32 %v3478_v47, %v755_v53  ;;  %v3049_v55 = vpop.f32.mrb[18].mxu0  ;;  %3114 = vmatprep.mubr.msk.bf16.mxu1 %vm1081_vm3, %v1016_v50 }
 0x10c   : > { %v767_v56 = vadd.f32 %v3049_v55, %v3478_v47  ;;  %v758_v57 = vpop.f32.mrb[19].mxu0  ;;  %3115 = vmatmul.mubr.msk.bf16.gmra.mrb[12].mxu1 %vm1081_vm3, %v1017_v49  ;;  %v964_v59 = vmax.f32 %v764_v52, 0.0 }
 0x10d   : > { %v759_v58 = vadd.f32 %v3478_v47, %v758_v57  ;;  %3180 = vmatpush1.bf16.msra.mxu1 %v3527_v14  ;;  %v962_v61 = vmax.f32 %v756_v54, 0.0 }
 0x10e   : > { %v965_v60 = vmax.f32 %v767_v56, 0.0 }
 0x10f   : > { %v963_v62 = vmax.f32 %v759_v58, 0.0 }
 0x110   : > { %v1019_v63 = vpack.c.bf16 %v965_v60, %v964_v59 }
 0x111   : > { %v1018_v2 = vpack.c.bf16 %v963_v62, %v962_v61  ;;  %v3052_v3 = vpop.f32.mrb[20].mxu0 }
 0x112   : > { %v780_v4 = vadd.f32 %v3052_v3, %v3478_v47  ;;  %v771_v5 = vpop.f32.mrb[21].mxu0 }
 0x113   : > { %v772_v6 = vadd.f32 %v3478_v47, %v771_v5  ;;  %v3053_v7 = vpop.f32.mrb[22].mxu0  ;;  %3118 = vmatprep.mubr.msk.bf16.mxu1 %vm1081_vm3, %v1018_v2 }
 0x114   : > { %v783_v8 = vadd.f32 %v3053_v7, %v3478_v47  ;;  %v774_v9 = vpop.f32.mrb[23].mxu0  ;;  %3119 = vmatmul.mubr.msk.bf16.gmra.mrb[16].mxu1 %vm1081_vm3, %v1019_v63  ;;  %v968_v11 = vmax.f32 %v780_v4, 0.0 }
 0x115   : > { %v775_v10 = vadd.f32 %v3478_v47, %v774_v9  ;;  %v966_v13 = vmax.f32 %v772_v6, 0.0 }
 0x116   : > { %v969_v12 = vmax.f32 %v783_v8, 0.0 }
 0x117   : > { %v967_v14 = vmax.f32 %v775_v10, 0.0 }
 0x118   : > { %v1021_v15 = vpack.c.bf16 %v969_v12, %v968_v11 }
 0x119   : > { %v1020_v16 = vpack.c.bf16 %v967_v14, %v966_v13  ;;  %v3056_v17 = vpop.f32.mrb[24].mxu0 }
 0x11a   : > { %v796_v18 = vadd.f32 %v3056_v17, %v3478_v47  ;;  %v787_v19 = vpop.f32.mrb[25].mxu0 }
 0x11b   : > { %v788_v20 = vadd.f32 %v3478_v47, %v787_v19  ;;  %v3057_v21 = vpop.f32.mrb[26].mxu0  ;;  %3122 = vmatprep.mubr.msk.bf16.mxu1 %vm1081_vm3, %v1020_v16 }
 0x11c   : > { %v799_v22 = vadd.f32 %v3057_v21, %v3478_v47  ;;  %v790_v23 = vpop.f32.mrb[27].mxu0  ;;  %3123 = vmatmul.mubr.msk.bf16.gmra.mrb[20].mxu1 %vm1081_vm3, %v1021_v15  ;;  %v972_v25 = vmax.f32 %v796_v18, 0.0 }
 0x11d   : > { %v791_v24 = vadd.f32 %v3478_v47, %v790_v23  ;;  %v970_v27 = vmax.f32 %v788_v20, 0.0 }
 0x11e   : > { %v973_v26 = vmax.f32 %v799_v22, 0.0 }
 0x11f   : > { %v971_v28 = vmax.f32 %v791_v24, 0.0 }
 0x120   : > { %v1023_v29 = vpack.c.bf16 %v973_v26, %v972_v25 }
 0x121   : > { %v1022_v30 = vpack.c.bf16 %v971_v28, %v970_v27  ;;  %v3060_v31 = vpop.f32.mrb[28].mxu0 }
 0x122   : > { %v812_v32 = vadd.f32 %v3060_v31, %v3478_v47  ;;  %v803_v33 = vpop.f32.mrb[29].mxu0 }
 0x123   : > { %v804_v34 = vadd.f32 %v3478_v47, %v803_v33  ;;  %v3061_v35 = vpop.f32.mrb[30].mxu0  ;;  %3126 = vmatprep.mubr.msk.bf16.mxu1 %vm1081_vm3, %v1022_v30 }
 0x124   : > { %v815_v36 = vadd.f32 %v3061_v35, %v3478_v47  ;;  %v806_v37 = vpop.f32.mrb[31].mxu0  ;;  %3127 = vmatmul.mubr.msk.bf16.gmra.mrb[24].mxu1 %vm1081_vm3, %v1023_v29  ;;  %v976_v39 = vmax.f32 %v812_v32, 0.0 }
 0x125   : > { %v807_v38 = vadd.f32 %v3478_v47, %v806_v37  ;;  %v974_v41 = vmax.f32 %v804_v34, 0.0 }
 0x126   : > { %v977_v40 = vmax.f32 %v815_v36, 0.0 }
 0x127   : > { %v975_v42 = vmax.f32 %v807_v38, 0.0 }
 0x128   : > { %v1025_v43 = vpack.c.bf16 %v977_v40, %v976_v39 }
 0x129   : > { %v1024_v44 = vpack.c.bf16 %v975_v42, %v974_v41  ;;  %v3064_v45 = vpop.f32.mrb[32].mxu0 }
 0x12a   : > { %v828_v46 = vadd.f32 %v3064_v45, %v3478_v47  ;;  %v819_v48 = vpop.f32.mrb[33].mxu0  ;;  %v3269_v45 = vld [vmem:[%s3920_s5 + $0x74] ss:$8 sps:$4 sm:$0xff]  }
 0x12b   : > { %v820_v49 = vadd.f32 %v3478_v47, %v819_v48  ;;  %v3065_v50 = vpop.f32.mrb[34].mxu0  ;;  %3130 = vmatprep.mubr.msk.bf16.mxu1 %vm1081_vm3, %v1024_v44  ;;  %1685 = vmatprep.subr.bf16.mxu0 %v3269_v45 }
 0x12c   : > { %v831_v51 = vadd.f32 %v3065_v50, %v3478_v47  ;;  %v822_v52 = vpop.f32.mrb[35].mxu0  ;;  %3131 = vmatmul.mubr.msk.bf16.gmra.mrb[28].mxu1 %vm1081_vm3, %v1025_v43  ;;  %v980_v54 = vmax.f32 %v828_v46, 0.0  ;;  %v3267_v50 = vld [vmem:[%s3920_s5 + $0x70] ss:$8 sps:$4 sm:$0xff]   ;;  %3173 = vmatprep.subr.bf16.mxu1 %v3269_v45 }
 0x12d   : > { %v823_v53 = vadd.f32 %v3478_v47, %v822_v52  ;;  %v978_v56 = vmax.f32 %v820_v49, 0.0  ;;  %1686 = vmatpush1.bf16.msra.mxu0 %v3267_v50  ;;  %3181 = vmatpush1.bf16.msra.mxu1 %v3267_v50 }
 0x12e   : > { %v981_v55 = vmax.f32 %v831_v51, 0.0 }
 0x12f   : > { %v979_v57 = vmax.f32 %v823_v53, 0.0 }
 0x130   : > { %v1027_v58 = vpack.c.bf16 %v981_v55, %v980_v54 }
 0x131   : > { %v1026_v59 = vpack.c.bf16 %v979_v57, %v978_v56  ;;  %v3068_v60 = vpop.f32.mrb[36].mxu0  ;;  %v3295_v56 = vmov 0  }
 0x132   : > { %v844_v61 = vadd.f32 %v3068_v60, %v3478_v47  ;;  %v835_v62 = vpop.f32.mrb[37].mxu0  ;;  %1703 = vmatprep.mubr.bf16.mxu0 %v3295_v56 }
 0x133   : > { %v836_v63 = vadd.f32 %v3478_v47, %v835_v62  ;;  %v3069_v2 = vpop.f32.mrb[38].mxu0  ;;  %3134 = vmatprep.mubr.msk.bf16.mxu1 %vm1081_vm3, %v1026_v59 }
 0x134   : > { %v847_v3 = vadd.f32 %v3069_v2, %v3478_v47  ;;  %v838_v4 = vpop.f32.mrb[39].mxu0  ;;  %3135 = vmatmul.mubr.msk.bf16.gmra.mrb[32].mxu1 %vm1081_vm3, %v1027_v58  ;;  %v984_v6 = vmax.f32 %v844_v61, 0.0 }
 0x135   : > { %v839_v5 = vadd.f32 %v3478_v47, %v838_v4  ;;  %v982_v8 = vmax.f32 %v836_v63, 0.0 }
 0x136   : > { %v985_v7 = vmax.f32 %v847_v3, 0.0 }
 0x137   : > { %v983_v9 = vmax.f32 %v839_v5, 0.0 }
 0x138   : > { %v1029_v10 = vpack.c.bf16 %v985_v7, %v984_v6 }
 0x139   : > { %v1028_v11 = vpack.c.bf16 %v983_v9, %v982_v8  ;;  %v3072_v12 = vpop.f32.mrb[40].mxu0 }
 0x13a   : > { %v860_v13 = vadd.f32 %v3072_v12, %v3478_v47  ;;  %v851_v14 = vpop.f32.mrb[41].mxu0 }
 0x13b   : > { %v852_v15 = vadd.f32 %v3478_v47, %v851_v14  ;;  %3138 = vmatprep.mubr.msk.bf16.mxu1 %vm1081_vm3, %v1028_v11  ;;  %v3073_v16 = vpop.f32.mrb[42].mxu0 }
 0x13c   : > { %v988_v17 = vmax.f32 %v860_v13, 0.0  ;;  %v863_v18 = vadd.f32 %v3073_v16, %v3478_v47  ;;  %3139 = vmatmul.mubr.msk.bf16.gmra.mrb[36].mxu1 %vm1081_vm3, %v1029_v10  ;;  %v854_v19 = vpop.f32.mrb[43].mxu0 }
 0x13d   : > { %v986_v20 = vmax.f32 %v852_v15, 0.0  ;;  %v855_v21 = vadd.f32 %v3478_v47, %v854_v19 }
 0x13e   : > { %v989_v22 = vmax.f32 %v863_v18, 0.0 }
 0x13f   : > { %v987_v23 = vmax.f32 %v855_v21, 0.0 }
 0x140   : > { %v1031_v24 = vpack.c.bf16 %v989_v22, %v988_v17 }
 0x141   : > { %v1030_v25 = vpack.c.bf16 %v987_v23, %v986_v20  ;;  %v3076_v26 = vpop.f32.mrb[44].mxu0 }
 0x142   : > { %v876_v27 = vadd.f32 %v3076_v26, %v3478_v47  ;;  %v867_v28 = vpop.f32.mrb[45].mxu0 }
 0x143   : > { %3142 = vmatprep.mubr.msk.bf16.mxu1 %vm1081_vm3, %v1030_v25  ;;  %v868_v29 = vadd.f32 %v3478_v47, %v867_v28  ;;  %v3077_v30 = vpop.f32.mrb[46].mxu0 }
 0x144   : > { %3143 = vmatmul.mubr.msk.bf16.gmra.mrb[40].mxu1 %vm1081_vm3, %v1031_v24  ;;  %v992_v31 = vmax.f32 %v876_v27, 0.0  ;;  %v879_v32 = vadd.f32 %v3077_v30, %v3478_v47  ;;  %v870_v33 = vpop.f32.mrb[47].mxu0 }
 0x145   : > { %v990_v34 = vmax.f32 %v868_v29, 0.0  ;;  %v871_v35 = vadd.f32 %v3478_v47, %v870_v33 }
 0x146   : > { %v993_v36 = vmax.f32 %v879_v32, 0.0 }
 0x147   : > { %v991_v37 = vmax.f32 %v871_v35, 0.0 }
 0x148   : > { %v1033_v38 = vpack.c.bf16 %v993_v36, %v992_v31 }
 0x149   : > { %v1032_v39 = vpack.c.bf16 %v991_v37, %v990_v34  ;;  %v3080_v40 = vpop.f32.mrb[48].mxu0 }
 0x14a   : > { %v892_v41 = vadd.f32 %v3080_v40, %v3478_v47  ;;  %v883_v42 = vpop.f32.mrb[49].mxu0 }
 0x14b   : > { %3146 = vmatprep.mubr.msk.bf16.mxu1 %vm1081_vm3, %v1032_v39  ;;  %v884_v43 = vadd.f32 %v3478_v47, %v883_v42  ;;  %v3081_v44 = vpop.f32.mrb[50].mxu0 }
 0x14c   : > { %3147 = vmatmul.mubr.msk.bf16.gmra.mrb[44].mxu1 %vm1081_vm3, %v1033_v38  ;;  %v996_v46 = vmax.f32 %v892_v41, 0.0  ;;  %v895_v48 = vadd.f32 %v3081_v44, %v3478_v47  ;;  %v886_v49 = vpop.f32.mrb[51].mxu0  ;;  %v3636_v38 = vld [vmem:[%s3919_s4] ss:$0 sm:$0xff] }
 0x14d   : > { %v994_v51 = vmax.f32 %v884_v43, 0.0  ;;  %v887_v52 = vadd.f32 %v3478_v47, %v886_v49 }
 0x14e   : > { %v997_v53 = vmax.f32 %v895_v48, 0.0 }
 0x14f   : > { %v995_v54 = vmax.f32 %v887_v52, 0.0 }
 0x150   : > { %v1035_v55 = vpack.c.bf16 %v997_v53, %v996_v46 }
 0x151   : > { %v1034_v57 = vpack.c.bf16 %v995_v54, %v994_v51  ;;  %v3084_v58 = vpop.f32.mrb[52].mxu0 }
 0x152   : > { %v908_v59 = vadd.f32 %v3084_v58, %v3478_v47  ;;  %v899_v60 = vpop.f32.mrb[53].mxu0 }
 0x153   : > { %3150 = vmatprep.mubr.msk.bf16.mxu1 %vm1081_vm3, %v1034_v57  ;;  %v900_v61 = vadd.f32 %v3478_v47, %v899_v60  ;;  %v3085_v62 = vpop.f32.mrb[54].mxu0 }
 0x154   : > { %3151 = vmatmul.mubr.msk.bf16.gmra.mrb[48].mxu1 %vm1081_vm3, %v1035_v55  ;;  %v1000_v63 = vmax.f32 %v908_v59, 0.0  ;;  %v911_v2 = vadd.f32 %v3085_v62, %v3478_v47  ;;  %v902_v3 = vpop.f32.mrb[55].mxu0 }
 0x155   : > { %v998_v4 = vmax.f32 %v900_v61, 0.0  ;;  %v903_v5 = vadd.f32 %v3478_v47, %v902_v3 }
 0x156   : > { %v1001_v6 = vmax.f32 %v911_v2, 0.0 }
 0x157   : > { %v999_v7 = vmax.f32 %v903_v5, 0.0 }
 0x158   : > { %v1037_v8 = vpack.c.bf16 %v1001_v6, %v1000_v63 }
 0x159   : > { %v1036_v9 = vpack.c.bf16 %v999_v7, %v998_v4  ;;  %v3088_v10 = vpop.f32.mrb[56].mxu0 }
 0x15a   : > { %v924_v11 = vadd.f32 %v3088_v10, %v3478_v47  ;;  %v915_v12 = vpop.f32.mrb[57].mxu0 }
 0x15b   : > { %3154 = vmatprep.mubr.msk.bf16.mxu1 %vm1081_vm3, %v1036_v9  ;;  %v916_v13 = vadd.f32 %v3478_v47, %v915_v12  ;;  %v3089_v14 = vpop.f32.mrb[58].mxu0 }
 0x15c   : > { %3155 = vmatmul.mubr.msk.bf16.gmra.mrb[52].mxu1 %vm1081_vm3, %v1037_v8  ;;  %v1004_v15 = vmax.f32 %v924_v11, 0.0  ;;  %v927_v16 = vadd.f32 %v3089_v14, %v3478_v47  ;;  %v918_v17 = vpop.f32.mrb[59].mxu0 }
 0x15d   : > { %v1002_v18 = vmax.f32 %v916_v13, 0.0  ;;  %v919_v19 = vadd.f32 %v3478_v47, %v918_v17 }
 0x15e   : > { %v1005_v20 = vmax.f32 %v927_v16, 0.0 }
 0x15f   : > { %v1003_v21 = vmax.f32 %v919_v19, 0.0 }
 0x160   : > { %v1039_v22 = vpack.c.bf16 %v1005_v20, %v1004_v15 }
 0x161   : > { %v1038_v23 = vpack.c.bf16 %v1003_v21, %v1002_v18  ;;  %v3092_v24 = vpop.f32.mrb[60].mxu0 }
 0x162   : > { %v940_v25 = vadd.f32 %v3092_v24, %v3478_v47  ;;  %v931_v26 = vpop.f32.mrb[61].mxu0 }
 0x163   : > { %3158 = vmatprep.mubr.msk.bf16.mxu1 %vm1081_vm3, %v1038_v23  ;;  %v932_v27 = vadd.f32 %v3478_v47, %v931_v26  ;;  %v3093_v28 = vpop.f32.mrb[62].mxu0 }
 0x164   : > { %3159 = vmatmul.mubr.msk.bf16.gmra.mrb[56].mxu1 %vm1081_vm3, %v1039_v22  ;;  %v1008_v29 = vmax.f32 %v940_v25, 0.0  ;;  %v943_v30 = vadd.f32 %v3093_v28, %v3478_v47  ;;  %v934_v31 = vpop.f32.mrb[63].mxu0 }
 0x165   : > { %v1006_v32 = vmax.f32 %v932_v27, 0.0  ;;  %v935_v33 = vadd.f32 %v3478_v47, %v934_v31 }
 0x166   : > { %v1009_v34 = vmax.f32 %v943_v30, 0.0 }
 0x167   : > { %v1007_v35 = vmax.f32 %v935_v33, 0.0 }
 0x168   : > { %v1041_v36 = vpack.c.bf16 %v1009_v34, %v1008_v29 }
 0x169   : > { %v1040_v37 = vpack.c.bf16 %v1007_v35, %v1006_v32 }
 0x16b   : > { %3162 = vmatprep.mubr.msk.bf16.mxu1 %vm1081_vm3, %v1040_v37 }
 0x16c   : > { %3163 = vmatmul.mubr.msk.bf16.gmra.mrb[60].mxu1 %vm1081_vm3, %v1041_v36 }
 0x16d   : > { %1873 = vmatprep.mubr.bf16.mxu1 %v3295_v56 }
 0x1c7   : > { %v3104_v39 = vpop.f32.mrb[0].mxu1 }
 0x1c8   : > { %v1221_v40 = vadd.f32 %v3104_v39, %v3636_v38  ;;  %v1212_v41 = vpop.f32.mrb[1].mxu1 }
 0x1c9   : > { %v1213_v47 = vadd.f32 %v3636_v38, %v1212_v41  ;;  %v3105_v42 = vpop.f32.mrb[2].mxu1 }
 0x1ca   : > { %v1224_v43 = vadd.f32 %v3105_v42, %v3636_v38  ;;  %v1215_v44 = vpop.f32.mrb[3].mxu1  ;;  %v1469_v46 = vmax.f32 %v1221_v40, 0.0 }
 0x1cb   : > { %v1216_v45 = vadd.f32 %v3636_v38, %v1215_v44  ;;  %v1467_v49 = vmax.f32 %v1213_v47, 0.0 }
 0x1cc   : > { %v1470_v48 = vmax.f32 %v1224_v43, 0.0 }
 0x1cd   : > { %v1468_v50 = vmax.f32 %v1216_v45, 0.0 }
 0x1ce   : > { %v1532_v51 = vpack.c.bf16 %v1470_v48, %v1469_v46 }
 0x1cf   : > { %v1531_v52 = vpack.c.bf16 %v1468_v50, %v1467_v49  ;;  %v3108_v53 = vpop.f32.mrb[4].mxu1 }
 0x1d0   : > { %v1237_v54 = vadd.f32 %v3108_v53, %v3636_v38  ;;  %v1228_v55 = vpop.f32.mrb[5].mxu1 }
 0x1d1   : > { %v1229_v57 = vadd.f32 %v3636_v38, %v1228_v55  ;;  %v3109_v58 = vpop.f32.mrb[6].mxu1  ;;  %1704 = vmatmul.mubr.bf16.vlgmr.msra.gmra.mrb[64].mxu0 %v1531_v52 }
 0x1d2   : > { %v1240_v59 = vadd.f32 %v3109_v58, %v3636_v38  ;;  %v1231_v60 = vpop.f32.mrb[7].mxu1  ;;  %1713 = vmatprep.mubr.bf16.mxu0 %v3295_v56  ;;  %v1473_v62 = vmax.f32 %v1237_v54, 0.0 }
 0x1d3   : > { %v1232_v61 = vadd.f32 %v3636_v38, %v1231_v60  ;;  %v1471_v2 = vmax.f32 %v1229_v57, 0.0 }
 0x1d4   : > { %v1474_v63 = vmax.f32 %v1240_v59, 0.0 }
 0x1d5   : > { %v1472_v3 = vmax.f32 %v1232_v61, 0.0 }
 0x1d6   : > { %v1534_v4 = vpack.c.bf16 %v1474_v63, %v1473_v62 }
 0x1d7   : > { %v1533_v5 = vpack.c.bf16 %v1472_v3, %v1471_v2  ;;  %v3112_v6 = vpop.f32.mrb[8].mxu1 }
 0x1d8   : > { %v1253_v7 = vadd.f32 %v3112_v6, %v3636_v38  ;;  %v1244_v8 = vpop.f32.mrb[9].mxu1 }
 0x1d9   : > { %v1245_v9 = vadd.f32 %v3636_v38, %v1244_v8  ;;  %v3113_v10 = vpop.f32.mrb[10].mxu1  ;;  %1714 = vmatmul.mubr.bf16.gmra.mrb[68].mxu0 %v1532_v51 }
 0x1da   : > { %v1256_v11 = vadd.f32 %v3113_v10, %v3636_v38  ;;  %v1247_v12 = vpop.f32.mrb[11].mxu1  ;;  %1723 = vmatprep.mubr.bf16.mxu0 %v3295_v56  ;;  %v1477_v14 = vmax.f32 %v1253_v7, 0.0 }
 0x1db   : > { %v1248_v13 = vadd.f32 %v3636_v38, %v1247_v12  ;;  %v1475_v16 = vmax.f32 %v1245_v9, 0.0 }
 0x1dc   : > { %v1478_v15 = vmax.f32 %v1256_v11, 0.0 }
 0x1dd   : > { %v1476_v17 = vmax.f32 %v1248_v13, 0.0 }
 0x1de   : > { %v1536_v18 = vpack.c.bf16 %v1478_v15, %v1477_v14 }
 0x1df   : > { %v1535_v19 = vpack.c.bf16 %v1476_v17, %v1475_v16  ;;  %v3116_v20 = vpop.f32.mrb[12].mxu1 }
 0x1e0   : > { %v1269_v21 = vadd.f32 %v3116_v20, %v3636_v38  ;;  %v1260_v22 = vpop.f32.mrb[13].mxu1 }
 0x1e1   : > { %v1261_v23 = vadd.f32 %v3636_v38, %v1260_v22  ;;  %v3117_v24 = vpop.f32.mrb[14].mxu1  ;;  %1724 = vmatmul.mubr.bf16.gmra.mrb[72].mxu0 %v1533_v5 }
 0x1e2   : > { %v1272_v25 = vadd.f32 %v3117_v24, %v3636_v38  ;;  %v1263_v26 = vpop.f32.mrb[15].mxu1  ;;  %1733 = vmatprep.mubr.bf16.mxu0 %v3295_v56  ;;  %v1481_v28 = vmax.f32 %v1269_v21, 0.0 }
 0x1e3   : > { %v1264_v27 = vadd.f32 %v3636_v38, %v1263_v26  ;;  %v1479_v30 = vmax.f32 %v1261_v23, 0.0 }
 0x1e4   : > { %v1482_v29 = vmax.f32 %v1272_v25, 0.0 }
 0x1e5   : > { %v1480_v31 = vmax.f32 %v1264_v27, 0.0 }
 0x1e6   : > { %v3657_v32 = vpack.c.bf16 %v1482_v29, %v1481_v28 }
 0x1e7   : > { %v1537_v33 = vpack.c.bf16 %v1480_v31, %v1479_v30  ;;  %v3120_v34 = vpop.f32.mrb[16].mxu1 }
 0x1e8   : > { %v1285_v35 = vadd.f32 %v3120_v34, %v3636_v38  ;;  %v1276_v36 = vpop.f32.mrb[17].mxu1 }
 0x1e9   : > { %v1277_v37 = vadd.f32 %v3636_v38, %v1276_v36  ;;  %v3121_v39 = vpop.f32.mrb[18].mxu1  ;;  %1734 = vmatmul.mubr.bf16.gmra.mrb[76].mxu0 %v1534_v4 }
 0x1ea   : > { %v1288_v40 = vadd.f32 %v3121_v39, %v3636_v38  ;;  %v1279_v41 = vpop.f32.mrb[19].mxu1  ;;  %1743 = vmatprep.mubr.bf16.mxu0 %v3295_v56  ;;  %v1485_v42 = vmax.f32 %v1285_v35, 0.0 }
 0x1eb   : > { %v1280_v47 = vadd.f32 %v3636_v38, %v1279_v41  ;;  %v1483_v44 = vmax.f32 %v1277_v37, 0.0 }
 0x1ec   : > { %v1486_v43 = vmax.f32 %v1288_v40, 0.0 }
 0x1ed   : > { %v1484_v45 = vmax.f32 %v1280_v47, 0.0 }
 0x1ee   : > { %v3664_v46 = vpack.c.bf16 %v1486_v43, %v1485_v42 }
 0x1ef   : > { %v3666_v48 = vpack.c.bf16 %v1484_v45, %v1483_v44  ;;  %v3124_v49 = vpop.f32.mrb[20].mxu1 }
 0x1f0   : > { %v1301_v50 = vadd.f32 %v3124_v49, %v3636_v38  ;;  %v1292_v51 = vpop.f32.mrb[21].mxu1 }
 0x1f1   : > { %v1293_v52 = vadd.f32 %v3636_v38, %v1292_v51  ;;  %v3125_v53 = vpop.f32.mrb[22].mxu1  ;;  %1744 = vmatmul.mubr.bf16.gmra.mrb[80].mxu0 %v1535_v19 }
 0x1f2   : > { %v1304_v54 = vadd.f32 %v3125_v53, %v3636_v38  ;;  %v1295_v55 = vpop.f32.mrb[23].mxu1  ;;  %1753 = vmatprep.mubr.bf16.mxu0 %v3295_v56  ;;  %v1489_v58 = vmax.f32 %v1301_v50, 0.0 }
 0x1f3   : > { %v1296_v57 = vadd.f32 %v3636_v38, %v1295_v55  ;;  %v1487_v60 = vmax.f32 %v1293_v52, 0.0 }
 0x1f4   : > { %v1490_v59 = vmax.f32 %v1304_v54, 0.0 }
 0x1f5   : > { %v1488_v61 = vmax.f32 %v1296_v57, 0.0 }
 0x1f6   : > { %v3673_v62 = vpack.c.bf16 %v1490_v59, %v1489_v58 }
 0x1f7   : > { %v3675_v63 = vpack.c.bf16 %v1488_v61, %v1487_v60  ;;  %v3128_v2 = vpop.f32.mrb[24].mxu1 }
 0x1f8   : > { %v1317_v3 = vadd.f32 %v3128_v2, %v3636_v38  ;;  %v1308_v4 = vpop.f32.mrb[25].mxu1 }
 0x1f9   : > { %v1309_v5 = vadd.f32 %v3636_v38, %v1308_v4  ;;  %v3129_v6 = vpop.f32.mrb[26].mxu1  ;;  %1754 = vmatmul.mubr.bf16.gmra.mrb[84].mxu0 %v1536_v18 }
 0x1fa   : > { %v1320_v7 = vadd.f32 %v3129_v6, %v3636_v38  ;;  %v1311_v8 = vpop.f32.mrb[27].mxu1  ;;  %1763 = vmatprep.mubr.bf16.mxu0 %v3295_v56  ;;  %v1493_v10 = vmax.f32 %v1317_v3, 0.0 }
 0x1fb   : > { %v1312_v9 = vadd.f32 %v3636_v38, %v1311_v8  ;;  %v1491_v12 = vmax.f32 %v1309_v5, 0.0 }
 0x1fc   : > { %v1494_v11 = vmax.f32 %v1320_v7, 0.0 }
 0x1fd   : > { %v1492_v13 = vmax.f32 %v1312_v9, 0.0 }
 0x1fe   : > { %v3682_v14 = vpack.c.bf16 %v1494_v11, %v1493_v10 }
 0x1ff   : > { %v3684_v15 = vpack.c.bf16 %v1492_v13, %v1491_v12  ;;  %v3132_v16 = vpop.f32.mrb[28].mxu1 }
 0x200   : > { %v1333_v17 = vadd.f32 %v3132_v16, %v3636_v38  ;;  %v1324_v19 = vpop.f32.mrb[29].mxu1 }
 0x201   : > { %v1325_v18 = vadd.f32 %v3636_v38, %v1324_v19  ;;  %v3133_v20 = vpop.f32.mrb[30].mxu1  ;;  %1764 = vmatmul.mubr.bf16.gmra.mrb[88].mxu0 %v1537_v33 }
 0x202   : > { %v1336_v21 = vadd.f32 %v3133_v20, %v3636_v38  ;;  %v1327_v22 = vpop.f32.mrb[31].mxu1  ;;  %1773 = vmatprep.mubr.bf16.mxu0 %v3295_v56  ;;  %v1497_v24 = vmax.f32 %v1333_v17, 0.0 }
 0x203   : > { %v1328_v23 = vadd.f32 %v3636_v38, %v1327_v22  ;;  %v1495_v26 = vmax.f32 %v1325_v18, 0.0 }
 0x204   : > { %v1498_v25 = vmax.f32 %v1336_v21, 0.0 }
 0x205   : > { %v1496_v27 = vmax.f32 %v1328_v23, 0.0 }
 0x206   : > { %v3691_v28 = vpack.c.bf16 %v1498_v25, %v1497_v24 }
 0x207   : > { %v3693_v29 = vpack.c.bf16 %v1496_v27, %v1495_v26  ;;  %v3136_v30 = vpop.f32.mrb[32].mxu1 }
 0x208   : > { %v1349_v31 = vadd.f32 %v3136_v30, %v3636_v38  ;;  %v1340_v34 = vpop.f32.mrb[33].mxu1 }
 0x209   : > { %v1341_v33 = vadd.f32 %v3636_v38, %v1340_v34  ;;  %v3137_v35 = vpop.f32.mrb[34].mxu1  ;;  %1774 = vmatmul.mubr.bf16.gmra.mrb[92].mxu0 %v3657_v32 }
 0x20a   : > { %v1352_v36 = vadd.f32 %v3137_v35, %v3636_v38  ;;  %v1343_v37 = vpop.f32.mrb[35].mxu1  ;;  %1783 = vmatprep.mubr.bf16.mxu0 %v3295_v56  ;;  %v1501_v40 = vmax.f32 %v1349_v31, 0.0 }
 0x20b   : > { %v1344_v39 = vadd.f32 %v3636_v38, %v1343_v37  ;;  %v1499_v47 = vmax.f32 %v1341_v33, 0.0 }
 0x20c   : > { %v1502_v41 = vmax.f32 %v1352_v36, 0.0 }
 0x20d   : > { %v1500_v42 = vmax.f32 %v1344_v39, 0.0 }
 0x20e   : > { %v1548_v43 = vpack.c.bf16 %v1502_v41, %v1501_v40 }
 0x20f   : > { %v3701_v44 = vpack.c.bf16 %v1500_v42, %v1499_v47  ;;  %v3140_v45 = vpop.f32.mrb[36].mxu1 }
 0x210   : > { %v1365_v49 = vadd.f32 %v3140_v45, %v3636_v38  ;;  %v1356_v50 = vpop.f32.mrb[37].mxu1  ;;  %1874 = vmatmul.mubr.bf16.vlgmr.msra.gmra.mrb[64].mxu1 %v1548_v43 }
 0x211   : > { %v1357_v32 = vadd.f32 %v3636_v38, %v1356_v50  ;;  %v3141_v51 = vpop.f32.mrb[38].mxu1  ;;  %1784 = vmatmul.mubr.bf16.gmra.mrb[96].mxu0 %v3666_v48  ;;  %1883 = vmatprep.mubr.bf16.mxu1 %v3295_v56 }
 0x212   : > { %v1368_v52 = vadd.f32 %v3141_v51, %v3636_v38  ;;  %v1359_v53 = vpop.f32.mrb[39].mxu1  ;;  %1793 = vmatprep.mubr.bf16.mxu0 %v3295_v56  ;;  %v1505_v55 = vmax.f32 %v1365_v49, 0.0 }
 0x213   : > { %v1360_v54 = vadd.f32 %v3636_v38, %v1359_v53  ;;  %v1503_v58 = vmax.f32 %v1357_v32, 0.0 }
 0x214   : > { %v1506_v57 = vmax.f32 %v1368_v52, 0.0 }
 0x215   : > { %v1504_v59 = vmax.f32 %v1360_v54, 0.0 }
 0x216   : > { %v1550_v60 = vpack.c.bf16 %v1506_v57, %v1505_v55 }
 0x217   : > { %v1549_v61 = vpack.c.bf16 %v1504_v59, %v1503_v58  ;;  %v3144_v2 = vpop.f32.mrb[40].mxu1 }
 0x218   : > { %v1381_v3 = vadd.f32 %v3144_v2, %v3636_v38  ;;  %v1372_v4 = vpop.f32.mrb[41].mxu1 }
 0x219   : > { %v1373_v48 = vadd.f32 %v3636_v38, %v1372_v4  ;;  %1794 = vmatmul.mubr.bf16.gmra.mrb[100].mxu0 %v3664_v46  ;;  %1884 = vmatmul.mubr.bf16.gmra.mrb[68].mxu1 %v1549_v61  ;;  %v3145_v5 = vpop.f32.mrb[42].mxu1 }
 0x21a   : > { %v1509_v6 = vmax.f32 %v1381_v3, 0.0  ;;  %v1384_v7 = vadd.f32 %v3145_v5, %v3636_v38  ;;  %v1375_v8 = vpop.f32.mrb[43].mxu1  ;;  %1803 = vmatprep.mubr.bf16.mxu0 %v3295_v56  ;;  %1893 = vmatprep.mubr.bf16.mxu1 %v3295_v56 }
 0x21b   : > { %v1507_v9 = vmax.f32 %v1373_v48, 0.0  ;;  %v1376_v10 = vadd.f32 %v3636_v38, %v1375_v8 }
 0x21c   : > { %v1510_v11 = vmax.f32 %v1384_v7, 0.0 }
 0x21d   : > { %v1508_v12 = vmax.f32 %v1376_v10, 0.0 }
 0x21e   : > { %v1552_v13 = vpack.c.bf16 %v1510_v11, %v1509_v6 }
 0x21f   : > { %v1551_v16 = vpack.c.bf16 %v1508_v12, %v1507_v9  ;;  %v3148_v17 = vpop.f32.mrb[44].mxu1 }
 0x220   : > { %v1397_v46 = vadd.f32 %v3148_v17, %v3636_v38  ;;  %v1388_v19 = vpop.f32.mrb[45].mxu1 }
 0x221   : > { %1804 = vmatmul.mubr.bf16.gmra.mrb[104].mxu0 %v3675_v63  ;;  %1894 = vmatmul.mubr.bf16.gmra.mrb[72].mxu1 %v1550_v60  ;;  %v1389_v18 = vadd.f32 %v3636_v38, %v1388_v19  ;;  %v3149_v20 = vpop.f32.mrb[46].mxu1 }
 0x222   : > { %v1513_v21 = vmax.f32 %v1397_v46, 0.0  ;;  %1813 = vmatprep.mubr.bf16.mxu0 %v3295_v56  ;;  %1903 = vmatprep.mubr.bf16.mxu1 %v3295_v56  ;;  %v1400_v22 = vadd.f32 %v3149_v20, %v3636_v38  ;;  %v1391_v23 = vpop.f32.mrb[47].mxu1 }
 0x223   : > { %v1511_v24 = vmax.f32 %v1389_v18, 0.0  ;;  %v1392_v25 = vadd.f32 %v3636_v38, %v1391_v23 }
 0x224   : > { %v1514_v26 = vmax.f32 %v1400_v22, 0.0 }
 0x225   : > { %v1512_v27 = vmax.f32 %v1392_v25, 0.0 }
 0x226   : > { %v1554_v30 = vpack.c.bf16 %v1514_v26, %v1513_v21 }
 0x227   : > { %v1553_v31 = vpack.c.bf16 %v1512_v27, %v1511_v24  ;;  %v3152_v63 = vpop.f32.mrb[48].mxu1 }
 0x228   : > { %v1413_v34 = vadd.f32 %v3152_v63, %v3636_v38  ;;  %v1404_v33 = vpop.f32.mrb[49].mxu1 }
 0x229   : > { %1814 = vmatmul.mubr.bf16.gmra.mrb[108].mxu0 %v3673_v62  ;;  %1904 = vmatmul.mubr.bf16.gmra.mrb[76].mxu1 %v1551_v16  ;;  %v1405_v35 = vadd.f32 %v3636_v38, %v1404_v33  ;;  %v3153_v36 = vpop.f32.mrb[50].mxu1 }
 0x22a   : > { %1823 = vmatprep.mubr.bf16.mxu0 %v3295_v56  ;;  %1913 = vmatprep.mubr.bf16.mxu1 %v3295_v56  ;;  %v1517_v37 = vmax.f32 %v1413_v34, 0.0  ;;  %v1416_v39 = vadd.f32 %v3153_v36, %v3636_v38  ;;  %v1407_v40 = vpop.f32.mrb[51].mxu1 }
 0x22b   : > { %v1515_v41 = vmax.f32 %v1405_v35, 0.0  ;;  %v1408_v47 = vadd.f32 %v3636_v38, %v1407_v40 }
 0x22c   : > { %v1518_v42 = vmax.f32 %v1416_v39, 0.0 }
 0x22d   : > { %v1516_v43 = vmax.f32 %v1408_v47, 0.0 }
 0x22e   : > { %v1556_v45 = vpack.c.bf16 %v1518_v42, %v1517_v37 }
 0x22f   : > { %v1555_v49 = vpack.c.bf16 %v1516_v43, %v1515_v41  ;;  %v3156_v62 = vpop.f32.mrb[52].mxu1 }
 0x230   : > { %v1429_v50 = vadd.f32 %v3156_v62, %v3636_v38  ;;  %v1420_v32 = vpop.f32.mrb[53].mxu1 }
 0x231   : > { %1824 = vmatmul.mubr.bf16.gmra.mrb[112].mxu0 %v3684_v15  ;;  %1914 = vmatmul.mubr.bf16.gmra.mrb[80].mxu1 %v1552_v13  ;;  %v1421_v51 = vadd.f32 %v3636_v38, %v1420_v32  ;;  %v3157_v52 = vpop.f32.mrb[54].mxu1 }
 0x232   : > { %1833 = vmatprep.mubr.bf16.mxu0 %v3295_v56  ;;  %1923 = vmatprep.mubr.bf16.mxu1 %v3295_v56  ;;  %v1521_v53 = vmax.f32 %v1429_v50, 0.0  ;;  %v1432_v54 = vadd.f32 %v3157_v52, %v3636_v38  ;;  %v1423_v55 = vpop.f32.mrb[55].mxu1 }
 0x233   : > { %v1519_v57 = vmax.f32 %v1421_v51, 0.0  ;;  %v1424_v58 = vadd.f32 %v3636_v38, %v1423_v55 }
 0x234   : > { %v1522_v59 = vmax.f32 %v1432_v54, 0.0 }
 0x235   : > { %v1520_v60 = vmax.f32 %v1424_v58, 0.0 }
 0x236   : > { %v1558_v61 = vpack.c.bf16 %v1522_v59, %v1521_v53 }
 0x237   : > { %v1557_v2 = vpack.c.bf16 %v1520_v60, %v1519_v57  ;;  %v3160_v15 = vpop.f32.mrb[56].mxu1 }
 0x238   : > { %v1445_v3 = vadd.f32 %v3160_v15, %v3636_v38  ;;  %v1436_v4 = vpop.f32.mrb[57].mxu1 }
 0x239   : > { %1834 = vmatmul.mubr.bf16.gmra.mrb[116].mxu0 %v3682_v14  ;;  %1924 = vmatmul.mubr.bf16.gmra.mrb[84].mxu1 %v1553_v31  ;;  %v1437_v48 = vadd.f32 %v3636_v38, %v1436_v4  ;;  %v3161_v5 = vpop.f32.mrb[58].mxu1 }
 0x23a   : > { %1843 = vmatprep.mubr.bf16.mxu0 %v3295_v56  ;;  %1933 = vmatprep.mubr.bf16.mxu1 %v3295_v56  ;;  %v1525_v6 = vmax.f32 %v1445_v3, 0.0  ;;  %v1448_v7 = vadd.f32 %v3161_v5, %v3636_v38  ;;  %v1439_v8 = vpop.f32.mrb[59].mxu1 }
 0x23b   : > { %v1523_v9 = vmax.f32 %v1437_v48, 0.0  ;;  %v1440_v10 = vadd.f32 %v3636_v38, %v1439_v8 }
 0x23c   : > { %v1526_v11 = vmax.f32 %v1448_v7, 0.0 }
 0x23d   : > { %v1524_v12 = vmax.f32 %v1440_v10, 0.0 }
 0x23e   : > { %v1560_v13 = vpack.c.bf16 %v1526_v11, %v1525_v6 }
 0x23f   : > { %v1559_v16 = vpack.c.bf16 %v1524_v12, %v1523_v9  ;;  %v3164_v14 = vpop.f32.mrb[60].mxu1 }
 0x240   : > { %v1461_v17 = vadd.f32 %v3164_v14, %v3636_v38  ;;  %v1452_v46 = vpop.f32.mrb[61].mxu1 }
 0x241   : > { %1844 = vmatmul.mubr.bf16.gmra.mrb[120].mxu0 %v3693_v29  ;;  %1934 = vmatmul.mubr.bf16.gmra.mrb[88].mxu1 %v1554_v30  ;;  %v1453_v19 = vadd.f32 %v3636_v38, %v1452_v46  ;;  %v3165_v18 = vpop.f32.mrb[62].mxu1  ;;  %v1579_v30 = vld [vmem:[%s3921_s6] sm:$0x3] }
 0x242   : > { %1853 = vmatprep.mubr.bf16.mxu0 %v3295_v56  ;;  %1943 = vmatprep.mubr.bf16.mxu1 %v3295_v56  ;;  %v1529_v20 = vmax.f32 %v1461_v17, 0.0  ;;  %v1464_v21 = vadd.f32 %v3165_v18, %v3636_v38  ;;  %v1455_v22 = vpop.f32.mrb[63].mxu1 }
 0x243   : > { %v1527_v23 = vmax.f32 %v1453_v19, 0.0  ;;  %v1456_v24 = vadd.f32 %v3636_v38, %v1455_v22  ;;  %v3763_v38 = vshrl.u32 %v1581_v0, 7 }
 0x244   : > { %v1530_v25 = vmax.f32 %v1464_v21, 0.0 }
 0x245   : > { %v1528_v26 = vmax.f32 %v1456_v24, 0.0  ;;  %v1583_v29 = vsub.s32 0, %v3763_v38  ;;  %v1587_v63 = vsub.s32 1, %v3763_v38 }
 0x246   : > { %v1562_v27 = vpack.c.bf16 %v1530_v25, %v1529_v20 }
 0x247   : > { %v1561_v31 = vpack.c.bf16 %v1528_v26, %v1527_v23  ;;  %v3770_v35 = vrot.slane %v1579_v30, %v1583_v29  ;;  %v3772_v36 = vrot.slane %v1579_v30, %v1587_v63 }
 0x249   : > { %1854 = vmatmul.mubr.bf16.gmra.mrb[124].mxu0 %v3691_v28  ;;  %1944 = vmatmul.mubr.bf16.gmra.mrb[92].mxu1 %v1555_v49 }
 0x24a   : > { %1863 = vmatprep.mubr.bf16.mxu0 %v3295_v56  ;;  %1953 = vmatprep.mubr.bf16.mxu1 %v3295_v56 }
 0x251   : > { %1864 = vmatmul.mubr.bf16.gmra.mrb[128].mxu0 %v3701_v44  ;;  %1954 = vmatmul.mubr.bf16.gmra.mrb[96].mxu1 %v1556_v45 }
 0x252   : > { %1963 = vmatprep.mubr.bf16.mxu1 %v3295_v56 }
 0x259   : > { %1964 = vmatmul.mubr.bf16.gmra.mrb[100].mxu1 %v1557_v2 }
 0x25a   : > { %1973 = vmatprep.mubr.bf16.mxu1 %v3295_v56 }
 0x261   : > { %1974 = vmatmul.mubr.bf16.gmra.mrb[104].mxu1 %v1558_v61 }
 0x262   : > { %1983 = vmatprep.mubr.bf16.mxu1 %v3295_v56 }
 0x269   : > { %1984 = vmatmul.mubr.bf16.gmra.mrb[108].mxu1 %v1559_v16 }
 0x26a   : > { %1993 = vmatprep.mubr.bf16.mxu1 %v3295_v56 }
 0x271   : > { %1994 = vmatmul.mubr.bf16.gmra.mrb[112].mxu1 %v1560_v13 }
 0x272   : > { %2003 = vmatprep.mubr.bf16.mxu1 %v3295_v56 }
 0x279   : > { %2004 = vmatmul.mubr.bf16.gmra.mrb[116].mxu1 %v1561_v31 }
 0x27a   : > { %2013 = vmatprep.mubr.bf16.mxu1 %v3295_v56 }
 0x281   : > { %2014 = vmatmul.mubr.bf16.gmra.mrb[120].mxu1 %v1562_v27 }
 0x2a4   : > { %v1705_v28 = vpop.f32.mrb[64].mxu0 }
 0x2a5   : > { %v1707_v44 = vpop.f32.mrb[65].mxu0  ;;  %v1706_v0 = vadd.f32 %v1705_v28, %v3770_v35 }
 0x2a6   : > { %v1709_v34 = vpop.f32.mrb[66].mxu0  ;;  %v1708_v40 = vadd.f32 %v1707_v44, %v3772_v36 }
 0x2a7   : > { %v1711_v33 = vpop.f32.mrb[67].mxu0  ;;  %v1710_v42 = vadd.f32 %v1709_v34, %v3770_v35 }
 0x2a8   : > { %v1712_v62 = vadd.f32 %v1711_v33, %v3772_v36 }
 0x2ac   : > { %v1715_v56 = vpop.f32.mrb[68].mxu0 }
 0x2ad   : > { %v1716_v37 = vadd.f32 %v1715_v56, %v3770_v35  ;;  %v1717_v39 = vpop.f32.mrb[69].mxu0 }
 0x2ae   : > { %v1718_v41 = vadd.f32 %v1717_v39, %v3772_v36  ;;  %v1719_v47 = vpop.f32.mrb[70].mxu0 }
 0x2af   : > { %v2588_v43 = vmax.f32 %v1706_v0, %v1716_v37  ;;  %v1720_v45 = vadd.f32 %v1719_v47, %v3770_v35  ;;  %v1721_v49 = vpop.f32.mrb[71].mxu0 }
 0x2b0   : > { %v2657_v50 = vmax.f32 %v1708_v40, %v1718_v41  ;;  %v1722_v32 = vadd.f32 %v1721_v49, %v3772_v36 }
 0x2b1   : > { %v2589_v51 = vmax.f32 %v1710_v42, %v1720_v45 }
 0x2b2   : > { %v2658_v52 = vmax.f32 %v1712_v62, %v1722_v32 }
 0x2b4   : > { %v1725_v53 = vpop.f32.mrb[72].mxu0 }
 0x2b5   : > { %v1726_v54 = vadd.f32 %v1725_v53, %v3770_v35  ;;  %v1727_v55 = vpop.f32.mrb[73].mxu0 }
 0x2b6   : > { %v1728_v57 = vadd.f32 %v1727_v55, %v3772_v36  ;;  %v1729_v58 = vpop.f32.mrb[74].mxu0 }
 0x2b7   : > { %v2590_v59 = vmax.f32 %v2588_v43, %v1726_v54  ;;  %v1730_v60 = vadd.f32 %v1729_v58, %v3770_v35  ;;  %v1731_v61 = vpop.f32.mrb[75].mxu0 }
 0x2b8   : > { %v2659_v2 = vmax.f32 %v2657_v50, %v1728_v57  ;;  %v1732_v15 = vadd.f32 %v1731_v61, %v3772_v36 }
 0x2b9   : > { %v2591_v3 = vmax.f32 %v2589_v51, %v1730_v60 }
 0x2ba   : > { %v2660_v4 = vmax.f32 %v2658_v52, %v1732_v15 }
 0x2bc   : > { %v1735_v48 = vpop.f32.mrb[76].mxu0 }
 0x2bd   : > { %v1736_v5 = vadd.f32 %v1735_v48, %v3770_v35  ;;  %v1737_v6 = vpop.f32.mrb[77].mxu0 }
 0x2be   : > { %v1738_v7 = vadd.f32 %v1737_v6, %v3772_v36  ;;  %v1739_v8 = vpop.f32.mrb[78].mxu0 }
 0x2bf   : > { %v2592_v9 = vmax.f32 %v2590_v59, %v1736_v5  ;;  %v1740_v10 = vadd.f32 %v1739_v8, %v3770_v35  ;;  %v1741_v11 = vpop.f32.mrb[79].mxu0 }
 0x2c0   : > { %v2661_v12 = vmax.f32 %v2659_v2, %v1738_v7  ;;  %v1742_v13 = vadd.f32 %v1741_v11, %v3772_v36 }
 0x2c1   : > { %v2593_v16 = vmax.f32 %v2591_v3, %v1740_v10 }
 0x2c2   : > { %v2662_v14 = vmax.f32 %v2660_v4, %v1742_v13 }
 0x2c4   : > { %v1745_v17 = vpop.f32.mrb[80].mxu0 }
 0x2c5   : > { %v1746_v46 = vadd.f32 %v1745_v17, %v3770_v35  ;;  %v1747_v19 = vpop.f32.mrb[81].mxu0 }
 0x2c6   : > { %v1748_v18 = vadd.f32 %v1747_v19, %v3772_v36  ;;  %v1749_v20 = vpop.f32.mrb[82].mxu0 }
 0x2c7   : > { %v2594_v21 = vmax.f32 %v2592_v9, %v1746_v46  ;;  %v1750_v22 = vadd.f32 %v1749_v20, %v3770_v35  ;;  %v1751_v23 = vpop.f32.mrb[83].mxu0 }
 0x2c8   : > { %v2663_v24 = vmax.f32 %v2661_v12, %v1748_v18  ;;  %v1752_v25 = vadd.f32 %v1751_v23, %v3772_v36 }
 0x2c9   : > { %v2595_v26 = vmax.f32 %v2593_v16, %v1750_v22 }
 0x2ca   : > { %v2664_v27 = vmax.f32 %v2662_v14, %v1752_v25 }
 0x2cc   : > { %v1755_v31 = vpop.f32.mrb[84].mxu0 }
 0x2cd   : > { %v1756_v28 = vadd.f32 %v1755_v31, %v3770_v35  ;;  %v1757_v29 = vpop.f32.mrb[85].mxu0 }
 0x2ce   : > { %v1758_v44 = vadd.f32 %v1757_v29, %v3772_v36  ;;  %v1759_v30 = vpop.f32.mrb[86].mxu0 }
 0x2cf   : > { %v2596_v63 = vmax.f32 %v2594_v21, %v1756_v28  ;;  %v1760_v34 = vadd.f32 %v1759_v30, %v3770_v35  ;;  %v1761_v33 = vpop.f32.mrb[87].mxu0 }
 0x2d0   : > { %v2665_v56 = vmax.f32 %v2663_v24, %v1758_v44  ;;  %v1762_v0 = vadd.f32 %v1761_v33, %v3772_v36 }
 0x2d1   : > { %v2597_v37 = vmax.f32 %v2595_v26, %v1760_v34 }
 0x2d2   : > { %v2666_v39 = vmax.f32 %v2664_v27, %v1762_v0 }
 0x2d4   : > { %v1765_v40 = vpop.f32.mrb[88].mxu0 }
 0x2d5   : > { %v1766_v41 = vadd.f32 %v1765_v40, %v3770_v35  ;;  %v1767_v47 = vpop.f32.mrb[89].mxu0 }
 0x2d6   : > { %v1768_v42 = vadd.f32 %v1767_v47, %v3772_v36  ;;  %v1769_v43 = vpop.f32.mrb[90].mxu0 }
 0x2d7   : > { %v2598_v45 = vmax.f32 %v2596_v63, %v1766_v41  ;;  %v1770_v49 = vadd.f32 %v1769_v43, %v3770_v35  ;;  %v1771_v62 = vpop.f32.mrb[91].mxu0 }
 0x2d8   : > { %v2667_v50 = vmax.f32 %v2665_v56, %v1768_v42  ;;  %v1772_v32 = vadd.f32 %v1771_v62, %v3772_v36 }
 0x2d9   : > { %v2599_v51 = vmax.f32 %v2597_v37, %v1770_v49 }
 0x2da   : > { %v2668_v52 = vmax.f32 %v2666_v39, %v1772_v32 }
 0x2dc   : > { %v1775_v53 = vpop.f32.mrb[92].mxu0 }
 0x2dd   : > { %v1776_v54 = vadd.f32 %v1775_v53, %v3770_v35  ;;  %v1777_v55 = vpop.f32.mrb[93].mxu0 }
 0x2de   : > { %v1778_v57 = vadd.f32 %v1777_v55, %v3772_v36  ;;  %v1779_v58 = vpop.f32.mrb[94].mxu0 }
 0x2df   : > { %v2600_v59 = vmax.f32 %v2598_v45, %v1776_v54  ;;  %v1780_v60 = vadd.f32 %v1779_v58, %v3770_v35  ;;  %v1781_v61 = vpop.f32.mrb[95].mxu0 }
 0x2e0   : > { %v2669_v2 = vmax.f32 %v2667_v50, %v1778_v57  ;;  %v1782_v15 = vadd.f32 %v1781_v61, %v3772_v36 }
 0x2e1   : > { %v2601_v3 = vmax.f32 %v2599_v51, %v1780_v60 }
 0x2e2   : > { %v2670_v4 = vmax.f32 %v2668_v52, %v1782_v15 }
 0x2e3   : > { %v1875_v48 = vpop.f32.mrb[64].mxu1 }
 0x2e4   : > { %v1785_v5 = vpop.f32.mrb[96].mxu0  ;;  %v1877_v6 = vpop.f32.mrb[65].mxu1  ;;  %v1876_v10 = vadd.f32 %v1875_v48, %v3770_v35 }
 0x2e5   : > { %v1786_v7 = vadd.f32 %v1785_v5, %v3770_v35  ;;  %v1787_v8 = vpop.f32.mrb[97].mxu0  ;;  %v1879_v9 = vpop.f32.mrb[66].mxu1  ;;  %v1878_v17 = vadd.f32 %v1877_v6, %v3772_v36 }
 0x2e6   : > { %v1788_v11 = vadd.f32 %v1787_v8, %v3772_v36  ;;  %v1880_v12 = vadd.f32 %v1879_v9, %v3770_v35  ;;  %v1789_v13 = vpop.f32.mrb[98].mxu0  ;;  %v1881_v16 = vpop.f32.mrb[67].mxu1 }
 0x2e7   : > { %v2602_v14 = vmax.f32 %v2600_v59, %v1786_v7  ;;  %v1790_v46 = vadd.f32 %v1789_v13, %v3770_v35  ;;  %v1882_v19 = vadd.f32 %v1881_v16, %v3772_v36  ;;  %v1791_v18 = vpop.f32.mrb[99].mxu0 }
 0x2e8   : > { %v2671_v20 = vmax.f32 %v2669_v2, %v1788_v11  ;;  %v2620_v21 = vmax.f32 %v1880_v12, %v1876_v10  ;;  %v1792_v22 = vadd.f32 %v1791_v18, %v3772_v36 }
 0x2e9   : > { %v2603_v23 = vmax.f32 %v2601_v3, %v1790_v46  ;;  %v2689_v24 = vmax.f32 %v1882_v19, %v1878_v17 }
 0x2ea   : > { %v2672_v25 = vmax.f32 %v2670_v4, %v1792_v22 }
 0x2ec   : > { %v1795_v26 = vpop.f32.mrb[100].mxu0  ;;  %v1885_v27 = vpop.f32.mrb[68].mxu1 }
 0x2ed   : > { %v1796_v31 = vadd.f32 %v1795_v26, %v3770_v35  ;;  %v1886_v28 = vadd.f32 %v1885_v27, %v3770_v35  ;;  %v1797_v29 = vpop.f32.mrb[101].mxu0  ;;  %v1887_v44 = vpop.f32.mrb[69].mxu1 }
 0x2ee   : > { %v1798_v30 = vadd.f32 %v1797_v29, %v3772_v36  ;;  %v1888_v63 = vadd.f32 %v1887_v44, %v3772_v36  ;;  %v1799_v34 = vpop.f32.mrb[102].mxu0  ;;  %v1889_v33 = vpop.f32.mrb[70].mxu1 }
 0x2ef   : > { %v2604_v56 = vmax.f32 %v2602_v14, %v1796_v31  ;;  %v2622_v0 = vmax.f32 %v2620_v21, %v1886_v28  ;;  %v1800_v37 = vadd.f32 %v1799_v34, %v3770_v35  ;;  %v1890_v39 = vadd.f32 %v1889_v33, %v3770_v35  ;;  %v1801_v40 = vpop.f32.mrb[103].mxu0  ;;  %v1891_v41 = vpop.f32.mrb[71].mxu1 }
 0x2f0   : > { %v2673_v47 = vmax.f32 %v2671_v20, %v1798_v30  ;;  %v2691_v42 = vmax.f32 %v2689_v24, %v1888_v63  ;;  %v1802_v43 = vadd.f32 %v1801_v40, %v3772_v36  ;;  %v1892_v45 = vadd.f32 %v1891_v41, %v3772_v36 }
 0x2f1   : > { %v2605_v49 = vmax.f32 %v2603_v23, %v1800_v37  ;;  %v2624_v62 = vmax.f32 %v2622_v0, %v1890_v39 }
 0x2f2   : > { %v2674_v50 = vmax.f32 %v2672_v25, %v1802_v43  ;;  %v2693_v32 = vmax.f32 %v2691_v42, %v1892_v45 }
 0x2f4   : > { %v1805_v51 = vpop.f32.mrb[104].mxu0  ;;  %v1895_v52 = vpop.f32.mrb[72].mxu1 }
 0x2f5   : > { %v1806_v53 = vadd.f32 %v1805_v51, %v3770_v35  ;;  %v1896_v54 = vadd.f32 %v1895_v52, %v3770_v35  ;;  %v1807_v55 = vpop.f32.mrb[105].mxu0  ;;  %v1897_v57 = vpop.f32.mrb[73].mxu1 }
 0x2f6   : > { %v1808_v58 = vadd.f32 %v1807_v55, %v3772_v36  ;;  %v1898_v59 = vadd.f32 %v1897_v57, %v3772_v36  ;;  %v1809_v60 = vpop.f32.mrb[106].mxu0  ;;  %v1899_v61 = vpop.f32.mrb[74].mxu1 }
 0x2f7   : > { %v2606_v2 = vmax.f32 %v2604_v56, %v1806_v53  ;;  %v2626_v15 = vmax.f32 %v2624_v62, %v1896_v54  ;;  %v1810_v3 = vadd.f32 %v1809_v60, %v3770_v35  ;;  %v1900_v4 = vadd.f32 %v1899_v61, %v3770_v35  ;;  %v1811_v48 = vpop.f32.mrb[107].mxu0  ;;  %v1901_v5 = vpop.f32.mrb[75].mxu1 }
 0x2f8   : > { %v2675_v6 = vmax.f32 %v2673_v47, %v1808_v58  ;;  %v2695_v7 = vmax.f32 %v2693_v32, %v1898_v59  ;;  %v1812_v8 = vadd.f32 %v1811_v48, %v3772_v36  ;;  %v1902_v9 = vadd.f32 %v1901_v5, %v3772_v36 }
 0x2f9   : > { %v2607_v10 = vmax.f32 %v2605_v49, %v1810_v3  ;;  %v2628_v11 = vmax.f32 %v2626_v15, %v1900_v4 }
 0x2fa   : > { %v2676_v12 = vmax.f32 %v2674_v50, %v1812_v8  ;;  %v2697_v13 = vmax.f32 %v2695_v7, %v1902_v9 }
 0x2fc   : > { %v1815_v16 = vpop.f32.mrb[108].mxu0  ;;  %v1905_v14 = vpop.f32.mrb[76].mxu1 }
 0x2fd   : > { %v1816_v17 = vadd.f32 %v1815_v16, %v3770_v35  ;;  %v1906_v46 = vadd.f32 %v1905_v14, %v3770_v35  ;;  %v1817_v19 = vpop.f32.mrb[109].mxu0  ;;  %v1907_v18 = vpop.f32.mrb[77].mxu1 }
 0x2fe   : > { %v1818_v20 = vadd.f32 %v1817_v19, %v3772_v36  ;;  %v1908_v21 = vadd.f32 %v1907_v18, %v3772_v36  ;;  %v1819_v22 = vpop.f32.mrb[110].mxu0  ;;  %v1909_v23 = vpop.f32.mrb[78].mxu1 }
 0x2ff   : > { %v2608_v24 = vmax.f32 %v2606_v2, %v1816_v17  ;;  %v2630_v25 = vmax.f32 %v2628_v11, %v1906_v46  ;;  %v1820_v26 = vadd.f32 %v1819_v22, %v3770_v35  ;;  %v1910_v27 = vadd.f32 %v1909_v23, %v3770_v35  ;;  %v1821_v31 = vpop.f32.mrb[111].mxu0  ;;  %v1911_v28 = vpop.f32.mrb[79].mxu1 }
 0x300   : > { %v2677_v29 = vmax.f32 %v2675_v6, %v1818_v20  ;;  %v2699_v44 = vmax.f32 %v2697_v13, %v1908_v21  ;;  %v1822_v30 = vadd.f32 %v1821_v31, %v3772_v36  ;;  %v1912_v63 = vadd.f32 %v1911_v28, %v3772_v36 }
 0x301   : > { %v2609_v34 = vmax.f32 %v2607_v10, %v1820_v26  ;;  %v2632_v33 = vmax.f32 %v2630_v25, %v1910_v27 }
 0x302   : > { %v2678_v56 = vmax.f32 %v2676_v12, %v1822_v30  ;;  %v2701_v0 = vmax.f32 %v2699_v44, %v1912_v63 }
 0x304   : > { %v1825_v37 = vpop.f32.mrb[112].mxu0  ;;  %v1915_v39 = vpop.f32.mrb[80].mxu1 }
 0x305   : > { %v1826_v40 = vadd.f32 %v1825_v37, %v3770_v35  ;;  %v1916_v41 = vadd.f32 %v1915_v39, %v3770_v35  ;;  %v1827_v47 = vpop.f32.mrb[113].mxu0  ;;  %v1917_v42 = vpop.f32.mrb[81].mxu1 }
 0x306   : > { %v1828_v43 = vadd.f32 %v1827_v47, %v3772_v36  ;;  %v1918_v45 = vadd.f32 %v1917_v42, %v3772_v36  ;;  %v1829_v49 = vpop.f32.mrb[114].mxu0  ;;  %v1919_v62 = vpop.f32.mrb[82].mxu1 }
 0x307   : > { %v2610_v50 = vmax.f32 %v2608_v24, %v1826_v40  ;;  %v2634_v32 = vmax.f32 %v2632_v33, %v1916_v41  ;;  %v1830_v51 = vadd.f32 %v1829_v49, %v3770_v35  ;;  %v1920_v52 = vadd.f32 %v1919_v62, %v3770_v35  ;;  %v1831_v53 = vpop.f32.mrb[115].mxu0  ;;  %v1921_v54 = vpop.f32.mrb[83].mxu1 }
 0x308   : > { %v2679_v55 = vmax.f32 %v2677_v29, %v1828_v43  ;;  %v2703_v57 = vmax.f32 %v2701_v0, %v1918_v45  ;;  %v1832_v58 = vadd.f32 %v1831_v53, %v3772_v36  ;;  %v1922_v59 = vadd.f32 %v1921_v54, %v3772_v36 }
 0x309   : > { %v2611_v60 = vmax.f32 %v2609_v34, %v1830_v51  ;;  %v2636_v61 = vmax.f32 %v2634_v32, %v1920_v52 }
 0x30a   : > { %v2680_v2 = vmax.f32 %v2678_v56, %v1832_v58  ;;  %v2705_v15 = vmax.f32 %v2703_v57, %v1922_v59 }
 0x30c   : > { %v1835_v3 = vpop.f32.mrb[116].mxu0  ;;  %v1925_v4 = vpop.f32.mrb[84].mxu1 }
 0x30d   : > { %v1836_v48 = vadd.f32 %v1835_v3, %v3770_v35  ;;  %v1926_v5 = vadd.f32 %v1925_v4, %v3770_v35  ;;  %v1837_v6 = vpop.f32.mrb[117].mxu0  ;;  %v1927_v7 = vpop.f32.mrb[85].mxu1 }
 0x30e   : > { %v1838_v8 = vadd.f32 %v1837_v6, %v3772_v36  ;;  %v1928_v9 = vadd.f32 %v1927_v7, %v3772_v36  ;;  %v1839_v10 = vpop.f32.mrb[118].mxu0  ;;  %v1929_v11 = vpop.f32.mrb[86].mxu1 }
 0x30f   : > { %v2612_v12 = vmax.f32 %v2610_v50, %v1836_v48  ;;  %v2621_v13 = vmax.f32 %v1926_v5, %v2636_v61  ;;  %v1840_v16 = vadd.f32 %v1839_v10, %v3770_v35  ;;  %v1930_v14 = vadd.f32 %v1929_v11, %v3770_v35  ;;  %v1841_v17 = vpop.f32.mrb[119].mxu0  ;;  %v1931_v46 = vpop.f32.mrb[87].mxu1 }
 0x310   : > { %v2681_v19 = vmax.f32 %v2679_v55, %v1838_v8  ;;  %v2690_v18 = vmax.f32 %v1928_v9, %v2705_v15  ;;  %v1842_v20 = vadd.f32 %v1841_v17, %v3772_v36  ;;  %v1932_v21 = vadd.f32 %v1931_v46, %v3772_v36 }
 0x311   : > { %v2613_v22 = vmax.f32 %v2611_v60, %v1840_v16  ;;  %v2623_v23 = vmax.f32 %v2621_v13, %v1930_v14 }
 0x312   : > { %v2682_v24 = vmax.f32 %v2680_v2, %v1842_v20  ;;  %v2692_v25 = vmax.f32 %v2690_v18, %v1932_v21 }
 0x314   : > { %v1845_v26 = vpop.f32.mrb[120].mxu0  ;;  %v1935_v27 = vpop.f32.mrb[88].mxu1 }
 0x315   : > { %v1846_v31 = vadd.f32 %v1845_v26, %v3770_v35  ;;  %v1936_v28 = vadd.f32 %v1935_v27, %v3770_v35  ;;  %v1847_v29 = vpop.f32.mrb[121].mxu0  ;;  %v1937_v44 = vpop.f32.mrb[89].mxu1 }
 0x316   : > { %v1848_v30 = vadd.f32 %v1847_v29, %v3772_v36  ;;  %v1938_v63 = vadd.f32 %v1937_v44, %v3772_v36  ;;  %v1849_v34 = vpop.f32.mrb[122].mxu0  ;;  %v1939_v33 = vpop.f32.mrb[90].mxu1 }
 0x317   : > { %v2614_v56 = vmax.f32 %v2612_v12, %v1846_v31  ;;  %v2625_v0 = vmax.f32 %v2623_v23, %v1936_v28  ;;  %v1850_v37 = vadd.f32 %v1849_v34, %v3770_v35  ;;  %v1940_v39 = vadd.f32 %v1939_v33, %v3770_v35  ;;  %v1851_v40 = vpop.f32.mrb[123].mxu0  ;;  %v1941_v41 = vpop.f32.mrb[91].mxu1 }
 0x318   : > { %v2683_v47 = vmax.f32 %v2681_v19, %v1848_v30  ;;  %v2694_v42 = vmax.f32 %v2692_v25, %v1938_v63  ;;  %v1852_v43 = vadd.f32 %v1851_v40, %v3772_v36  ;;  %v1942_v45 = vadd.f32 %v1941_v41, %v3772_v36 }
 0x319   : > { %v2615_v49 = vmax.f32 %v2613_v22, %v1850_v37  ;;  %v2627_v62 = vmax.f32 %v2625_v0, %v1940_v39 }
 0x31a   : > { %v2684_v50 = vmax.f32 %v2682_v24, %v1852_v43  ;;  %v2696_v32 = vmax.f32 %v2694_v42, %v1942_v45 }
 0x31c   : > { %v1855_v51 = vpop.f32.mrb[124].mxu0  ;;  %v1945_v52 = vpop.f32.mrb[92].mxu1 }
 0x31d   : > { %v1856_v53 = vadd.f32 %v1855_v51, %v3770_v35  ;;  %v1946_v54 = vadd.f32 %v1945_v52, %v3770_v35  ;;  %v1857_v55 = vpop.f32.mrb[125].mxu0  ;;  %v1947_v57 = vpop.f32.mrb[93].mxu1 }
 0x31e   : > { %v1858_v58 = vadd.f32 %v1857_v55, %v3772_v36  ;;  %v1948_v59 = vadd.f32 %v1947_v57, %v3772_v36  ;;  %v1859_v60 = vpop.f32.mrb[126].mxu0  ;;  %v1949_v61 = vpop.f32.mrb[94].mxu1 }
 0x31f   : > { %v2616_v2 = vmax.f32 %v2614_v56, %v1856_v53  ;;  %v2629_v15 = vmax.f32 %v2627_v62, %v1946_v54  ;;  %v1860_v3 = vadd.f32 %v1859_v60, %v3770_v35  ;;  %v1950_v4 = vadd.f32 %v1949_v61, %v3770_v35  ;;  %v1861_v48 = vpop.f32.mrb[127].mxu0  ;;  %v1951_v5 = vpop.f32.mrb[95].mxu1 }
 0x320   : > { %v2685_v6 = vmax.f32 %v2683_v47, %v1858_v58  ;;  %v2698_v7 = vmax.f32 %v2696_v32, %v1948_v59  ;;  %v1862_v8 = vadd.f32 %v1861_v48, %v3772_v36  ;;  %v1952_v9 = vadd.f32 %v1951_v5, %v3772_v36 }
 0x321   : > { %v2617_v10 = vmax.f32 %v2615_v49, %v1860_v3  ;;  %v2631_v11 = vmax.f32 %v2629_v15, %v1950_v4 }
 0x322   : > { %v2686_v12 = vmax.f32 %v2684_v50, %v1862_v8  ;;  %v2700_v13 = vmax.f32 %v2698_v7, %v1952_v9 }
 0x324   : > { %v1865_v16 = vpop.f32.mrb[128].mxu0  ;;  %v1955_v14 = vpop.f32.mrb[96].mxu1 }
 0x325   : > { %v1866_v17 = vadd.f32 %v1865_v16, %v3770_v35  ;;  %v1867_v46 = vpop.f32.mrb[129].mxu0  ;;  %v1957_v19 = vpop.f32.mrb[97].mxu1  ;;  %v1956_v28 = vadd.f32 %v1955_v14, %v3770_v35 }
 0x326   : > { %v1868_v18 = vadd.f32 %v1867_v46, %v3772_v36  ;;  %v1869_v20 = vpop.f32.mrb[130].mxu0  ;;  %v1959_v21 = vpop.f32.mrb[98].mxu1  ;;  %v1958_v30 = vadd.f32 %v1957_v19, %v3772_v36 }
 0x327   : > { %v2618_v22 = vmax.f32 %v2616_v2, %v1866_v17  ;;  %v1870_v23 = vadd.f32 %v1869_v20, %v3770_v35  ;;  %v1871_v24 = vpop.f32.mrb[131].mxu0  ;;  %v1961_v25 = vpop.f32.mrb[99].mxu1  ;;  %v1960_v37 = vadd.f32 %v1959_v21, %v3770_v35 }
 0x328   : > { %v2687_v26 = vmax.f32 %v2685_v6, %v1868_v18  ;;  %v1872_v27 = vadd.f32 %v1871_v24, %v3772_v36  ;;  %v1962_v41 = vadd.f32 %v1961_v25, %v3772_v36 }
 0x329   : > { %v2633_v31 = vmax.f32 %v2631_v11, %v2618_v22  ;;  %v2619_v29 = vmax.f32 %v2617_v10, %v1870_v23 }
 0x32a   : > { %v2702_v44 = vmax.f32 %v2700_v13, %v2687_v26  ;;  %v2688_v63 = vmax.f32 %v2686_v12, %v1872_v27 }
 0x32b   : > { %v2635_v34 = vmax.f32 %v2633_v31, %v1956_v28 }
 0x32c   : > { %v2704_v33 = vmax.f32 %v2702_v44, %v1958_v30  ;;  %v1965_v56 = vpop.f32.mrb[100].mxu1 }
 0x32d   : > { %v2637_v0 = vmax.f32 %v2635_v34, %v2619_v29  ;;  %v1967_v39 = vpop.f32.mrb[101].mxu1  ;;  %v1966_v43 = vadd.f32 %v1965_v56, %v3770_v35 }
 0x32e   : > { %v2706_v40 = vmax.f32 %v2704_v33, %v2688_v63  ;;  %v1969_v47 = vpop.f32.mrb[102].mxu1  ;;  %v1968_v62 = vadd.f32 %v1967_v39, %v3772_v36 }
 0x32f   : > { %v2638_v42 = vmax.f32 %v1960_v37, %v2637_v0  ;;  %v1971_v45 = vpop.f32.mrb[103].mxu1  ;;  %v1970_v32 = vadd.f32 %v1969_v47, %v3770_v35 }
 0x330   : > { %v2707_v49 = vmax.f32 %v1962_v41, %v2706_v40  ;;  %v1972_v52 = vadd.f32 %v1971_v45, %v3772_v36  ;;  %v2265_v40 = vadd.s32 496, %v3763_v38 }
 0x331   : > { %v2639_v50 = vmax.f32 %v1966_v43, %v2638_v42 }
 0x332   : > { %v2708_v51 = vmax.f32 %v1968_v62, %v2707_v49  ;;  %vm2329_vm4 = vcmp.lt.s32.totalorder %v2265_v40, 500 }
 0x333   : > { %v2640_v53 = vmax.f32 %v1970_v32, %v2639_v50 }
 0x334   : > { %v2709_v54 = vmax.f32 %v1972_v52, %v2708_v51  ;;  %v1975_v55 = vpop.f32.mrb[104].mxu1 }
 0x335   : > { %v1976_v57 = vadd.f32 %v1975_v55, %v3770_v35  ;;  %v1977_v58 = vpop.f32.mrb[105].mxu1 }
 0x336   : > { %v1978_v59 = vadd.f32 %v1977_v58, %v3772_v36  ;;  %v1979_v60 = vpop.f32.mrb[106].mxu1 }
 0x337   : > { %v2641_v61 = vmax.f32 %v1976_v57, %v2640_v53  ;;  %v1980_v2 = vadd.f32 %v1979_v60, %v3770_v35  ;;  %v1981_v15 = vpop.f32.mrb[107].mxu1 }
 0x338   : > { %v2710_v3 = vmax.f32 %v1978_v59, %v2709_v54  ;;  %v1982_v4 = vadd.f32 %v1981_v15, %v3772_v36  ;;  %v3296_v59 = vmov 1966171168  }
 0x339   : > { %v2642_v48 = vmax.f32 %v1980_v2, %v2641_v61  ;;  %v2730_v60 = vunpack.c.l.s4 %v3296_v59 }
 0x33a   : > { %v2711_v5 = vmax.f32 %v1982_v4, %v2710_v3 }
 0x33b   : > { %v2731_v3 = vunpack.c.0.s8 %v2730_v60 }
 0x33c   : > { %v1985_v6 = vpop.f32.mrb[108].mxu1 }
 0x33d   : > { %v1986_v7 = vadd.f32 %v1985_v6, %v3770_v35  ;;  %v1987_v8 = vpop.f32.mrb[109].mxu1  ;;  %v2734_v6 = vsub.s32 %v2731_v3, %v3763_v38 }
 0x33e   : > { %v1988_v9 = vadd.f32 %v1987_v8, %v3772_v36  ;;  %v1989_v10 = vpop.f32.mrb[110].mxu1 }
 0x33f   : > { %v2643_v11 = vmax.f32 %v1986_v7, %v2642_v48  ;;  %v1990_v12 = vadd.f32 %v1989_v10, %v3770_v35  ;;  %v1991_v13 = vpop.f32.mrb[111].mxu1 }
 0x340   : > { %v2712_v16 = vmax.f32 %v1988_v9, %v2711_v5  ;;  %v1992_v14 = vadd.f32 %v1991_v13, %v3772_v36  ;;  %v2587_v9 = vld [vmem:[%s3377_s19] sm:$0x3] }
 0x341   : > { %v2644_v17 = vmax.f32 %v1990_v12, %v2643_v11 }
 0x342   : > { %v2713_v46 = vmax.f32 %v1992_v14, %v2712_v16 }
 0x344   : > { %v1995_v19 = vpop.f32.mrb[112].mxu1 }
 0x345   : > { %v1996_v18 = vadd.f32 %v1995_v19, %v3770_v35  ;;  %v1997_v20 = vpop.f32.mrb[113].mxu1 }
 0x346   : > { %v1998_v21 = vadd.f32 %v1997_v20, %v3772_v36  ;;  %v1999_v22 = vpop.f32.mrb[114].mxu1 }
 0x347   : > { %v2645_v23 = vmax.f32 %v1996_v18, %v2644_v17  ;;  %v2000_v24 = vadd.f32 %v1999_v22, %v3770_v35  ;;  %v2001_v25 = vpop.f32.mrb[115].mxu1 }
 0x348   : > { %v2714_v26 = vmax.f32 %v1998_v21, %v2713_v46  ;;  %v2002_v27 = vadd.f32 %v2001_v25, %v3772_v36 }
 0x349   : > { %v2646_v31 = vmax.f32 %v2000_v24, %v2645_v23 }
 0x34a   : > { %v2715_v28 = vmax.f32 %v2002_v27, %v2714_v26 }
 0x34c   : > { %v2005_v29 = vpop.f32.mrb[116].mxu1 }
 0x34d   : > { %v2006_v44 = vadd.f32 %v2005_v29, %v3770_v35  ;;  %v2007_v30 = vpop.f32.mrb[117].mxu1 }
 0x34e   : > { %v2008_v63 = vadd.f32 %v2007_v30, %v3772_v36  ;;  %v2009_v34 = vpop.f32.mrb[118].mxu1 }
 0x34f   : > { %v2647_v33 = vmax.f32 %v2006_v44, %v2646_v31  ;;  %v2010_v56 = vadd.f32 %v2009_v34, %v3770_v35  ;;  %v2011_v0 = vpop.f32.mrb[119].mxu1 }
 0x350   : > { %v2716_v37 = vmax.f32 %v2008_v63, %v2715_v28  ;;  %v2012_v39 = vadd.f32 %v2011_v0, %v3772_v36 }
 0x351   : > { %v2648_v41 = vmax.f32 %v2010_v56, %v2647_v33 }
 0x352   : > { %v2717_v47 = vmax.f32 %v2012_v39, %v2716_v37 }
 0x354   : > { %v2015_v42 = vpop.f32.mrb[120].mxu1 }
 0x355   : > { %v2016_v43 = vadd.f32 %v2015_v42, %v3770_v35  ;;  %v2017_v45 = vpop.f32.mrb[121].mxu1 }
 0x356   : > { %v2018_v49 = vadd.f32 %v2017_v45, %v3772_v36  ;;  %v2019_v62 = vpop.f32.mrb[122].mxu1 }
 0x357   : > { %v2583_v50 = vsel %vm2329_vm4, %v2016_v43, -inf  ;;  %v2021_v32 = vpop.f32.mrb[123].mxu1 }
 0x358   : > { %v2650_v51 = vmax.f32 %v2648_v41, %v2583_v50  ;;  %v2584_v52 = vsel %vm2329_vm4, %v2018_v49, -inf }
 0x359   : > { %v2719_v53 = vmax.f32 %v2717_v47, %v2584_v52 }
 0x35a   : > { %v2651_v54 = vrot.slane %v2650_v51, 4 }
 0x35b   : > { %v2720_v55 = vrot.slane %v2719_v53, 4 }
 0x35c   : > { %v2652_v57 = vmax.f32 %v2650_v51, %v2651_v54 }
 0x35d   : > { %v2721_v58 = vmax.f32 %v2719_v53, %v2720_v55 }
 0x35e   : > { %v2653_v61 = vrot.slane %v2652_v57, 2 }
 0x35f   : > { %v2722_v2 = vrot.slane %v2721_v58, 2 }
 0x360   : > { %v2654_v35 = vmax.f32 %v2652_v57, %v2653_v61 }
 0x361   : > { %v2723_v15 = vmax.f32 %v2721_v58, %v2722_v2 }
 0x362   : > { %v2655_v36 = vrot.slane %v2654_v35, 1 }
 0x363   : > { %v2724_v4 = vrot.slane %v2723_v15, 1 }
 0x364   : > { %v2656_v48 = vmax.f32 %v2654_v35, %v2655_v36 }
 0x365   : > { %v2725_v5 = vmax.f32 %v2723_v15, %v2724_v4 }
 0x367   : > { %v2728_v7 = vcombine.low %v2656_v48, %v2725_v5 }
 0x369   : > { %v2735_v8 = vrot.slane %v2728_v7, %v2734_v6 }
 0x36b   : > { %v2742_v10 = vrot.slane %v2735_v8, %v2734_v6 }
 0x36d   : > { %v2744_v11 = vmax.f32 %v2587_v9, %v2742_v10 }
 0x36f   : > { %2749 = vst.msk [vmem:[%s3377_s19] sm:$0x3] %vm3356_vm1, %v2744_v11 }
 0x370 PF: > { %s17_s26 = sadd.s32 1, %s3292_s26   ;;  %s3925_s24 = smov %s3288_s25 }
 0x371   : > { %p14_p5 = scmp.ge.s32.totalorder %s17_s26, 4   ;;  %s3926_s25 = smov %s3928_s27 }
 0x373   :  { %16 = sbr.rel (!%p14_p5) target bundleno = 2 (0x2), region = 93 }

// kernel: pointnet_densecls_forward.3
= control target key start
LH: loop header
LB: loop body
LE: loop exit
PB: predicated region body
PF: predicated region fallthrough
CT: control target
= control target key end

     0   :  { %s5102_s0 = inlined_call_operand.vmem [shape: bf16[2,512,4], index: 0, kind: input, shape index: {}]   ;;  %s5103_s1 = inlined_call_operand.vmem [shape: bf16[1,4,64], index: 1, kind: input, shape index: {}]   ;;  %s5104_s2 = inlined_call_operand.vmem [shape: f32[1,64], index: 2, kind: input, shape index: {}]   ;;  %s5105_s3 = inlined_call_operand.vmem [shape: bf16[64,128], index: 3, kind: input, shape index: {}]   ;;  %s5106_s4 = inlined_call_operand.vmem [shape: f32[1,128], index: 4, kind: input, shape index: {}]   ;;  %s5107_s5 = inlined_call_operand.vmem [shape: bf16[128,256], index: 5, kind: input, shape index: {}]   ;;  %s5108_s6 = inlined_call_operand.vmem [shape: f32[1,256], index: 6, kind: input, shape index: {}]   ;;  %s5109_s7 = inlined_call_operand.vmem [shape: bf16[256,128], index: 7, kind: input, shape index: {}]   ;;  %s5110_s8 = inlined_call_operand.vmem [shape: f32[1,128], index: 8, kind: input, shape index: {}]   ;;  %s5111_s9 = inlined_call_operand.vmem [shape: bf16[128,64], index: 9, kind: input, shape index: {}]   ;;  %s5112_s10 = inlined_call_operand.vmem [shape: f32[1,64], index: 10, kind: input, shape index: {}]   ;;  %s5113_s11 = inlined_call_operand.vmem [shape: bf16[64,16], index: 11, kind: input, shape index: {}]   ;;  %s5114_s12 = inlined_call_operand.vmem [shape: f32[1,16], index: 12, kind: input, shape index: {}]   ;;  %s5115_s13 = inlined_call_operand.hbm [shape: f32[2,1,256], index: 13, kind: output, shape index: {0}]   ;;  %s5116_s14 = inlined_call_operand.vmem [shape: f32[2,1,16], index: 14, kind: output, shape index: {1}]  }
   0x1   :  { %5119 = sst [smem:[#allocation7_spill]] %s5102_s0 }
   0x2   :  { %5120 = sst [smem:[#allocation8_spill]] %s5103_s1 }
   0x3   :  { %5121 = sst [smem:[#allocation9_spill]] %s5104_s2 }
   0x4   :  { %5122 = sst [smem:[#allocation10_spill]] %s5105_s3 }
   0x5   :  { %5123 = sst [smem:[#allocation11_spill]] %s5106_s4 }
   0x6   :  { %20 = vsyncpa [#allocation3], 0 }
   0x7   :  { %22 = vsyncpa [#allocation3 + $0x1], 0  ;;  %s4294_s29 = smov 0   ;;  %s4296_s30 = smov 0  }
   0x8   :  { %s4298_s15 = smov 0   ;;  %s4300_s16 = smov 0  }
   0x9   :  { %s4302_s17 = smov 0   ;;  %s4304_s18 = smov 0  }
   0xa LB: > { %5124 = sst [smem:[#allocation5_spill]] %s4207_s17  ;;  %s3544_s19 = sadd.s32 4294967295, %s4211_s18   ;;  %s4211_s18 = sphi %s4304_s18, %s28_s18   ;;  %s4207_s17 = sphi %s4302_s17, %s5136_s17   ;;  %s4203_s16 = sphi %s4300_s16, %s5135_s16   ;;  %s4199_s15 = sphi %s4298_s15, %s5139_s15   ;;  %s4195_s30 = sphi %s4296_s30, %s5138_s30   ;;  %s4191_s29 = sphi %s4294_s29, %s5137_s29  }
   0xb   : > { %s3545_s20 = sadd.s32 4294967294, %s4211_s18   ;;  %s40_s21 = sadd.s32 1, %s4207_s17 }
   0xc   : > { %s327_s22 = sadd.s32 1, %s4199_s15  ;;  %p42_p0 = scmp.ge.s32.totalorder %s40_s21, 2 }
   0xd   : > { %p337_p1 = scmp.ne.s32.totalorder %s4199_s15, %s4195_s30  ;;  %p338_p2 = scmp.eq.s32.totalorder %s3544_s19, 1 }
   0xe   : > { %p343_p3 = scmp.ne.s32.totalorder %s4195_s30, %s4191_s29  ;;  %s5141_s21 = smov (%p42_p0, %s40_s21), 0 }
   0xf   : > { %5125 = sst [smem:[#allocation6_spill]] %s5141_s21  ;;  %p4334_p4 = por %p338_p2, %p337_p1 }
  0x10   : > { %p344_p5 = scmp.eq.s32.totalorder %s3545_s20, 1  ;;  %s324_s24 = ssub.s32 %s4207_s17, %s5141_s21 }
  0x11   : > { %p3548_p6 = scmp.ge.s32.totalorder %s4211_s18, 1  ;;  %p325_p7 = scmp.eq.s32.totalorder %s324_s24, 0 }
  0x12   : > { %p4341_p8 = por %p344_p5, %p343_p3  ;;  %p437_p9 = scmp.lt.s32.totalorder %s4211_s18, 3 }
  0x13   : > { %s4347_s26 = scalar_select %p325_p7, %s4199_s15, %s327_s22  }
  0x14   : > { %p438_p10 = pnand %p3548_p6, %p437_p9 }
  0x15   : > { %s5128_s1 = sld [smem:[#allocation8_spill]] (!%p438_p10)  ;;  %vm834_vm0 = vcmask (!%p438_p10), 1041408   ;;  %p491_p11 = scmp.lt.s32.totalorder (!%p438_p10), %s4203_s16, 1  ;;  %vm737_vm1 = vcmask (!%p438_p10), 31744   ;;  %v4081_v38 = vld [vmem:[%s5107_s5] ss:$8 sps:$4 sm:$0xff] (!%p438_p10)  }
  0x16   : > { %441 = sbr.rel (%p438_p10) target bundleno = 1635 (0x663), region = 72  ;;  %s5129_s3 = sld [smem:[#allocation10_spill]] (!%p438_p10)  ;;  %v4083_v39 = vld [vmem:[%s5107_s5 + $0x4] ss:$8 sps:$4 sm:$0xff] (!%p438_p10)   ;;  %v4084_v40 = vld [vmem:[%s5107_s5 + $0x10] ss:$8 sps:$4 sm:$0xff] (!%p438_p10)  }
  0x17   : > { %s5130_s0 = sld [smem:[#allocation7_spill]] (!%p438_p10)  ;;  %v4086_v41 = vld [vmem:[%s5107_s5 + $0x14] ss:$8 sps:$4 sm:$0xff] (!%p438_p10)   ;;  %v4089_v42 = vld [vmem:[%s5107_s5 + $0x24] ss:$8 sps:$4 sm:$0xff] (!%p438_p10)   ;;  %s5131_s2 = sld [smem:[#allocation9_spill]] (!%p438_p10) }
  0x18   : > { %v4087_v43 = vld [vmem:[%s5107_s5 + $0x20] ss:$8 sps:$4 sm:$0xff] (!%p438_p10)   ;;  %v4090_v44 = vld [vmem:[%s5107_s5 + $0x30] ss:$8 sps:$4 sm:$0xff] (!%p438_p10)   ;;  %v4092_v45 = vld [vmem:[%s5107_s5 + $0x34] ss:$8 sps:$4 sm:$0xff] (!%p438_p10)  }
  0x19   : > { %v4095_v46 = vld [vmem:[%s5107_s5 + $0x44] ss:$8 sps:$4 sm:$0xff] (!%p438_p10)   ;;  %v4093_v48 = vld [vmem:[%s5107_s5 + $0x40] ss:$8 sps:$4 sm:$0xff] (!%p438_p10)   ;;  %v4096_v56 = vld [vmem:[%s5107_s5 + $0x50] ss:$8 sps:$4 sm:$0xff] (!%p438_p10)  }
  0x1a   : > { %v4098_v57 = vld [vmem:[%s5107_s5 + $0x54] ss:$8 sps:$4 sm:$0xff] (!%p438_p10)   ;;  %vm1262_vm2 = vcmask (!%p438_p10), 523264   ;;  %s5132_s4 = sld [smem:[#allocation11_spill]] (!%p438_p10)  ;;  %s482_s27 = sand.u32 (!%p438_p10), 1, %s4195_s30   ;;  %vm4217_vm5 = vmmov (!%p438_p10), 0  }
  0x1b   : > { %v569_v0 = vld [vmem:[%s5128_s1] sm:$0x3] (!%p438_p10)  ;;  %s3549_s28 = sshll.u32 (!%p438_p10), %s482_s27, 1  ;;  %vm2341_vm6 = vcmask (!%p438_p10), 122880   ;;  %s3432_s17 = scalar_lea.sflag (!%p438_p10), [#allocation3], %s482_s27 }
  0x1c   : > { %v4063_v1 = vld [vmem:[%s5129_s3] sm:$0xff] (!%p438_p10)   ;;  %3983 = vmatprep.subr.msk.bf16.mxu0 (!%p438_p10), %vm834_vm0, %v569_v0  ;;  %v836_v2 = vsel (!%p438_p10), %vm834_vm0, %v569_v0, 0  ;;  %3984 = vmatprep.subr.msk.bf16.mxu1 (!%p438_p10), %vm834_vm0, %v569_v0  ;;  %v4066_v9 = vld [vmem:[%s5129_s3 + $0x8] sm:$0xff] (!%p438_p10)   ;;  %v4071_v12 = vld [vmem:[%s5129_s3 + $0x10] sm:$0xff] (!%p438_p10)  }
  0x1d   : > { %3812 = vmatpush3.bf16.msra.mxu0 %v836_v2  ;;  %s4357_s22 = scalar_select %p491_p11, %s4203_s16, 1  ;;  %3982 = vmatpush3.bf16.msra.mxu1 %v836_v2  ;;  %v4076_v17 = vld [vmem:[%s5129_s3 + $0x18] sm:$0xff]   ;;  %v4468_v47 = vld [vmem:[%s5131_s2] ss:$0 sm:$0xff] }
  0x1e   : > { %3877 = vmatprep.subr.bf16.mxu1 %v4063_v1  ;;  %1852 = vmatprep.subr.bf16.mxu0 %v4083_v39 }
  0x1f   : > { %s3704_s24 = sshll.u32 %s4357_s22, 8 }
  0x20   : > { %s4363_s1 = scalar_lea.vmem %s5130_s0, %s3704_s24  ;;  %s4901_s0 = scalar_lea.vmem [#allocation2], %s3549_s28 }
  0x21   : > { %v4045_v3 = vld [vmem:[%s4363_s1] sm:$0xff]   ;;  %v4046_v4 = vld [vmem:[%s4363_s1 + $0x8] sm:$0xff]   ;;  %v4047_v5 = vld [vmem:[%s4363_s1 + $0x10] sm:$0xff]   ;;  %s3449_s28 = sshll.u32 %s4901_s0, 4  ;;  %s4218_s24 = smov [#allocation2]   ;;  %s3450_s28 = int_to_ptr.vmem [resolvable:$true] %s3449_s28 }
  0x22   : > { %3813 = vmatprep.mubr.msk.bf16.mxu0 %vm737_vm1, %v4045_v3  ;;  %v4048_v6 = vld [vmem:[%s4363_s1 + $0x18] sm:$0xff]   ;;  %v4049_v7 = vld [vmem:[%s4363_s1 + $0x20] sm:$0xff]   ;;  %v4054_v10 = vld [vmem:[%s4363_s1 + $0x48] sm:$0xff]   ;;  %s4133_s20 = scalar_lea.vmem %s3450_s28, 32  ;;  %s4137_s2 = sshll.u32 %s4218_s24, 4  ;;  %s4138_s2 = int_to_ptr.vmem [resolvable:$false] %s4137_s2 }
  0x23   : > { %3814 = vmatmul.mubr.msk.bf16.vlgmr.msra.gmra.mrb[0].mxu0 %vm737_vm1, %v4046_v4  ;;  %v4053_v8 = vld [vmem:[%s4363_s1 + $0x40] sm:$0xff]   ;;  %v4055_v11 = vld [vmem:[%s4363_s1 + $0x50] sm:$0xff]   ;;  %v4050_v13 = vld [vmem:[%s4363_s1 + $0x28] sm:$0xff]   ;;  %p4134_p12 = scmp.ne.s32.totalorder %s3450_s28, %s4133_s20  ;;  %p4140_p1 = scmp.lt.s32.totalorder %s3450_s28, %s4138_s2 }
  0x24   : > { %3817 = vmatprep.mubr.msk.bf16.mxu0 %vm737_vm1, %v4047_v5  ;;  %3829 = vmatprep.mubr.msk.bf16.mxu1 %vm737_vm1, %v4053_v8  ;;  %v4051_v14 = vld [vmem:[%s4363_s1 + $0x30] sm:$0xff]   ;;  %v4056_v15 = vld [vmem:[%s4363_s1 + $0x58] sm:$0xff]   ;;  %v4057_v16 = vld [vmem:[%s4363_s1 + $0x60] sm:$0xff]  }
  0x25   : > { %3830 = vmatmul.mubr.msk.bf16.vlgmr.msra.gmra.mrb[0].mxu1 %vm737_vm1, %v4054_v10  ;;  %v4052_v18 = vld [vmem:[%s4363_s1 + $0x38] sm:$0xff]   ;;  %v4058_v19 = vld [vmem:[%s4363_s1 + $0x68] sm:$0xff]   ;;  %v4059_v20 = vld [vmem:[%s4363_s1 + $0x70] sm:$0xff]   ;;  %1853 = vmatpush1.bf16.msra.mxu0 %v4081_v38  ;;  %p4135_p13 = pnand %p4134_p12, %p4334_p4 }
  0x26   : > { %3833 = vmatprep.mubr.msk.bf16.mxu1 %vm737_vm1, %v4055_v11  ;;  %3878 = vmatpush3.bf16.msra.mxu1 %v4063_v1  ;;  %v4060_v21 = vld [vmem:[%s4363_s1 + $0x78] sm:$0xff]   ;;  %v4061_v22 = vld [vmem:[%s4363_s1 + $0x80] sm:$0xff]   ;;  %v4062_v23 = vld [vmem:[%s4363_s1 + $0x88] sm:$0xff]  }
  0x27   : > { %3879 = vmatprep.subr.bf16.mxu1 %v4066_v9  ;;  %v4064_v24 = vld [vmem:[%s4363_s1 + $0x90] sm:$0xff]   ;;  %v4065_v25 = vld [vmem:[%s4363_s1 + $0x98] sm:$0xff]   ;;  %v4067_v26 = vld [vmem:[%s4363_s1 + $0xa0] sm:$0xff]   ;;  %1854 = vmatprep.subr.bf16.mxu0 %v4086_v41  ;;  %p4136_p0 = pneg %p4135_p13 }
  0x28   : > { %v4068_v27 = vld [vmem:[%s4363_s1 + $0xa8] sm:$0xff]   ;;  %v4069_v28 = vld [vmem:[%s4363_s1 + $0xb0] sm:$0xff]   ;;  %v4070_v29 = vld [vmem:[%s4363_s1 + $0xb8] sm:$0xff]  }
  0x29   : > { %v4072_v30 = vld [vmem:[%s4363_s1 + $0xc0] sm:$0xff]   ;;  %v4073_v31 = vld [vmem:[%s4363_s1 + $0xc8] sm:$0xff]   ;;  %v4074_v32 = vld [vmem:[%s4363_s1 + $0xd0] sm:$0xff]   ;;  %1855 = vmatpush1.bf16.msra.mxu0 %v4084_v40 }
  0x2a   : > { %3880 = vmatpush3.bf16.msra.mxu1 %v4066_v9  ;;  %v4075_v33 = vld [vmem:[%s4363_s1 + $0xd8] sm:$0xff]   ;;  %v4077_v34 = vld [vmem:[%s4363_s1 + $0xe0] sm:$0xff]   ;;  %v4078_v35 = vld [vmem:[%s4363_s1 + $0xe8] sm:$0xff]   ;;  %1856 = vmatprep.subr.bf16.mxu0 %v4089_v42 }
  0x2b   : > { %3818 = vmatmul.mubr.msk.bf16.gmra.mrb[4].mxu0 %vm737_vm1, %v4048_v6  ;;  %3881 = vmatprep.subr.bf16.mxu1 %v4071_v12  ;;  %v4079_v36 = vld [vmem:[%s4363_s1 + $0xf0] sm:$0xff]   ;;  %v4080_v37 = vld [vmem:[%s4363_s1 + $0xf8] sm:$0xff]   ;;  %s5040_s1 = scalar_lea.vmem %s5116_s14, %s4357_s22  ;;  %s3705_s22 = sshll.u32 %s4203_s16, 5 }
  0x2c   : > { %3821 = vmatprep.mubr.msk.bf16.mxu0 %vm737_vm1, %v4049_v7  ;;  %s5054_s21 = scalar_lea.hbm %s5115_s13, %s3705_s22 }
  0x2d   : > { %3834 = vmatmul.mubr.msk.bf16.gmra.mrb[4].mxu1 %vm737_vm1, %v4056_v15  ;;  %1857 = vmatpush1.bf16.msra.mxu0 %v4087_v43 }
  0x2e   : > { %3837 = vmatprep.mubr.msk.bf16.mxu1 %vm737_vm1, %v4057_v16  ;;  %3882 = vmatpush3.bf16.msra.mxu1 %v4071_v12 }
  0x2f   : > { %3883 = vmatprep.subr.bf16.mxu1 %v4076_v17  ;;  %1858 = vmatprep.subr.bf16.mxu0 %v4092_v45 }
  0x31   : > { %1859 = vmatpush1.bf16.msra.mxu0 %v4090_v44 }
  0x32   : > { %3884 = vmatpush3.bf16.msra.mxu1 %v4076_v17  ;;  %1860 = vmatprep.subr.bf16.mxu0 %v4095_v46 }
  0x33   : > { %3822 = vmatmul.mubr.msk.bf16.gmra.mrb[8].mxu0 %vm737_vm1, %v4050_v13 }
  0x34   : > { %3825 = vmatprep.mubr.msk.bf16.mxu0 %vm737_vm1, %v4051_v14 }
  0x35   : > { %3838 = vmatmul.mubr.msk.bf16.gmra.mrb[8].mxu1 %vm737_vm1, %v4058_v19  ;;  %1861 = vmatpush1.bf16.msra.mxu0 %v4093_v48 }
  0x36   : > { %3841 = vmatprep.mubr.msk.bf16.mxu1 %vm737_vm1, %v4059_v20  ;;  %1862 = vmatprep.subr.bf16.mxu0 %v4098_v57 }
  0x39   : > { %1863 = vmatpush1.bf16.msra.mxu0 %v4096_v56 }
  0x3b   : > { %3826 = vmatmul.mubr.msk.bf16.gmra.mrb[12].mxu0 %vm737_vm1, %v4052_v18 }
  0x3d   : > { %3842 = vmatmul.mubr.msk.bf16.gmra.mrb[12].mxu1 %vm737_vm1, %v4060_v21 }
  0x3e   : > { %3845 = vmatprep.mubr.msk.bf16.mxu1 %vm737_vm1, %v4061_v22 }
  0x45   : > { %3846 = vmatmul.mubr.msk.bf16.gmra.mrb[16].mxu1 %vm737_vm1, %v4062_v23 }
  0x46   : > { %3849 = vmatprep.mubr.msk.bf16.mxu1 %vm737_vm1, %v4064_v24 }
  0x4d   : > { %3850 = vmatmul.mubr.msk.bf16.gmra.mrb[20].mxu1 %vm737_vm1, %v4065_v25 }
  0x4e   : > { %3853 = vmatprep.mubr.msk.bf16.mxu1 %vm737_vm1, %v4067_v26 }
  0x55   : > { %3854 = vmatmul.mubr.msk.bf16.gmra.mrb[24].mxu1 %vm737_vm1, %v4068_v27 }
  0x56   : > { %3857 = vmatprep.mubr.msk.bf16.mxu1 %vm737_vm1, %v4069_v28 }
  0x5d   : > { %3858 = vmatmul.mubr.msk.bf16.gmra.mrb[28].mxu1 %vm737_vm1, %v4070_v29 }
  0x5e   : > { %3861 = vmatprep.mubr.msk.bf16.mxu1 %vm737_vm1, %v4072_v30 }
  0x65   : > { %3862 = vmatmul.mubr.msk.bf16.gmra.mrb[32].mxu1 %vm737_vm1, %v4073_v31 }
  0x66   : > { %3865 = vmatprep.mubr.msk.bf16.mxu1 %vm737_vm1, %v4074_v32 }
  0x6d   : > { %3866 = vmatmul.mubr.msk.bf16.gmra.mrb[36].mxu1 %vm737_vm1, %v4075_v33 }
  0x6e   : > { %3869 = vmatprep.mubr.msk.bf16.mxu1 %vm737_vm1, %v4077_v34 }
  0x75   : > { %3870 = vmatmul.mubr.msk.bf16.gmra.mrb[40].mxu1 %vm737_vm1, %v4078_v35 }
  0x76   : > { %3873 = vmatprep.mubr.msk.bf16.mxu1 %vm737_vm1, %v4079_v36 }
  0x7d   : > { %3874 = vmatmul.mubr.msk.bf16.gmra.mrb[44].mxu1 %vm737_vm1, %v4080_v37 }
  0xf6   : > { %v3815_v49 = vpop.f32.mrb[0].mxu0 }
  0xf7   : > { %v881_v50 = vadd.f32 %v3815_v49, %v4468_v47  ;;  %v872_v51 = vpop.f32.mrb[1].mxu0 }
  0xf8   : > { %v873_v52 = vadd.f32 %v4468_v47, %v872_v51  ;;  %v3816_v53 = vpop.f32.mrb[2].mxu0  ;;  %v3831_v2 = vpop.f32.mrb[0].mxu1 }
  0xf9   : > { %v884_v54 = vadd.f32 %v3816_v53, %v4468_v47  ;;  %v875_v55 = vpop.f32.mrb[3].mxu0  ;;  %v1129_v59 = vmax.f32 %v881_v50, 0.0  ;;  %v945_v5 = vadd.f32 %v3831_v2, %v4468_v47  ;;  %v936_v6 = vpop.f32.mrb[1].mxu1 }
  0xfa   : > { %v876_v58 = vadd.f32 %v4468_v47, %v875_v55  ;;  %v1127_v61 = vmax.f32 %v873_v52, 0.0  ;;  %v937_v9 = vadd.f32 %v4468_v47, %v936_v6  ;;  %v3832_v10 = vpop.f32.mrb[2].mxu1 }
  0xfb   : > { %v1130_v60 = vmax.f32 %v884_v54, 0.0  ;;  %v1145_v14 = vmax.f32 %v945_v5, 0.0  ;;  %v948_v15 = vadd.f32 %v3832_v10, %v4468_v47  ;;  %v939_v16 = vpop.f32.mrb[3].mxu1 }
  0xfc   : > { %v1128_v62 = vmax.f32 %v876_v58, 0.0  ;;  %v1143_v19 = vmax.f32 %v937_v9, 0.0  ;;  %v940_v20 = vadd.f32 %v4468_v47, %v939_v16 }
  0xfd   : > { %v1192_v63 = vpack.c.bf16 %v1130_v60, %v1129_v59  ;;  %v1146_v22 = vmax.f32 %v948_v15, 0.0 }
  0xfe   : > { %v1191_v0 = vpack.c.bf16 %v1128_v62, %v1127_v61  ;;  %v3819_v1 = vpop.f32.mrb[4].mxu0  ;;  %v1144_v24 = vmax.f32 %v940_v20, 0.0 }
  0xff   : > { %v897_v3 = vadd.f32 %v3819_v1, %v4468_v47  ;;  %v888_v4 = vpop.f32.mrb[5].mxu0  ;;  %v4493_v26 = vpack.c.bf16 %v1146_v22, %v1145_v14 }
 0x100   : > { %v889_v7 = vadd.f32 %v4468_v47, %v888_v4  ;;  %3885 = vmatprep.mubr.msk.bf16.mxu1 %vm1262_vm2, %v1191_v0  ;;  %v3820_v8 = vpop.f32.mrb[6].mxu0  ;;  %v4495_v29 = vpack.c.bf16 %v1144_v24, %v1143_v19  ;;  %v3835_v30 = vpop.f32.mrb[4].mxu1 }
 0x101   : > { %v1133_v11 = vmax.f32 %v897_v3, 0.0  ;;  %v900_v12 = vadd.f32 %v3820_v8, %v4468_v47  ;;  %3886 = vmatmul.mubr.msk.bf16.vlgmr.msra.gmra.mrb[48].mxu1 %vm1262_vm2, %v1192_v63  ;;  %v891_v13 = vpop.f32.mrb[7].mxu0  ;;  %v961_v33 = vadd.f32 %v3835_v30, %v4468_v47  ;;  %v952_v34 = vpop.f32.mrb[5].mxu1 }
 0x102   : > { %v1131_v17 = vmax.f32 %v889_v7, 0.0  ;;  %v892_v18 = vadd.f32 %v4468_v47, %v891_v13  ;;  %v953_v37 = vadd.f32 %v4468_v47, %v952_v34  ;;  %v3836_v38 = vpop.f32.mrb[6].mxu1 }
 0x103   : > { %v1134_v21 = vmax.f32 %v900_v12, 0.0  ;;  %v1149_v42 = vmax.f32 %v961_v33, 0.0  ;;  %v964_v43 = vadd.f32 %v3836_v38, %v4468_v47  ;;  %v955_v44 = vpop.f32.mrb[7].mxu1 }
 0x104   : > { %v1132_v23 = vmax.f32 %v892_v18, 0.0  ;;  %v1147_v48 = vmax.f32 %v953_v37, 0.0  ;;  %v956_v49 = vadd.f32 %v4468_v47, %v955_v44 }
 0x105   : > { %v1194_v25 = vpack.c.bf16 %v1134_v21, %v1133_v11  ;;  %v1150_v51 = vmax.f32 %v964_v43, 0.0 }
 0x106   : > { %v1193_v27 = vpack.c.bf16 %v1132_v23, %v1131_v17  ;;  %v3823_v28 = vpop.f32.mrb[8].mxu0  ;;  %v1148_v53 = vmax.f32 %v956_v49, 0.0 }
 0x107   : > { %v913_v31 = vadd.f32 %v3823_v28, %v4468_v47  ;;  %v904_v32 = vpop.f32.mrb[9].mxu0  ;;  %v4507_v55 = vpack.c.bf16 %v1150_v51, %v1149_v42 }
 0x108   : > { %3889 = vmatprep.mubr.msk.bf16.mxu1 %vm1262_vm2, %v1193_v27  ;;  %v905_v35 = vadd.f32 %v4468_v47, %v904_v32  ;;  %v3824_v36 = vpop.f32.mrb[10].mxu0  ;;  %v1201_v58 = vpack.c.bf16 %v1148_v53, %v1147_v48  ;;  %v3839_v59 = vpop.f32.mrb[8].mxu1 }
 0x109   : > { %3890 = vmatmul.mubr.msk.bf16.gmra.mrb[52].mxu1 %vm1262_vm2, %v1194_v25  ;;  %v1137_v39 = vmax.f32 %v913_v31, 0.0  ;;  %v916_v40 = vadd.f32 %v3824_v36, %v4468_v47  ;;  %v907_v41 = vpop.f32.mrb[11].mxu0  ;;  %v977_v62 = vadd.f32 %v3839_v59, %v4468_v47  ;;  %v968_v63 = vpop.f32.mrb[9].mxu1 }
 0x10a   : > { %v1135_v45 = vmax.f32 %v905_v35, 0.0  ;;  %v908_v46 = vadd.f32 %v4468_v47, %v907_v41  ;;  %v969_v2 = vadd.f32 %v4468_v47, %v968_v63  ;;  %v3840_v3 = vpop.f32.mrb[10].mxu1 }
 0x10b   : > { %v1138_v50 = vmax.f32 %v916_v40, 0.0  ;;  %v1153_v7 = vmax.f32 %v977_v62, 0.0  ;;  %v980_v8 = vadd.f32 %v3840_v3, %v4468_v47  ;;  %v971_v9 = vpop.f32.mrb[11].mxu1 }
 0x10c   : > { %v1136_v52 = vmax.f32 %v908_v46, 0.0  ;;  %v1151_v12 = vmax.f32 %v969_v2, 0.0  ;;  %v972_v13 = vadd.f32 %v4468_v47, %v971_v9 }
 0x10d   : > { %v1196_v54 = vpack.c.bf16 %v1138_v50, %v1137_v39  ;;  %v1154_v15 = vmax.f32 %v980_v8, 0.0 }
 0x10e   : > { %v1195_v56 = vpack.c.bf16 %v1136_v52, %v1135_v45  ;;  %v3827_v57 = vpop.f32.mrb[12].mxu0  ;;  %v1152_v17 = vmax.f32 %v972_v13, 0.0 }
 0x10f   : > { %v929_v60 = vadd.f32 %v3827_v57, %v4468_v47  ;;  %v920_v61 = vpop.f32.mrb[13].mxu0  ;;  %v1204_v19 = vpack.c.bf16 %v1154_v15, %v1153_v7 }
 0x110   : > { %3893 = vmatprep.mubr.msk.bf16.mxu1 %vm1262_vm2, %v1195_v56  ;;  %v921_v0 = vadd.f32 %v4468_v47, %v920_v61  ;;  %v3828_v1 = vpop.f32.mrb[14].mxu0  ;;  %v1203_v21 = vpack.c.bf16 %v1152_v17, %v1151_v12  ;;  %v3843_v22 = vpop.f32.mrb[12].mxu1 }
 0x111   : > { %3894 = vmatmul.mubr.msk.bf16.gmra.mrb[56].mxu1 %vm1262_vm2, %v1196_v54  ;;  %v1141_v4 = vmax.f32 %v929_v60, 0.0  ;;  %v932_v5 = vadd.f32 %v3828_v1, %v4468_v47  ;;  %v923_v6 = vpop.f32.mrb[15].mxu0  ;;  %v993_v23 = vadd.f32 %v3843_v22, %v4468_v47  ;;  %v984_v24 = vpop.f32.mrb[13].mxu1 }
 0x112   : > { %v1139_v10 = vmax.f32 %v921_v0, 0.0  ;;  %v924_v11 = vadd.f32 %v4468_v47, %v923_v6  ;;  %v985_v25 = vadd.f32 %v4468_v47, %v984_v24  ;;  %v3844_v27 = vpop.f32.mrb[14].mxu1 }
 0x113   : > { %v1142_v14 = vmax.f32 %v932_v5, 0.0  ;;  %v1157_v28 = vmax.f32 %v993_v23, 0.0  ;;  %v996_v30 = vadd.f32 %v3844_v27, %v4468_v47  ;;  %v987_v31 = vpop.f32.mrb[15].mxu1 }
 0x114   : > { %v1140_v16 = vmax.f32 %v924_v11, 0.0  ;;  %v1155_v32 = vmax.f32 %v985_v25, 0.0  ;;  %v988_v33 = vadd.f32 %v4468_v47, %v987_v31 }
 0x115   : > { %v1198_v18 = vpack.c.bf16 %v1142_v14, %v1141_v4  ;;  %v1158_v34 = vmax.f32 %v996_v30, 0.0 }
 0x116   : > { %v1197_v20 = vpack.c.bf16 %v1140_v16, %v1139_v10  ;;  %v1156_v35 = vmax.f32 %v988_v33, 0.0 }
 0x117   : > { %v1206_v36 = vpack.c.bf16 %v1158_v34, %v1157_v28 }
 0x118   : > { %3897 = vmatprep.mubr.msk.bf16.mxu1 %vm1262_vm2, %v1197_v20  ;;  %v1205_v37 = vpack.c.bf16 %v1156_v35, %v1155_v32  ;;  %v3847_v38 = vpop.f32.mrb[16].mxu1 }
 0x119   : > { %3898 = vmatmul.mubr.msk.bf16.gmra.mrb[60].mxu1 %vm1262_vm2, %v1198_v18  ;;  %v1009_v39 = vadd.f32 %v3847_v38, %v4468_v47  ;;  %v1000_v40 = vpop.f32.mrb[17].mxu1 }
 0x11a   : > { %3901 = vmatprep.mubr.msk.bf16.mxu1 %vm1262_vm2, %v4495_v29  ;;  %v1001_v41 = vadd.f32 %v4468_v47, %v1000_v40  ;;  %v3848_v42 = vpop.f32.mrb[18].mxu1 }
 0x11b   : > { %v1161_v43 = vmax.f32 %v1009_v39, 0.0  ;;  %v1012_v29 = vadd.f32 %v3848_v42, %v4468_v47  ;;  %v1003_v44 = vpop.f32.mrb[19].mxu1 }
 0x11c   : > { %v1159_v45 = vmax.f32 %v1001_v41, 0.0  ;;  %v1004_v46 = vadd.f32 %v4468_v47, %v1003_v44 }
 0x11d   : > { %v1162_v48 = vmax.f32 %v1012_v29, 0.0 }
 0x11e   : > { %v1160_v49 = vmax.f32 %v1004_v46, 0.0 }
 0x11f   : > { %v1208_v50 = vpack.c.bf16 %v1162_v48, %v1161_v43 }
 0x120   : > { %v1207_v51 = vpack.c.bf16 %v1160_v49, %v1159_v45  ;;  %v3851_v52 = vpop.f32.mrb[20].mxu1 }
 0x121   : > { %3902 = vmatmul.mubr.msk.bf16.gmra.mrb[64].mxu1 %vm1262_vm2, %v4493_v26  ;;  %v1025_v53 = vadd.f32 %v3851_v52, %v4468_v47  ;;  %v1016_v54 = vpop.f32.mrb[21].mxu1 }
 0x122   : > { %3905 = vmatprep.mubr.msk.bf16.mxu1 %vm1262_vm2, %v1201_v58  ;;  %v1017_v56 = vadd.f32 %v4468_v47, %v1016_v54  ;;  %v3852_v26 = vpop.f32.mrb[22].mxu1 }
 0x123   : > { %v1165_v57 = vmax.f32 %v1025_v53, 0.0  ;;  %v1028_v58 = vadd.f32 %v3852_v26, %v4468_v47  ;;  %v1019_v59 = vpop.f32.mrb[23].mxu1 }
 0x124   : > { %v1163_v60 = vmax.f32 %v1017_v56, 0.0  ;;  %v1020_v61 = vadd.f32 %v4468_v47, %v1019_v59 }
 0x125   : > { %v1166_v62 = vmax.f32 %v1028_v58, 0.0 }
 0x126   : > { %v1164_v63 = vmax.f32 %v1020_v61, 0.0 }
 0x127   : > { %v1210_v0 = vpack.c.bf16 %v1166_v62, %v1165_v57 }
 0x128   : > { %v1209_v1 = vpack.c.bf16 %v1164_v63, %v1163_v60  ;;  %v3855_v2 = vpop.f32.mrb[24].mxu1 }
 0x129   : > { %3906 = vmatmul.mubr.msk.bf16.gmra.mrb[68].mxu1 %vm1262_vm2, %v4507_v55  ;;  %v1041_v3 = vadd.f32 %v3855_v2, %v4468_v47  ;;  %v1032_v4 = vpop.f32.mrb[25].mxu1 }
 0x12a   : > { %3909 = vmatprep.mubr.msk.bf16.mxu1 %vm1262_vm2, %v1203_v21  ;;  %v1033_v5 = vadd.f32 %v4468_v47, %v1032_v4  ;;  %v3856_v55 = vpop.f32.mrb[26].mxu1 }
 0x12b   : > { %v1169_v6 = vmax.f32 %v1041_v3, 0.0  ;;  %v1044_v7 = vadd.f32 %v3856_v55, %v4468_v47  ;;  %v1035_v8 = vpop.f32.mrb[27].mxu1 }
 0x12c   : > { %v1167_v9 = vmax.f32 %v1033_v5, 0.0  ;;  %v1036_v10 = vadd.f32 %v4468_v47, %v1035_v8  ;;  %v4099_v8 = vld [vmem:[%s5107_s5 + $0x60] ss:$8 sps:$4 sm:$0xff]  }
 0x12d   : > { %v1170_v11 = vmax.f32 %v1044_v7, 0.0 }
 0x12e   : > { %v1168_v12 = vmax.f32 %v1036_v10, 0.0 }
 0x12f   : > { %v1212_v13 = vpack.c.bf16 %v1170_v11, %v1169_v6  ;;  %v4101_v6 = vld [vmem:[%s5107_s5 + $0x64] ss:$8 sps:$4 sm:$0xff]  }
 0x130   : > { %v1211_v14 = vpack.c.bf16 %v1168_v12, %v1167_v9  ;;  %v3859_v15 = vpop.f32.mrb[28].mxu1  ;;  %1864 = vmatprep.subr.bf16.mxu0 %v4101_v6 }
 0x131   : > { %3910 = vmatmul.mubr.msk.bf16.gmra.mrb[72].mxu1 %vm1262_vm2, %v1204_v19  ;;  %v1057_v16 = vadd.f32 %v3859_v15, %v4468_v47  ;;  %v1048_v17 = vpop.f32.mrb[29].mxu1  ;;  %1865 = vmatpush1.bf16.msra.mxu0 %v4099_v8  ;;  %v4104_v15 = vld [vmem:[%s5107_s5 + $0x74] ss:$8 sps:$4 sm:$0xff]  }
 0x132   : > { %3913 = vmatprep.mubr.msk.bf16.mxu1 %vm1262_vm2, %v1205_v37  ;;  %v1049_v18 = vadd.f32 %v4468_v47, %v1048_v17  ;;  %v3860_v19 = vpop.f32.mrb[30].mxu1  ;;  %1866 = vmatprep.subr.bf16.mxu0 %v4104_v15 }
 0x133   : > { %v1173_v20 = vmax.f32 %v1057_v16, 0.0  ;;  %v1060_v21 = vadd.f32 %v3860_v19, %v4468_v47  ;;  %v1051_v22 = vpop.f32.mrb[31].mxu1  ;;  %v4102_v19 = vld [vmem:[%s5107_s5 + $0x70] ss:$8 sps:$4 sm:$0xff]  }
 0x134   : > { %v1171_v23 = vmax.f32 %v1049_v18, 0.0  ;;  %v1052_v24 = vadd.f32 %v4468_v47, %v1051_v22 }
 0x135   : > { %v1174_v25 = vmax.f32 %v1060_v21, 0.0  ;;  %1867 = vmatpush1.bf16.msra.mxu0 %v4102_v19 }
 0x136   : > { %v1172_v27 = vmax.f32 %v1052_v24, 0.0 }
 0x137   : > { %v1214_v28 = vpack.c.bf16 %v1174_v25, %v1173_v20  ;;  %v4213_v25 = vmov 0  }
 0x138   : > { %v1213_v30 = vpack.c.bf16 %v1172_v27, %v1171_v23  ;;  %v3863_v31 = vpop.f32.mrb[32].mxu1  ;;  %1884 = vmatprep.mubr.bf16.mxu0 %v4213_v25 }
 0x139   : > { %3914 = vmatmul.mubr.msk.bf16.gmra.mrb[76].mxu1 %vm1262_vm2, %v1206_v36  ;;  %v1073_v32 = vadd.f32 %v3863_v31, %v4468_v47  ;;  %v1064_v33 = vpop.f32.mrb[33].mxu1 }
 0x13a   : > { %3917 = vmatprep.mubr.msk.bf16.mxu1 %vm1262_vm2, %v1207_v51  ;;  %v1065_v34 = vadd.f32 %v4468_v47, %v1064_v33  ;;  %v3864_v35 = vpop.f32.mrb[34].mxu1 }
 0x13b   : > { %v1177_v36 = vmax.f32 %v1073_v32, 0.0  ;;  %v1076_v37 = vadd.f32 %v3864_v35, %v4468_v47  ;;  %v1067_v38 = vpop.f32.mrb[35].mxu1 }
 0x13c   : > { %v1175_v39 = vmax.f32 %v1065_v34, 0.0  ;;  %v1068_v40 = vadd.f32 %v4468_v47, %v1067_v38 }
 0x13d   : > { %v1178_v41 = vmax.f32 %v1076_v37, 0.0 }
 0x13e   : > { %v1176_v42 = vmax.f32 %v1068_v40, 0.0 }
 0x13f   : > { %v1216_v43 = vpack.c.bf16 %v1178_v41, %v1177_v36 }
 0x140   : > { %v1215_v29 = vpack.c.bf16 %v1176_v42, %v1175_v39  ;;  %v3867_v44 = vpop.f32.mrb[36].mxu1 }
 0x141   : > { %3918 = vmatmul.mubr.msk.bf16.gmra.mrb[80].mxu1 %vm1262_vm2, %v1208_v50  ;;  %v1089_v45 = vadd.f32 %v3867_v44, %v4468_v47  ;;  %v1080_v46 = vpop.f32.mrb[37].mxu1 }
 0x142   : > { %3921 = vmatprep.mubr.msk.bf16.mxu1 %vm1262_vm2, %v1209_v1  ;;  %v1081_v48 = vadd.f32 %v4468_v47, %v1080_v46  ;;  %v3868_v49 = vpop.f32.mrb[38].mxu1 }
 0x143   : > { %v1181_v50 = vmax.f32 %v1089_v45, 0.0  ;;  %v1092_v51 = vadd.f32 %v3868_v49, %v4468_v47  ;;  %v1083_v52 = vpop.f32.mrb[39].mxu1 }
 0x144   : > { %v1179_v53 = vmax.f32 %v1081_v48, 0.0  ;;  %v1084_v54 = vadd.f32 %v4468_v47, %v1083_v52 }
 0x145   : > { %v1182_v56 = vmax.f32 %v1092_v51, 0.0 }
 0x146   : > { %v1180_v26 = vmax.f32 %v1084_v54, 0.0 }
 0x147   : > { %v1218_v57 = vpack.c.bf16 %v1182_v56, %v1181_v50 }
 0x148   : > { %v1217_v58 = vpack.c.bf16 %v1180_v26, %v1179_v53  ;;  %v3871_v59 = vpop.f32.mrb[40].mxu1 }
 0x149   : > { %3922 = vmatmul.mubr.msk.bf16.gmra.mrb[84].mxu1 %vm1262_vm2, %v1210_v0  ;;  %v1105_v60 = vadd.f32 %v3871_v59, %v4468_v47  ;;  %v1096_v61 = vpop.f32.mrb[41].mxu1 }
 0x14a   : > { %3925 = vmatprep.mubr.msk.bf16.mxu1 %vm1262_vm2, %v1211_v14  ;;  %v1097_v62 = vadd.f32 %v4468_v47, %v1096_v61  ;;  %v3872_v63 = vpop.f32.mrb[42].mxu1 }
 0x14b   : > { %v1185_v0 = vmax.f32 %v1105_v60, 0.0  ;;  %v1108_v1 = vadd.f32 %v3872_v63, %v4468_v47  ;;  %v1099_v2 = vpop.f32.mrb[43].mxu1 }
 0x14c   : > { %v1183_v3 = vmax.f32 %v1097_v62, 0.0  ;;  %v1100_v4 = vadd.f32 %v4468_v47, %v1099_v2 }
 0x14d   : > { %v1186_v5 = vmax.f32 %v1108_v1, 0.0 }
 0x14e   : > { %v1184_v55 = vmax.f32 %v1100_v4, 0.0 }
 0x14f   : > { %v1220_v7 = vpack.c.bf16 %v1186_v5, %v1185_v0 }
 0x150   : > { %v1219_v9 = vpack.c.bf16 %v1184_v55, %v1183_v3  ;;  %v3875_v10 = vpop.f32.mrb[44].mxu1 }
 0x151   : > { %3926 = vmatmul.mubr.msk.bf16.gmra.mrb[88].mxu1 %vm1262_vm2, %v1212_v13  ;;  %v1121_v11 = vadd.f32 %v3875_v10, %v4468_v47  ;;  %v1112_v12 = vpop.f32.mrb[45].mxu1 }
 0x152   : > { %3929 = vmatprep.mubr.msk.bf16.mxu1 %vm1262_vm2, %v1213_v30  ;;  %v1113_v13 = vadd.f32 %v4468_v47, %v1112_v12  ;;  %v3876_v14 = vpop.f32.mrb[46].mxu1 }
 0x153   : > { %v1189_v16 = vmax.f32 %v1121_v11, 0.0  ;;  %v1124_v17 = vadd.f32 %v3876_v14, %v4468_v47  ;;  %v1115_v18 = vpop.f32.mrb[47].mxu1 }
 0x154   : > { %v1187_v20 = vmax.f32 %v1113_v13, 0.0  ;;  %v1116_v21 = vadd.f32 %v4468_v47, %v1115_v18  ;;  %v4600_v47 = vld [vmem:[%s5132_s4] ss:$0 sm:$0xff]  ;;  %s4139_s4 = scalar_lea.vmem %s4138_s2, 64 }
 0x155   : > { %v1190_v22 = vmax.f32 %v1124_v17, 0.0  ;;  %p4141_p2 = scmp.lt.s32.totalorder %s4139_s4, %s4133_s20 }
 0x156   : > { %v1188_v23 = vmax.f32 %v1116_v21, 0.0 }
 0x157   : > { %v1222_v24 = vpack.c.bf16 %v1190_v22, %v1189_v16  ;;  %p4142_p3 = por %p4141_p2, %p4140_p1 }
 0x158   : > { %v1221_v27 = vpack.c.bf16 %v1188_v23, %v1187_v20 }
 0x159   : > { %3930 = vmatmul.mubr.msk.bf16.gmra.mrb[92].mxu1 %vm1262_vm2, %v1214_v28  ;;  %p4143_p5 = pnand %p4142_p3, %p4136_p0 }
 0x15a   : > { %3933 = vmatprep.mubr.msk.bf16.mxu1 %vm1262_vm2, %v1215_v29 }
 0x161   : > { %3934 = vmatmul.mubr.msk.bf16.gmra.mrb[96].mxu1 %vm1262_vm2, %v1216_v43 }
 0x162   : > { %3937 = vmatprep.mubr.msk.bf16.mxu1 %vm1262_vm2, %v1217_v58 }
 0x169   : > { %3938 = vmatmul.mubr.msk.bf16.gmra.mrb[100].mxu1 %vm1262_vm2, %v1218_v57 }
 0x16a   : > { %3941 = vmatprep.mubr.msk.bf16.mxu1 %vm1262_vm2, %v1219_v9 }
 0x171   : > { %3942 = vmatmul.mubr.msk.bf16.gmra.mrb[104].mxu1 %vm1262_vm2, %v1220_v7 }
 0x172   : > { %3945 = vmatprep.mubr.msk.bf16.mxu1 %vm1262_vm2, %v1221_v27 }
 0x179   : > { %3946 = vmatmul.mubr.msk.bf16.gmra.mrb[108].mxu1 %vm1262_vm2, %v1222_v24 }
 0x1d4   : > { %v3887_v28 = vpop.f32.mrb[48].mxu1 }
 0x1d5   : > { %v1402_v30 = vadd.f32 %v3887_v28, %v4600_v47  ;;  %v1393_v31 = vpop.f32.mrb[49].mxu1 }
 0x1d6   : > { %v1394_v32 = vadd.f32 %v4600_v47, %v1393_v31  ;;  %v3888_v33 = vpop.f32.mrb[50].mxu1 }
 0x1d7   : > { %v1405_v34 = vadd.f32 %v3888_v33, %v4600_v47  ;;  %v1396_v35 = vpop.f32.mrb[51].mxu1  ;;  %v1650_v37 = vmax.f32 %v1402_v30, 0.0 }
 0x1d8   : > { %v1397_v36 = vadd.f32 %v4600_v47, %v1396_v35  ;;  %v1648_v39 = vmax.f32 %v1394_v32, 0.0 }
 0x1d9   : > { %v1651_v38 = vmax.f32 %v1405_v34, 0.0 }
 0x1da   : > { %v1649_v40 = vmax.f32 %v1397_v36, 0.0 }
 0x1db   : > { %v1713_v41 = vpack.c.bf16 %v1651_v38, %v1650_v37 }
 0x1dc   : > { %v1712_v42 = vpack.c.bf16 %v1649_v40, %v1648_v39  ;;  %v3891_v43 = vpop.f32.mrb[52].mxu1 }
 0x1dd   : > { %v1418_v29 = vadd.f32 %v3891_v43, %v4600_v47  ;;  %v1409_v44 = vpop.f32.mrb[53].mxu1 }
 0x1de   : > { %v1410_v45 = vadd.f32 %v4600_v47, %v1409_v44  ;;  %1885 = vmatmul.mubr.bf16.vlgmr.msra.gmra.mrb[16].mxu0 %v1712_v42  ;;  %v3892_v46 = vpop.f32.mrb[54].mxu1 }
 0x1df   : > { %v1654_v48 = vmax.f32 %v1418_v29, 0.0  ;;  %v1421_v49 = vadd.f32 %v3892_v46, %v4600_v47  ;;  %v1412_v50 = vpop.f32.mrb[55].mxu1  ;;  %1894 = vmatprep.mubr.bf16.mxu0 %v4213_v25 }
 0x1e0   : > { %v1652_v51 = vmax.f32 %v1410_v45, 0.0  ;;  %v1413_v52 = vadd.f32 %v4600_v47, %v1412_v50 }
 0x1e1   : > { %v1655_v53 = vmax.f32 %v1421_v49, 0.0 }
 0x1e2   : > { %v1653_v54 = vmax.f32 %v1413_v52, 0.0 }
 0x1e3   : > { %v1715_v56 = vpack.c.bf16 %v1655_v53, %v1654_v48 }
 0x1e4   : > { %v1714_v26 = vpack.c.bf16 %v1653_v54, %v1652_v51  ;;  %v3895_v57 = vpop.f32.mrb[56].mxu1 }
 0x1e5   : > { %v1434_v58 = vadd.f32 %v3895_v57, %v4600_v47  ;;  %v1425_v59 = vpop.f32.mrb[57].mxu1 }
 0x1e6   : > { %1895 = vmatmul.mubr.bf16.gmra.mrb[20].mxu0 %v1713_v41  ;;  %v1426_v60 = vadd.f32 %v4600_v47, %v1425_v59  ;;  %v3896_v61 = vpop.f32.mrb[58].mxu1 }
 0x1e7   : > { %v1658_v62 = vmax.f32 %v1434_v58, 0.0  ;;  %1904 = vmatprep.mubr.bf16.mxu0 %v4213_v25  ;;  %v1437_v63 = vadd.f32 %v3896_v61, %v4600_v47  ;;  %v1428_v0 = vpop.f32.mrb[59].mxu1 }
 0x1e8   : > { %v1656_v1 = vmax.f32 %v1426_v60, 0.0  ;;  %v1429_v2 = vadd.f32 %v4600_v47, %v1428_v0 }
 0x1e9   : > { %v1659_v3 = vmax.f32 %v1437_v63, 0.0 }
 0x1ea   : > { %v1657_v4 = vmax.f32 %v1429_v2, 0.0 }
 0x1eb   : > { %v1717_v5 = vpack.c.bf16 %v1659_v3, %v1658_v62 }
 0x1ec   : > { %v1716_v55 = vpack.c.bf16 %v1657_v4, %v1656_v1  ;;  %v3899_v6 = vpop.f32.mrb[60].mxu1 }
 0x1ed   : > { %v1450_v7 = vadd.f32 %v3899_v6, %v4600_v47  ;;  %v1441_v8 = vpop.f32.mrb[61].mxu1 }
 0x1ee   : > { %1905 = vmatmul.mubr.bf16.gmra.mrb[24].mxu0 %v1714_v26  ;;  %v1442_v9 = vadd.f32 %v4600_v47, %v1441_v8  ;;  %v3900_v10 = vpop.f32.mrb[62].mxu1 }
 0x1ef   : > { %1914 = vmatprep.mubr.bf16.mxu0 %v4213_v25  ;;  %v1662_v11 = vmax.f32 %v1450_v7, 0.0  ;;  %v1453_v12 = vadd.f32 %v3900_v10, %v4600_v47  ;;  %v1444_v13 = vpop.f32.mrb[63].mxu1 }
 0x1f0   : > { %v1660_v14 = vmax.f32 %v1442_v9, 0.0  ;;  %v1445_v15 = vadd.f32 %v4600_v47, %v1444_v13 }
 0x1f1   : > { %v1663_v16 = vmax.f32 %v1453_v12, 0.0 }
 0x1f2   : > { %v1661_v17 = vmax.f32 %v1445_v15, 0.0 }
 0x1f3   : > { %v4621_v18 = vpack.c.bf16 %v1663_v16, %v1662_v11 }
 0x1f4   : > { %v1718_v19 = vpack.c.bf16 %v1661_v17, %v1660_v14  ;;  %v3903_v20 = vpop.f32.mrb[64].mxu1 }
 0x1f5   : > { %v1466_v21 = vadd.f32 %v3903_v20, %v4600_v47  ;;  %v1457_v22 = vpop.f32.mrb[65].mxu1 }
 0x1f6   : > { %1915 = vmatmul.mubr.bf16.gmra.mrb[28].mxu0 %v1715_v56  ;;  %v1458_v23 = vadd.f32 %v4600_v47, %v1457_v22  ;;  %v3904_v24 = vpop.f32.mrb[66].mxu1 }
 0x1f7   : > { %1924 = vmatprep.mubr.bf16.mxu0 %v4213_v25  ;;  %v1666_v27 = vmax.f32 %v1466_v21, 0.0  ;;  %v1469_v28 = vadd.f32 %v3904_v24, %v4600_v47  ;;  %v1460_v30 = vpop.f32.mrb[67].mxu1 }
 0x1f8   : > { %v1664_v31 = vmax.f32 %v1458_v23, 0.0  ;;  %v1461_v32 = vadd.f32 %v4600_v47, %v1460_v30 }
 0x1f9   : > { %v1667_v33 = vmax.f32 %v1469_v28, 0.0 }
 0x1fa   : > { %v1665_v34 = vmax.f32 %v1461_v32, 0.0 }
 0x1fb   : > { %v4628_v35 = vpack.c.bf16 %v1667_v33, %v1666_v27 }
 0x1fc   : > { %v4630_v36 = vpack.c.bf16 %v1665_v34, %v1664_v31  ;;  %v3907_v37 = vpop.f32.mrb[68].mxu1 }
 0x1fd   : > { %v1482_v38 = vadd.f32 %v3907_v37, %v4600_v47  ;;  %v1473_v39 = vpop.f32.mrb[69].mxu1 }
 0x1fe   : > { %1925 = vmatmul.mubr.bf16.gmra.mrb[32].mxu0 %v1716_v55  ;;  %v1474_v40 = vadd.f32 %v4600_v47, %v1473_v39  ;;  %v3908_v41 = vpop.f32.mrb[70].mxu1 }
 0x1ff   : > { %1934 = vmatprep.mubr.bf16.mxu0 %v4213_v25  ;;  %v1670_v42 = vmax.f32 %v1482_v38, 0.0  ;;  %v1485_v43 = vadd.f32 %v3908_v41, %v4600_v47  ;;  %v1476_v29 = vpop.f32.mrb[71].mxu1 }
 0x200   : > { %v1668_v44 = vmax.f32 %v1474_v40, 0.0  ;;  %v1477_v45 = vadd.f32 %v4600_v47, %v1476_v29 }
 0x201   : > { %v1671_v46 = vmax.f32 %v1485_v43, 0.0 }
 0x202   : > { %v1669_v48 = vmax.f32 %v1477_v45, 0.0 }
 0x203   : > { %v4637_v49 = vpack.c.bf16 %v1671_v46, %v1670_v42 }
 0x204   : > { %v4639_v50 = vpack.c.bf16 %v1669_v48, %v1668_v44  ;;  %v3911_v51 = vpop.f32.mrb[72].mxu1 }
 0x205   : > { %v1498_v52 = vadd.f32 %v3911_v51, %v4600_v47  ;;  %v1489_v53 = vpop.f32.mrb[73].mxu1 }
 0x206   : > { %1935 = vmatmul.mubr.bf16.gmra.mrb[36].mxu0 %v1717_v5  ;;  %v1490_v54 = vadd.f32 %v4600_v47, %v1489_v53  ;;  %v3912_v56 = vpop.f32.mrb[74].mxu1 }
 0x207   : > { %1944 = vmatprep.mubr.bf16.mxu0 %v4213_v25  ;;  %v1674_v26 = vmax.f32 %v1498_v52, 0.0  ;;  %v1501_v57 = vadd.f32 %v3912_v56, %v4600_v47  ;;  %v1492_v58 = vpop.f32.mrb[75].mxu1 }
 0x208   : > { %v1672_v59 = vmax.f32 %v1490_v54, 0.0  ;;  %v1493_v60 = vadd.f32 %v4600_v47, %v1492_v58 }
 0x209   : > { %v1675_v61 = vmax.f32 %v1501_v57, 0.0 }
 0x20a   : > { %v1673_v62 = vmax.f32 %v1493_v60, 0.0 }
 0x20b   : > { %v4646_v63 = vpack.c.bf16 %v1675_v61, %v1674_v26 }
 0x20c   : > { %v4648_v0 = vpack.c.bf16 %v1673_v62, %v1672_v59  ;;  %v3915_v1 = vpop.f32.mrb[76].mxu1 }
 0x20d   : > { %v1514_v2 = vadd.f32 %v3915_v1, %v4600_v47  ;;  %v1505_v3 = vpop.f32.mrb[77].mxu1 }
 0x20e   : > { %1945 = vmatmul.mubr.bf16.gmra.mrb[40].mxu0 %v1718_v19  ;;  %v1506_v4 = vadd.f32 %v4600_v47, %v1505_v3  ;;  %v3916_v5 = vpop.f32.mrb[78].mxu1 }
 0x20f   : > { %1954 = vmatprep.mubr.bf16.mxu0 %v4213_v25  ;;  %v1678_v55 = vmax.f32 %v1514_v2, 0.0  ;;  %v1517_v6 = vadd.f32 %v3916_v5, %v4600_v47  ;;  %v1508_v7 = vpop.f32.mrb[79].mxu1 }
 0x210   : > { %v1676_v8 = vmax.f32 %v1506_v4, 0.0  ;;  %v1509_v9 = vadd.f32 %v4600_v47, %v1508_v7 }
 0x211   : > { %v1679_v10 = vmax.f32 %v1517_v6, 0.0 }
 0x212   : > { %v1677_v11 = vmax.f32 %v1509_v9, 0.0 }
 0x213   : > { %v4655_v12 = vpack.c.bf16 %v1679_v10, %v1678_v55 }
 0x214   : > { %v4657_v13 = vpack.c.bf16 %v1677_v11, %v1676_v8  ;;  %v3919_v14 = vpop.f32.mrb[80].mxu1 }
 0x215   : > { %v1530_v15 = vadd.f32 %v3919_v14, %v4600_v47  ;;  %v1521_v16 = vpop.f32.mrb[81].mxu1 }
 0x216   : > { %1955 = vmatmul.mubr.bf16.gmra.mrb[44].mxu0 %v4621_v18  ;;  %v1522_v17 = vadd.f32 %v4600_v47, %v1521_v16  ;;  %v3920_v19 = vpop.f32.mrb[82].mxu1 }
 0x217   : > { %1964 = vmatprep.mubr.bf16.mxu0 %v4213_v25  ;;  %v1682_v20 = vmax.f32 %v1530_v15, 0.0  ;;  %v1533_v21 = vadd.f32 %v3920_v19, %v4600_v47  ;;  %v1524_v22 = vpop.f32.mrb[83].mxu1 }
 0x218   : > { %v1680_v23 = vmax.f32 %v1522_v17, 0.0  ;;  %v1525_v24 = vadd.f32 %v4600_v47, %v1524_v22 }
 0x219   : > { %v1683_v27 = vmax.f32 %v1533_v21, 0.0 }
 0x21a   : > { %v1681_v28 = vmax.f32 %v1525_v24, 0.0 }
 0x21b   : > { %v4665_v30 = vpack.c.bf16 %v1683_v27, %v1682_v20 }
 0x21c   : > { %v4667_v31 = vpack.c.bf16 %v1681_v28, %v1680_v23  ;;  %v3923_v32 = vpop.f32.mrb[84].mxu1 }
 0x21d   : > { %v1546_v18 = vadd.f32 %v3923_v32, %v4600_v47  ;;  %v1537_v33 = vpop.f32.mrb[85].mxu1 }
 0x21e   : > { %1965 = vmatmul.mubr.bf16.gmra.mrb[48].mxu0 %v4630_v36  ;;  %v1538_v34 = vadd.f32 %v4600_v47, %v1537_v33  ;;  %v3924_v37 = vpop.f32.mrb[86].mxu1 }
 0x21f   : > { %1974 = vmatprep.mubr.bf16.mxu0 %v4213_v25  ;;  %v1686_v38 = vmax.f32 %v1546_v18, 0.0  ;;  %v1549_v39 = vadd.f32 %v3924_v37, %v4600_v47  ;;  %v1540_v40 = vpop.f32.mrb[87].mxu1 }
 0x220   : > { %v1684_v41 = vmax.f32 %v1538_v34, 0.0  ;;  %v1541_v42 = vadd.f32 %v4600_v47, %v1540_v40 }
 0x221   : > { %v1687_v43 = vmax.f32 %v1549_v39, 0.0 }
 0x222   : > { %v1685_v29 = vmax.f32 %v1541_v42, 0.0 }
 0x223   : > { %v4675_v44 = vpack.c.bf16 %v1687_v43, %v1686_v38 }
 0x224   : > { %v4677_v45 = vpack.c.bf16 %v1685_v29, %v1684_v41  ;;  %v3927_v46 = vpop.f32.mrb[88].mxu1 }
 0x225   : > { %v1562_v36 = vadd.f32 %v3927_v46, %v4600_v47  ;;  %v1553_v48 = vpop.f32.mrb[89].mxu1 }
 0x226   : > { %1975 = vmatmul.mubr.bf16.gmra.mrb[52].mxu0 %v4628_v35  ;;  %v1554_v51 = vadd.f32 %v4600_v47, %v1553_v48  ;;  %v3928_v52 = vpop.f32.mrb[90].mxu1 }
 0x227   : > { %1984 = vmatprep.mubr.bf16.mxu0 %v4213_v25  ;;  %v1690_v53 = vmax.f32 %v1562_v36, 0.0  ;;  %v1565_v54 = vadd.f32 %v3928_v52, %v4600_v47  ;;  %v1556_v56 = vpop.f32.mrb[91].mxu1 }
 0x228   : > { %v1688_v26 = vmax.f32 %v1554_v51, 0.0  ;;  %v1557_v57 = vadd.f32 %v4600_v47, %v1556_v56 }
 0x229   : > { %v1691_v58 = vmax.f32 %v1565_v54, 0.0 }
 0x22a   : > { %v1689_v59 = vmax.f32 %v1557_v57, 0.0 }
 0x22b   : > { %v4685_v60 = vpack.c.bf16 %v1691_v58, %v1690_v53 }
 0x22c   : > { %v4687_v61 = vpack.c.bf16 %v1689_v59, %v1688_v26  ;;  %v3931_v62 = vpop.f32.mrb[92].mxu1 }
 0x22d   : > { %v1578_v35 = vadd.f32 %v3931_v62, %v4600_v47  ;;  %v1569_v1 = vpop.f32.mrb[93].mxu1 }
 0x22e   : > { %1985 = vmatmul.mubr.bf16.gmra.mrb[56].mxu0 %v4639_v50  ;;  %v1570_v2 = vadd.f32 %v4600_v47, %v1569_v1  ;;  %v3932_v3 = vpop.f32.mrb[94].mxu1 }
 0x22f   : > { %1994 = vmatprep.mubr.bf16.mxu0 %v4213_v25  ;;  %v1694_v4 = vmax.f32 %v1578_v35, 0.0  ;;  %v1581_v5 = vadd.f32 %v3932_v3, %v4600_v47  ;;  %v1572_v55 = vpop.f32.mrb[95].mxu1 }
 0x230   : > { %v1692_v6 = vmax.f32 %v1570_v2, 0.0  ;;  %v1573_v7 = vadd.f32 %v4600_v47, %v1572_v55 }
 0x231   : > { %v1695_v8 = vmax.f32 %v1581_v5, 0.0 }
 0x232   : > { %v1693_v9 = vmax.f32 %v1573_v7, 0.0 }
 0x233   : > { %v4695_v10 = vpack.c.bf16 %v1695_v8, %v1694_v4 }
 0x234   : > { %v4697_v11 = vpack.c.bf16 %v1693_v9, %v1692_v6  ;;  %v3935_v14 = vpop.f32.mrb[96].mxu1 }
 0x235   : > { %v1594_v50 = vadd.f32 %v3935_v14, %v4600_v47  ;;  %v1585_v15 = vpop.f32.mrb[97].mxu1 }
 0x236   : > { %1995 = vmatmul.mubr.bf16.gmra.mrb[60].mxu0 %v4637_v49  ;;  %v1586_v16 = vadd.f32 %v4600_v47, %v1585_v15  ;;  %v3936_v17 = vpop.f32.mrb[98].mxu1 }
 0x237   : > { %2004 = vmatprep.mubr.bf16.mxu0 %v4213_v25  ;;  %v1698_v19 = vmax.f32 %v1594_v50, 0.0  ;;  %v1597_v20 = vadd.f32 %v3936_v17, %v4600_v47  ;;  %v1588_v21 = vpop.f32.mrb[99].mxu1 }
 0x238   : > { %v1696_v22 = vmax.f32 %v1586_v16, 0.0  ;;  %v1589_v23 = vadd.f32 %v4600_v47, %v1588_v21 }
 0x239   : > { %v1699_v24 = vmax.f32 %v1597_v20, 0.0 }
 0x23a   : > { %v1697_v27 = vmax.f32 %v1589_v23, 0.0 }
 0x23b   : > { %v4705_v28 = vpack.c.bf16 %v1699_v24, %v1698_v19 }
 0x23c   : > { %v4707_v32 = vpack.c.bf16 %v1697_v27, %v1696_v22  ;;  %v3939_v18 = vpop.f32.mrb[100].mxu1 }
 0x23d   : > { %v1610_v49 = vadd.f32 %v3939_v18, %v4600_v47  ;;  %v1601_v33 = vpop.f32.mrb[101].mxu1 }
 0x23e   : > { %2005 = vmatmul.mubr.bf16.gmra.mrb[64].mxu0 %v4648_v0  ;;  %v1602_v34 = vadd.f32 %v4600_v47, %v1601_v33  ;;  %v3940_v37 = vpop.f32.mrb[102].mxu1 }
 0x23f   : > { %2014 = vmatprep.mubr.bf16.mxu0 %v4213_v25  ;;  %v1702_v38 = vmax.f32 %v1610_v49, 0.0  ;;  %v1613_v39 = vadd.f32 %v3940_v37, %v4600_v47  ;;  %v1604_v40 = vpop.f32.mrb[103].mxu1 }
 0x240   : > { %v1700_v41 = vmax.f32 %v1602_v34, 0.0  ;;  %v1605_v42 = vadd.f32 %v4600_v47, %v1604_v40 }
 0x241   : > { %v1703_v43 = vmax.f32 %v1613_v39, 0.0 }
 0x242   : > { %v1701_v29 = vmax.f32 %v1605_v42, 0.0 }
 0x243   : > { %v4715_v46 = vpack.c.bf16 %v1703_v43, %v1702_v38 }
 0x244   : > { %v1738_v36 = vpack.c.bf16 %v1701_v29, %v1700_v41  ;;  %v3943_v48 = vpop.f32.mrb[104].mxu1 }
 0x245   : > { %v1626_v0 = vadd.f32 %v3943_v48, %v4600_v47  ;;  %v1617_v51 = vpop.f32.mrb[105].mxu1 }
 0x246   : > { %2015 = vmatmul.mubr.bf16.gmra.mrb[68].mxu0 %v4646_v63  ;;  %v1618_v52 = vadd.f32 %v4600_v47, %v1617_v51  ;;  %v3944_v53 = vpop.f32.mrb[106].mxu1 }
 0x247   : > { %2024 = vmatprep.mubr.bf16.mxu0 %v4213_v25  ;;  %v1706_v54 = vmax.f32 %v1626_v0, 0.0  ;;  %v1629_v56 = vadd.f32 %v3944_v53, %v4600_v47  ;;  %v1620_v26 = vpop.f32.mrb[107].mxu1 }
 0x248   : > { %v1704_v57 = vmax.f32 %v1618_v52, 0.0  ;;  %v1621_v58 = vadd.f32 %v4600_v47, %v1620_v26 }
 0x249   : > { %v1707_v59 = vmax.f32 %v1629_v56, 0.0 }
 0x24a   : > { %v1705_v62 = vmax.f32 %v1621_v58, 0.0 }
 0x24b   : > { %v4723_v35 = vpack.c.bf16 %v1707_v59, %v1706_v54 }
 0x24c   : > { %v4725_v1 = vpack.c.bf16 %v1705_v62, %v1704_v57  ;;  %v3947_v2 = vpop.f32.mrb[108].mxu1 }
 0x24d   : > { %v1642_v63 = vadd.f32 %v3947_v2, %v4600_v47  ;;  %v1633_v3 = vpop.f32.mrb[109].mxu1 }
 0x24e   : > { %2025 = vmatmul.mubr.bf16.gmra.mrb[72].mxu0 %v4657_v13  ;;  %v1634_v4 = vadd.f32 %v4600_v47, %v1633_v3  ;;  %v3948_v5 = vpop.f32.mrb[110].mxu1 }
 0x24f   : > { %2034 = vmatprep.mubr.bf16.mxu0 %v4213_v25  ;;  %v1710_v55 = vmax.f32 %v1642_v63, 0.0  ;;  %v1645_v6 = vadd.f32 %v3948_v5, %v4600_v47  ;;  %v1636_v7 = vpop.f32.mrb[111].mxu1 }
 0x250   : > { %v1708_v8 = vmax.f32 %v1634_v4, 0.0  ;;  %v1637_v9 = vadd.f32 %v4600_v47, %v1636_v7  ;;  %v1762_v47 = vlaneseq }
 0x251   : > { %v1711_v14 = vmax.f32 %v1645_v6, 0.0 }
 0x252   : > { %v1709_v50 = vmax.f32 %v1637_v9, 0.0  ;;  %vm4892_vm3 = vcmp.lt.s32.totalorder %v1762_v47, 256 }
 0x253   : > { %v4733_v15 = vpack.c.bf16 %v1711_v14, %v1710_v55 }
 0x254   : > { %v4735_v16 = vpack.c.bf16 %v1709_v50, %v1708_v8 }
 0x256   : > { %2035 = vmatmul.mubr.bf16.gmra.mrb[76].mxu0 %v4655_v12  ;;  %v4760_v12 = vshrl.u32 %v1762_v47, 7 }
 0x257   : > { %2044 = vmatprep.mubr.bf16.mxu0 %v4213_v25 }
 0x258   : > { %v1764_v13 = vsub.s32 0, %v4760_v12 }
 0x25e   : > { %2045 = vmatmul.mubr.bf16.gmra.mrb[80].mxu0 %v4667_v31 }
 0x25f   : > { %2054 = vmatprep.mubr.bf16.mxu0 %v4213_v25 }
 0x266   : > { %2055 = vmatmul.mubr.bf16.gmra.mrb[84].mxu0 %v4665_v30  ;;  %v1760_v30 = vld [vmem:[%s5108_s6] sm:$0x3] }
 0x267   : > { %2064 = vmatprep.mubr.bf16.mxu0 %v4213_v25 }
 0x26e   : > { %2065 = vmatmul.mubr.bf16.gmra.mrb[88].mxu0 %v4677_v45 }
 0x26f   : > { %2074 = vmatprep.mubr.bf16.mxu0 %v4213_v25 }
 0x276   : > { %2075 = vmatmul.mubr.bf16.gmra.mrb[92].mxu0 %v4675_v44  ;;  %v1768_v44 = vsub.s32 1, %v4760_v12 }
 0x277   : > { %2084 = vmatprep.mubr.bf16.mxu0 %v4213_v25 }
 0x27e   : > { %2085 = vmatmul.mubr.bf16.gmra.mrb[96].mxu0 %v4687_v61  ;;  %v4770_v61 = vrot.slane %v1760_v30, %v1764_v13 }
 0x27f   : > { %2094 = vmatprep.mubr.bf16.mxu0 %v4213_v25 }
 0x286   : > { %2095 = vmatmul.mubr.bf16.gmra.mrb[100].mxu0 %v4685_v60 }
 0x287   : > { %2104 = vmatprep.mubr.bf16.mxu0 %v4213_v25 }
 0x28e   : > { %2105 = vmatmul.mubr.bf16.gmra.mrb[104].mxu0 %v4697_v11  ;;  %v4774_v11 = vrot.slane %v1760_v30, %v1768_v44 }
 0x28f   : > { %2114 = vmatprep.mubr.bf16.mxu0 %v4213_v25 }
 0x296   : > { %2115 = vmatmul.mubr.bf16.gmra.mrb[108].mxu0 %v4695_v10 }
 0x297   : > { %2124 = vmatprep.mubr.bf16.mxu0 %v4213_v25 }
 0x29e   : > { %2125 = vmatmul.mubr.bf16.gmra.mrb[112].mxu0 %v4707_v32 }
 0x29f   : > { %2134 = vmatprep.mubr.bf16.mxu0 %v4213_v25 }
 0x2a6   : > { %2135 = vmatmul.mubr.bf16.gmra.mrb[116].mxu0 %v4705_v28 }
 0x2a7   : > { %2144 = vmatprep.mubr.bf16.mxu0 %v4213_v25 }
 0x2ae   : > { %2145 = vmatmul.mubr.bf16.gmra.mrb[120].mxu0 %v1738_v36 }
 0x2af   : > { %2154 = vmatprep.mubr.bf16.mxu0 %v4213_v25 }
 0x2b1   : > { %v1886_v31 = vpop.f32.mrb[16].mxu0 }
 0x2b2   : > { %v1888_v45 = vpop.f32.mrb[17].mxu0  ;;  %v1887_v17 = vadd.f32 %v1886_v31, %v4770_v61 }
 0x2b3   : > { %v1890_v60 = vpop.f32.mrb[18].mxu0  ;;  %v1889_v19 = vadd.f32 %v1888_v45, %v4774_v11 }
 0x2b4   : > { %v1892_v10 = vpop.f32.mrb[19].mxu0  ;;  %v1891_v21 = vadd.f32 %v1890_v60, %v4770_v61  ;;  %v2205_v32 = vmax.f32 %v1887_v17, 0.0 }
 0x2b5   : > { %v1893_v24 = vadd.f32 %v1892_v10, %v4774_v11  ;;  %v2206_v34 = vmax.f32 %v1889_v19, 0.0 }
 0x2b6   : > { %2155 = vmatmul.mubr.bf16.gmra.mrb[124].mxu0 %v4715_v46  ;;  %v2207_v39 = vmax.f32 %v1891_v21, 0.0 }
 0x2b7   : > { %2164 = vmatprep.mubr.bf16.mxu0 %v4213_v25  ;;  %v2208_v42 = vmax.f32 %v1893_v24, 0.0 }
 0x2b9   : > { %v1896_v20 = vpop.f32.mrb[20].mxu0 }
 0x2ba   : > { %v1897_v22 = vadd.f32 %v1896_v20, %v4770_v61  ;;  %v1898_v23 = vpop.f32.mrb[21].mxu0 }
 0x2bb   : > { %v1899_v27 = vadd.f32 %v1898_v23, %v4774_v11  ;;  %v1900_v28 = vpop.f32.mrb[22].mxu0 }
 0x2bc   : > { %v2209_v18 = vmax.f32 %v1897_v22, 0.0  ;;  %v1901_v49 = vadd.f32 %v1900_v28, %v4770_v61  ;;  %v1902_v33 = vpop.f32.mrb[23].mxu0 }
 0x2bd   : > { %v2210_v37 = vmax.f32 %v1899_v27, 0.0  ;;  %v1903_v38 = vadd.f32 %v1902_v33, %v4774_v11 }
 0x2be   : > { %v2899_v40 = vmax.f32 %v2205_v32, %v2209_v18  ;;  %v2211_v41 = vmax.f32 %v1901_v49, 0.0  ;;  %2165 = vmatmul.mubr.bf16.gmra.mrb[128].mxu0 %v4725_v1 }
 0x2bf   : > { %v2968_v43 = vmax.f32 %v2206_v34, %v2210_v37  ;;  %v2212_v29 = vmax.f32 %v1903_v38, 0.0  ;;  %2174 = vmatprep.mubr.bf16.mxu0 %v4213_v25 }
 0x2c0   : > { %v2900_v46 = vmax.f32 %v2207_v39, %v2211_v41  ;;  %v4105_v39 = vld [vmem:[%s5109_s7 + $0x40] sm:$0xff]  }
 0x2c1   : > { %v2969_v36 = vmax.f32 %v2208_v42, %v2212_v29  ;;  %v1906_v48 = vpop.f32.mrb[24].mxu0  ;;  %3775 = vmatprep.subr.bf16.mxu1 %v4105_v39 }
 0x2c2   : > { %v1907_v0 = vadd.f32 %v1906_v48, %v4770_v61  ;;  %v1908_v51 = vpop.f32.mrb[25].mxu0 }
 0x2c3   : > { %v1909_v52 = vadd.f32 %v1908_v51, %v4774_v11  ;;  %v1910_v53 = vpop.f32.mrb[26].mxu0 }
 0x2c4   : > { %v2213_v54 = vmax.f32 %v1907_v0, 0.0  ;;  %v1911_v56 = vadd.f32 %v1910_v53, %v4770_v61  ;;  %v1912_v26 = vpop.f32.mrb[27].mxu0 }
 0x2c5   : > { %v2214_v57 = vmax.f32 %v1909_v52, 0.0  ;;  %v1913_v58 = vadd.f32 %v1912_v26, %v4774_v11 }
 0x2c6   : > { %v2901_v59 = vmax.f32 %v2899_v40, %v2213_v54  ;;  %v2215_v62 = vmax.f32 %v1911_v56, 0.0  ;;  %2175 = vmatmul.mubr.bf16.gmra.mrb[132].mxu0 %v4723_v35  ;;  %v4106_v40 = vld [vmem:[%s5109_s7] sm:$0xff]  }
 0x2c7   : > { %v2970_v1 = vmax.f32 %v2968_v43, %v2214_v57  ;;  %v2216_v2 = vmax.f32 %v1913_v58, 0.0  ;;  %2184 = vmatprep.mubr.bf16.mxu0 %v4213_v25  ;;  %3776 = vmatpush3.bf16.msra.mxu1 %v4106_v40 }
 0x2c8   : > { %v2902_v63 = vmax.f32 %v2900_v46, %v2215_v62 }
 0x2c9   : > { %v2971_v3 = vmax.f32 %v2969_v36, %v2216_v2  ;;  %v1916_v4 = vpop.f32.mrb[28].mxu0 }
 0x2ca   : > { %v1917_v5 = vadd.f32 %v1916_v4, %v4770_v61  ;;  %v1918_v55 = vpop.f32.mrb[29].mxu0 }
 0x2cb   : > { %v1919_v6 = vadd.f32 %v1918_v55, %v4774_v11  ;;  %v1920_v7 = vpop.f32.mrb[30].mxu0 }
 0x2cc   : > { %v2217_v8 = vmax.f32 %v1917_v5, 0.0  ;;  %v1921_v9 = vadd.f32 %v1920_v7, %v4770_v61  ;;  %v1922_v14 = vpop.f32.mrb[31].mxu0 }
 0x2cd   : > { %v2218_v50 = vmax.f32 %v1919_v6, 0.0  ;;  %v1923_v35 = vadd.f32 %v1922_v14, %v4774_v11 }
 0x2ce   : > { %v2903_v30 = vmax.f32 %v2901_v59, %v2217_v8  ;;  %v2219_v31 = vmax.f32 %v1921_v9, 0.0  ;;  %2185 = vmatmul.mubr.bf16.gmra.mrb[136].mxu0 %v4735_v16 }
 0x2cf   : > { %v2972_v45 = vmax.f32 %v2970_v1, %v2218_v50  ;;  %v2220_v60 = vmax.f32 %v1923_v35, 0.0  ;;  %2194 = vmatprep.mubr.bf16.mxu0 %v4213_v25  ;;  %v4107_v35 = vld [vmem:[%s5109_s7 + $0x48] sm:$0xff]  }
 0x2d0   : > { %v2904_v10 = vmax.f32 %v2902_v63, %v2219_v31  ;;  %3777 = vmatprep.subr.bf16.mxu1 %v4107_v35 }
 0x2d1   : > { %v2973_v17 = vmax.f32 %v2971_v3, %v2220_v60  ;;  %v1926_v19 = vpop.f32.mrb[32].mxu0 }
 0x2d2   : > { %v1927_v20 = vadd.f32 %v1926_v19, %v4770_v61  ;;  %v1928_v21 = vpop.f32.mrb[33].mxu0 }
 0x2d3   : > { %v1929_v22 = vadd.f32 %v1928_v21, %v4774_v11  ;;  %v1930_v23 = vpop.f32.mrb[34].mxu0 }
 0x2d4   : > { %v2221_v24 = vmax.f32 %v1927_v20, 0.0  ;;  %v1931_v27 = vadd.f32 %v1930_v23, %v4770_v61  ;;  %v1932_v28 = vpop.f32.mrb[35].mxu0 }
 0x2d5   : > { %v2222_v32 = vmax.f32 %v1929_v22, 0.0  ;;  %v1933_v16 = vadd.f32 %v1932_v28, %v4774_v11 }
 0x2d6   : > { %v2905_v18 = vmax.f32 %v2903_v30, %v2221_v24  ;;  %v2223_v49 = vmax.f32 %v1931_v27, 0.0  ;;  %2195 = vmatmul.mubr.bf16.gmra.mrb[140].mxu0 %v4733_v15  ;;  %v4108_v30 = vld [vmem:[%s5109_s7 + $0x8] sm:$0xff]  }
 0x2d7   : > { %v2974_v25 = vmax.f32 %v2972_v45, %v2222_v32  ;;  %v2224_v33 = vmax.f32 %v1933_v16, 0.0  ;;  %3778 = vmatpush3.bf16.msra.mxu1 %v4108_v30 }
 0x2d8   : > { %v2906_v34 = vmax.f32 %v2904_v10, %v2223_v49 }
 0x2d9   : > { %v2975_v37 = vmax.f32 %v2973_v17, %v2224_v33  ;;  %v1936_v38 = vpop.f32.mrb[36].mxu0 }
 0x2da   : > { %v1937_v41 = vadd.f32 %v1936_v38, %v4770_v61  ;;  %v1938_v42 = vpop.f32.mrb[37].mxu0 }
 0x2db   : > { %v1939_v43 = vadd.f32 %v1938_v42, %v4774_v11  ;;  %v1940_v29 = vpop.f32.mrb[38].mxu0 }
 0x2dc   : > { %v2225_v15 = vmax.f32 %v1937_v41, 0.0  ;;  %v1941_v46 = vadd.f32 %v1940_v29, %v4770_v61  ;;  %v1942_v36 = vpop.f32.mrb[39].mxu0 }
 0x2dd   : > { %v2226_v48 = vmax.f32 %v1939_v43, 0.0  ;;  %v1943_v0 = vadd.f32 %v1942_v36, %v4774_v11 }
 0x2de   : > { %v2907_v51 = vmax.f32 %v2905_v18, %v2225_v15  ;;  %v2227_v52 = vmax.f32 %v1941_v46, 0.0 }
 0x2df   : > { %v2976_v53 = vmax.f32 %v2974_v25, %v2226_v48  ;;  %v2228_v54 = vmax.f32 %v1943_v0, 0.0  ;;  %v4109_v0 = vld [vmem:[%s5109_s7 + $0x50] sm:$0xff]  }
 0x2e0   : > { %v2908_v56 = vmax.f32 %v2906_v34, %v2227_v52  ;;  %3779 = vmatprep.subr.bf16.mxu1 %v4109_v0 }
 0x2e1   : > { %v2977_v26 = vmax.f32 %v2975_v37, %v2228_v54  ;;  %v1946_v57 = vpop.f32.mrb[40].mxu0 }
 0x2e2   : > { %v1947_v58 = vadd.f32 %v1946_v57, %v4770_v61  ;;  %v1948_v59 = vpop.f32.mrb[41].mxu0 }
 0x2e3   : > { %v1949_v62 = vadd.f32 %v1948_v59, %v4774_v11  ;;  %v1950_v1 = vpop.f32.mrb[42].mxu0 }
 0x2e4   : > { %v2229_v2 = vmax.f32 %v1947_v58, 0.0  ;;  %v1951_v63 = vadd.f32 %v1950_v1, %v4770_v61  ;;  %v1952_v3 = vpop.f32.mrb[43].mxu0 }
 0x2e5   : > { %v2230_v4 = vmax.f32 %v1949_v62, 0.0  ;;  %v1953_v5 = vadd.f32 %v1952_v3, %v4774_v11 }
 0x2e6   : > { %v2909_v55 = vmax.f32 %v2907_v51, %v2229_v2  ;;  %v2231_v6 = vmax.f32 %v1951_v63, 0.0  ;;  %v4110_v51 = vld [vmem:[%s5109_s7 + $0x10] sm:$0xff]  }
 0x2e7   : > { %v2978_v7 = vmax.f32 %v2976_v53, %v2230_v4  ;;  %v2232_v8 = vmax.f32 %v1953_v5, 0.0  ;;  %3780 = vmatpush3.bf16.msra.mxu1 %v4110_v51 }
 0x2e8   : > { %v2910_v9 = vmax.f32 %v2908_v56, %v2231_v6 }
 0x2e9   : > { %v2979_v14 = vmax.f32 %v2977_v26, %v2232_v8  ;;  %v1956_v50 = vpop.f32.mrb[44].mxu0 }
 0x2ea   : > { %v1957_v31 = vadd.f32 %v1956_v50, %v4770_v61  ;;  %v1958_v45 = vpop.f32.mrb[45].mxu0 }
 0x2eb   : > { %v1959_v60 = vadd.f32 %v1958_v45, %v4774_v11  ;;  %v1960_v10 = vpop.f32.mrb[46].mxu0 }
 0x2ec   : > { %v2233_v17 = vmax.f32 %v1957_v31, 0.0  ;;  %v1961_v19 = vadd.f32 %v1960_v10, %v4770_v61  ;;  %v1962_v20 = vpop.f32.mrb[47].mxu0 }
 0x2ed   : > { %v2234_v21 = vmax.f32 %v1959_v60, 0.0  ;;  %v1963_v22 = vadd.f32 %v1962_v20, %v4774_v11 }
 0x2ee   : > { %v2911_v23 = vmax.f32 %v2909_v55, %v2233_v17  ;;  %v2235_v24 = vmax.f32 %v1961_v19, 0.0 }
 0x2ef   : > { %v2980_v27 = vmax.f32 %v2978_v7, %v2234_v21  ;;  %v2236_v28 = vmax.f32 %v1963_v22, 0.0  ;;  %v4111_v22 = vld [vmem:[%s5109_s7 + $0x58] sm:$0xff]  }
 0x2f0   : > { %v2912_v32 = vmax.f32 %v2910_v9, %v2235_v24  ;;  %3781 = vmatprep.subr.bf16.mxu1 %v4111_v22 }
 0x2f1   : > { %v2981_v16 = vmax.f32 %v2979_v14, %v2236_v28  ;;  %v1966_v18 = vpop.f32.mrb[48].mxu0 }
 0x2f2   : > { %v1967_v49 = vadd.f32 %v1966_v18, %v4770_v61  ;;  %v1968_v25 = vpop.f32.mrb[49].mxu0 }
 0x2f3   : > { %v1969_v33 = vadd.f32 %v1968_v25, %v4774_v11  ;;  %v1970_v34 = vpop.f32.mrb[50].mxu0 }
 0x2f4   : > { %v2237_v37 = vmax.f32 %v1967_v49, 0.0  ;;  %v1971_v38 = vadd.f32 %v1970_v34, %v4770_v61  ;;  %v1972_v39 = vpop.f32.mrb[51].mxu0 }
 0x2f5   : > { %v2238_v40 = vmax.f32 %v1969_v33, 0.0  ;;  %v1973_v41 = vadd.f32 %v1972_v39, %v4774_v11 }
 0x2f6   : > { %v2913_v42 = vmax.f32 %v2911_v23, %v2237_v37  ;;  %v2239_v43 = vmax.f32 %v1971_v38, 0.0  ;;  %v4112_v23 = vld [vmem:[%s5109_s7 + $0x18] sm:$0xff]  }
 0x2f7   : > { %v2982_v29 = vmax.f32 %v2980_v27, %v2238_v40  ;;  %v2240_v15 = vmax.f32 %v1973_v41, 0.0  ;;  %3782 = vmatpush3.bf16.msra.mxu1 %v4112_v23 }
 0x2f8   : > { %v2914_v46 = vmax.f32 %v2912_v32, %v2239_v43 }
 0x2f9   : > { %v2983_v36 = vmax.f32 %v2981_v16, %v2240_v15  ;;  %v1976_v48 = vpop.f32.mrb[52].mxu0 }
 0x2fa   : > { %v1977_v52 = vadd.f32 %v1976_v48, %v4770_v61  ;;  %v1978_v53 = vpop.f32.mrb[53].mxu0 }
 0x2fb   : > { %v1979_v54 = vadd.f32 %v1978_v53, %v4774_v11  ;;  %v1980_v56 = vpop.f32.mrb[54].mxu0 }
 0x2fc   : > { %v2241_v26 = vmax.f32 %v1977_v52, 0.0  ;;  %v1981_v57 = vadd.f32 %v1980_v56, %v4770_v61  ;;  %v1982_v58 = vpop.f32.mrb[55].mxu0 }
 0x2fd   : > { %v2242_v59 = vmax.f32 %v1979_v54, 0.0  ;;  %v1983_v62 = vadd.f32 %v1982_v58, %v4774_v11 }
 0x2fe   : > { %v2915_v1 = vmax.f32 %v2913_v42, %v2241_v26  ;;  %v2243_v2 = vmax.f32 %v1981_v57, 0.0 }
 0x2ff   : > { %v2984_v63 = vmax.f32 %v2982_v29, %v2242_v59  ;;  %v2244_v3 = vmax.f32 %v1983_v62, 0.0  ;;  %v4113_v62 = vld [vmem:[%s5109_s7 + $0x60] sm:$0xff]  }
 0x300   : > { %v2916_v4 = vmax.f32 %v2914_v46, %v2243_v2  ;;  %3783 = vmatprep.subr.bf16.mxu1 %v4113_v62 }
 0x301   : > { %v2985_v5 = vmax.f32 %v2983_v36, %v2244_v3  ;;  %v1986_v55 = vpop.f32.mrb[56].mxu0 }
 0x302   : > { %v1987_v6 = vadd.f32 %v1986_v55, %v4770_v61  ;;  %v1988_v7 = vpop.f32.mrb[57].mxu0 }
 0x303   : > { %v1989_v8 = vadd.f32 %v1988_v7, %v4774_v11  ;;  %v1990_v9 = vpop.f32.mrb[58].mxu0 }
 0x304   : > { %v2245_v14 = vmax.f32 %v1987_v6, 0.0  ;;  %v1991_v50 = vadd.f32 %v1990_v9, %v4770_v61  ;;  %v1992_v35 = vpop.f32.mrb[59].mxu0 }
 0x305   : > { %v2246_v30 = vmax.f32 %v1989_v8, 0.0  ;;  %v1993_v31 = vadd.f32 %v1992_v35, %v4774_v11 }
 0x306   : > { %v2917_v45 = vmax.f32 %v2915_v1, %v2245_v14  ;;  %v2247_v60 = vmax.f32 %v1991_v50, 0.0  ;;  %v4114_v1 = vld [vmem:[%s5109_s7 + $0x20] sm:$0xff]  }
 0x307   : > { %v2986_v10 = vmax.f32 %v2984_v63, %v2246_v30  ;;  %v2248_v17 = vmax.f32 %v1993_v31, 0.0  ;;  %3784 = vmatpush3.bf16.msra.mxu1 %v4114_v1 }
 0x308   : > { %v2918_v19 = vmax.f32 %v2916_v4, %v2247_v60 }
 0x309   : > { %v2987_v20 = vmax.f32 %v2985_v5, %v2248_v17  ;;  %v1996_v21 = vpop.f32.mrb[60].mxu0 }
 0x30a   : > { %v1997_v24 = vadd.f32 %v1996_v21, %v4770_v61  ;;  %v1998_v27 = vpop.f32.mrb[61].mxu0 }
 0x30b   : > { %v1999_v28 = vadd.f32 %v1998_v27, %v4774_v11  ;;  %v2000_v32 = vpop.f32.mrb[62].mxu0 }
 0x30c   : > { %v2249_v16 = vmax.f32 %v1997_v24, 0.0  ;;  %v2001_v18 = vadd.f32 %v2000_v32, %v4770_v61  ;;  %v2002_v49 = vpop.f32.mrb[63].mxu0 }
 0x30d   : > { %v2250_v25 = vmax.f32 %v1999_v28, 0.0  ;;  %v2003_v33 = vadd.f32 %v2002_v49, %v4774_v11 }
 0x30e   : > { %v2919_v34 = vmax.f32 %v2917_v45, %v2249_v16  ;;  %v2251_v37 = vmax.f32 %v2001_v18, 0.0 }
 0x30f   : > { %v2988_v38 = vmax.f32 %v2986_v10, %v2250_v25  ;;  %v2252_v39 = vmax.f32 %v2003_v33, 0.0  ;;  %v4115_v33 = vld [vmem:[%s5109_s7 + $0x68] sm:$0xff]  }
 0x310   : > { %v2920_v40 = vmax.f32 %v2918_v19, %v2251_v37  ;;  %3785 = vmatprep.subr.bf16.mxu1 %v4115_v33  ;;  %v4117_v33 = vld [vmem:[%s5109_s7 + $0x70] sm:$0xff]  }
 0x311   : > { %v2989_v41 = vmax.f32 %v2987_v20, %v2252_v39  ;;  %v2006_v42 = vpop.f32.mrb[64].mxu0 }
 0x312   : > { %v2007_v43 = vadd.f32 %v2006_v42, %v4770_v61  ;;  %v2008_v29 = vpop.f32.mrb[65].mxu0 }
 0x313   : > { %v2009_v15 = vadd.f32 %v2008_v29, %v4774_v11  ;;  %v2010_v46 = vpop.f32.mrb[66].mxu0 }
 0x314   : > { %v2253_v36 = vmax.f32 %v2007_v43, 0.0  ;;  %v2011_v48 = vadd.f32 %v2010_v46, %v4770_v61  ;;  %v2012_v0 = vpop.f32.mrb[67].mxu0 }
 0x315   : > { %v2254_v51 = vmax.f32 %v2009_v15, 0.0  ;;  %v2013_v52 = vadd.f32 %v2012_v0, %v4774_v11 }
 0x316   : > { %v2921_v53 = vmax.f32 %v2919_v34, %v2253_v36  ;;  %v2255_v54 = vmax.f32 %v2011_v48, 0.0  ;;  %v4116_v34 = vld [vmem:[%s5109_s7 + $0x28] sm:$0xff]  }
 0x317   : > { %v2990_v56 = vmax.f32 %v2988_v38, %v2254_v51  ;;  %v2256_v26 = vmax.f32 %v2013_v52, 0.0  ;;  %3786 = vmatpush3.bf16.msra.mxu1 %v4116_v34  ;;  %v4118_v34 = vld [vmem:[%s5109_s7 + $0x30] sm:$0xff]  }
 0x318   : > { %v2922_v57 = vmax.f32 %v2920_v40, %v2255_v54  ;;  %3787 = vmatprep.subr.bf16.mxu1 %v4117_v33 }
 0x319   : > { %v2991_v58 = vmax.f32 %v2989_v41, %v2256_v26  ;;  %v2016_v59 = vpop.f32.mrb[68].mxu0 }
 0x31a   : > { %v2017_v2 = vadd.f32 %v2016_v59, %v4770_v61  ;;  %v2018_v63 = vpop.f32.mrb[69].mxu0 }
 0x31b   : > { %v2019_v3 = vadd.f32 %v2018_v63, %v4774_v11  ;;  %v2020_v4 = vpop.f32.mrb[70].mxu0  ;;  %3788 = vmatpush3.bf16.msra.mxu1 %v4118_v34 }
 0x31c   : > { %v2257_v5 = vmax.f32 %v2017_v2, 0.0  ;;  %v2021_v55 = vadd.f32 %v2020_v4, %v4770_v61  ;;  %v2022_v6 = vpop.f32.mrb[71].mxu0 }
 0x31d   : > { %v2258_v7 = vmax.f32 %v2019_v3, 0.0  ;;  %v2023_v8 = vadd.f32 %v2022_v6, %v4774_v11 }
 0x31e   : > { %v2923_v9 = vmax.f32 %v2921_v53, %v2257_v5  ;;  %v2259_v14 = vmax.f32 %v2021_v55, 0.0 }
 0x31f   : > { %v2992_v50 = vmax.f32 %v2990_v56, %v2258_v7  ;;  %v2260_v35 = vmax.f32 %v2023_v8, 0.0 }
 0x320   : > { %v2924_v30 = vmax.f32 %v2922_v57, %v2259_v14 }
 0x321   : > { %v2993_v31 = vmax.f32 %v2991_v58, %v2260_v35  ;;  %v2026_v45 = vpop.f32.mrb[72].mxu0  ;;  %v4122_v35 = vld [vmem:[%s5111_s9 + $0x8] sm:$0xff]  }
 0x322   : > { %v2027_v60 = vadd.f32 %v2026_v45, %v4770_v61  ;;  %v2028_v10 = vpop.f32.mrb[73].mxu0 }
 0x323   : > { %v2029_v17 = vadd.f32 %v2028_v10, %v4774_v11  ;;  %v2030_v19 = vpop.f32.mrb[74].mxu0 }
 0x324   : > { %v2261_v20 = vmax.f32 %v2027_v60, 0.0  ;;  %v2031_v21 = vadd.f32 %v2030_v19, %v4770_v61  ;;  %v2032_v22 = vpop.f32.mrb[75].mxu0 }
 0x325   : > { %v2262_v23 = vmax.f32 %v2029_v17, 0.0  ;;  %v2033_v24 = vadd.f32 %v2032_v22, %v4774_v11 }
 0x326   : > { %v2925_v27 = vmax.f32 %v2923_v9, %v2261_v20  ;;  %v2263_v28 = vmax.f32 %v2031_v21, 0.0  ;;  %v4214_v20 = vmov -inf  }
 0x327   : > { %v2994_v32 = vmax.f32 %v2992_v50, %v2262_v23  ;;  %v2264_v16 = vmax.f32 %v2033_v24, 0.0  ;;  %2340 = vst.msk [vmem:[%s4901_s0] sm:$0x3] %vm4892_vm3, %v4214_v20 }
 0x328   : > { %v2926_v18 = vmax.f32 %v2924_v30, %v2263_v28 }
 0x329   : > { %v2995_v49 = vmax.f32 %v2993_v31, %v2264_v16  ;;  %v2036_v25 = vpop.f32.mrb[76].mxu0 }
 0x32a   : > { %v2037_v37 = vadd.f32 %v2036_v25, %v4770_v61  ;;  %v2038_v38 = vpop.f32.mrb[77].mxu0 }
 0x32b   : > { %v2039_v39 = vadd.f32 %v2038_v38, %v4774_v11  ;;  %v2040_v40 = vpop.f32.mrb[78].mxu0 }
 0x32c   : > { %v2265_v41 = vmax.f32 %v2037_v37, 0.0  ;;  %v2041_v42 = vadd.f32 %v2040_v40, %v4770_v61  ;;  %v2042_v43 = vpop.f32.mrb[79].mxu0  ;;  %v4119_v37 = vld [vmem:[%s5109_s7 + $0x78] sm:$0xff]  }
 0x32d   : > { %v2266_v29 = vmax.f32 %v2039_v39, 0.0  ;;  %v2043_v15 = vadd.f32 %v2042_v43, %v4774_v11  ;;  %3789 = vmatprep.subr.bf16.mxu1 %v4119_v37 }
 0x32e   : > { %v2927_v46 = vmax.f32 %v2925_v27, %v2265_v41  ;;  %v2267_v36 = vmax.f32 %v2041_v42, 0.0 }
 0x32f   : > { %v2996_v48 = vmax.f32 %v2994_v32, %v2266_v29  ;;  %v2268_v0 = vmax.f32 %v2043_v15, 0.0  ;;  %v4120_v29 = vld [vmem:[%s5109_s7 + $0x38] sm:$0xff]  }
 0x330   : > { %v2928_v51 = vmax.f32 %v2926_v18, %v2267_v36  ;;  %3790 = vmatpush3.bf16.msra.mxu1 %v4120_v29 }
 0x331   : > { %v2997_v52 = vmax.f32 %v2995_v49, %v2268_v0  ;;  %v2046_v53 = vpop.f32.mrb[80].mxu0 }
 0x332   : > { %v2047_v54 = vadd.f32 %v2046_v53, %v4770_v61  ;;  %v2048_v56 = vpop.f32.mrb[81].mxu0 }
 0x333   : > { %v2049_v26 = vadd.f32 %v2048_v56, %v4774_v11  ;;  %v2050_v57 = vpop.f32.mrb[82].mxu0 }
 0x334   : > { %v2269_v58 = vmax.f32 %v2047_v54, 0.0  ;;  %v2051_v59 = vadd.f32 %v2050_v57, %v4770_v61  ;;  %v2052_v62 = vpop.f32.mrb[83].mxu0 }
 0x335   : > { %v2270_v1 = vmax.f32 %v2049_v26, 0.0  ;;  %v2053_v2 = vadd.f32 %v2052_v62, %v4774_v11 }
 0x336   : > { %v2929_v63 = vmax.f32 %v2927_v46, %v2269_v58  ;;  %v2271_v3 = vmax.f32 %v2051_v59, 0.0 }
 0x337   : > { %v2998_v4 = vmax.f32 %v2996_v48, %v2270_v1  ;;  %v2272_v5 = vmax.f32 %v2053_v2, 0.0 }
 0x338   : > { %v2930_v55 = vmax.f32 %v2928_v51, %v2271_v3 }
 0x339   : > { %v2999_v6 = vmax.f32 %v2997_v52, %v2272_v5  ;;  %v2056_v7 = vpop.f32.mrb[84].mxu0 }
 0x33a   : > { %v2057_v8 = vadd.f32 %v2056_v7, %v4770_v61  ;;  %v2058_v9 = vpop.f32.mrb[85].mxu0 }
 0x33b   : > { %v2059_v14 = vadd.f32 %v2058_v9, %v4774_v11  ;;  %v2060_v50 = vpop.f32.mrb[86].mxu0 }
 0x33c   : > { %v2273_v30 = vmax.f32 %v2057_v8, 0.0  ;;  %v2061_v31 = vadd.f32 %v2060_v50, %v4770_v61  ;;  %v2062_v45 = vpop.f32.mrb[87].mxu0 }
 0x33d   : > { %v2274_v60 = vmax.f32 %v2059_v14, 0.0  ;;  %v2063_v10 = vadd.f32 %v2062_v45, %v4774_v11  ;;  %v4215_v45 = vmov 0.0  }
 0x33e   : > { %v2931_v17 = vmax.f32 %v2929_v63, %v2273_v30  ;;  %v2275_v19 = vmax.f32 %v2061_v31, 0.0  ;;  %3949 = vmatprep.subr.bf16.mxu1 %v4215_v45  ;;  %2342 = vst.msk [vmem:[%s5040_s1] sm:$0x1] %vm2341_vm6, %v4215_v45 }
 0x33f   : > { %v3000_v47 = vmax.f32 %v2998_v4, %v2274_v60  ;;  %v2276_v21 = vmax.f32 %v2063_v10, 0.0 }
 0x340   : > { %v2932_v22 = vmax.f32 %v2930_v55, %v2275_v19 }
 0x341   : > { %v3001_v23 = vmax.f32 %v2999_v6, %v2276_v21  ;;  %v2066_v24 = vpop.f32.mrb[88].mxu0 }
 0x342   : > { %v2067_v27 = vadd.f32 %v2066_v24, %v4770_v61  ;;  %v2068_v28 = vpop.f32.mrb[89].mxu0 }
 0x343   : > { %v2069_v32 = vadd.f32 %v2068_v28, %v4774_v11  ;;  %v2070_v16 = vpop.f32.mrb[90].mxu0 }
 0x344   : > { %v2277_v18 = vmax.f32 %v2067_v27, 0.0  ;;  %v2071_v49 = vadd.f32 %v2070_v16, %v4770_v61  ;;  %v2072_v25 = vpop.f32.mrb[91].mxu0 }
 0x345   : > { %v2278_v38 = vmax.f32 %v2069_v32, 0.0  ;;  %v2073_v39 = vadd.f32 %v2072_v25, %v4774_v11 }
 0x346   : > { %v2933_v40 = vmax.f32 %v2931_v17, %v2277_v18  ;;  %v2279_v41 = vmax.f32 %v2071_v49, 0.0 }
 0x347   : > { %v3002_v42 = vmax.f32 %v3000_v47, %v2278_v38  ;;  %v2280_v43 = vmax.f32 %v2073_v39, 0.0 }
 0x348   : > { %v2934_v15 = vmax.f32 %v2932_v22, %v2279_v41 }
 0x349   : > { %v3003_v46 = vmax.f32 %v3001_v23, %v2280_v43  ;;  %v2076_v36 = vpop.f32.mrb[92].mxu0 }
 0x34a   : > { %v2077_v48 = vadd.f32 %v2076_v36, %v4770_v61  ;;  %v2078_v0 = vpop.f32.mrb[93].mxu0 }
 0x34b   : > { %v2079_v51 = vadd.f32 %v2078_v0, %v4774_v11  ;;  %v2080_v52 = vpop.f32.mrb[94].mxu0 }
 0x34c   : > { %v2281_v53 = vmax.f32 %v2077_v48, 0.0  ;;  %v2081_v54 = vadd.f32 %v2080_v52, %v4770_v61  ;;  %v2082_v56 = vpop.f32.mrb[95].mxu0 }
 0x34d   : > { %v2282_v26 = vmax.f32 %v2079_v51, 0.0  ;;  %v2083_v57 = vadd.f32 %v2082_v56, %v4774_v11 }
 0x34e   : > { %v2935_v58 = vmax.f32 %v2933_v40, %v2281_v53  ;;  %v2283_v59 = vmax.f32 %v2081_v54, 0.0 }
 0x34f   : > { %v3004_v62 = vmax.f32 %v3002_v42, %v2282_v26  ;;  %v2284_v1 = vmax.f32 %v2083_v57, 0.0 }
 0x350   : > { %v2936_v2 = vmax.f32 %v2934_v15, %v2283_v59 }
 0x351   : > { %v3005_v63 = vmax.f32 %v3003_v46, %v2284_v1  ;;  %v2086_v3 = vpop.f32.mrb[96].mxu0 }
 0x352   : > { %v2087_v4 = vadd.f32 %v2086_v3, %v4770_v61  ;;  %v2088_v5 = vpop.f32.mrb[97].mxu0 }
 0x353   : > { %v2089_v55 = vadd.f32 %v2088_v5, %v4774_v11  ;;  %v2090_v6 = vpop.f32.mrb[98].mxu0 }
 0x354   : > { %v2285_v7 = vmax.f32 %v2087_v4, 0.0  ;;  %v2091_v8 = vadd.f32 %v2090_v6, %v4770_v61  ;;  %v2092_v9 = vpop.f32.mrb[99].mxu0 }
 0x355   : > { %v2286_v14 = vmax.f32 %v2089_v55, 0.0  ;;  %v2093_v50 = vadd.f32 %v2092_v9, %v4774_v11 }
 0x356   : > { %v2937_v30 = vmax.f32 %v2935_v58, %v2285_v7  ;;  %v2287_v31 = vmax.f32 %v2091_v8, 0.0 }
 0x357   : > { %v3006_v60 = vmax.f32 %v3004_v62, %v2286_v14  ;;  %v2288_v10 = vmax.f32 %v2093_v50, 0.0 }
 0x358   : > { %v2938_v17 = vmax.f32 %v2936_v2, %v2287_v31 }
 0x359   : > { %v3007_v19 = vmax.f32 %v3005_v63, %v2288_v10  ;;  %v2096_v20 = vpop.f32.mrb[100].mxu0 }
 0x35a   : > { %v2097_v47 = vadd.f32 %v2096_v20, %v4770_v61  ;;  %v2098_v21 = vpop.f32.mrb[101].mxu0 }
 0x35b   : > { %v2099_v22 = vadd.f32 %v2098_v21, %v4774_v11  ;;  %v2100_v23 = vpop.f32.mrb[102].mxu0 }
 0x35c   : > { %v2289_v24 = vmax.f32 %v2097_v47, 0.0  ;;  %v2101_v27 = vadd.f32 %v2100_v23, %v4770_v61  ;;  %v2102_v28 = vpop.f32.mrb[103].mxu0 }
 0x35d   : > { %v2290_v32 = vmax.f32 %v2099_v22, 0.0  ;;  %v2103_v16 = vadd.f32 %v2102_v28, %v4774_v11 }
 0x35e   : > { %v2939_v18 = vmax.f32 %v2937_v30, %v2289_v24  ;;  %v2291_v49 = vmax.f32 %v2101_v27, 0.0 }
 0x35f   : > { %v3008_v25 = vmax.f32 %v3006_v60, %v2290_v32  ;;  %v2292_v33 = vmax.f32 %v2103_v16, 0.0 }
 0x360   : > { %v2940_v34 = vmax.f32 %v2938_v17, %v2291_v49 }
 0x361   : > { %v3009_v37 = vmax.f32 %v3007_v19, %v2292_v33  ;;  %v2106_v38 = vpop.f32.mrb[104].mxu0 }
 0x362   : > { %v2107_v39 = vadd.f32 %v2106_v38, %v4770_v61  ;;  %v2108_v40 = vpop.f32.mrb[105].mxu0 }
 0x363   : > { %v2109_v41 = vadd.f32 %v2108_v40, %v4774_v11  ;;  %v2110_v42 = vpop.f32.mrb[106].mxu0 }
 0x364   : > { %v2293_v43 = vmax.f32 %v2107_v39, 0.0  ;;  %v2111_v29 = vadd.f32 %v2110_v42, %v4770_v61  ;;  %v2112_v15 = vpop.f32.mrb[107].mxu0 }
 0x365   : > { %v2294_v46 = vmax.f32 %v2109_v41, 0.0  ;;  %v2113_v36 = vadd.f32 %v2112_v15, %v4774_v11 }
 0x366   : > { %v2941_v48 = vmax.f32 %v2939_v18, %v2293_v43  ;;  %v2295_v0 = vmax.f32 %v2111_v29, 0.0 }
 0x367   : > { %v3010_v51 = vmax.f32 %v3008_v25, %v2294_v46  ;;  %v2296_v52 = vmax.f32 %v2113_v36, 0.0 }
 0x368   : > { %v2942_v53 = vmax.f32 %v2940_v34, %v2295_v0 }
 0x369   : > { %v3011_v54 = vmax.f32 %v3009_v37, %v2296_v52  ;;  %v2116_v56 = vpop.f32.mrb[108].mxu0 }
 0x36a   : > { %v2117_v26 = vadd.f32 %v2116_v56, %v4770_v61  ;;  %v2118_v57 = vpop.f32.mrb[109].mxu0 }
 0x36b   : > { %v2119_v58 = vadd.f32 %v2118_v57, %v4774_v11  ;;  %v2120_v59 = vpop.f32.mrb[110].mxu0 }
 0x36c   : > { %v2297_v62 = vmax.f32 %v2117_v26, 0.0  ;;  %v2121_v1 = vadd.f32 %v2120_v59, %v4770_v61  ;;  %v2122_v2 = vpop.f32.mrb[111].mxu0 }
 0x36d   : > { %v2298_v63 = vmax.f32 %v2119_v58, 0.0  ;;  %v2123_v3 = vadd.f32 %v2122_v2, %v4774_v11 }
 0x36e   : > { %v2943_v4 = vmax.f32 %v2941_v48, %v2297_v62  ;;  %v2299_v5 = vmax.f32 %v2121_v1, 0.0 }
 0x36f   : > { %v3012_v55 = vmax.f32 %v3010_v51, %v2298_v63  ;;  %v2300_v6 = vmax.f32 %v2123_v3, 0.0 }
 0x370   : > { %v2944_v7 = vmax.f32 %v2942_v53, %v2299_v5 }
 0x371   : > { %v3013_v8 = vmax.f32 %v3011_v54, %v2300_v6  ;;  %v2126_v9 = vpop.f32.mrb[112].mxu0 }
 0x372   : > { %v2127_v14 = vadd.f32 %v2126_v9, %v4770_v61  ;;  %v2128_v50 = vpop.f32.mrb[113].mxu0 }
 0x373   : > { %v2129_v30 = vadd.f32 %v2128_v50, %v4774_v11  ;;  %v2130_v31 = vpop.f32.mrb[114].mxu0 }
 0x374   : > { %v2301_v60 = vmax.f32 %v2127_v14, 0.0  ;;  %v2131_v10 = vadd.f32 %v2130_v31, %v4770_v61  ;;  %v2132_v17 = vpop.f32.mrb[115].mxu0 }
 0x375   : > { %v2302_v19 = vmax.f32 %v2129_v30, 0.0  ;;  %v2133_v20 = vadd.f32 %v2132_v17, %v4774_v11 }
 0x376   : > { %v2945_v47 = vmax.f32 %v2943_v4, %v2301_v60  ;;  %v2303_v21 = vmax.f32 %v2131_v10, 0.0 }
 0x377   : > { %v3014_v22 = vmax.f32 %v3012_v55, %v2302_v19  ;;  %v2304_v23 = vmax.f32 %v2133_v20, 0.0 }
 0x378   : > { %v2946_v24 = vmax.f32 %v2944_v7, %v2303_v21 }
 0x379   : > { %v3015_v27 = vmax.f32 %v3013_v8, %v2304_v23  ;;  %v2136_v28 = vpop.f32.mrb[116].mxu0 }
 0x37a   : > { %v2137_v32 = vadd.f32 %v2136_v28, %v4770_v61  ;;  %v2138_v16 = vpop.f32.mrb[117].mxu0 }
 0x37b   : > { %v2139_v18 = vadd.f32 %v2138_v16, %v4774_v11  ;;  %v2140_v49 = vpop.f32.mrb[118].mxu0 }
 0x37c   : > { %v2305_v25 = vmax.f32 %v2137_v32, 0.0  ;;  %v2141_v33 = vadd.f32 %v2140_v49, %v4770_v61  ;;  %v2142_v34 = vpop.f32.mrb[119].mxu0 }
 0x37d   : > { %v2306_v37 = vmax.f32 %v2139_v18, 0.0  ;;  %v2143_v38 = vadd.f32 %v2142_v34, %v4774_v11 }
 0x37e   : > { %v2947_v39 = vmax.f32 %v2945_v47, %v2305_v25  ;;  %v2307_v40 = vmax.f32 %v2141_v33, 0.0 }
 0x37f   : > { %v3016_v41 = vmax.f32 %v3014_v22, %v2306_v37  ;;  %v2308_v42 = vmax.f32 %v2143_v38, 0.0 }
 0x380   : > { %v2948_v43 = vmax.f32 %v2946_v24, %v2307_v40 }
 0x381   : > { %v3017_v29 = vmax.f32 %v3015_v27, %v2308_v42  ;;  %v2146_v15 = vpop.f32.mrb[120].mxu0 }
 0x382   : > { %v2147_v46 = vadd.f32 %v2146_v15, %v4770_v61  ;;  %v2148_v36 = vpop.f32.mrb[121].mxu0 }
 0x383   : > { %v2149_v48 = vadd.f32 %v2148_v36, %v4774_v11  ;;  %v2150_v0 = vpop.f32.mrb[122].mxu0 }
 0x384   : > { %v2309_v51 = vmax.f32 %v2147_v46, 0.0  ;;  %v2151_v52 = vadd.f32 %v2150_v0, %v4770_v61  ;;  %v2152_v53 = vpop.f32.mrb[123].mxu0 }
 0x385   : > { %v2310_v54 = vmax.f32 %v2149_v48, 0.0  ;;  %v2153_v56 = vadd.f32 %v2152_v53, %v4774_v11 }
 0x386   : > { %v2949_v26 = vmax.f32 %v2947_v39, %v2309_v51  ;;  %v2311_v57 = vmax.f32 %v2151_v52, 0.0 }
 0x387   : > { %v3018_v58 = vmax.f32 %v3016_v41, %v2310_v54  ;;  %v2312_v59 = vmax.f32 %v2153_v56, 0.0 }
 0x388   : > { %v2950_v62 = vmax.f32 %v2948_v43, %v2311_v57 }
 0x389   : > { %v3019_v1 = vmax.f32 %v3017_v29, %v2312_v59  ;;  %v2156_v2 = vpop.f32.mrb[124].mxu0 }
 0x38a   : > { %v2157_v63 = vadd.f32 %v2156_v2, %v4770_v61  ;;  %v2158_v3 = vpop.f32.mrb[125].mxu0 }
 0x38b   : > { %v2159_v4 = vadd.f32 %v2158_v3, %v4774_v11  ;;  %v2160_v5 = vpop.f32.mrb[126].mxu0 }
 0x38c   : > { %v2313_v55 = vmax.f32 %v2157_v63, 0.0  ;;  %v2161_v6 = vadd.f32 %v2160_v5, %v4770_v61  ;;  %v2162_v7 = vpop.f32.mrb[127].mxu0 }
 0x38d   : > { %v2314_v8 = vmax.f32 %v2159_v4, 0.0  ;;  %v2163_v9 = vadd.f32 %v2162_v7, %v4774_v11 }
 0x38e   : > { %v2951_v14 = vmax.f32 %v2949_v26, %v2313_v55  ;;  %v2315_v50 = vmax.f32 %v2161_v6, 0.0  ;;  %v2576_v55 = vadd.s32 496, %v4760_v12 }
 0x38f   : > { %v3020_v30 = vmax.f32 %v3018_v58, %v2314_v8  ;;  %v2316_v31 = vmax.f32 %v2163_v9, 0.0 }
 0x390   : > { %v2952_v60 = vmax.f32 %v2950_v62, %v2315_v50  ;;  %vm2640_vm4 = vcmp.lt.s32.totalorder %v2576_v55, 500  ;;  %v4132_v55 = vld [vmem:[%s5113_s11 + $0x18] sm:$0xff]  }
 0x391   : > { %v3021_v10 = vmax.f32 %v3019_v1, %v2316_v31  ;;  %v2166_v17 = vpop.f32.mrb[128].mxu0 }
 0x392   : > { %v2167_v19 = vadd.f32 %v2166_v17, %v4770_v61  ;;  %v2168_v20 = vpop.f32.mrb[129].mxu0 }
 0x393   : > { %v2169_v47 = vadd.f32 %v2168_v20, %v4774_v11  ;;  %v2170_v21 = vpop.f32.mrb[130].mxu0 }
 0x394   : > { %v2317_v22 = vmax.f32 %v2167_v19, 0.0  ;;  %v2171_v23 = vadd.f32 %v2170_v21, %v4770_v61  ;;  %v2172_v24 = vpop.f32.mrb[131].mxu0 }
 0x395   : > { %v2318_v27 = vmax.f32 %v2169_v47, 0.0  ;;  %v2173_v28 = vadd.f32 %v2172_v24, %v4774_v11 }
 0x396   : > { %v2953_v32 = vmax.f32 %v2951_v14, %v2317_v22  ;;  %v2319_v16 = vmax.f32 %v2171_v23, 0.0 }
 0x397   : > { %v3022_v18 = vmax.f32 %v3020_v30, %v2318_v27  ;;  %v2320_v49 = vmax.f32 %v2173_v28, 0.0 }
 0x398   : > { %v2954_v25 = vmax.f32 %v2952_v60, %v2319_v16 }
 0x399   : > { %v3023_v33 = vmax.f32 %v3021_v10, %v2320_v49  ;;  %v2176_v34 = vpop.f32.mrb[132].mxu0 }
 0x39a   : > { %v2177_v37 = vadd.f32 %v2176_v34, %v4770_v61  ;;  %v2178_v38 = vpop.f32.mrb[133].mxu0 }
 0x39b   : > { %v2179_v39 = vadd.f32 %v2178_v38, %v4774_v11  ;;  %v2180_v40 = vpop.f32.mrb[134].mxu0 }
 0x39c   : > { %v2321_v41 = vmax.f32 %v2177_v37, 0.0  ;;  %v2181_v42 = vadd.f32 %v2180_v40, %v4770_v61  ;;  %v2182_v43 = vpop.f32.mrb[135].mxu0 }
 0x39d   : > { %v2322_v29 = vmax.f32 %v2179_v39, 0.0  ;;  %v2183_v15 = vadd.f32 %v2182_v43, %v4774_v11 }
 0x39e   : > { %v2955_v46 = vmax.f32 %v2953_v32, %v2321_v41  ;;  %v2323_v36 = vmax.f32 %v2181_v42, 0.0  ;;  %v2898_v42 = vld [vmem:[%s4901_s0] sm:$0x3] }
 0x39f   : > { %v3024_v48 = vmax.f32 %v3022_v18, %v2322_v29  ;;  %v2324_v0 = vmax.f32 %v2183_v15, 0.0 }
 0x3a0   : > { %v2956_v51 = vmax.f32 %v2954_v25, %v2323_v36 }
 0x3a1   : > { %v3025_v52 = vmax.f32 %v3023_v33, %v2324_v0  ;;  %v2186_v53 = vpop.f32.mrb[136].mxu0 }
 0x3a2   : > { %v2187_v54 = vadd.f32 %v2186_v53, %v4770_v61  ;;  %v2188_v56 = vpop.f32.mrb[137].mxu0  ;;  %v4127_v53 = vld [vmem:[%s5111_s9 + $0x30] sm:$0xff]  }
 0x3a3   : > { %v2189_v26 = vadd.f32 %v2188_v56, %v4774_v11  ;;  %v2190_v57 = vpop.f32.mrb[138].mxu0 }
 0x3a4   : > { %v2325_v58 = vmax.f32 %v2187_v54, 0.0  ;;  %v2191_v59 = vadd.f32 %v2190_v57, %v4770_v61  ;;  %v2192_v62 = vpop.f32.mrb[139].mxu0  ;;  %v4128_v54 = vld [vmem:[%s5111_s9 + $0x38] sm:$0xff]  }
 0x3a5   : > { %v2326_v1 = vmax.f32 %v2189_v26, 0.0  ;;  %v2193_v2 = vadd.f32 %v2192_v62, %v4774_v11  ;;  %v3107_v26 = vld [vmem:[%s5110_s8] sm:$0x1] }
 0x3a6   : > { %v2957_v63 = vmax.f32 %v2955_v46, %v2325_v58  ;;  %v2327_v3 = vmax.f32 %v2191_v59, 0.0 }
 0x3a7   : > { %v3026_v4 = vmax.f32 %v3024_v48, %v2326_v1  ;;  %v2328_v5 = vmax.f32 %v2193_v2, 0.0 }
 0x3a8   : > { %v2958_v6 = vmax.f32 %v2956_v51, %v2327_v3  ;;  %v4121_v51 = vld [vmem:[%s5111_s9] sm:$0xff]  }
 0x3a9   : > { %v3027_v7 = vmax.f32 %v3025_v52, %v2328_v5  ;;  %v2196_v8 = vpop.f32.mrb[140].mxu0  ;;  %v4126_v52 = vld [vmem:[%s5111_s9 + $0x28] sm:$0xff]   ;;  %v4131_v5 = vld [vmem:[%s5113_s11 + $0x10] sm:$0xff]  }
 0x3aa   : > { %v2197_v9 = vadd.f32 %v2196_v8, %v4770_v61  ;;  %v2198_v14 = vpop.f32.mrb[141].mxu0  ;;  %v4216_v61 = vmov 1966171168  }
 0x3ab   : > { %v2199_v50 = vadd.f32 %v2198_v14, %v4774_v11  ;;  %v2200_v30 = vpop.f32.mrb[142].mxu0  ;;  %v3041_v32 = vunpack.c.l.s4 %v4216_v61 }
 0x3ac   : > { %v2329_v31 = vmax.f32 %v2197_v9, 0.0  ;;  %v2202_v60 = vpop.f32.mrb[143].mxu0 }
 0x3ad   : > { %v2330_v10 = vmax.f32 %v2199_v50, 0.0  ;;  %v3042_v25 = vunpack.c.0.s8 %v3041_v32 }
 0x3ae   : > { %v2894_v17 = vsel %vm2640_vm4, %v2329_v31, -inf }
 0x3af   : > { %v2959_v19 = vmax.f32 %v2957_v63, %v2894_v17  ;;  %v2895_v20 = vsel %vm2640_vm4, %v2330_v10, -inf  ;;  %v3045_v39 = vsub.s32 %v3042_v25, %v4760_v12  ;;  %v4123_v12 = vld [vmem:[%s5111_s9 + $0x10] sm:$0xff]   ;;  %v4129_v63 = vld [vmem:[%s5113_s11] sm:$0xff]  }
 0x3b0   : > { %v3028_v47 = vmax.f32 %v3026_v4, %v2895_v20  ;;  %v4130_v4 = vld [vmem:[%s5113_s11 + $0x8] sm:$0xff]  }
 0x3b1   : > { %v2961_v21 = vmax.f32 %v2959_v19, %v2958_v6  ;;  %v3262_v6 = vld [vmem:[%s5112_s10] sm:$0x1] }
 0x3b2   : > { %v3030_v22 = vmax.f32 %v3028_v47, %v3027_v7 }
 0x3b3   : > { %v2962_v23 = vrot.slane %v2961_v21, 4 }
 0x3b4   : > { %v3031_v24 = vrot.slane %v3030_v22, 4 }
 0x3b5   : > { %v2963_v27 = vmax.f32 %v2961_v21, %v2962_v23 }
 0x3b6   : > { %v3032_v28 = vmax.f32 %v3030_v22, %v3031_v24 }
 0x3b7   : > { %v2964_v16 = vrot.slane %v2963_v27, 2 }
 0x3b8   : > { %v3033_v11 = vrot.slane %v3032_v28, 2 }
 0x3b9   : > { %v2965_v18 = vmax.f32 %v2963_v27, %v2964_v16 }
 0x3ba   : > { %v3034_v49 = vmax.f32 %v3032_v28, %v3033_v11 }
 0x3bb   : > { %v2966_v33 = vrot.slane %v2965_v18, 1 }
 0x3bc   : > { %v3035_v34 = vrot.slane %v3034_v49, 1 }
 0x3bd   : > { %v2967_v37 = vmax.f32 %v2965_v18, %v2966_v33 }
 0x3be   : > { %v3036_v38 = vmax.f32 %v3034_v49, %v3035_v34 }
 0x3c0   : > { %v3039_v40 = vcombine.low %v2967_v37, %v3036_v38 }
 0x3c2   : > { %v3046_v41 = vrot.slane %v3039_v40, %v3045_v39 }
 0x3c4   : > { %v3053_v43 = vrot.slane %v3046_v41, %v3045_v39 }
 0x3c6   : > { %v3055_v29 = vmax.f32 %v2898_v42, %v3053_v43 }
 0x3c8   : > { %3060 = vst.msk [vmem:[%s4901_s0] sm:$0x3] %vm4892_vm3, %v3055_v29 }
 0x3cf   : > { %v3061_v15 = vld [vmem:[%s4901_s0] sm:$0x3] }
 0x3d0   : > { %v3066_v46 = vrot.slane %v3061_v15, %v1764_v13  ;;  %v3070_v36 = vrot.slane %v3061_v15, %v1768_v44  ;;  %v4124_v13 = vld [vmem:[%s5111_s9 + $0x18] sm:$0xff]   ;;  %v4125_v44 = vld [vmem:[%s5111_s9 + $0x20] sm:$0xff]  }
 0x3d2   : > { %v3073_v48 = vpack.c.bf16 %v3066_v46, %v3066_v46  ;;  %v3074_v0 = vpack.c.bf16 %v3070_v36, %v3070_v36 }
 0x3d4   : > { %3236 = vmatprep.mubr.bf16.mxu1 %v3074_v0 }
 0x3d5   : > { %3237 = vmatmul.mubr.bf16.vlgmr.msra.gmra.mrb[112].mxu1 %v3073_v48 }
 0x3d6   : > { %3950 = vmatpush3.bf16.msra.mxu1 %v4121_v51  ;;  %3965 = vmatprep.mubr.msk.bf16.mxu1 %vm4217_vm5, %v4215_v45 }
 0x3d7   : > { %3951 = vmatprep.subr.bf16.mxu1 %v4215_v45 }
 0x3da   : > { %3952 = vmatpush3.bf16.msra.mxu1 %v4122_v35 }
 0x3db   : > { %3953 = vmatprep.subr.bf16.mxu1 %v4215_v45 }
 0x3de   : > { %3954 = vmatpush3.bf16.msra.mxu1 %v4123_v12 }
 0x3df   : > { %3955 = vmatprep.subr.bf16.mxu1 %v4215_v45 }
 0x3e2   : > { %3956 = vmatpush3.bf16.msra.mxu1 %v4124_v13 }
 0x3e3   : > { %3957 = vmatprep.subr.bf16.mxu1 %v4215_v45 }
 0x3e6   : > { %3958 = vmatpush3.bf16.msra.mxu1 %v4125_v44 }
 0x3e7   : > { %3959 = vmatprep.subr.bf16.mxu1 %v4215_v45 }
 0x3ea   : > { %3960 = vmatpush3.bf16.msra.mxu1 %v4126_v52 }
 0x3eb   : > { %3961 = vmatprep.subr.bf16.mxu1 %v4215_v45 }
 0x3ee   : > { %3962 = vmatpush3.bf16.msra.mxu1 %v4127_v53 }
 0x3ef   : > { %3963 = vmatprep.subr.bf16.mxu1 %v4215_v45 }
 0x3f2   : > { %3964 = vmatpush3.bf16.msra.mxu1 %v4128_v54 }
 0x3f3   : > { %3969 = vmatprep.subr.bf16.mxu1 %v4215_v45 }
 0x4a8   : > { %v3791_v56 = vpop.f32.mrb[112].mxu1 }
 0x4a9   : > { %v3792_v57 = vpop.f32.mrb[113].mxu1 }
 0x4aa   : > { %v3793_v58 = vadd.f32 %v3792_v57, %v3791_v56  ;;  %v3794_v59 = vpop.f32.mrb[114].mxu1 }
 0x4ab   : > { %v3795_v62 = vpop.f32.mrb[115].mxu1 }
 0x4ac   : > { %v3239_v1 = vadd.f32 %v3793_v58, %v3107_v26 }
 0x4ae   : > { %v3244_v2 = vmax.f32 %v3239_v1, 0.0 }
 0x4b0   : > { %v3245_v3 = vpack.c.bf16 %v3244_v2, %v3244_v2 }
 0x4b2   : > { %3966 = vmatmul.mubr.bf16.vlgmr.msra.gmra.mrb[116].mxu1 %v3245_v3 }
 0x4b3   : > { %3970 = vmatpush3.bf16.msra.mxu1 %v4129_v63  ;;  %3977 = vmatprep.mubr.msk.bf16.mxu1 %vm4217_vm5, %v4215_v45 }
 0x4b4   : > { %3971 = vmatprep.subr.bf16.mxu1 %v4215_v45 }
 0x4b7   : > { %3972 = vmatpush3.bf16.msra.mxu1 %v4130_v4 }
 0x4b8   : > { %3973 = vmatprep.subr.bf16.mxu1 %v4215_v45 }
 0x4bb   : > { %3974 = vmatpush3.bf16.msra.mxu1 %v4131_v5 }
 0x4bc   : > { %3975 = vmatprep.subr.bf16.mxu1 %v4215_v45 }
 0x4bf   : > { %3976 = vmatpush3.bf16.msra.mxu1 %v4132_v55 }
 0x585   : > { %v3345_v7 = vpop.f32.mrb[116].mxu1 }
 0x586   : > { %v3346_v8 = vadd.f32 %v3345_v7, %v3262_v6  ;;  %v3967_v9 = vpop.f32.mrb[117].mxu1 }
 0x587   : > { %v3348_v14 = vpop.f32.mrb[118].mxu1 }
 0x588   : > { %v3351_v50 = vmax.f32 %v3346_v8, 0.0  ;;  %v3968_v30 = vpop.f32.mrb[119].mxu1 }
 0x58a   : > { %v3352_v31 = vpack.c.bf16 %v3351_v50, %v3351_v50 }
 0x58c   : > { %3978 = vmatmul.mubr.msk.bf16.vlgmr.msra.gmra.mrb[120].mxu1 %vm1262_vm2, %v3352_v31 }
 0x58d   : > { %4146 = shalt.err (!%p4143_p5)
}
 0x58e   : > { %s4147_s16 = scalar_lea.hbm %s5054_s21, 32  ;;  %s4151_s22 = scalar_lea.hbm %s5115_s13, 64 }
 0x58f   : > { %p4148_p6 = scmp.ne.s32.totalorder %s5054_s21, %s4147_s16  ;;  %p4152_p10 = scmp.lt.u32.totalorder %s5054_s21, %s5115_s13 }
 0x590   : > { %p4153_p11 = scmp.lt.u32.totalorder %s4151_s22, %s4147_s16  ;;  %p4155_p13 = scmp.lt.u32.totalorder %s4147_s16, %s5054_s21 }
 0x591   : > { %p4149_p7 = pnand %p4148_p6, %p4334_p4 }
 0x592   : > { %p4154_p12 = por %p4153_p11, %p4152_p10 }
 0x593   : > { %p4150_p9 = pneg %p4149_p7 }
 0x594   : > { %p4156_p0 = por %p4155_p13, %p4154_p12 }
 0x596   : > { %p4157_p1 = pnand %p4156_p0, %p4150_p9 }
 0x598   : > { %4160 = shalt.err (!%p4157_p1)
}
 0x599   : > { %3985 = dma.vmem_to_hbm [thread:$0]  (%p4334_p4), %s3450_s28, 32, %s5054_s21, %s3432_s17   ;;  %v3361_v45 = vld [vmem:[%s5114_s12] sm:$0x1] }
 0x65f   : > { %v3423_v60 = vpop.f32.mrb[120].mxu1 }
 0x660   : > { %v3424_v10 = vadd.f32 %v3423_v60, %v3361_v45  ;;  %v3979_v17 = vpop.f32.mrb[121].mxu1 }
 0x661   : > { %v3426_v19 = vpop.f32.mrb[122].mxu1 }
 0x662   : > { %3430 = vst.msk [vmem:[%s5040_s1] sm:$0x1] %vm2341_vm6, %v3424_v10  ;;  %v3980_v20 = vpop.f32.mrb[123].mxu1 }
 0x663 PF: > { %p3991_p2 = scmp.ge.s32.totalorder %s4211_s18, 2  ;;  %s3464_s23 = sand.u32 1, %s4191_s29  }
 0x664   : > { %s3465_s28 = scalar_lea.sflag [#allocation3], %s3464_s23 }
 0x665   : > { %p3988_p3 = pnand %p3991_p2, %p4341_p8 }
 0x667   : > { %4186 = dma.done.wait (!%p3988_p3), %s3465_s28, 32  }
 0x668   : > { %4188 = vsyncadd (!%p3988_p3), %s3465_s28, 4294967264  ;;  %s28_s18 = sadd.s32 1, %s4211_s18   ;;  %s5135_s16 = sld [smem:[#allocation5_spill]] }
 0x669   : > { %p25_p4 = scmp.ge.s32.totalorder %s28_s18, 4   ;;  %s5136_s17 = sld [smem:[#allocation6_spill]] }
 0x66a   : > { %s5137_s29 = smov %s4195_s30  ;;  %s5138_s30 = smov %s4199_s15 }
 0x66b   : > { %s5139_s15 = smov %s4347_s26  ;;  %27 = sbr.rel (!%p25_p4) target bundleno = 10 (0xa), region = 131 }
 0x672   :  { %3476 = vsyncpa [#allocation3], 1 }
 0x673   :  { %3478 = vsyncpa [#allocation3 + $0x1], 1 }

// kernel: pointnet_densecls_forward.5
= control target key start
LH: loop header
LB: loop body
LE: loop exit
PB: predicated region body
PF: predicated region fallthrough
CT: control target
= control target key end

     0   :  { %s3292_s17 = smov 0   ;;  %s3294_s18 = smov 0   ;;  %s3755_s0 = inlined_call_operand.vmem [shape: bf16[2,4,512], index: 0, kind: input, shape index: {}]   ;;  %s3756_s1 = inlined_call_operand.vmem [shape: bf16[2,64,4], index: 1, kind: input, shape index: {}]   ;;  %s3757_s2 = inlined_call_operand.vmem [shape: f32[64,1], index: 2, kind: input, shape index: {}]   ;;  %s3758_s3 = inlined_call_operand.vmem [shape: bf16[256,64], index: 3, kind: input, shape index: {}]   ;;  %s3759_s4 = inlined_call_operand.vmem [shape: f32[2,256,1], index: 4, kind: input, shape index: {}]   ;;  %s3760_s5 = inlined_call_operand.vmem [shape: bf16[128,256], index: 5, kind: input, shape index: {}]   ;;  %s3761_s6 = inlined_call_operand.vmem [shape: f32[128,1], index: 6, kind: input, shape index: {}]   ;;  %s3762_s7 = inlined_call_operand.vmem [shape: bf16[128,128], index: 7, kind: input, shape index: {}]   ;;  %s3763_s8 = inlined_call_operand.vmem [shape: f32[128,1], index: 8, kind: input, shape index: {}]   ;;  %s3764_s9 = inlined_call_operand.vmem [shape: bf16[4,128], index: 9, kind: input, shape index: {}]   ;;  %s3765_s10 = inlined_call_operand.vmem [shape: f32[4,1], index: 10, kind: input, shape index: {}]   ;;  %s3766_s11 = inlined_call_operand.vmem [shape: f32[2,4,512], index: 11, kind: output, shape index: {}]  }
   0x1   :  { %s3296_s19 = smov 0  }
   0x2 LB: > { %s33_s20 = sadd.s32 1, %s3224_s18  ;;  %p3008_p0 = scmp.ge.s32.totalorder %s3228_s19, 1  ;;  %s3228_s19 = sphi %s3296_s19, %s21_s19   ;;  %s3224_s18 = sphi %s3294_s18, %s3768_s18   ;;  %s3220_s17 = sphi %s3292_s17, %s3767_s17  }
   0x3   : > { %p35_p1 = scmp.ge.s32.totalorder %s33_s20, 2  ;;  %p378_p2 = scmp.lt.s32.totalorder %s3228_s19, 3 }
   0x5   : > { %s3770_s20 = smov (%p35_p1, %s33_s20), 0  ;;  %p379_p3 = pnand %p3008_p0, %p378_p2 }
   0x6   : > { %v478_v0 = vld [vmem:[%s3757_s2 + $0x10] sm:$0xff] (!%p379_p3)  ;;  %v476_v1 = vld [vmem:[%s3757_s2] sm:$0xff] (!%p379_p3)  ;;  %p437_p4 = scmp.lt.s32.totalorder (!%p379_p3), %s3220_s17, 1  ;;  %v549_v2 = vlaneseq (!%p379_p3)  ;;  %v3230_v3 = vmov (!%p379_p3), 0   ;;  %v3231_v4 = vmov (!%p379_p3), 1983009808  }
   0x7   : > { %382 = sbr.rel (%p379_p3) target bundleno = 1460 (0x5b4), region = 64  ;;  %3136 = vset.pattern.permute.xlu1 (!%p379_p3), %v3230_v3  ;;  %3135 = vset.pattern.permute.xlu0 (!%p379_p3), %v3230_v3  ;;  %v547_v5 = vunpack.c.l.s4 (!%p379_p3), %v3231_v4  ;;  %v479_v7 = vld [vmem:[%s3757_s2 + $0x18] sm:$0xff] (!%p379_p3)  ;;  %v477_v8 = vld [vmem:[%s3757_s2 + $0x8] sm:$0xff] (!%p379_p3)  ;;  %v480_v13 = vld [vmem:[%s3757_s2 + $0x20] sm:$0xff] (!%p379_p3)  ;;  %vm575_vm0 = vcmask (!%p379_p3), 1041408   ;;  %vm562_vm1 = vcmask (!%p379_p3), 31744  }
   0x8   : > { %496 = vperm.xlu1 (!%p379_p3), %3136, %v478_v0   ;;  %486 = vperm.xlu0 (!%p379_p3), %3135, %v476_v1   ;;  %v550_v6 = vshrl.u32 (!%p379_p3), %v549_v2, 7  ;;  %v481_v10 = vld [vmem:[%s3757_s2 + $0x28] sm:$0xff] (!%p379_p3)  ;;  %v483_v19 = vld [vmem:[%s3757_s2 + $0x38] sm:$0xff] (!%p379_p3)  ;;  %v482_v21 = vld [vmem:[%s3757_s2 + $0x30] sm:$0xff] (!%p379_p3)  ;;  %vm1086_vm2 = vcmask (!%p379_p3), 523264   ;;  %vm2798_vm3 = vcmask (!%p379_p3), 1043456  }
   0x9   : > { %620 = vmatprep.mubr.bf16.mxu0 (!%p379_p3), %v3230_v3  ;;  %693 = vmatprep.mubr.bf16.mxu1 (!%p379_p3), %v3230_v3  ;;  %v548_v9 = vunpack.c.0.s8 (!%p379_p3), %v547_v5  ;;  %v1730_v59 = vld [vmem:[%s3761_s6 + $0x8] sm:$0xff] (!%p379_p3)  ;;  %v1729_v60 = vld [vmem:[%s3761_s6] sm:$0xff] (!%p379_p3)  ;;  %v1732_v61 = vld [vmem:[%s3761_s6 + $0x18] sm:$0xff] (!%p379_p3) }
   0xa   : > { %v1731_v62 = vld [vmem:[%s3761_s6 + $0x10] sm:$0xff] (!%p379_p3)  ;;  %v1734_v63 = vld [vmem:[%s3761_s6 + $0x28] sm:$0xff] (!%p379_p3)  ;;  %v1733_v0 = vld [vmem:[%s3761_s6 + $0x20] sm:$0xff] (!%p379_p3) }
   0xb   : > { %v551_v12 = vsub.s32 (!%p379_p3), %v548_v9, %v550_v6  ;;  %v1736_v1 = vld [vmem:[%s3761_s6 + $0x38] sm:$0xff] (!%p379_p3)  ;;  %v1735_v2 = vld [vmem:[%s3761_s6 + $0x30] sm:$0xff] (!%p379_p3)  ;;  %v1738_v4 = vld [vmem:[%s3761_s6 + $0x48] sm:$0xff] (!%p379_p3) }
   0xc   : > { %501 = vperm.xlu1 (!%p379_p3), %3136, %v479_v7   ;;  %491 = vperm.xlu0 (!%p379_p3), %3135, %v477_v8   ;;  %v1737_v5 = vld [vmem:[%s3761_s6 + $0x40] sm:$0xff] (!%p379_p3)  ;;  %v1740_v6 = vld [vmem:[%s3761_s6 + $0x58] sm:$0xff] (!%p379_p3)  ;;  %v1739_v7 = vld [vmem:[%s3761_s6 + $0x50] sm:$0xff] (!%p379_p3) }
   0xd   : > { %v1742_v8 = vld [vmem:[%s3761_s6 + $0x68] sm:$0xff] (!%p379_p3)  ;;  %v1741_v9 = vld [vmem:[%s3761_s6 + $0x60] sm:$0xff] (!%p379_p3) }
   0xe   : > { %s3772_s17 = smov (!%p437_p4, %s3220_s17), 1 }
   0xf   : > { %s3105_s29 = sshll.u32 %s3772_s17, 3  ;;  %s3106_s30 = sshll.u32 %s3772_s17, 5 }
  0x10   : > { %s444_s16 = scalar_lea.vmem %s3755_s0, %s3105_s29  ;;  %s3339_s23 = scalar_lea.vmem %s3756_s1, %s3106_s30  ;;  %511 = vperm.xlu1 %3136, %v481_v10   ;;  %506 = vperm.xlu0 %3135, %v480_v13   ;;  %v1744_v10 = vld [vmem:[%s3761_s6 + $0x78] sm:$0xff]  ;;  %v2243_v13 = vld [vmem:[%s3763_s8] sm:$0xff] }
  0x11   : > { %v467_v11 = vld [vmem:[%s444_s16] sm:$0xff]  ;;  %s3107_s26 = sshll.u32 %s3772_s17, 8  ;;  %v3139_v28 = vld [vmem:[%s3339_s23 + $0x8] sm:$0xff]   ;;  %v3140_v33 = vld [vmem:[%s3339_s23 + $0x10] sm:$0xff]   ;;  %s3108_s13 = sshll.u32 %s3772_s17, 4 }
  0x12   : > { %v545_v14 = vcombine.high %v467_v11, %v467_v11  ;;  %v552_v15 = vrot.slane %v467_v11, %v551_v12  ;;  %s3355_s14 = scalar_lea.vmem %s3759_s4, %s3107_s26  ;;  %v3138_v23 = vld [vmem:[%s3339_s23] sm:$0xff]   ;;  %v3141_v38 = vld [vmem:[%s3339_s23 + $0x18] sm:$0xff]   ;;  %v1743_v11 = vld [vmem:[%s3761_s6 + $0x70] sm:$0xff]  ;;  %s464_s16 = scalar_lea.vmem %s3766_s11, %s3108_s13 }
  0x13   : > { %v815_v24 = vld [vmem:[%s3355_s14 + $0x8] sm:$0xff]  ;;  %v814_v25 = vld [vmem:[%s3355_s14] sm:$0xff]  ;;  %v817_v26 = vld [vmem:[%s3355_s14 + $0x18] sm:$0xff] }
  0x14   : > { %v559_v16 = vrot.slane %v545_v14, %v551_v12  ;;  %v560_v17 = vcombine.high %v552_v15, %v552_v15  ;;  %v577_v18 = vsel %vm575_vm0, %v552_v15, 0  ;;  %521 = vperm.xlu1 %3136, %v483_v19   ;;  %516 = vperm.xlu0 %3135, %v482_v21   ;;  %v816_v27 = vld [vmem:[%s3355_s14 + $0x10] sm:$0xff]  ;;  %v819_v29 = vld [vmem:[%s3355_s14 + $0x28] sm:$0xff]  ;;  %v818_v30 = vld [vmem:[%s3355_s14 + $0x20] sm:$0xff] }
  0x15   : > { %v821_v31 = vld [vmem:[%s3355_s14 + $0x38] sm:$0xff]  ;;  %v820_v32 = vld [vmem:[%s3355_s14 + $0x30] sm:$0xff]  ;;  %v823_v34 = vld [vmem:[%s3355_s14 + $0x48] sm:$0xff] }
  0x16   : > { %v561_v20 = vcombine.high %v559_v16, %v559_v16  ;;  %3021 = vmatprep.subr.msk.bf16.mxu0 %vm575_vm0, %v560_v17  ;;  %v583_v22 = vsel %vm575_vm0, %v559_v16, 0  ;;  %v822_v35 = vld [vmem:[%s3355_s14 + $0x40] sm:$0xff]  ;;  %v825_v36 = vld [vmem:[%s3355_s14 + $0x58] sm:$0xff]  ;;  %v824_v37 = vld [vmem:[%s3355_s14 + $0x50] sm:$0xff] }
  0x17   : > { %589 = vmatpush1.bf16.msra.mxu0 %v577_v18  ;;  %v827_v39 = vld [vmem:[%s3355_s14 + $0x68] sm:$0xff]  ;;  %v826_v40 = vld [vmem:[%s3355_s14 + $0x60] sm:$0xff]  ;;  %v829_v41 = vld [vmem:[%s3355_s14 + $0x78] sm:$0xff] }
  0x18   : > { %3026 = vmatprep.subr.msk.bf16.mxu1 %vm575_vm0, %v561_v20  ;;  %853 = vperm.xlu1 %3136, %v815_v24   ;;  %v828_v42 = vld [vmem:[%s3355_s14 + $0x70] sm:$0xff]  ;;  %v831_v43 = vld [vmem:[%s3355_s14 + $0x88] sm:$0xff]  ;;  %v830_v44 = vld [vmem:[%s3355_s14 + $0x80] sm:$0xff] }
  0x19   : > { %662 = vmatpush1.bf16.msra.mxu1 %v583_v22  ;;  %848 = vperm.xlu0 %3135, %v814_v25   ;;  %v833_v45 = vld [vmem:[%s3355_s14 + $0x98] sm:$0xff]  ;;  %v832_v46 = vld [vmem:[%s3355_s14 + $0x90] sm:$0xff]  ;;  %v835_v47 = vld [vmem:[%s3355_s14 + $0xa8] sm:$0xff] }
  0x1a   : > { %3022 = vmatmul.mubr.msk.bf16.vlgmr.msra.gmra.mrb[0].mxu0 %vm562_vm1, %v3138_v23  ;;  %v834_v48 = vld [vmem:[%s3355_s14 + $0xa0] sm:$0xff]  ;;  %v837_v49 = vld [vmem:[%s3355_s14 + $0xb8] sm:$0xff]  ;;  %v836_v50 = vld [vmem:[%s3355_s14 + $0xb0] sm:$0xff] }
  0x1b   : > { %630 = vmatprep.mubr.bf16.mxu0 %v3230_v3  ;;  %v839_v51 = vld [vmem:[%s3355_s14 + $0xc8] sm:$0xff]  ;;  %v838_v52 = vld [vmem:[%s3355_s14 + $0xc0] sm:$0xff]  ;;  %v841_v53 = vld [vmem:[%s3355_s14 + $0xd8] sm:$0xff] }
  0x1c   : > { %3027 = vmatmul.mubr.msk.bf16.vlgmr.msra.gmra.mrb[0].mxu1 %vm562_vm1, %v3138_v23  ;;  %863 = vperm.xlu1 %3136, %v817_v26   ;;  %v840_v54 = vld [vmem:[%s3355_s14 + $0xd0] sm:$0xff]  ;;  %v843_v55 = vld [vmem:[%s3355_s14 + $0xe8] sm:$0xff]  ;;  %v842_v56 = vld [vmem:[%s3355_s14 + $0xe0] sm:$0xff] }
  0x1d   : > { %703 = vmatprep.mubr.bf16.mxu1 %v3230_v3  ;;  %858 = vperm.xlu0 %3135, %v816_v27   ;;  %v845_v57 = vld [vmem:[%s3355_s14 + $0xf8] sm:$0xff]  ;;  %v844_v58 = vld [vmem:[%s3355_s14 + $0xf0] sm:$0xff]  ;;  %v2244_v12 = vld [vmem:[%s3763_s8 + $0x8] sm:$0xff] }
  0x1e   : > { %v2246_v14 = vld [vmem:[%s3763_s8 + $0x18] sm:$0xff]  ;;  %v2245_v15 = vld [vmem:[%s3763_s8 + $0x10] sm:$0xff]  ;;  %v2248_v16 = vld [vmem:[%s3763_s8 + $0x28] sm:$0xff] }
  0x1f   : > { %v2247_v17 = vld [vmem:[%s3763_s8 + $0x20] sm:$0xff]  ;;  %v2250_v18 = vld [vmem:[%s3763_s8 + $0x38] sm:$0xff]  ;;  %v2249_v19 = vld [vmem:[%s3763_s8 + $0x30] sm:$0xff] }
  0x20   : > { %873 = vperm.xlu1 %3136, %v819_v29   ;;  %v2252_v20 = vld [vmem:[%s3763_s8 + $0x48] sm:$0xff]  ;;  %v2251_v21 = vld [vmem:[%s3763_s8 + $0x40] sm:$0xff]  ;;  %v2254_v22 = vld [vmem:[%s3763_s8 + $0x58] sm:$0xff] }
  0x21   : > { %868 = vperm.xlu0 %3135, %v818_v30   ;;  %v2253_v23 = vld [vmem:[%s3763_s8 + $0x50] sm:$0xff]  ;;  %v2256_v24 = vld [vmem:[%s3763_s8 + $0x68] sm:$0xff]  ;;  %v2255_v25 = vld [vmem:[%s3763_s8 + $0x60] sm:$0xff] }
  0x22   : > { %3023 = vmatmul.mubr.msk.bf16.gmra.mrb[4].mxu0 %vm562_vm1, %v3139_v28  ;;  %v2258_v26 = vld [vmem:[%s3763_s8 + $0x78] sm:$0xff]  ;;  %v2257_v27 = vld [vmem:[%s3763_s8 + $0x70] sm:$0xff] }
  0x23   : > { %640 = vmatprep.mubr.bf16.mxu0 %v3230_v3 }
  0x24   : > { %3028 = vmatmul.mubr.msk.bf16.gmra.mrb[4].mxu1 %vm562_vm1, %v3139_v28  ;;  %883 = vperm.xlu1 %3136, %v821_v31   ;;  %v2710_v28 = vld [vmem:[%s3765_s10] sm:$0xf] }
  0x25   : > { %713 = vmatprep.mubr.bf16.mxu1 %v3230_v3  ;;  %878 = vperm.xlu0 %3135, %v820_v32  }
  0x28   : > { %893 = vperm.xlu1 %3136, %v823_v34  }
  0x29   : > { %888 = vperm.xlu0 %3135, %v822_v35  }
  0x2a   : > { %3024 = vmatmul.mubr.msk.bf16.gmra.mrb[8].mxu0 %vm562_vm1, %v3140_v33 }
  0x2b   : > { %650 = vmatprep.mubr.bf16.mxu0 %v3230_v3 }
  0x2c   : > { %3029 = vmatmul.mubr.msk.bf16.gmra.mrb[8].mxu1 %vm562_vm1, %v3140_v33  ;;  %903 = vperm.xlu1 %3136, %v825_v36  }
  0x2d   : > { %723 = vmatprep.mubr.bf16.mxu1 %v3230_v3  ;;  %898 = vperm.xlu0 %3135, %v824_v37  }
  0x30   : > { %913 = vperm.xlu1 %3136, %v827_v39  }
  0x31   : > { %908 = vperm.xlu0 %3135, %v826_v40  }
  0x32   : > { %3025 = vmatmul.mubr.msk.bf16.gmra.mrb[12].mxu0 %vm562_vm1, %v3141_v38 }
  0x33   : > { %1167 = vmatprep.mubr.bf16.mxu0 %v3230_v3 }
  0x34   : > { %3030 = vmatmul.mubr.msk.bf16.gmra.mrb[12].mxu1 %vm562_vm1, %v3141_v38  ;;  %923 = vperm.xlu1 %3136, %v829_v41  }
  0x35   : > { %1360 = vmatprep.mubr.bf16.mxu1 %v3230_v3  ;;  %918 = vperm.xlu0 %3135, %v828_v42  }
  0x38   : > { %933 = vperm.xlu1 %3136, %v831_v43  }
  0x39   : > { %928 = vperm.xlu0 %3135, %v830_v44  }
  0x3c   : > { %943 = vperm.xlu1 %3136, %v833_v45  }
  0x3d   : > { %938 = vperm.xlu0 %3135, %v832_v46  }
  0x40   : > { %953 = vperm.xlu1 %3136, %v835_v47  }
  0x41   : > { %948 = vperm.xlu0 %3135, %v834_v48  }
  0x44   : > { %963 = vperm.xlu1 %3136, %v837_v49  }
  0x45   : > { %958 = vperm.xlu0 %3135, %v836_v50  }
  0x48   : > { %973 = vperm.xlu1 %3136, %v839_v51  }
  0x49   : > { %968 = vperm.xlu0 %3135, %v838_v52  }
  0x4c   : > { %983 = vperm.xlu1 %3136, %v841_v53  }
  0x4d   : > { %978 = vperm.xlu0 %3135, %v840_v54  }
  0x50   : > { %993 = vperm.xlu1 %3136, %v843_v55  }
  0x51   : > { %988 = vperm.xlu0 %3135, %v842_v56  }
  0x54   : > { %1003 = vperm.xlu1 %3136, %v845_v57  }
  0x55   : > { %998 = vperm.xlu0 %3135, %v844_v58  }
  0x58   : > { %1752 = vperm.xlu1 %3136, %v1730_v59  }
  0x59   : > { %1747 = vperm.xlu0 %3135, %v1729_v60  }
  0x5c   : > { %1762 = vperm.xlu1 %3136, %v1732_v61  }
  0x5d   : > { %1757 = vperm.xlu0 %3135, %v1731_v62  }
  0x60   : > { %1772 = vperm.xlu1 %3136, %v1734_v63  }
  0x61   : > { %1767 = vperm.xlu0 %3135, %v1733_v0  }
  0x64   : > { %1782 = vperm.xlu1 %3136, %v1736_v1  }
  0x65   : > { %1777 = vperm.xlu0 %3135, %v1735_v2  }
  0x68   : > { %1792 = vperm.xlu1 %3136, %v1738_v4  }
  0x69   : > { %1787 = vperm.xlu0 %3135, %v1737_v5  }
  0x6c   : > { %1802 = vperm.xlu1 %3136, %v1740_v6  }
  0x6d   : > { %1797 = vperm.xlu0 %3135, %v1739_v7  }
  0x70   : > { %1812 = vperm.xlu1 %3136, %v1742_v8  }
  0x71   : > { %1807 = vperm.xlu0 %3135, %v1741_v9  }
  0x74   : > { %1822 = vperm.xlu1 %3136, %v1744_v10  }
  0x75   : > { %1817 = vperm.xlu0 %3135, %v1743_v11  }
  0x78   : > { %2266 = vperm.xlu1 %3136, %v2244_v12  }
  0x79   : > { %2261 = vperm.xlu0 %3135, %v2243_v13  }
  0x7c   : > { %2276 = vperm.xlu1 %3136, %v2246_v14  }
  0x7d   : > { %2271 = vperm.xlu0 %3135, %v2245_v15  }
  0x80   : > { %2286 = vperm.xlu1 %3136, %v2248_v16  }
  0x81   : > { %2281 = vperm.xlu0 %3135, %v2247_v17  }
  0x84   : > { %2296 = vperm.xlu1 %3136, %v2250_v18  }
  0x85   : > { %2291 = vperm.xlu0 %3135, %v2249_v19  }
  0x87   : > { %v487_v29 = vpop.permute.xlu0 %486  ;;  %v497_v37 = vpop.permute.xlu1 %496 }
  0x88   : > { %2306 = vperm.xlu1 %3136, %v2252_v20  }
  0x89   : > { %2301 = vperm.xlu0 %3135, %v2251_v21  }
  0x8b   : > { %v492_v31 = vpop.permute.xlu0 %491  ;;  %v502_v56 = vpop.permute.xlu1 %501 }
  0x8c   : > { %2316 = vperm.xlu1 %3136, %v2254_v22  }
  0x8d   : > { %2311 = vperm.xlu0 %3135, %v2253_v23  }
  0x8f   : > { %v507_v19 = vpop.permute.xlu0 %506  ;;  %v512_v23 = vpop.permute.xlu1 %511 }
  0x90   : > { %2326 = vperm.xlu1 %3136, %v2256_v24  }
  0x91   : > { %2321 = vperm.xlu0 %3135, %v2255_v25  }
  0x94   : > { %2336 = vperm.xlu1 %3136, %v2258_v26  }
  0x95   : > { %2331 = vperm.xlu0 %3135, %v2257_v27  }
  0x99   : > { %2713 = vperm.xlu0 %3135, %v2710_v28  }
  0xed   : > { %v622_v30 = vpop.f32.mrb[0].mxu0 }
  0xee   : > { %v623_v32 = vadd.f32 %v622_v30, %v487_v29  ;;  %v624_v33 = vpop.f32.mrb[1].mxu0 }
  0xef   : > { %v625_v34 = vadd.f32 %v624_v33, %v487_v29  ;;  %v626_v35 = vpop.f32.mrb[2].mxu0  ;;  %v695_v36 = vpop.f32.mrb[0].mxu1 }
  0xf0   : > { %v734_v38 = vmax.f32 %v623_v32, 0.0  ;;  %v627_v39 = vadd.f32 %v626_v35, %v492_v31  ;;  %v696_v40 = vadd.f32 %v695_v36, %v487_v29  ;;  %v628_v41 = vpop.f32.mrb[3].mxu0  ;;  %v697_v42 = vpop.f32.mrb[1].mxu1 }
  0xf1   : > { %v735_v43 = vmax.f32 %v625_v34, 0.0  ;;  %v629_v45 = vadd.f32 %v628_v41, %v492_v31  ;;  %v698_v46 = vadd.f32 %v697_v42, %v487_v29  ;;  %v699_v47 = vpop.f32.mrb[2].mxu1 }
  0xf2   : > { %v738_v44 = vmax.f32 %v627_v39, 0.0  ;;  %v700_v48 = vadd.f32 %v699_v47, %v492_v31  ;;  %v701_v49 = vpop.f32.mrb[3].mxu1  ;;  %v736_v53 = vmax.f32 %v696_v40, 0.0 }
  0xf3   : > { %v739_v51 = vmax.f32 %v629_v45, 0.0  ;;  %v702_v52 = vadd.f32 %v701_v49, %v492_v31  ;;  %v737_v58 = vmax.f32 %v698_v46, 0.0  ;;  %v517_v49 = vpop.permute.xlu0 %516 }
  0xf4   : > { %v798_v50 = vpack.c.bf16 %v738_v44, %v734_v38  ;;  %v740_v54 = vmax.f32 %v700_v48, 0.0 }
  0xf5   : > { %v632_v55 = vpop.f32.mrb[4].mxu0  ;;  %v799_v57 = vpack.c.bf16 %v739_v51, %v735_v43  ;;  %v741_v59 = vmax.f32 %v702_v52, 0.0 }
  0xf6   : > { %v633_v60 = vadd.f32 %v632_v55, %v497_v37  ;;  %v634_v61 = vpop.f32.mrb[5].mxu0  ;;  %v800_v62 = vpack.c.bf16 %v740_v54, %v736_v53  ;;  %v522_v53 = vpop.permute.xlu1 %521 }
  0xf7   : > { %v635_v63 = vadd.f32 %v634_v61, %v497_v37  ;;  %v636_v0 = vpop.f32.mrb[6].mxu0  ;;  %v705_v1 = vpop.f32.mrb[4].mxu1  ;;  %v801_v2 = vpack.c.bf16 %v741_v59, %v737_v58  ;;  %1135 = vmatprep.subr.bf16.mxu0 %v799_v57 }
  0xf8   : > { %v742_v4 = vmax.f32 %v633_v60, 0.0  ;;  %v637_v5 = vadd.f32 %v636_v0, %v502_v56  ;;  %v706_v6 = vadd.f32 %v705_v1, %v497_v37  ;;  %v638_v7 = vpop.f32.mrb[7].mxu0  ;;  %v707_v8 = vpop.f32.mrb[5].mxu1  ;;  %1136 = vmatpush1.bf16.msra.mxu0 %v798_v50 }
  0xf9   : > { %v743_v9 = vmax.f32 %v635_v63, 0.0  ;;  %v639_v11 = vadd.f32 %v638_v7, %v502_v56  ;;  %v708_v12 = vadd.f32 %v707_v8, %v497_v37  ;;  %v709_v13 = vpop.f32.mrb[6].mxu1  ;;  %1328 = vmatprep.subr.bf16.mxu1 %v801_v2 }
  0xfa   : > { %v746_v10 = vmax.f32 %v637_v5, 0.0  ;;  %v710_v14 = vadd.f32 %v709_v13, %v502_v56  ;;  %v711_v15 = vpop.f32.mrb[7].mxu1  ;;  %1329 = vmatpush1.bf16.msra.mxu1 %v800_v62  ;;  %v744_v20 = vmax.f32 %v706_v6, 0.0 }
  0xfb   : > { %v747_v17 = vmax.f32 %v639_v11, 0.0  ;;  %v712_v18 = vadd.f32 %v711_v15, %v502_v56  ;;  %v745_v25 = vmax.f32 %v708_v12, 0.0 }
  0xfc   : > { %v802_v16 = vpack.c.bf16 %v746_v10, %v742_v4  ;;  %v748_v21 = vmax.f32 %v710_v14, 0.0 }
  0xfd   : > { %v642_v22 = vpop.f32.mrb[8].mxu0  ;;  %v803_v24 = vpack.c.bf16 %v747_v17, %v743_v9  ;;  %v749_v26 = vmax.f32 %v712_v18, 0.0 }
  0xfe   : > { %v643_v27 = vadd.f32 %v642_v22, %v507_v19  ;;  %v644_v28 = vpop.f32.mrb[9].mxu0  ;;  %v804_v29 = vpack.c.bf16 %v748_v21, %v744_v20 }
  0xff   : > { %v646_v30 = vpop.f32.mrb[10].mxu0  ;;  %v715_v31 = vpop.f32.mrb[8].mxu1  ;;  %v805_v32 = vpack.c.bf16 %v749_v26, %v745_v25  ;;  %v645_v33 = vadd.f32 %v644_v28, %v507_v19  ;;  %1137 = vmatprep.subr.bf16.mxu0 %v803_v24  ;;  %v3143_v24 = vld [vmem:[%s3758_s3 + $0x8] sm:$0xff]   ;;  %v3144_v25 = vld [vmem:[%s3758_s3 + $0x10] sm:$0xff]   ;;  %v3145_v26 = vld [vmem:[%s3758_s3 + $0x18] sm:$0xff]  }
 0x100   : > { %v647_v34 = vadd.f32 %v646_v30, %v512_v23  ;;  %v716_v35 = vadd.f32 %v715_v31, %v507_v19  ;;  %v648_v36 = vpop.f32.mrb[11].mxu0  ;;  %v717_v37 = vpop.f32.mrb[9].mxu1  ;;  %1138 = vmatpush1.bf16.msra.mxu0 %v802_v16  ;;  %v750_v38 = vmax.f32 %v643_v27, 0.0  ;;  %v3146_v27 = vld [vmem:[%s3758_s3 + $0x20] sm:$0xff]   ;;  %v3147_v28 = vld [vmem:[%s3758_s3 + $0x28] sm:$0xff]   ;;  %v3149_v30 = vld [vmem:[%s3758_s3 + $0x38] sm:$0xff]  }
 0x101   : > { %v649_v40 = vadd.f32 %v648_v36, %v512_v23  ;;  %v718_v41 = vadd.f32 %v717_v37, %v507_v19  ;;  %v719_v42 = vpop.f32.mrb[10].mxu1  ;;  %1330 = vmatprep.subr.bf16.mxu1 %v805_v32  ;;  %v751_v45 = vmax.f32 %v645_v33, 0.0  ;;  %v3150_v31 = vld [vmem:[%s3758_s3 + $0x40] sm:$0xff]   ;;  %v3151_v32 = vld [vmem:[%s3758_s3 + $0x48] sm:$0xff]   ;;  %v3152_v33 = vld [vmem:[%s3758_s3 + $0x50] sm:$0xff]  }
 0x102   : > { %v754_v39 = vmax.f32 %v647_v34, 0.0  ;;  %v720_v43 = vadd.f32 %v719_v42, %v512_v23  ;;  %v721_v44 = vpop.f32.mrb[11].mxu1  ;;  %1331 = vmatpush1.bf16.msra.mxu1 %v804_v29  ;;  %v752_v50 = vmax.f32 %v716_v35, 0.0  ;;  %v3148_v29 = vld [vmem:[%s3758_s3 + $0x30] sm:$0xff]   ;;  %v3153_v34 = vld [vmem:[%s3758_s3 + $0x58] sm:$0xff]   ;;  %v3154_v35 = vld [vmem:[%s3758_s3 + $0x60] sm:$0xff]  }
 0x103   : > { %v755_v47 = vmax.f32 %v649_v40, 0.0  ;;  %v722_v48 = vadd.f32 %v721_v44, %v512_v23  ;;  %v753_v55 = vmax.f32 %v718_v41, 0.0  ;;  %v3142_v23 = vld [vmem:[%s3758_s3] sm:$0xff]   ;;  %v3155_v36 = vld [vmem:[%s3758_s3 + $0x68] sm:$0xff]   ;;  %v3156_v37 = vld [vmem:[%s3758_s3 + $0x70] sm:$0xff]   ;;  %v854_v41 = vpop.permute.xlu1 %853 }
 0x104   : > { %v806_v46 = vpack.c.bf16 %v754_v39, %v750_v38  ;;  %v756_v51 = vmax.f32 %v720_v43, 0.0  ;;  %v3157_v38 = vld [vmem:[%s3758_s3 + $0x78] sm:$0xff]   ;;  %v849_v39 = vpop.permute.xlu0 %848 }
 0x105   : > { %v652_v52 = vpop.f32.mrb[12].mxu0  ;;  %v807_v54 = vpack.c.bf16 %v755_v47, %v751_v45  ;;  %v757_v56 = vmax.f32 %v722_v48, 0.0 }
 0x106   : > { %v653_v57 = vadd.f32 %v652_v52, %v517_v49  ;;  %v654_v58 = vpop.f32.mrb[13].mxu0  ;;  %v808_v59 = vpack.c.bf16 %v756_v51, %v752_v50  ;;  %v3160_v51 = vld [vmem:[%s3760_s5 + $0x4] ss:$8 sps:$4 sm:$0xff]  }
 0x107   : > { %v656_v60 = vpop.f32.mrb[14].mxu0  ;;  %v725_v61 = vpop.f32.mrb[12].mxu1  ;;  %v809_v62 = vpack.c.bf16 %v757_v56, %v753_v55  ;;  %v655_v63 = vadd.f32 %v654_v58, %v517_v49  ;;  %1139 = vmatprep.subr.bf16.mxu0 %v807_v54 }
 0x108   : > { %v657_v0 = vadd.f32 %v656_v60, %v522_v53  ;;  %v726_v1 = vadd.f32 %v725_v61, %v517_v49  ;;  %v658_v2 = vpop.f32.mrb[15].mxu0  ;;  %v727_v4 = vpop.f32.mrb[13].mxu1  ;;  %1140 = vmatpush1.bf16.msra.mxu0 %v806_v46  ;;  %v758_v5 = vmax.f32 %v653_v57, 0.0 }
 0x109   : > { %v659_v7 = vadd.f32 %v658_v2, %v522_v53  ;;  %v728_v8 = vadd.f32 %v727_v4, %v517_v49  ;;  %v729_v9 = vpop.f32.mrb[14].mxu1  ;;  %1332 = vmatprep.subr.bf16.mxu1 %v809_v62  ;;  %v759_v12 = vmax.f32 %v655_v63, 0.0 }
 0x10a   : > { %v762_v6 = vmax.f32 %v657_v0, 0.0  ;;  %v730_v10 = vadd.f32 %v729_v9, %v522_v53  ;;  %v731_v11 = vpop.f32.mrb[15].mxu1  ;;  %1333 = vmatpush1.bf16.msra.mxu1 %v808_v59  ;;  %v760_v16 = vmax.f32 %v726_v1, 0.0  ;;  %v859_v1 = vpop.permute.xlu0 %858 }
 0x10b   : > { %v763_v14 = vmax.f32 %v659_v7, 0.0  ;;  %v732_v15 = vadd.f32 %v731_v11, %v522_v53  ;;  %v761_v19 = vmax.f32 %v728_v8, 0.0  ;;  %v864_v7 = vpop.permute.xlu1 %863 }
 0x10c   : > { %v810_v13 = vpack.c.bf16 %v762_v6, %v758_v5  ;;  %v764_v17 = vmax.f32 %v730_v10, 0.0 }
 0x10d   : > { %v811_v18 = vpack.c.bf16 %v763_v14, %v759_v12  ;;  %v765_v20 = vmax.f32 %v732_v15, 0.0 }
 0x10e   : > { %v812_v21 = vpack.c.bf16 %v764_v17, %v760_v16 }
 0x10f   : > { %v813_v22 = vpack.c.bf16 %v765_v20, %v761_v19  ;;  %1141 = vmatprep.subr.bf16.mxu0 %v811_v18 }
 0x110   : > { %1142 = vmatpush1.bf16.msra.mxu0 %v810_v13 }
 0x111   : > { %1334 = vmatprep.subr.bf16.mxu1 %v813_v22 }
 0x112   : > { %1335 = vmatpush1.bf16.msra.mxu1 %v812_v21 }
 0x113   : > { %3047 = vmatmul.mubr.msk.bf16.vlgmr.msra.gmra.mrb[16].mxu0 %vm1086_vm2, %v3142_v23 }
 0x114   : > { %1177 = vmatprep.mubr.bf16.mxu0 %v3230_v3 }
 0x115   : > { %3063 = vmatmul.mubr.msk.bf16.vlgmr.msra.gmra.mrb[16].mxu1 %vm1086_vm2, %v3142_v23 }
 0x116   : > { %1370 = vmatprep.mubr.bf16.mxu1 %v3230_v3 }
 0x11b   : > { %3048 = vmatmul.mubr.msk.bf16.gmra.mrb[20].mxu0 %vm1086_vm2, %v3143_v24 }
 0x11c   : > { %1187 = vmatprep.mubr.bf16.mxu0 %v3230_v3 }
 0x11d   : > { %3064 = vmatmul.mubr.msk.bf16.gmra.mrb[20].mxu1 %vm1086_vm2, %v3143_v24 }
 0x11e   : > { %1380 = vmatprep.mubr.bf16.mxu1 %v3230_v3 }
 0x123   : > { %3049 = vmatmul.mubr.msk.bf16.gmra.mrb[24].mxu0 %vm1086_vm2, %v3144_v25 }
 0x124   : > { %1197 = vmatprep.mubr.bf16.mxu0 %v3230_v3 }
 0x125   : > { %3065 = vmatmul.mubr.msk.bf16.gmra.mrb[24].mxu1 %vm1086_vm2, %v3144_v25 }
 0x126   : > { %1390 = vmatprep.mubr.bf16.mxu1 %v3230_v3 }
 0x12b   : > { %3050 = vmatmul.mubr.msk.bf16.gmra.mrb[28].mxu0 %vm1086_vm2, %v3145_v26 }
 0x12c   : > { %1207 = vmatprep.mubr.bf16.mxu0 %v3230_v3 }
 0x12d   : > { %3066 = vmatmul.mubr.msk.bf16.gmra.mrb[28].mxu1 %vm1086_vm2, %v3145_v26 }
 0x12e   : > { %1400 = vmatprep.mubr.bf16.mxu1 %v3230_v3 }
 0x133   : > { %3051 = vmatmul.mubr.msk.bf16.gmra.mrb[32].mxu0 %vm1086_vm2, %v3146_v27 }
 0x134   : > { %1217 = vmatprep.mubr.bf16.mxu0 %v3230_v3 }
 0x135   : > { %3067 = vmatmul.mubr.msk.bf16.gmra.mrb[32].mxu1 %vm1086_vm2, %v3146_v27 }
 0x136   : > { %1410 = vmatprep.mubr.bf16.mxu1 %v3230_v3 }
 0x13b   : > { %3052 = vmatmul.mubr.msk.bf16.gmra.mrb[36].mxu0 %vm1086_vm2, %v3147_v28 }
 0x13c   : > { %1227 = vmatprep.mubr.bf16.mxu0 %v3230_v3 }
 0x13d   : > { %3068 = vmatmul.mubr.msk.bf16.gmra.mrb[36].mxu1 %vm1086_vm2, %v3147_v28 }
 0x13e   : > { %1420 = vmatprep.mubr.bf16.mxu1 %v3230_v3 }
 0x143   : > { %3053 = vmatmul.mubr.msk.bf16.gmra.mrb[40].mxu0 %vm1086_vm2, %v3148_v29 }
 0x144   : > { %1237 = vmatprep.mubr.bf16.mxu0 %v3230_v3 }
 0x145   : > { %3069 = vmatmul.mubr.msk.bf16.gmra.mrb[40].mxu1 %vm1086_vm2, %v3148_v29 }
 0x146   : > { %1430 = vmatprep.mubr.bf16.mxu1 %v3230_v3 }
 0x14b   : > { %3054 = vmatmul.mubr.msk.bf16.gmra.mrb[44].mxu0 %vm1086_vm2, %v3149_v30 }
 0x14c   : > { %1247 = vmatprep.mubr.bf16.mxu0 %v3230_v3 }
 0x14d   : > { %3070 = vmatmul.mubr.msk.bf16.gmra.mrb[44].mxu1 %vm1086_vm2, %v3149_v30 }
 0x14e   : > { %1440 = vmatprep.mubr.bf16.mxu1 %v3230_v3 }
 0x153   : > { %3055 = vmatmul.mubr.msk.bf16.gmra.mrb[48].mxu0 %vm1086_vm2, %v3150_v31 }
 0x154   : > { %1257 = vmatprep.mubr.bf16.mxu0 %v3230_v3 }
 0x155   : > { %3071 = vmatmul.mubr.msk.bf16.gmra.mrb[48].mxu1 %vm1086_vm2, %v3150_v31 }
 0x156   : > { %1450 = vmatprep.mubr.bf16.mxu1 %v3230_v3 }
 0x15b   : > { %3056 = vmatmul.mubr.msk.bf16.gmra.mrb[52].mxu0 %vm1086_vm2, %v3151_v32 }
 0x15c   : > { %1267 = vmatprep.mubr.bf16.mxu0 %v3230_v3 }
 0x15d   : > { %3072 = vmatmul.mubr.msk.bf16.gmra.mrb[52].mxu1 %vm1086_vm2, %v3151_v32  ;;  %v869_v32 = vpop.permute.xlu0 %868 }
 0x15e   : > { %1460 = vmatprep.mubr.bf16.mxu1 %v3230_v3 }
 0x163   : > { %3057 = vmatmul.mubr.msk.bf16.gmra.mrb[56].mxu0 %vm1086_vm2, %v3152_v33 }
 0x164   : > { %1277 = vmatprep.mubr.bf16.mxu0 %v3230_v3 }
 0x165   : > { %3073 = vmatmul.mubr.msk.bf16.gmra.mrb[56].mxu1 %vm1086_vm2, %v3152_v33 }
 0x166   : > { %1470 = vmatprep.mubr.bf16.mxu1 %v3230_v3 }
 0x16b   : > { %3058 = vmatmul.mubr.msk.bf16.gmra.mrb[60].mxu0 %vm1086_vm2, %v3153_v34 }
 0x16c   : > { %1287 = vmatprep.mubr.bf16.mxu0 %v3230_v3 }
 0x16d   : > { %3074 = vmatmul.mubr.msk.bf16.gmra.mrb[60].mxu1 %vm1086_vm2, %v3153_v34 }
 0x16e   : > { %1480 = vmatprep.mubr.bf16.mxu1 %v3230_v3 }
 0x173   : > { %3059 = vmatmul.mubr.msk.bf16.gmra.mrb[64].mxu0 %vm1086_vm2, %v3154_v35 }
 0x174   : > { %1297 = vmatprep.mubr.bf16.mxu0 %v3230_v3 }
 0x175   : > { %3075 = vmatmul.mubr.msk.bf16.gmra.mrb[64].mxu1 %vm1086_vm2, %v3154_v35 }
 0x176   : > { %1490 = vmatprep.mubr.bf16.mxu1 %v3230_v3 }
 0x17b   : > { %3060 = vmatmul.mubr.msk.bf16.gmra.mrb[68].mxu0 %vm1086_vm2, %v3155_v36 }
 0x17c   : > { %1307 = vmatprep.mubr.bf16.mxu0 %v3230_v3 }
 0x17d   : > { %3076 = vmatmul.mubr.msk.bf16.gmra.mrb[68].mxu1 %vm1086_vm2, %v3155_v36 }
 0x17e   : > { %1500 = vmatprep.mubr.bf16.mxu1 %v3230_v3 }
 0x183   : > { %3061 = vmatmul.mubr.msk.bf16.gmra.mrb[72].mxu0 %vm1086_vm2, %v3156_v37 }
 0x184   : > { %1317 = vmatprep.mubr.bf16.mxu0 %v3230_v3 }
 0x185   : > { %3077 = vmatmul.mubr.msk.bf16.gmra.mrb[72].mxu1 %vm1086_vm2, %v3156_v37  ;;  %v874_v37 = vpop.permute.xlu1 %873 }
 0x186   : > { %1510 = vmatprep.mubr.bf16.mxu1 %v3230_v3 }
 0x18b   : > { %3062 = vmatmul.mubr.msk.bf16.gmra.mrb[76].mxu0 %vm1086_vm2, %v3157_v38 }
 0x18c   : > { %1937 = vmatprep.mubr.bf16.mxu0 %v3160_v51 }
 0x18d   : > { %3078 = vmatmul.mubr.msk.bf16.gmra.mrb[76].mxu1 %vm1086_vm2, %v3157_v38 }
 0x18e   : > { %2050 = vmatprep.mubr.bf16.mxu1 %v3160_v51 }
 0x1e6   : > { %v1169_v40 = vpop.f32.mrb[16].mxu0 }
 0x1e7   : > { %v1170_v42 = vadd.f32 %v1169_v40, %v849_v39  ;;  %v1171_v43 = vpop.f32.mrb[17].mxu0 }
 0x1e8   : > { %v1172_v44 = vadd.f32 %v1171_v43, %v849_v39  ;;  %v1173_v45 = vpop.f32.mrb[18].mxu0  ;;  %v1362_v46 = vpop.f32.mrb[16].mxu1 }
 0x1e9   : > { %v1174_v47 = vadd.f32 %v1173_v45, %v854_v41  ;;  %v1363_v48 = vadd.f32 %v1362_v46, %v849_v39  ;;  %v1175_v49 = vpop.f32.mrb[19].mxu0  ;;  %v1364_v50 = vpop.f32.mrb[17].mxu1  ;;  %v1521_v55 = vmax.f32 %v1170_v42, 0.0 }
 0x1ea   : > { %v1176_v52 = vadd.f32 %v1175_v49, %v854_v41  ;;  %v1365_v53 = vadd.f32 %v1364_v50, %v849_v39  ;;  %v1366_v54 = vpop.f32.mrb[18].mxu1  ;;  %v1522_v59 = vmax.f32 %v1172_v44, 0.0 }
 0x1eb   : > { %v1525_v56 = vmax.f32 %v1174_v47, 0.0  ;;  %v1367_v57 = vadd.f32 %v1366_v54, %v854_v41  ;;  %v1368_v58 = vpop.f32.mrb[19].mxu1  ;;  %v1523_v63 = vmax.f32 %v1363_v48, 0.0 }
 0x1ec   : > { %v1526_v60 = vmax.f32 %v1176_v52, 0.0  ;;  %v1369_v61 = vadd.f32 %v1368_v58, %v854_v41  ;;  %v1524_v4 = vmax.f32 %v1365_v53, 0.0 }
 0x1ed   : > { %v1665_v62 = vpack.c.bf16 %v1525_v56, %v1521_v55  ;;  %v1527_v0 = vmax.f32 %v1367_v57, 0.0 }
 0x1ee   : > { %v1666_v2 = vpack.c.bf16 %v1526_v60, %v1522_v59  ;;  %v1528_v5 = vmax.f32 %v1369_v61, 0.0  ;;  %v1179_v6 = vpop.f32.mrb[20].mxu0 }
 0x1ef   : > { %v1667_v8 = vpack.c.bf16 %v1527_v0, %v1523_v63  ;;  %v1180_v9 = vadd.f32 %v1179_v6, %v859_v1  ;;  %v1181_v10 = vpop.f32.mrb[21].mxu0 }
 0x1f0   : > { %v1668_v11 = vpack.c.bf16 %v1528_v5, %v1524_v4  ;;  %v1182_v12 = vadd.f32 %v1181_v10, %v859_v1  ;;  %v1183_v13 = vpop.f32.mrb[22].mxu0  ;;  %v1372_v14 = vpop.f32.mrb[20].mxu1  ;;  %1905 = vmatprep.subr.bf16.mxu0 %v1666_v2 }
 0x1f1   : > { %v1184_v15 = vadd.f32 %v1183_v13, %v864_v7  ;;  %v1373_v16 = vadd.f32 %v1372_v14, %v859_v1  ;;  %v1185_v17 = vpop.f32.mrb[23].mxu0  ;;  %v1374_v18 = vpop.f32.mrb[21].mxu1  ;;  %1906 = vmatpush1.bf16.msra.mxu0 %v1665_v62  ;;  %v1529_v22 = vmax.f32 %v1180_v9, 0.0 }
 0x1f2   : > { %v1186_v19 = vadd.f32 %v1185_v17, %v864_v7  ;;  %v1375_v20 = vadd.f32 %v1374_v18, %v859_v1  ;;  %v1376_v21 = vpop.f32.mrb[22].mxu1  ;;  %2018 = vmatprep.subr.bf16.mxu1 %v1668_v11  ;;  %v1530_v26 = vmax.f32 %v1182_v12, 0.0  ;;  %v879_v62 = vpop.permute.xlu0 %878 }
 0x1f3   : > { %v1533_v23 = vmax.f32 %v1184_v15, 0.0  ;;  %v1377_v24 = vadd.f32 %v1376_v21, %v864_v7  ;;  %v1378_v25 = vpop.f32.mrb[23].mxu1  ;;  %2019 = vmatpush1.bf16.msra.mxu1 %v1667_v8  ;;  %v1531_v30 = vmax.f32 %v1373_v16, 0.0  ;;  %v884_v4 = vpop.permute.xlu1 %883 }
 0x1f4   : > { %v1534_v27 = vmax.f32 %v1186_v19, 0.0  ;;  %v1379_v28 = vadd.f32 %v1378_v25, %v864_v7  ;;  %v1532_v34 = vmax.f32 %v1375_v20, 0.0 }
 0x1f5   : > { %v1669_v29 = vpack.c.bf16 %v1533_v23, %v1529_v22  ;;  %v1535_v31 = vmax.f32 %v1377_v24, 0.0 }
 0x1f6   : > { %v1670_v33 = vpack.c.bf16 %v1534_v27, %v1530_v26  ;;  %v1536_v35 = vmax.f32 %v1379_v28, 0.0  ;;  %v1189_v36 = vpop.f32.mrb[24].mxu0 }
 0x1f7   : > { %v1671_v38 = vpack.c.bf16 %v1535_v31, %v1531_v30  ;;  %v1190_v39 = vadd.f32 %v1189_v36, %v869_v32  ;;  %v1191_v40 = vpop.f32.mrb[25].mxu0 }
 0x1f8   : > { %v1672_v41 = vpack.c.bf16 %v1536_v35, %v1532_v34  ;;  %v1192_v42 = vadd.f32 %v1191_v40, %v869_v32  ;;  %v1193_v43 = vpop.f32.mrb[26].mxu0  ;;  %v1382_v44 = vpop.f32.mrb[24].mxu1  ;;  %1907 = vmatprep.subr.bf16.mxu0 %v1670_v33 }
 0x1f9   : > { %v1194_v45 = vadd.f32 %v1193_v43, %v874_v37  ;;  %v1383_v46 = vadd.f32 %v1382_v44, %v869_v32  ;;  %v1195_v47 = vpop.f32.mrb[27].mxu0  ;;  %v1384_v48 = vpop.f32.mrb[25].mxu1  ;;  %1908 = vmatpush1.bf16.msra.mxu0 %v1669_v29  ;;  %v1537_v52 = vmax.f32 %v1190_v39, 0.0 }
 0x1fa   : > { %v1196_v49 = vadd.f32 %v1195_v47, %v874_v37  ;;  %v1385_v50 = vadd.f32 %v1384_v48, %v869_v32  ;;  %v1386_v51 = vpop.f32.mrb[26].mxu1  ;;  %2020 = vmatprep.subr.bf16.mxu1 %v1672_v41  ;;  %v1538_v56 = vmax.f32 %v1192_v42, 0.0  ;;  %v889_v29 = vpop.permute.xlu0 %888 }
 0x1fb   : > { %v1541_v53 = vmax.f32 %v1194_v45, 0.0  ;;  %v1387_v54 = vadd.f32 %v1386_v51, %v874_v37  ;;  %v1388_v55 = vpop.f32.mrb[27].mxu1  ;;  %2021 = vmatpush1.bf16.msra.mxu1 %v1671_v38  ;;  %v1539_v60 = vmax.f32 %v1383_v46, 0.0  ;;  %v894_v34 = vpop.permute.xlu1 %893 }
 0x1fc   : > { %v1542_v57 = vmax.f32 %v1196_v49, 0.0  ;;  %v1389_v58 = vadd.f32 %v1388_v55, %v874_v37  ;;  %v1540_v0 = vmax.f32 %v1385_v50, 0.0 }
 0x1fd   : > { %v1673_v59 = vpack.c.bf16 %v1541_v53, %v1537_v52  ;;  %v1543_v61 = vmax.f32 %v1387_v54, 0.0 }
 0x1fe   : > { %v1674_v63 = vpack.c.bf16 %v1542_v57, %v1538_v56  ;;  %v1544_v1 = vmax.f32 %v1389_v58, 0.0  ;;  %v1199_v2 = vpop.f32.mrb[28].mxu0 }
 0x1ff   : > { %v1675_v5 = vpack.c.bf16 %v1543_v61, %v1539_v60  ;;  %v1200_v6 = vadd.f32 %v1199_v2, %v879_v62  ;;  %v1201_v7 = vpop.f32.mrb[29].mxu0 }
 0x200   : > { %v1676_v8 = vpack.c.bf16 %v1544_v1, %v1540_v0  ;;  %v1202_v9 = vadd.f32 %v1201_v7, %v879_v62  ;;  %v1203_v10 = vpop.f32.mrb[30].mxu0  ;;  %v1392_v11 = vpop.f32.mrb[28].mxu1  ;;  %1909 = vmatprep.subr.bf16.mxu0 %v1674_v63 }
 0x201   : > { %v1204_v12 = vadd.f32 %v1203_v10, %v884_v4  ;;  %v1393_v13 = vadd.f32 %v1392_v11, %v879_v62  ;;  %v1205_v14 = vpop.f32.mrb[31].mxu0  ;;  %v1394_v15 = vpop.f32.mrb[29].mxu1  ;;  %1910 = vmatpush1.bf16.msra.mxu0 %v1673_v59  ;;  %v1545_v19 = vmax.f32 %v1200_v6, 0.0 }
 0x202   : > { %v1206_v16 = vadd.f32 %v1205_v14, %v884_v4  ;;  %v1395_v17 = vadd.f32 %v1394_v15, %v879_v62  ;;  %v1396_v18 = vpop.f32.mrb[30].mxu1  ;;  %2022 = vmatprep.subr.bf16.mxu1 %v1676_v8  ;;  %v1546_v23 = vmax.f32 %v1202_v9, 0.0  ;;  %v899_v59 = vpop.permute.xlu0 %898 }
 0x203   : > { %v1549_v20 = vmax.f32 %v1204_v12, 0.0  ;;  %v1397_v21 = vadd.f32 %v1396_v18, %v884_v4  ;;  %v1398_v22 = vpop.f32.mrb[31].mxu1  ;;  %2023 = vmatpush1.bf16.msra.mxu1 %v1675_v5  ;;  %v1547_v27 = vmax.f32 %v1393_v13, 0.0  ;;  %v904_v0 = vpop.permute.xlu1 %903 }
 0x204   : > { %v1550_v24 = vmax.f32 %v1206_v16, 0.0  ;;  %v1399_v25 = vadd.f32 %v1398_v22, %v884_v4  ;;  %v1548_v31 = vmax.f32 %v1395_v17, 0.0 }
 0x205   : > { %v1677_v26 = vpack.c.bf16 %v1549_v20, %v1545_v19  ;;  %v1551_v28 = vmax.f32 %v1397_v21, 0.0 }
 0x206   : > { %v1678_v30 = vpack.c.bf16 %v1550_v24, %v1546_v23  ;;  %v1552_v32 = vmax.f32 %v1399_v25, 0.0  ;;  %v1209_v33 = vpop.f32.mrb[32].mxu0 }
 0x207   : > { %v1679_v35 = vpack.c.bf16 %v1551_v28, %v1547_v27  ;;  %v1210_v36 = vadd.f32 %v1209_v33, %v889_v29  ;;  %v1211_v37 = vpop.f32.mrb[33].mxu0 }
 0x208   : > { %v1680_v38 = vpack.c.bf16 %v1552_v32, %v1548_v31  ;;  %v1212_v39 = vadd.f32 %v1211_v37, %v889_v29  ;;  %v1213_v40 = vpop.f32.mrb[34].mxu0  ;;  %v1402_v41 = vpop.f32.mrb[32].mxu1  ;;  %1911 = vmatprep.subr.bf16.mxu0 %v1678_v30 }
 0x209   : > { %v1214_v42 = vadd.f32 %v1213_v40, %v894_v34  ;;  %v1403_v43 = vadd.f32 %v1402_v41, %v889_v29  ;;  %v1215_v44 = vpop.f32.mrb[35].mxu0  ;;  %v1404_v45 = vpop.f32.mrb[33].mxu1  ;;  %1912 = vmatpush1.bf16.msra.mxu0 %v1677_v26  ;;  %v1553_v49 = vmax.f32 %v1210_v36, 0.0 }
 0x20a   : > { %v1216_v46 = vadd.f32 %v1215_v44, %v894_v34  ;;  %v1405_v47 = vadd.f32 %v1404_v45, %v889_v29  ;;  %v1406_v48 = vpop.f32.mrb[34].mxu1  ;;  %2024 = vmatprep.subr.bf16.mxu1 %v1680_v38  ;;  %v1554_v53 = vmax.f32 %v1212_v39, 0.0  ;;  %v909_v26 = vpop.permute.xlu0 %908 }
 0x20b   : > { %v1557_v50 = vmax.f32 %v1214_v42, 0.0  ;;  %v1407_v51 = vadd.f32 %v1406_v48, %v894_v34  ;;  %v1408_v52 = vpop.f32.mrb[35].mxu1  ;;  %2025 = vmatpush1.bf16.msra.mxu1 %v1679_v35  ;;  %v1555_v57 = vmax.f32 %v1403_v43, 0.0  ;;  %v914_v31 = vpop.permute.xlu1 %913 }
 0x20c   : > { %v1558_v54 = vmax.f32 %v1216_v46, 0.0  ;;  %v1409_v55 = vadd.f32 %v1408_v52, %v894_v34  ;;  %v1556_v61 = vmax.f32 %v1405_v47, 0.0 }
 0x20d   : > { %v1681_v56 = vpack.c.bf16 %v1557_v50, %v1553_v49  ;;  %v1559_v58 = vmax.f32 %v1407_v51, 0.0 }
 0x20e   : > { %v1682_v60 = vpack.c.bf16 %v1558_v54, %v1554_v53  ;;  %v1560_v62 = vmax.f32 %v1409_v55, 0.0  ;;  %v1219_v63 = vpop.f32.mrb[36].mxu0 }
 0x20f   : > { %v1683_v1 = vpack.c.bf16 %v1559_v58, %v1555_v57  ;;  %v1220_v2 = vadd.f32 %v1219_v63, %v899_v59  ;;  %v1221_v4 = vpop.f32.mrb[37].mxu0 }
 0x210   : > { %v1684_v5 = vpack.c.bf16 %v1560_v62, %v1556_v61  ;;  %v1222_v6 = vadd.f32 %v1221_v4, %v899_v59  ;;  %v1223_v7 = vpop.f32.mrb[38].mxu0  ;;  %v1412_v8 = vpop.f32.mrb[36].mxu1  ;;  %1913 = vmatprep.subr.bf16.mxu0 %v1682_v60 }
 0x211   : > { %v1224_v9 = vadd.f32 %v1223_v7, %v904_v0  ;;  %v1413_v10 = vadd.f32 %v1412_v8, %v899_v59  ;;  %v1225_v11 = vpop.f32.mrb[39].mxu0  ;;  %v1414_v12 = vpop.f32.mrb[37].mxu1  ;;  %1914 = vmatpush1.bf16.msra.mxu0 %v1681_v56  ;;  %v1561_v16 = vmax.f32 %v1220_v2, 0.0 }
 0x212   : > { %v1226_v13 = vadd.f32 %v1225_v11, %v904_v0  ;;  %v1415_v14 = vadd.f32 %v1414_v12, %v899_v59  ;;  %v1416_v15 = vpop.f32.mrb[38].mxu1  ;;  %2026 = vmatprep.subr.bf16.mxu1 %v1684_v5  ;;  %v1562_v20 = vmax.f32 %v1222_v6, 0.0  ;;  %v919_v56 = vpop.permute.xlu0 %918 }
 0x213   : > { %v1565_v17 = vmax.f32 %v1224_v9, 0.0  ;;  %v1417_v18 = vadd.f32 %v1416_v15, %v904_v0  ;;  %v1418_v19 = vpop.f32.mrb[39].mxu1  ;;  %2027 = vmatpush1.bf16.msra.mxu1 %v1683_v1  ;;  %v1563_v24 = vmax.f32 %v1413_v10, 0.0  ;;  %v924_v61 = vpop.permute.xlu1 %923 }
 0x214   : > { %v1566_v21 = vmax.f32 %v1226_v13, 0.0  ;;  %v1419_v22 = vadd.f32 %v1418_v19, %v904_v0  ;;  %v1564_v28 = vmax.f32 %v1415_v14, 0.0 }
 0x215   : > { %v1685_v23 = vpack.c.bf16 %v1565_v17, %v1561_v16  ;;  %v1567_v25 = vmax.f32 %v1417_v18, 0.0 }
 0x216   : > { %v1686_v27 = vpack.c.bf16 %v1566_v21, %v1562_v20  ;;  %v1568_v29 = vmax.f32 %v1419_v22, 0.0  ;;  %v1229_v30 = vpop.f32.mrb[40].mxu0 }
 0x217   : > { %v1687_v32 = vpack.c.bf16 %v1567_v25, %v1563_v24  ;;  %v1230_v33 = vadd.f32 %v1229_v30, %v909_v26  ;;  %v1231_v34 = vpop.f32.mrb[41].mxu0 }
 0x218   : > { %v1688_v35 = vpack.c.bf16 %v1568_v29, %v1564_v28  ;;  %v1232_v36 = vadd.f32 %v1231_v34, %v909_v26  ;;  %v1233_v37 = vpop.f32.mrb[42].mxu0  ;;  %v1422_v38 = vpop.f32.mrb[40].mxu1  ;;  %1915 = vmatprep.subr.bf16.mxu0 %v1686_v27 }
 0x219   : > { %v1234_v39 = vadd.f32 %v1233_v37, %v914_v31  ;;  %v1423_v40 = vadd.f32 %v1422_v38, %v909_v26  ;;  %v1235_v41 = vpop.f32.mrb[43].mxu0  ;;  %v1424_v42 = vpop.f32.mrb[41].mxu1  ;;  %1916 = vmatpush1.bf16.msra.mxu0 %v1685_v23  ;;  %v1569_v46 = vmax.f32 %v1230_v33, 0.0 }
 0x21a   : > { %v1236_v43 = vadd.f32 %v1235_v41, %v914_v31  ;;  %v1425_v44 = vadd.f32 %v1424_v42, %v909_v26  ;;  %v1426_v45 = vpop.f32.mrb[42].mxu1  ;;  %2028 = vmatprep.subr.bf16.mxu1 %v1688_v35  ;;  %v1570_v50 = vmax.f32 %v1232_v36, 0.0  ;;  %v929_v23 = vpop.permute.xlu0 %928 }
 0x21b   : > { %v1573_v47 = vmax.f32 %v1234_v39, 0.0  ;;  %v1427_v48 = vadd.f32 %v1426_v45, %v914_v31  ;;  %v1428_v49 = vpop.f32.mrb[43].mxu1  ;;  %2029 = vmatpush1.bf16.msra.mxu1 %v1687_v32  ;;  %v1571_v54 = vmax.f32 %v1423_v40, 0.0  ;;  %v934_v28 = vpop.permute.xlu1 %933 }
 0x21c   : > { %v1574_v51 = vmax.f32 %v1236_v43, 0.0  ;;  %v1429_v52 = vadd.f32 %v1428_v49, %v914_v31  ;;  %v1572_v58 = vmax.f32 %v1425_v44, 0.0 }
 0x21d   : > { %v1689_v53 = vpack.c.bf16 %v1573_v47, %v1569_v46  ;;  %v1575_v55 = vmax.f32 %v1427_v48, 0.0 }
 0x21e   : > { %v1690_v57 = vpack.c.bf16 %v1574_v51, %v1570_v50  ;;  %v1576_v59 = vmax.f32 %v1429_v52, 0.0  ;;  %v1239_v60 = vpop.f32.mrb[44].mxu0 }
 0x21f   : > { %v1691_v62 = vpack.c.bf16 %v1575_v55, %v1571_v54  ;;  %v1240_v63 = vadd.f32 %v1239_v60, %v919_v56  ;;  %v1241_v0 = vpop.f32.mrb[45].mxu0 }
 0x220   : > { %v1692_v1 = vpack.c.bf16 %v1576_v59, %v1572_v58  ;;  %v1242_v2 = vadd.f32 %v1241_v0, %v919_v56  ;;  %v1243_v4 = vpop.f32.mrb[46].mxu0  ;;  %v1432_v5 = vpop.f32.mrb[44].mxu1  ;;  %1917 = vmatprep.subr.bf16.mxu0 %v1690_v57 }
 0x221   : > { %v1244_v6 = vadd.f32 %v1243_v4, %v924_v61  ;;  %v1433_v7 = vadd.f32 %v1432_v5, %v919_v56  ;;  %v1245_v8 = vpop.f32.mrb[47].mxu0  ;;  %v1434_v9 = vpop.f32.mrb[45].mxu1  ;;  %1918 = vmatpush1.bf16.msra.mxu0 %v1689_v53  ;;  %v1577_v13 = vmax.f32 %v1240_v63, 0.0 }
 0x222   : > { %v1246_v10 = vadd.f32 %v1245_v8, %v924_v61  ;;  %v1435_v11 = vadd.f32 %v1434_v9, %v919_v56  ;;  %v1436_v12 = vpop.f32.mrb[46].mxu1  ;;  %2030 = vmatprep.subr.bf16.mxu1 %v1692_v1  ;;  %v1578_v17 = vmax.f32 %v1242_v2, 0.0  ;;  %v939_v53 = vpop.permute.xlu0 %938 }
 0x223   : > { %v1581_v14 = vmax.f32 %v1244_v6, 0.0  ;;  %v1437_v15 = vadd.f32 %v1436_v12, %v924_v61  ;;  %v1438_v16 = vpop.f32.mrb[47].mxu1  ;;  %2031 = vmatpush1.bf16.msra.mxu1 %v1691_v62  ;;  %v1579_v21 = vmax.f32 %v1433_v7, 0.0  ;;  %v944_v58 = vpop.permute.xlu1 %943 }
 0x224   : > { %v1582_v18 = vmax.f32 %v1246_v10, 0.0  ;;  %v1439_v19 = vadd.f32 %v1438_v16, %v924_v61  ;;  %v1580_v25 = vmax.f32 %v1435_v11, 0.0 }
 0x225   : > { %v1693_v20 = vpack.c.bf16 %v1581_v14, %v1577_v13  ;;  %v1583_v22 = vmax.f32 %v1437_v15, 0.0 }
 0x226   : > { %v1694_v24 = vpack.c.bf16 %v1582_v18, %v1578_v17  ;;  %v1584_v26 = vmax.f32 %v1439_v19, 0.0  ;;  %v1249_v27 = vpop.f32.mrb[48].mxu0 }
 0x227   : > { %v1695_v29 = vpack.c.bf16 %v1583_v22, %v1579_v21  ;;  %v1250_v30 = vadd.f32 %v1249_v27, %v929_v23  ;;  %v1251_v31 = vpop.f32.mrb[49].mxu0 }
 0x228   : > { %v1696_v32 = vpack.c.bf16 %v1584_v26, %v1580_v25  ;;  %v1252_v33 = vadd.f32 %v1251_v31, %v929_v23  ;;  %v1253_v34 = vpop.f32.mrb[50].mxu0  ;;  %v1442_v35 = vpop.f32.mrb[48].mxu1  ;;  %1919 = vmatprep.subr.bf16.mxu0 %v1694_v24 }
 0x229   : > { %v1254_v36 = vadd.f32 %v1253_v34, %v934_v28  ;;  %v1443_v37 = vadd.f32 %v1442_v35, %v929_v23  ;;  %v1255_v38 = vpop.f32.mrb[51].mxu0  ;;  %v1444_v39 = vpop.f32.mrb[49].mxu1  ;;  %1920 = vmatpush1.bf16.msra.mxu0 %v1693_v20  ;;  %v1585_v43 = vmax.f32 %v1250_v30, 0.0 }
 0x22a   : > { %v1256_v40 = vadd.f32 %v1255_v38, %v934_v28  ;;  %v1445_v41 = vadd.f32 %v1444_v39, %v929_v23  ;;  %v1446_v42 = vpop.f32.mrb[50].mxu1  ;;  %2032 = vmatprep.subr.bf16.mxu1 %v1696_v32  ;;  %v1586_v47 = vmax.f32 %v1252_v33, 0.0  ;;  %v949_v20 = vpop.permute.xlu0 %948 }
 0x22b   : > { %v1589_v44 = vmax.f32 %v1254_v36, 0.0  ;;  %v1447_v45 = vadd.f32 %v1446_v42, %v934_v28  ;;  %v1448_v46 = vpop.f32.mrb[51].mxu1  ;;  %2033 = vmatpush1.bf16.msra.mxu1 %v1695_v29  ;;  %v1587_v51 = vmax.f32 %v1443_v37, 0.0  ;;  %v954_v25 = vpop.permute.xlu1 %953 }
 0x22c   : > { %v1590_v48 = vmax.f32 %v1256_v40, 0.0  ;;  %v1449_v49 = vadd.f32 %v1448_v46, %v934_v28  ;;  %v1588_v55 = vmax.f32 %v1445_v41, 0.0 }
 0x22d   : > { %v1697_v50 = vpack.c.bf16 %v1589_v44, %v1585_v43  ;;  %v1591_v52 = vmax.f32 %v1447_v45, 0.0 }
 0x22e   : > { %v1698_v54 = vpack.c.bf16 %v1590_v48, %v1586_v47  ;;  %v1592_v56 = vmax.f32 %v1449_v49, 0.0  ;;  %v1259_v57 = vpop.f32.mrb[52].mxu0 }
 0x22f   : > { %v1699_v59 = vpack.c.bf16 %v1591_v52, %v1587_v51  ;;  %v1260_v60 = vadd.f32 %v1259_v57, %v939_v53  ;;  %v1261_v61 = vpop.f32.mrb[53].mxu0 }
 0x230   : > { %v1700_v62 = vpack.c.bf16 %v1592_v56, %v1588_v55  ;;  %v1262_v63 = vadd.f32 %v1261_v61, %v939_v53  ;;  %v1263_v0 = vpop.f32.mrb[54].mxu0  ;;  %v1452_v1 = vpop.f32.mrb[52].mxu1  ;;  %1921 = vmatprep.subr.bf16.mxu0 %v1698_v54 }
 0x231   : > { %v1264_v2 = vadd.f32 %v1263_v0, %v944_v58  ;;  %v1453_v4 = vadd.f32 %v1452_v1, %v939_v53  ;;  %v1265_v5 = vpop.f32.mrb[55].mxu0  ;;  %v1454_v6 = vpop.f32.mrb[53].mxu1  ;;  %1922 = vmatpush1.bf16.msra.mxu0 %v1697_v50  ;;  %v1593_v10 = vmax.f32 %v1260_v60, 0.0 }
 0x232   : > { %v1266_v7 = vadd.f32 %v1265_v5, %v944_v58  ;;  %v1455_v8 = vadd.f32 %v1454_v6, %v939_v53  ;;  %v1456_v9 = vpop.f32.mrb[54].mxu1  ;;  %2034 = vmatprep.subr.bf16.mxu1 %v1700_v62  ;;  %v1594_v14 = vmax.f32 %v1262_v63, 0.0  ;;  %v959_v50 = vpop.permute.xlu0 %958 }
 0x233   : > { %v1597_v11 = vmax.f32 %v1264_v2, 0.0  ;;  %v1457_v12 = vadd.f32 %v1456_v9, %v944_v58  ;;  %v1458_v13 = vpop.f32.mrb[55].mxu1  ;;  %2035 = vmatpush1.bf16.msra.mxu1 %v1699_v59  ;;  %v1595_v18 = vmax.f32 %v1453_v4, 0.0  ;;  %v964_v55 = vpop.permute.xlu1 %963 }
 0x234   : > { %v1598_v15 = vmax.f32 %v1266_v7, 0.0  ;;  %v1459_v16 = vadd.f32 %v1458_v13, %v944_v58  ;;  %v1596_v22 = vmax.f32 %v1455_v8, 0.0 }
 0x235   : > { %v1701_v17 = vpack.c.bf16 %v1597_v11, %v1593_v10  ;;  %v1599_v19 = vmax.f32 %v1457_v12, 0.0 }
 0x236   : > { %v1702_v21 = vpack.c.bf16 %v1598_v15, %v1594_v14  ;;  %v1600_v23 = vmax.f32 %v1459_v16, 0.0  ;;  %v1269_v24 = vpop.f32.mrb[56].mxu0 }
 0x237   : > { %v1703_v26 = vpack.c.bf16 %v1599_v19, %v1595_v18  ;;  %v1270_v27 = vadd.f32 %v1269_v24, %v949_v20  ;;  %v1271_v28 = vpop.f32.mrb[57].mxu0 }
 0x238   : > { %v1704_v29 = vpack.c.bf16 %v1600_v23, %v1596_v22  ;;  %v1272_v30 = vadd.f32 %v1271_v28, %v949_v20  ;;  %v1273_v31 = vpop.f32.mrb[58].mxu0  ;;  %v1462_v32 = vpop.f32.mrb[56].mxu1  ;;  %1923 = vmatprep.subr.bf16.mxu0 %v1702_v21 }
 0x239   : > { %v1274_v33 = vadd.f32 %v1273_v31, %v954_v25  ;;  %v1463_v34 = vadd.f32 %v1462_v32, %v949_v20  ;;  %v1275_v35 = vpop.f32.mrb[59].mxu0  ;;  %v1464_v36 = vpop.f32.mrb[57].mxu1  ;;  %1924 = vmatpush1.bf16.msra.mxu0 %v1701_v17  ;;  %v1601_v40 = vmax.f32 %v1270_v27, 0.0 }
 0x23a   : > { %v1276_v37 = vadd.f32 %v1275_v35, %v954_v25  ;;  %v1465_v38 = vadd.f32 %v1464_v36, %v949_v20  ;;  %v1466_v39 = vpop.f32.mrb[58].mxu1  ;;  %2036 = vmatprep.subr.bf16.mxu1 %v1704_v29  ;;  %v1602_v44 = vmax.f32 %v1272_v30, 0.0  ;;  %v969_v17 = vpop.permute.xlu0 %968 }
 0x23b   : > { %v1605_v41 = vmax.f32 %v1274_v33, 0.0  ;;  %v1467_v42 = vadd.f32 %v1466_v39, %v954_v25  ;;  %v1468_v43 = vpop.f32.mrb[59].mxu1  ;;  %2037 = vmatpush1.bf16.msra.mxu1 %v1703_v26  ;;  %v1603_v48 = vmax.f32 %v1463_v34, 0.0  ;;  %v974_v22 = vpop.permute.xlu1 %973 }
 0x23c   : > { %v1606_v45 = vmax.f32 %v1276_v37, 0.0  ;;  %v1469_v46 = vadd.f32 %v1468_v43, %v954_v25  ;;  %v1604_v52 = vmax.f32 %v1465_v38, 0.0 }
 0x23d   : > { %v1705_v47 = vpack.c.bf16 %v1605_v41, %v1601_v40  ;;  %v1607_v49 = vmax.f32 %v1467_v42, 0.0 }
 0x23e   : > { %v1706_v51 = vpack.c.bf16 %v1606_v45, %v1602_v44  ;;  %v1608_v53 = vmax.f32 %v1469_v46, 0.0  ;;  %v1279_v54 = vpop.f32.mrb[60].mxu0 }
 0x23f   : > { %v1707_v56 = vpack.c.bf16 %v1607_v49, %v1603_v48  ;;  %v1280_v57 = vadd.f32 %v1279_v54, %v959_v50  ;;  %v1281_v58 = vpop.f32.mrb[61].mxu0 }
 0x240   : > { %v1708_v59 = vpack.c.bf16 %v1608_v53, %v1604_v52  ;;  %v1282_v60 = vadd.f32 %v1281_v58, %v959_v50  ;;  %v1283_v61 = vpop.f32.mrb[62].mxu0  ;;  %v1472_v62 = vpop.f32.mrb[60].mxu1  ;;  %1925 = vmatprep.subr.bf16.mxu0 %v1706_v51 }
 0x241   : > { %v1284_v63 = vadd.f32 %v1283_v61, %v964_v55  ;;  %v1473_v0 = vadd.f32 %v1472_v62, %v959_v50  ;;  %v1285_v1 = vpop.f32.mrb[63].mxu0  ;;  %v1474_v2 = vpop.f32.mrb[61].mxu1  ;;  %1926 = vmatpush1.bf16.msra.mxu0 %v1705_v47  ;;  %v1609_v7 = vmax.f32 %v1280_v57, 0.0 }
 0x242   : > { %v1286_v4 = vadd.f32 %v1285_v1, %v964_v55  ;;  %v1475_v5 = vadd.f32 %v1474_v2, %v959_v50  ;;  %v1476_v6 = vpop.f32.mrb[62].mxu1  ;;  %2038 = vmatprep.subr.bf16.mxu1 %v1708_v59  ;;  %v1610_v11 = vmax.f32 %v1282_v60, 0.0  ;;  %v979_v47 = vpop.permute.xlu0 %978 }
 0x243   : > { %v1613_v8 = vmax.f32 %v1284_v63, 0.0  ;;  %v1477_v9 = vadd.f32 %v1476_v6, %v964_v55  ;;  %v1478_v10 = vpop.f32.mrb[63].mxu1  ;;  %2039 = vmatpush1.bf16.msra.mxu1 %v1707_v56  ;;  %v1611_v15 = vmax.f32 %v1473_v0, 0.0  ;;  %v984_v52 = vpop.permute.xlu1 %983 }
 0x244   : > { %v1614_v12 = vmax.f32 %v1286_v4, 0.0  ;;  %v1479_v13 = vadd.f32 %v1478_v10, %v964_v55  ;;  %v1612_v19 = vmax.f32 %v1475_v5, 0.0 }
 0x245   : > { %v1709_v14 = vpack.c.bf16 %v1613_v8, %v1609_v7  ;;  %v1615_v16 = vmax.f32 %v1477_v9, 0.0 }
 0x246   : > { %v1710_v18 = vpack.c.bf16 %v1614_v12, %v1610_v11  ;;  %v1616_v20 = vmax.f32 %v1479_v13, 0.0  ;;  %v1289_v21 = vpop.f32.mrb[64].mxu0 }
 0x247   : > { %v1711_v23 = vpack.c.bf16 %v1615_v16, %v1611_v15  ;;  %v1290_v24 = vadd.f32 %v1289_v21, %v969_v17  ;;  %v1291_v25 = vpop.f32.mrb[65].mxu0 }
 0x248   : > { %v1712_v26 = vpack.c.bf16 %v1616_v20, %v1612_v19  ;;  %v1292_v27 = vadd.f32 %v1291_v25, %v969_v17  ;;  %v1293_v28 = vpop.f32.mrb[66].mxu0  ;;  %v1482_v29 = vpop.f32.mrb[64].mxu1  ;;  %1927 = vmatprep.subr.bf16.mxu0 %v1710_v18 }
 0x249   : > { %v1294_v30 = vadd.f32 %v1293_v28, %v974_v22  ;;  %v1483_v31 = vadd.f32 %v1482_v29, %v969_v17  ;;  %v1295_v32 = vpop.f32.mrb[67].mxu0  ;;  %v1484_v33 = vpop.f32.mrb[65].mxu1  ;;  %1928 = vmatpush1.bf16.msra.mxu0 %v1709_v14  ;;  %v1617_v37 = vmax.f32 %v1290_v24, 0.0 }
 0x24a   : > { %v1296_v34 = vadd.f32 %v1295_v32, %v974_v22  ;;  %v1485_v35 = vadd.f32 %v1484_v33, %v969_v17  ;;  %v1486_v36 = vpop.f32.mrb[66].mxu1  ;;  %2040 = vmatprep.subr.bf16.mxu1 %v1712_v26  ;;  %v1618_v41 = vmax.f32 %v1292_v27, 0.0  ;;  %v989_v14 = vpop.permute.xlu0 %988 }
 0x24b   : > { %v1621_v38 = vmax.f32 %v1294_v30, 0.0  ;;  %v1487_v39 = vadd.f32 %v1486_v36, %v974_v22  ;;  %v1488_v40 = vpop.f32.mrb[67].mxu1  ;;  %2041 = vmatpush1.bf16.msra.mxu1 %v1711_v23  ;;  %v1619_v45 = vmax.f32 %v1483_v31, 0.0  ;;  %v994_v19 = vpop.permute.xlu1 %993 }
 0x24c   : > { %v1622_v42 = vmax.f32 %v1296_v34, 0.0  ;;  %v1489_v43 = vadd.f32 %v1488_v40, %v974_v22  ;;  %v1620_v49 = vmax.f32 %v1485_v35, 0.0 }
 0x24d   : > { %v1713_v44 = vpack.c.bf16 %v1621_v38, %v1617_v37  ;;  %v1623_v46 = vmax.f32 %v1487_v39, 0.0 }
 0x24e   : > { %v1714_v48 = vpack.c.bf16 %v1622_v42, %v1618_v41  ;;  %v1624_v50 = vmax.f32 %v1489_v43, 0.0  ;;  %v1299_v51 = vpop.f32.mrb[68].mxu0 }
 0x24f   : > { %v1715_v53 = vpack.c.bf16 %v1623_v46, %v1619_v45  ;;  %v1300_v54 = vadd.f32 %v1299_v51, %v979_v47  ;;  %v1301_v55 = vpop.f32.mrb[69].mxu0 }
 0x250   : > { %v1716_v56 = vpack.c.bf16 %v1624_v50, %v1620_v49  ;;  %v1302_v57 = vadd.f32 %v1301_v55, %v979_v47  ;;  %v1303_v58 = vpop.f32.mrb[70].mxu0  ;;  %v1492_v59 = vpop.f32.mrb[68].mxu1  ;;  %1929 = vmatprep.subr.bf16.mxu0 %v1714_v48 }
 0x251   : > { %v1304_v60 = vadd.f32 %v1303_v58, %v984_v52  ;;  %v1493_v61 = vadd.f32 %v1492_v59, %v979_v47  ;;  %v1305_v62 = vpop.f32.mrb[71].mxu0  ;;  %v1494_v63 = vpop.f32.mrb[69].mxu1  ;;  %1930 = vmatpush1.bf16.msra.mxu0 %v1713_v44  ;;  %v1625_v4 = vmax.f32 %v1300_v54, 0.0 }
 0x252   : > { %v1306_v0 = vadd.f32 %v1305_v62, %v984_v52  ;;  %v1495_v1 = vadd.f32 %v1494_v63, %v979_v47  ;;  %v1496_v2 = vpop.f32.mrb[70].mxu1  ;;  %2042 = vmatprep.subr.bf16.mxu1 %v1716_v56  ;;  %v1626_v8 = vmax.f32 %v1302_v57, 0.0  ;;  %v999_v44 = vpop.permute.xlu0 %998 }
 0x253   : > { %v1629_v5 = vmax.f32 %v1304_v60, 0.0  ;;  %v1497_v6 = vadd.f32 %v1496_v2, %v984_v52  ;;  %v1498_v7 = vpop.f32.mrb[71].mxu1  ;;  %2043 = vmatpush1.bf16.msra.mxu1 %v1715_v53  ;;  %v1627_v12 = vmax.f32 %v1493_v61, 0.0  ;;  %v1004_v49 = vpop.permute.xlu1 %1003 }
 0x254   : > { %v1630_v9 = vmax.f32 %v1306_v0, 0.0  ;;  %v1499_v10 = vadd.f32 %v1498_v7, %v984_v52  ;;  %v1628_v16 = vmax.f32 %v1495_v1, 0.0 }
 0x255   : > { %v1717_v11 = vpack.c.bf16 %v1629_v5, %v1625_v4  ;;  %v1631_v13 = vmax.f32 %v1497_v6, 0.0 }
 0x256   : > { %v1718_v15 = vpack.c.bf16 %v1630_v9, %v1626_v8  ;;  %v1632_v17 = vmax.f32 %v1499_v10, 0.0  ;;  %v1309_v18 = vpop.f32.mrb[72].mxu0 }
 0x257   : > { %v1719_v20 = vpack.c.bf16 %v1631_v13, %v1627_v12  ;;  %v1310_v21 = vadd.f32 %v1309_v18, %v989_v14  ;;  %v1311_v22 = vpop.f32.mrb[73].mxu0  ;;  %v3163_v18 = vld [vmem:[%s3760_s5 + $0x10] ss:$8 sps:$4 sm:$0xff]  }
 0x258   : > { %v1720_v23 = vpack.c.bf16 %v1632_v17, %v1628_v16  ;;  %v1312_v24 = vadd.f32 %v1311_v22, %v989_v14  ;;  %v1313_v25 = vpop.f32.mrb[74].mxu0  ;;  %v1502_v26 = vpop.f32.mrb[72].mxu1  ;;  %1931 = vmatprep.subr.bf16.mxu0 %v1718_v15  ;;  %v3158_v16 = vld [vmem:[%s3760_s5] ss:$8 sps:$4 sm:$0xff]   ;;  %v3161_v17 = vld [vmem:[%s3760_s5 + $0x14] ss:$8 sps:$4 sm:$0xff]  }
 0x259   : > { %v1314_v27 = vadd.f32 %v1313_v25, %v994_v19  ;;  %v1503_v28 = vadd.f32 %v1502_v26, %v989_v14  ;;  %v1315_v29 = vpop.f32.mrb[75].mxu0  ;;  %v1504_v30 = vpop.f32.mrb[73].mxu1  ;;  %1932 = vmatpush1.bf16.msra.mxu0 %v1717_v11  ;;  %v1633_v34 = vmax.f32 %v1310_v21, 0.0  ;;  %v3167_v21 = vld [vmem:[%s3760_s5 + $0x34] ss:$8 sps:$4 sm:$0xff]  }
 0x25a   : > { %v1316_v31 = vadd.f32 %v1315_v29, %v994_v19  ;;  %v1505_v32 = vadd.f32 %v1504_v30, %v989_v14  ;;  %v1506_v33 = vpop.f32.mrb[74].mxu1  ;;  %2044 = vmatprep.subr.bf16.mxu1 %v1720_v23  ;;  %v1634_v38 = vmax.f32 %v1312_v24, 0.0  ;;  %v3169_v22 = vld [vmem:[%s3760_s5 + $0x30] ss:$8 sps:$4 sm:$0xff]   ;;  %v3170_v23 = vld [vmem:[%s3760_s5 + $0x44] ss:$8 sps:$4 sm:$0xff]  }
 0x25b   : > { %v1637_v35 = vmax.f32 %v1314_v27, 0.0  ;;  %v1507_v36 = vadd.f32 %v1506_v33, %v994_v19  ;;  %v1508_v37 = vpop.f32.mrb[75].mxu1  ;;  %2045 = vmatpush1.bf16.msra.mxu1 %v1719_v20  ;;  %v1635_v42 = vmax.f32 %v1503_v28, 0.0  ;;  %v3166_v20 = vld [vmem:[%s3760_s5 + $0x20] ss:$8 sps:$4 sm:$0xff]   ;;  %v1753_v33 = vpop.permute.xlu1 %1752 }
 0x25c   : > { %v1638_v39 = vmax.f32 %v1316_v31, 0.0  ;;  %v1509_v40 = vadd.f32 %v1508_v37, %v994_v19  ;;  %v1636_v46 = vmax.f32 %v1505_v32, 0.0  ;;  %v3164_v19 = vld [vmem:[%s3760_s5 + $0x24] ss:$8 sps:$4 sm:$0xff]   ;;  %v3172_v24 = vld [vmem:[%s3760_s5 + $0x40] ss:$8 sps:$4 sm:$0xff]   ;;  %v1748_v31 = vpop.permute.xlu0 %1747 }
 0x25d   : > { %v1721_v41 = vpack.c.bf16 %v1637_v35, %v1633_v34  ;;  %v1639_v43 = vmax.f32 %v1507_v36, 0.0  ;;  %v3173_v25 = vld [vmem:[%s3760_s5 + $0x54] ss:$8 sps:$4 sm:$0xff]   ;;  %v3175_v26 = vld [vmem:[%s3760_s5 + $0x50] ss:$8 sps:$4 sm:$0xff]  }
 0x25e   : > { %v1722_v45 = vpack.c.bf16 %v1638_v39, %v1634_v38  ;;  %v1640_v47 = vmax.f32 %v1509_v40, 0.0  ;;  %v1319_v48 = vpop.f32.mrb[76].mxu0  ;;  %v3176_v27 = vld [vmem:[%s3760_s5 + $0x64] ss:$8 sps:$4 sm:$0xff]   ;;  %v3178_v28 = vld [vmem:[%s3760_s5 + $0x60] ss:$8 sps:$4 sm:$0xff]  }
 0x25f   : > { %v1723_v50 = vpack.c.bf16 %v1639_v43, %v1635_v42  ;;  %v1320_v51 = vadd.f32 %v1319_v48, %v999_v44  ;;  %v1321_v52 = vpop.f32.mrb[77].mxu0  ;;  %v3179_v29 = vld [vmem:[%s3760_s5 + $0x74] ss:$8 sps:$4 sm:$0xff]   ;;  %v3181_v30 = vld [vmem:[%s3760_s5 + $0x70] ss:$8 sps:$4 sm:$0xff]  }
 0x260   : > { %v1724_v53 = vpack.c.bf16 %v1640_v47, %v1636_v46  ;;  %v1322_v54 = vadd.f32 %v1321_v52, %v999_v44  ;;  %v1323_v55 = vpop.f32.mrb[78].mxu0  ;;  %v1512_v56 = vpop.f32.mrb[76].mxu1  ;;  %1933 = vmatprep.subr.bf16.mxu0 %v1722_v45 }
 0x261   : > { %v1324_v57 = vadd.f32 %v1323_v55, %v1004_v49  ;;  %v1513_v58 = vadd.f32 %v1512_v56, %v999_v44  ;;  %v1325_v59 = vpop.f32.mrb[79].mxu0  ;;  %v1514_v60 = vpop.f32.mrb[77].mxu1  ;;  %1934 = vmatpush1.bf16.msra.mxu0 %v1721_v41  ;;  %v1641_v0 = vmax.f32 %v1320_v51, 0.0 }
 0x262   : > { %v1326_v61 = vadd.f32 %v1325_v59, %v1004_v49  ;;  %v1515_v62 = vadd.f32 %v1514_v60, %v999_v44  ;;  %v1516_v63 = vpop.f32.mrb[78].mxu1  ;;  %2046 = vmatprep.subr.bf16.mxu1 %v1724_v53  ;;  %v1642_v5 = vmax.f32 %v1322_v54, 0.0  ;;  %v1758_v56 = vpop.permute.xlu0 %1757 }
 0x263   : > { %v1645_v1 = vmax.f32 %v1324_v57, 0.0  ;;  %v1517_v2 = vadd.f32 %v1516_v63, %v1004_v49  ;;  %v1518_v4 = vpop.f32.mrb[79].mxu1  ;;  %2047 = vmatpush1.bf16.msra.mxu1 %v1723_v50  ;;  %v1643_v9 = vmax.f32 %v1513_v58, 0.0 }
 0x264   : > { %v1646_v6 = vmax.f32 %v1326_v61, 0.0  ;;  %v1519_v7 = vadd.f32 %v1518_v4, %v1004_v49  ;;  %v1644_v12 = vmax.f32 %v1515_v62, 0.0  ;;  %v1763_v61 = vpop.permute.xlu1 %1762 }
 0x265   : > { %v1725_v8 = vpack.c.bf16 %v1645_v1, %v1641_v0  ;;  %v1647_v10 = vmax.f32 %v1517_v2, 0.0 }
 0x266   : > { %v1726_v11 = vpack.c.bf16 %v1646_v6, %v1642_v5  ;;  %v1648_v13 = vmax.f32 %v1519_v7, 0.0 }
 0x267   : > { %v1727_v14 = vpack.c.bf16 %v1647_v10, %v1643_v9 }
 0x268   : > { %v1728_v15 = vpack.c.bf16 %v1648_v13, %v1644_v12  ;;  %1935 = vmatprep.subr.bf16.mxu0 %v1726_v11 }
 0x269   : > { %1936 = vmatpush1.bf16.msra.mxu0 %v1725_v8 }
 0x26a   : > { %2048 = vmatprep.subr.bf16.mxu1 %v1728_v15 }
 0x26b   : > { %2049 = vmatpush1.bf16.msra.mxu1 %v1727_v14 }
 0x26c   : > { %1938 = vmatmul.mubr.bf16.vlgmr.msra.gmra.mrb[80].mxu0 %v3158_v16 }
 0x26d   : > { %1947 = vmatprep.mubr.bf16.mxu0 %v3161_v17 }
 0x26e   : > { %2051 = vmatmul.mubr.bf16.vlgmr.msra.gmra.mrb[80].mxu1 %v3158_v16 }
 0x26f   : > { %2060 = vmatprep.mubr.bf16.mxu1 %v3161_v17 }
 0x274   : > { %1948 = vmatmul.mubr.bf16.gmra.mrb[84].mxu0 %v3163_v18 }
 0x275   : > { %1957 = vmatprep.mubr.bf16.mxu0 %v3164_v19 }
 0x276   : > { %2061 = vmatmul.mubr.bf16.gmra.mrb[84].mxu1 %v3163_v18 }
 0x277   : > { %2070 = vmatprep.mubr.bf16.mxu1 %v3164_v19 }
 0x27c   : > { %1958 = vmatmul.mubr.bf16.gmra.mrb[88].mxu0 %v3166_v20 }
 0x27d   : > { %1967 = vmatprep.mubr.bf16.mxu0 %v3167_v21 }
 0x27e   : > { %2071 = vmatmul.mubr.bf16.gmra.mrb[88].mxu1 %v3166_v20 }
 0x27f   : > { %2080 = vmatprep.mubr.bf16.mxu1 %v3167_v21 }
 0x284   : > { %1968 = vmatmul.mubr.bf16.gmra.mrb[92].mxu0 %v3169_v22 }
 0x285   : > { %1977 = vmatprep.mubr.bf16.mxu0 %v3170_v23 }
 0x286   : > { %2081 = vmatmul.mubr.bf16.gmra.mrb[92].mxu1 %v3169_v22 }
 0x287   : > { %2090 = vmatprep.mubr.bf16.mxu1 %v3170_v23  ;;  %v1768_v23 = vpop.permute.xlu0 %1767 }
 0x28c   : > { %1978 = vmatmul.mubr.bf16.gmra.mrb[96].mxu0 %v3172_v24 }
 0x28d   : > { %1987 = vmatprep.mubr.bf16.mxu0 %v3173_v25 }
 0x28e   : > { %2091 = vmatmul.mubr.bf16.gmra.mrb[96].mxu1 %v3172_v24 }
 0x28f   : > { %2100 = vmatprep.mubr.bf16.mxu1 %v3173_v25 }
 0x294   : > { %1988 = vmatmul.mubr.bf16.gmra.mrb[100].mxu0 %v3175_v26 }
 0x295   : > { %1997 = vmatprep.mubr.bf16.mxu0 %v3176_v27 }
 0x296   : > { %2101 = vmatmul.mubr.bf16.gmra.mrb[100].mxu1 %v3175_v26 }
 0x297   : > { %2110 = vmatprep.mubr.bf16.mxu1 %v3176_v27 }
 0x29c   : > { %1998 = vmatmul.mubr.bf16.gmra.mrb[104].mxu0 %v3178_v28 }
 0x29d   : > { %2007 = vmatprep.mubr.bf16.mxu0 %v3179_v29 }
 0x29e   : > { %2111 = vmatmul.mubr.bf16.gmra.mrb[104].mxu1 %v3178_v28  ;;  %v1773_v28 = vpop.permute.xlu1 %1772 }
 0x29f   : > { %2120 = vmatprep.mubr.bf16.mxu1 %v3179_v29 }
 0x2a4   : > { %2008 = vmatmul.mubr.bf16.gmra.mrb[108].mxu0 %v3181_v30 }
 0x2a5   : > { %2419 = vmatprep.mubr.bf16.mxu0 %v3230_v3 }
 0x2a6   : > { %2121 = vmatmul.mubr.bf16.gmra.mrb[108].mxu1 %v3181_v30 }
 0x2a7   : > { %2532 = vmatprep.mubr.bf16.mxu1 %v3230_v3 }
 0x33f   : > { %v1939_v32 = vpop.f32.mrb[80].mxu0 }
 0x340   : > { %v1940_v34 = vadd.f32 %v1939_v32, %v1748_v31  ;;  %v1941_v35 = vpop.f32.mrb[81].mxu0 }
 0x341   : > { %v1942_v36 = vadd.f32 %v1941_v35, %v1748_v31  ;;  %v1943_v37 = vpop.f32.mrb[82].mxu0  ;;  %v2052_v38 = vpop.f32.mrb[80].mxu1 }
 0x342   : > { %v1944_v39 = vadd.f32 %v1943_v37, %v1753_v33  ;;  %v2053_v40 = vadd.f32 %v2052_v38, %v1748_v31  ;;  %v1945_v41 = vpop.f32.mrb[83].mxu0  ;;  %v2054_v42 = vpop.f32.mrb[81].mxu1  ;;  %v2131_v46 = vmax.f32 %v1940_v34, 0.0 }
 0x343   : > { %v1946_v43 = vadd.f32 %v1945_v41, %v1753_v33  ;;  %v2055_v44 = vadd.f32 %v2054_v42, %v1748_v31  ;;  %v2056_v45 = vpop.f32.mrb[82].mxu1  ;;  %v2132_v50 = vmax.f32 %v1942_v36, 0.0 }
 0x344   : > { %v2135_v47 = vmax.f32 %v1944_v39, 0.0  ;;  %v2057_v48 = vadd.f32 %v2056_v45, %v1753_v33  ;;  %v2058_v49 = vpop.f32.mrb[83].mxu1  ;;  %v2133_v54 = vmax.f32 %v2053_v40, 0.0 }
 0x345   : > { %v2136_v51 = vmax.f32 %v1946_v43, 0.0  ;;  %v2059_v52 = vadd.f32 %v2058_v49, %v1753_v33  ;;  %v2134_v58 = vmax.f32 %v2055_v44, 0.0 }
 0x346   : > { %v2211_v53 = vpack.c.bf16 %v2135_v47, %v2131_v46  ;;  %v2137_v55 = vmax.f32 %v2057_v48, 0.0 }
 0x347   : > { %v2212_v57 = vpack.c.bf16 %v2136_v51, %v2132_v50  ;;  %v2138_v59 = vmax.f32 %v2059_v52, 0.0  ;;  %v1949_v60 = vpop.f32.mrb[84].mxu0 }
 0x348   : > { %v2213_v62 = vpack.c.bf16 %v2137_v55, %v2133_v54  ;;  %v1950_v63 = vadd.f32 %v1949_v60, %v1758_v56  ;;  %v1951_v0 = vpop.f32.mrb[85].mxu0 }
 0x349   : > { %v2214_v1 = vpack.c.bf16 %v2138_v59, %v2134_v58  ;;  %v1952_v2 = vadd.f32 %v1951_v0, %v1758_v56  ;;  %v1953_v4 = vpop.f32.mrb[86].mxu0  ;;  %v2062_v5 = vpop.f32.mrb[84].mxu1  ;;  %2387 = vmatprep.subr.bf16.mxu0 %v2212_v57 }
 0x34a   : > { %v1954_v6 = vadd.f32 %v1953_v4, %v1763_v61  ;;  %v2063_v7 = vadd.f32 %v2062_v5, %v1758_v56  ;;  %v1955_v8 = vpop.f32.mrb[87].mxu0  ;;  %v2064_v9 = vpop.f32.mrb[85].mxu1  ;;  %2388 = vmatpush1.bf16.msra.mxu0 %v2211_v53  ;;  %v2139_v13 = vmax.f32 %v1950_v63, 0.0 }
 0x34b   : > { %v1956_v10 = vadd.f32 %v1955_v8, %v1763_v61  ;;  %v2065_v11 = vadd.f32 %v2064_v9, %v1758_v56  ;;  %v2066_v12 = vpop.f32.mrb[86].mxu1  ;;  %2500 = vmatprep.subr.bf16.mxu1 %v2214_v1  ;;  %v2140_v17 = vmax.f32 %v1952_v2, 0.0  ;;  %v1778_v53 = vpop.permute.xlu0 %1777 }
 0x34c   : > { %v2143_v14 = vmax.f32 %v1954_v6, 0.0  ;;  %v2067_v15 = vadd.f32 %v2066_v12, %v1763_v61  ;;  %v2068_v16 = vpop.f32.mrb[87].mxu1  ;;  %2501 = vmatpush1.bf16.msra.mxu1 %v2213_v62  ;;  %v2141_v21 = vmax.f32 %v2063_v7, 0.0  ;;  %v1783_v58 = vpop.permute.xlu1 %1782 }
 0x34d   : > { %v2144_v18 = vmax.f32 %v1956_v10, 0.0  ;;  %v2069_v19 = vadd.f32 %v2068_v16, %v1763_v61  ;;  %v2142_v25 = vmax.f32 %v2065_v11, 0.0 }
 0x34e   : > { %v2215_v20 = vpack.c.bf16 %v2143_v14, %v2139_v13  ;;  %v2145_v22 = vmax.f32 %v2067_v15, 0.0 }
 0x34f   : > { %v2216_v24 = vpack.c.bf16 %v2144_v18, %v2140_v17  ;;  %v2146_v26 = vmax.f32 %v2069_v19, 0.0  ;;  %v1959_v27 = vpop.f32.mrb[88].mxu0 }
 0x350   : > { %v2217_v29 = vpack.c.bf16 %v2145_v22, %v2141_v21  ;;  %v1960_v30 = vadd.f32 %v1959_v27, %v1768_v23  ;;  %v1961_v31 = vpop.f32.mrb[89].mxu0 }
 0x351   : > { %v2218_v32 = vpack.c.bf16 %v2146_v26, %v2142_v25  ;;  %v1962_v33 = vadd.f32 %v1961_v31, %v1768_v23  ;;  %v1963_v34 = vpop.f32.mrb[90].mxu0  ;;  %v2072_v35 = vpop.f32.mrb[88].mxu1  ;;  %2389 = vmatprep.subr.bf16.mxu0 %v2216_v24 }
 0x352   : > { %v1964_v36 = vadd.f32 %v1963_v34, %v1773_v28  ;;  %v2073_v37 = vadd.f32 %v2072_v35, %v1768_v23  ;;  %v1965_v38 = vpop.f32.mrb[91].mxu0  ;;  %v2074_v39 = vpop.f32.mrb[89].mxu1  ;;  %2390 = vmatpush1.bf16.msra.mxu0 %v2215_v20  ;;  %v2147_v43 = vmax.f32 %v1960_v30, 0.0 }
 0x353   : > { %v1966_v40 = vadd.f32 %v1965_v38, %v1773_v28  ;;  %v2075_v41 = vadd.f32 %v2074_v39, %v1768_v23  ;;  %v2076_v42 = vpop.f32.mrb[90].mxu1  ;;  %2502 = vmatprep.subr.bf16.mxu1 %v2218_v32  ;;  %v2148_v47 = vmax.f32 %v1962_v33, 0.0  ;;  %v1788_v20 = vpop.permute.xlu0 %1787 }
 0x354   : > { %v2151_v44 = vmax.f32 %v1964_v36, 0.0  ;;  %v2077_v45 = vadd.f32 %v2076_v42, %v1773_v28  ;;  %v2078_v46 = vpop.f32.mrb[91].mxu1  ;;  %2503 = vmatpush1.bf16.msra.mxu1 %v2217_v29  ;;  %v2149_v51 = vmax.f32 %v2073_v37, 0.0  ;;  %v1793_v25 = vpop.permute.xlu1 %1792 }
 0x355   : > { %v2152_v48 = vmax.f32 %v1966_v40, 0.0  ;;  %v2079_v49 = vadd.f32 %v2078_v46, %v1773_v28  ;;  %v2150_v55 = vmax.f32 %v2075_v41, 0.0 }
 0x356   : > { %v2219_v50 = vpack.c.bf16 %v2151_v44, %v2147_v43  ;;  %v2153_v52 = vmax.f32 %v2077_v45, 0.0 }
 0x357   : > { %v2220_v54 = vpack.c.bf16 %v2152_v48, %v2148_v47  ;;  %v2154_v56 = vmax.f32 %v2079_v49, 0.0  ;;  %v1969_v57 = vpop.f32.mrb[92].mxu0 }
 0x358   : > { %v2221_v59 = vpack.c.bf16 %v2153_v52, %v2149_v51  ;;  %v1970_v60 = vadd.f32 %v1969_v57, %v1778_v53  ;;  %v1971_v61 = vpop.f32.mrb[93].mxu0 }
 0x359   : > { %v2222_v62 = vpack.c.bf16 %v2154_v56, %v2150_v55  ;;  %v1972_v63 = vadd.f32 %v1971_v61, %v1778_v53  ;;  %v1973_v0 = vpop.f32.mrb[94].mxu0  ;;  %v2082_v1 = vpop.f32.mrb[92].mxu1  ;;  %2391 = vmatprep.subr.bf16.mxu0 %v2220_v54 }
 0x35a   : > { %v1974_v2 = vadd.f32 %v1973_v0, %v1783_v58  ;;  %v2083_v4 = vadd.f32 %v2082_v1, %v1778_v53  ;;  %v1975_v5 = vpop.f32.mrb[95].mxu0  ;;  %v2084_v6 = vpop.f32.mrb[93].mxu1  ;;  %2392 = vmatpush1.bf16.msra.mxu0 %v2219_v50  ;;  %v2155_v10 = vmax.f32 %v1970_v60, 0.0 }
 0x35b   : > { %v1976_v7 = vadd.f32 %v1975_v5, %v1783_v58  ;;  %v2085_v8 = vadd.f32 %v2084_v6, %v1778_v53  ;;  %v2086_v9 = vpop.f32.mrb[94].mxu1  ;;  %2504 = vmatprep.subr.bf16.mxu1 %v2222_v62  ;;  %v2156_v14 = vmax.f32 %v1972_v63, 0.0  ;;  %v1798_v50 = vpop.permute.xlu0 %1797 }
 0x35c   : > { %v2159_v11 = vmax.f32 %v1974_v2, 0.0  ;;  %v2087_v12 = vadd.f32 %v2086_v9, %v1783_v58  ;;  %v2088_v13 = vpop.f32.mrb[95].mxu1  ;;  %2505 = vmatpush1.bf16.msra.mxu1 %v2221_v59  ;;  %v2157_v18 = vmax.f32 %v2083_v4, 0.0  ;;  %v1803_v55 = vpop.permute.xlu1 %1802 }
 0x35d   : > { %v2160_v15 = vmax.f32 %v1976_v7, 0.0  ;;  %v2089_v16 = vadd.f32 %v2088_v13, %v1783_v58  ;;  %v2158_v22 = vmax.f32 %v2085_v8, 0.0 }
 0x35e   : > { %v2223_v17 = vpack.c.bf16 %v2159_v11, %v2155_v10  ;;  %v2161_v19 = vmax.f32 %v2087_v12, 0.0 }
 0x35f   : > { %v2224_v21 = vpack.c.bf16 %v2160_v15, %v2156_v14  ;;  %v2162_v23 = vmax.f32 %v2089_v16, 0.0  ;;  %v1979_v24 = vpop.f32.mrb[96].mxu0 }
 0x360   : > { %v2225_v26 = vpack.c.bf16 %v2161_v19, %v2157_v18  ;;  %v1980_v27 = vadd.f32 %v1979_v24, %v1788_v20  ;;  %v1981_v28 = vpop.f32.mrb[97].mxu0 }
 0x361   : > { %v2226_v29 = vpack.c.bf16 %v2162_v23, %v2158_v22  ;;  %v1982_v30 = vadd.f32 %v1981_v28, %v1788_v20  ;;  %v1983_v31 = vpop.f32.mrb[98].mxu0  ;;  %v2092_v32 = vpop.f32.mrb[96].mxu1  ;;  %2393 = vmatprep.subr.bf16.mxu0 %v2224_v21 }
 0x362   : > { %v1984_v33 = vadd.f32 %v1983_v31, %v1793_v25  ;;  %v2093_v34 = vadd.f32 %v2092_v32, %v1788_v20  ;;  %v1985_v35 = vpop.f32.mrb[99].mxu0  ;;  %v2094_v36 = vpop.f32.mrb[97].mxu1  ;;  %2394 = vmatpush1.bf16.msra.mxu0 %v2223_v17  ;;  %v2163_v40 = vmax.f32 %v1980_v27, 0.0 }
 0x363   : > { %v1986_v37 = vadd.f32 %v1985_v35, %v1793_v25  ;;  %v2095_v38 = vadd.f32 %v2094_v36, %v1788_v20  ;;  %v2096_v39 = vpop.f32.mrb[98].mxu1  ;;  %2506 = vmatprep.subr.bf16.mxu1 %v2226_v29  ;;  %v2164_v44 = vmax.f32 %v1982_v30, 0.0  ;;  %v1808_v17 = vpop.permute.xlu0 %1807 }
 0x364   : > { %v2167_v41 = vmax.f32 %v1984_v33, 0.0  ;;  %v2097_v42 = vadd.f32 %v2096_v39, %v1793_v25  ;;  %v2098_v43 = vpop.f32.mrb[99].mxu1  ;;  %2507 = vmatpush1.bf16.msra.mxu1 %v2225_v26  ;;  %v2165_v48 = vmax.f32 %v2093_v34, 0.0  ;;  %v1813_v22 = vpop.permute.xlu1 %1812 }
 0x365   : > { %v2168_v45 = vmax.f32 %v1986_v37, 0.0  ;;  %v2099_v46 = vadd.f32 %v2098_v43, %v1793_v25  ;;  %v2166_v52 = vmax.f32 %v2095_v38, 0.0 }
 0x366   : > { %v2227_v47 = vpack.c.bf16 %v2167_v41, %v2163_v40  ;;  %v2169_v49 = vmax.f32 %v2097_v42, 0.0 }
 0x367   : > { %v2228_v51 = vpack.c.bf16 %v2168_v45, %v2164_v44  ;;  %v2170_v53 = vmax.f32 %v2099_v46, 0.0  ;;  %v1989_v54 = vpop.f32.mrb[100].mxu0 }
 0x368   : > { %v2229_v56 = vpack.c.bf16 %v2169_v49, %v2165_v48  ;;  %v1990_v57 = vadd.f32 %v1989_v54, %v1798_v50  ;;  %v1991_v58 = vpop.f32.mrb[101].mxu0 }
 0x369   : > { %v2230_v59 = vpack.c.bf16 %v2170_v53, %v2166_v52  ;;  %v1992_v60 = vadd.f32 %v1991_v58, %v1798_v50  ;;  %v1993_v61 = vpop.f32.mrb[102].mxu0  ;;  %v2102_v62 = vpop.f32.mrb[100].mxu1  ;;  %2395 = vmatprep.subr.bf16.mxu0 %v2228_v51 }
 0x36a   : > { %v1994_v63 = vadd.f32 %v1993_v61, %v1803_v55  ;;  %v2103_v0 = vadd.f32 %v2102_v62, %v1798_v50  ;;  %v1995_v1 = vpop.f32.mrb[103].mxu0  ;;  %v2104_v2 = vpop.f32.mrb[101].mxu1  ;;  %2396 = vmatpush1.bf16.msra.mxu0 %v2227_v47  ;;  %v2171_v7 = vmax.f32 %v1990_v57, 0.0 }
 0x36b   : > { %v1996_v4 = vadd.f32 %v1995_v1, %v1803_v55  ;;  %v2105_v5 = vadd.f32 %v2104_v2, %v1798_v50  ;;  %v2106_v6 = vpop.f32.mrb[102].mxu1  ;;  %2508 = vmatprep.subr.bf16.mxu1 %v2230_v59  ;;  %v2172_v11 = vmax.f32 %v1992_v60, 0.0  ;;  %v1818_v47 = vpop.permute.xlu0 %1817 }
 0x36c   : > { %v2175_v8 = vmax.f32 %v1994_v63, 0.0  ;;  %v2107_v9 = vadd.f32 %v2106_v6, %v1803_v55  ;;  %v2108_v10 = vpop.f32.mrb[103].mxu1  ;;  %2509 = vmatpush1.bf16.msra.mxu1 %v2229_v56  ;;  %v2173_v15 = vmax.f32 %v2103_v0, 0.0  ;;  %v1823_v52 = vpop.permute.xlu1 %1822 }
 0x36d   : > { %v2176_v12 = vmax.f32 %v1996_v4, 0.0  ;;  %v2109_v13 = vadd.f32 %v2108_v10, %v1803_v55  ;;  %v2174_v19 = vmax.f32 %v2105_v5, 0.0 }
 0x36e   : > { %v2231_v14 = vpack.c.bf16 %v2175_v8, %v2171_v7  ;;  %v2177_v16 = vmax.f32 %v2107_v9, 0.0 }
 0x36f   : > { %v2232_v18 = vpack.c.bf16 %v2176_v12, %v2172_v11  ;;  %v2178_v20 = vmax.f32 %v2109_v13, 0.0  ;;  %v1999_v21 = vpop.f32.mrb[104].mxu0 }
 0x370   : > { %v2233_v23 = vpack.c.bf16 %v2177_v16, %v2173_v15  ;;  %v2000_v24 = vadd.f32 %v1999_v21, %v1808_v17  ;;  %v2001_v25 = vpop.f32.mrb[105].mxu0  ;;  %v3184_v21 = vld [vmem:[%s3762_s7 + $0x10] sm:$0xff]  }
 0x371   : > { %v2234_v26 = vpack.c.bf16 %v2178_v20, %v2174_v19  ;;  %v2002_v27 = vadd.f32 %v2001_v25, %v1808_v17  ;;  %v2003_v28 = vpop.f32.mrb[106].mxu0  ;;  %v2112_v29 = vpop.f32.mrb[104].mxu1  ;;  %2397 = vmatprep.subr.bf16.mxu0 %v2232_v18  ;;  %v3182_v19 = vld [vmem:[%s3762_s7] sm:$0xff]   ;;  %v3183_v20 = vld [vmem:[%s3762_s7 + $0x8] sm:$0xff]   ;;  %v3188_v25 = vld [vmem:[%s3762_s7 + $0x30] sm:$0xff]  }
 0x372   : > { %v2004_v30 = vadd.f32 %v2003_v28, %v1813_v22  ;;  %v2113_v31 = vadd.f32 %v2112_v29, %v1808_v17  ;;  %v2005_v32 = vpop.f32.mrb[107].mxu0  ;;  %v2114_v33 = vpop.f32.mrb[105].mxu1  ;;  %2398 = vmatpush1.bf16.msra.mxu0 %v2231_v14  ;;  %v2179_v37 = vmax.f32 %v2000_v24, 0.0  ;;  %v3187_v24 = vld [vmem:[%s3762_s7 + $0x28] sm:$0xff]  }
 0x373   : > { %v2006_v34 = vadd.f32 %v2005_v32, %v1813_v22  ;;  %v2115_v35 = vadd.f32 %v2114_v33, %v1808_v17  ;;  %v2116_v36 = vpop.f32.mrb[106].mxu1  ;;  %2510 = vmatprep.subr.bf16.mxu1 %v2234_v26  ;;  %v2180_v41 = vmax.f32 %v2002_v27, 0.0  ;;  %v3189_v26 = vld [vmem:[%s3762_s7 + $0x38] sm:$0xff]   ;;  %v2262_v27 = vpop.permute.xlu0 %2261 }
 0x374   : > { %v2183_v38 = vmax.f32 %v2004_v30, 0.0  ;;  %v2117_v39 = vadd.f32 %v2116_v36, %v1813_v22  ;;  %v2118_v40 = vpop.f32.mrb[107].mxu1  ;;  %2511 = vmatpush1.bf16.msra.mxu1 %v2233_v23  ;;  %v2181_v45 = vmax.f32 %v2113_v31, 0.0  ;;  %v3186_v23 = vld [vmem:[%s3762_s7 + $0x20] sm:$0xff]   ;;  %v2267_v29 = vpop.permute.xlu1 %2266 }
 0x375   : > { %v2184_v42 = vmax.f32 %v2006_v34, 0.0  ;;  %v2119_v43 = vadd.f32 %v2118_v40, %v1813_v22  ;;  %v2182_v49 = vmax.f32 %v2115_v35, 0.0  ;;  %v3185_v22 = vld [vmem:[%s3762_s7 + $0x18] sm:$0xff]  }
 0x376   : > { %v2235_v44 = vpack.c.bf16 %v2183_v38, %v2179_v37  ;;  %v2185_v46 = vmax.f32 %v2117_v39, 0.0 }
 0x377   : > { %v2236_v48 = vpack.c.bf16 %v2184_v42, %v2180_v41  ;;  %v2186_v50 = vmax.f32 %v2119_v43, 0.0  ;;  %v2009_v51 = vpop.f32.mrb[108].mxu0 }
 0x378   : > { %v2237_v53 = vpack.c.bf16 %v2185_v46, %v2181_v45  ;;  %v2010_v54 = vadd.f32 %v2009_v51, %v1818_v47  ;;  %v2011_v55 = vpop.f32.mrb[109].mxu0  ;;  %v2272_v51 = vpop.permute.xlu0 %2271 }
 0x379   : > { %v2238_v56 = vpack.c.bf16 %v2186_v50, %v2182_v49  ;;  %v2012_v57 = vadd.f32 %v2011_v55, %v1818_v47  ;;  %v2013_v58 = vpop.f32.mrb[110].mxu0  ;;  %v2122_v59 = vpop.f32.mrb[108].mxu1  ;;  %2399 = vmatprep.subr.bf16.mxu0 %v2236_v48 }
 0x37a   : > { %v2014_v60 = vadd.f32 %v2013_v58, %v1823_v52  ;;  %v2123_v61 = vadd.f32 %v2122_v59, %v1818_v47  ;;  %v2015_v62 = vpop.f32.mrb[111].mxu0  ;;  %v2124_v63 = vpop.f32.mrb[109].mxu1  ;;  %2400 = vmatpush1.bf16.msra.mxu0 %v2235_v44  ;;  %v2187_v4 = vmax.f32 %v2010_v54, 0.0 }
 0x37b   : > { %v2016_v0 = vadd.f32 %v2015_v62, %v1823_v52  ;;  %v2125_v1 = vadd.f32 %v2124_v63, %v1818_v47  ;;  %v2126_v2 = vpop.f32.mrb[110].mxu1  ;;  %2512 = vmatprep.subr.bf16.mxu1 %v2238_v56  ;;  %v2188_v8 = vmax.f32 %v2012_v57, 0.0  ;;  %v2277_v56 = vpop.permute.xlu1 %2276 }
 0x37c   : > { %v2191_v5 = vmax.f32 %v2014_v60, 0.0  ;;  %v2127_v6 = vadd.f32 %v2126_v2, %v1823_v52  ;;  %v2128_v7 = vpop.f32.mrb[111].mxu1  ;;  %2513 = vmatpush1.bf16.msra.mxu1 %v2237_v53  ;;  %v2189_v12 = vmax.f32 %v2123_v61, 0.0 }
 0x37d   : > { %v2192_v9 = vmax.f32 %v2016_v0, 0.0  ;;  %v2129_v10 = vadd.f32 %v2128_v7, %v1823_v52  ;;  %v2190_v15 = vmax.f32 %v2125_v1, 0.0 }
 0x37e   : > { %v2239_v11 = vpack.c.bf16 %v2191_v5, %v2187_v4  ;;  %v2193_v13 = vmax.f32 %v2127_v6, 0.0 }
 0x37f   : > { %v2240_v14 = vpack.c.bf16 %v2192_v9, %v2188_v8  ;;  %v2194_v16 = vmax.f32 %v2129_v10, 0.0 }
 0x380   : > { %v2241_v17 = vpack.c.bf16 %v2193_v13, %v2189_v12 }
 0x381   : > { %v2242_v18 = vpack.c.bf16 %v2194_v16, %v2190_v15  ;;  %2401 = vmatprep.subr.bf16.mxu0 %v2240_v14 }
 0x382   : > { %2402 = vmatpush1.bf16.msra.mxu0 %v2239_v11 }
 0x383   : > { %2514 = vmatprep.subr.bf16.mxu1 %v2242_v18  ;;  %v2282_v18 = vpop.permute.xlu0 %2281 }
 0x384   : > { %2515 = vmatpush1.bf16.msra.mxu1 %v2241_v17 }
 0x385   : > { %2420 = vmatmul.mubr.bf16.vlgmr.msra.gmra.mrb[112].mxu0 %v3182_v19 }
 0x386   : > { %2429 = vmatprep.mubr.bf16.mxu0 %v3230_v3 }
 0x387   : > { %2533 = vmatmul.mubr.bf16.vlgmr.msra.gmra.mrb[112].mxu1 %v3182_v19 }
 0x388   : > { %2542 = vmatprep.mubr.bf16.mxu1 %v3230_v3 }
 0x38d   : > { %2430 = vmatmul.mubr.bf16.gmra.mrb[116].mxu0 %v3183_v20 }
 0x38e   : > { %2439 = vmatprep.mubr.bf16.mxu0 %v3230_v3 }
 0x38f   : > { %2543 = vmatmul.mubr.bf16.gmra.mrb[116].mxu1 %v3183_v20 }
 0x390   : > { %2552 = vmatprep.mubr.bf16.mxu1 %v3230_v3 }
 0x395   : > { %2440 = vmatmul.mubr.bf16.gmra.mrb[120].mxu0 %v3184_v21 }
 0x396   : > { %2449 = vmatprep.mubr.bf16.mxu0 %v3230_v3 }
 0x397   : > { %2553 = vmatmul.mubr.bf16.gmra.mrb[120].mxu1 %v3184_v21 }
 0x398   : > { %2562 = vmatprep.mubr.bf16.mxu1 %v3230_v3 }
 0x39d   : > { %2450 = vmatmul.mubr.bf16.gmra.mrb[124].mxu0 %v3185_v22 }
 0x39e   : > { %2459 = vmatprep.mubr.bf16.mxu0 %v3230_v3 }
 0x39f   : > { %2563 = vmatmul.mubr.bf16.gmra.mrb[124].mxu1 %v3185_v22 }
 0x3a0   : > { %2572 = vmatprep.mubr.bf16.mxu1 %v3230_v3 }
 0x3a5   : > { %2460 = vmatmul.mubr.bf16.gmra.mrb[128].mxu0 %v3186_v23 }
 0x3a6   : > { %2469 = vmatprep.mubr.bf16.mxu0 %v3230_v3 }
 0x3a7   : > { %2573 = vmatmul.mubr.bf16.gmra.mrb[128].mxu1 %v3186_v23  ;;  %v2287_v23 = vpop.permute.xlu1 %2286 }
 0x3a8   : > { %2582 = vmatprep.mubr.bf16.mxu1 %v3230_v3 }
 0x3ad   : > { %2470 = vmatmul.mubr.bf16.gmra.mrb[132].mxu0 %v3187_v24 }
 0x3ae   : > { %2479 = vmatprep.mubr.bf16.mxu0 %v3230_v3 }
 0x3af   : > { %2583 = vmatmul.mubr.bf16.gmra.mrb[132].mxu1 %v3187_v24 }
 0x3b0   : > { %2592 = vmatprep.mubr.bf16.mxu1 %v3230_v3 }
 0x3b5   : > { %2480 = vmatmul.mubr.bf16.gmra.mrb[136].mxu0 %v3188_v25 }
 0x3b6   : > { %2489 = vmatprep.mubr.bf16.mxu0 %v3230_v3 }
 0x3b7   : > { %2593 = vmatmul.mubr.bf16.gmra.mrb[136].mxu1 %v3188_v25 }
 0x3b8   : > { %2602 = vmatprep.mubr.bf16.mxu1 %v3230_v3 }
 0x3bd   : > { %2490 = vmatmul.mubr.bf16.gmra.mrb[140].mxu0 %v3189_v26 }
 0x3be   : > { %2748 = vmatprep.mubr.bf16.mxu0 %v3230_v3 }
 0x3bf   : > { %2603 = vmatmul.mubr.bf16.gmra.mrb[140].mxu1 %v3189_v26 }
 0x3c0   : > { %2789 = vmatprep.mubr.bf16.mxu1 %v3230_v3 }
 0x458   : > { %v2421_v28 = vpop.f32.mrb[112].mxu0 }
 0x459   : > { %v2422_v30 = vadd.f32 %v2421_v28, %v2262_v27  ;;  %v2423_v31 = vpop.f32.mrb[113].mxu0 }
 0x45a   : > { %v2424_v32 = vadd.f32 %v2423_v31, %v2262_v27  ;;  %v2425_v33 = vpop.f32.mrb[114].mxu0  ;;  %v2534_v34 = vpop.f32.mrb[112].mxu1 }
 0x45b   : > { %v2426_v35 = vadd.f32 %v2425_v33, %v2267_v29  ;;  %v2535_v36 = vadd.f32 %v2534_v34, %v2262_v27  ;;  %v2427_v37 = vpop.f32.mrb[115].mxu0  ;;  %v2536_v38 = vpop.f32.mrb[113].mxu1  ;;  %v2613_v42 = vmax.f32 %v2422_v30, 0.0 }
 0x45c   : > { %v2428_v39 = vadd.f32 %v2427_v37, %v2267_v29  ;;  %v2537_v40 = vadd.f32 %v2536_v38, %v2262_v27  ;;  %v2538_v41 = vpop.f32.mrb[114].mxu1  ;;  %v2614_v3 = vmax.f32 %v2424_v32, 0.0 }
 0x45d   : > { %v2617_v43 = vmax.f32 %v2426_v35, 0.0  ;;  %v2539_v44 = vadd.f32 %v2538_v41, %v2267_v29  ;;  %v2540_v45 = vpop.f32.mrb[115].mxu1  ;;  %v2615_v49 = vmax.f32 %v2535_v36, 0.0 }
 0x45e   : > { %v2618_v46 = vmax.f32 %v2428_v39, 0.0  ;;  %v2541_v47 = vadd.f32 %v2540_v45, %v2267_v29  ;;  %v2616_v53 = vmax.f32 %v2537_v40, 0.0 }
 0x45f   : > { %v2678_v48 = vpack.c.bf16 %v2617_v43, %v2613_v42  ;;  %v2619_v50 = vmax.f32 %v2539_v44, 0.0 }
 0x460   : > { %v2679_v52 = vpack.c.bf16 %v2618_v46, %v2614_v3  ;;  %v2620_v54 = vmax.f32 %v2541_v47, 0.0  ;;  %v2431_v55 = vpop.f32.mrb[116].mxu0  ;;  %v2292_v47 = vpop.permute.xlu0 %2291 }
 0x461   : > { %v2680_v57 = vpack.c.bf16 %v2619_v50, %v2615_v49  ;;  %v2432_v58 = vadd.f32 %v2431_v55, %v2272_v51  ;;  %v2433_v59 = vpop.f32.mrb[117].mxu0 }
 0x462   : > { %v2681_v60 = vpack.c.bf16 %v2620_v54, %v2616_v53  ;;  %v2434_v61 = vadd.f32 %v2433_v59, %v2272_v51  ;;  %v2435_v62 = vpop.f32.mrb[118].mxu0  ;;  %v2544_v63 = vpop.f32.mrb[116].mxu1  ;;  %2716 = vmatprep.subr.bf16.mxu0 %v2679_v52 }
 0x463   : > { %v2436_v0 = vadd.f32 %v2435_v62, %v2277_v56  ;;  %v2545_v1 = vadd.f32 %v2544_v63, %v2272_v51  ;;  %v2437_v2 = vpop.f32.mrb[119].mxu0  ;;  %v2546_v4 = vpop.f32.mrb[117].mxu1  ;;  %2717 = vmatpush1.bf16.msra.mxu0 %v2678_v48  ;;  %v2621_v8 = vmax.f32 %v2432_v58, 0.0 }
 0x464   : > { %v2438_v5 = vadd.f32 %v2437_v2, %v2277_v56  ;;  %v2547_v6 = vadd.f32 %v2546_v4, %v2272_v51  ;;  %v2548_v7 = vpop.f32.mrb[118].mxu1  ;;  %2757 = vmatprep.subr.bf16.mxu1 %v2681_v60  ;;  %v2622_v12 = vmax.f32 %v2434_v61, 0.0  ;;  %v2297_v52 = vpop.permute.xlu1 %2296 }
 0x465   : > { %v2625_v9 = vmax.f32 %v2436_v0, 0.0  ;;  %v2549_v10 = vadd.f32 %v2548_v7, %v2277_v56  ;;  %v2550_v11 = vpop.f32.mrb[119].mxu1  ;;  %2758 = vmatpush1.bf16.msra.mxu1 %v2680_v57  ;;  %v2623_v16 = vmax.f32 %v2545_v1, 0.0 }
 0x466   : > { %v2626_v13 = vmax.f32 %v2438_v5, 0.0  ;;  %v2551_v14 = vadd.f32 %v2550_v11, %v2277_v56  ;;  %v2624_v20 = vmax.f32 %v2547_v6, 0.0 }
 0x467   : > { %v2682_v15 = vpack.c.bf16 %v2625_v9, %v2621_v8  ;;  %v2627_v17 = vmax.f32 %v2549_v10, 0.0 }
 0x468   : > { %v2683_v19 = vpack.c.bf16 %v2626_v13, %v2622_v12  ;;  %v2628_v21 = vmax.f32 %v2551_v14, 0.0  ;;  %v2441_v22 = vpop.f32.mrb[120].mxu0  ;;  %v2302_v14 = vpop.permute.xlu0 %2301 }
 0x469   : > { %v2684_v24 = vpack.c.bf16 %v2627_v17, %v2623_v16  ;;  %v2442_v25 = vadd.f32 %v2441_v22, %v2282_v18  ;;  %v2443_v26 = vpop.f32.mrb[121].mxu0 }
 0x46a   : > { %v2685_v27 = vpack.c.bf16 %v2628_v21, %v2624_v20  ;;  %v2444_v28 = vadd.f32 %v2443_v26, %v2282_v18  ;;  %v2445_v29 = vpop.f32.mrb[122].mxu0  ;;  %v2554_v30 = vpop.f32.mrb[120].mxu1  ;;  %2718 = vmatprep.subr.bf16.mxu0 %v2683_v19 }
 0x46b   : > { %v2446_v31 = vadd.f32 %v2445_v29, %v2287_v23  ;;  %v2555_v32 = vadd.f32 %v2554_v30, %v2282_v18  ;;  %v2447_v33 = vpop.f32.mrb[123].mxu0  ;;  %v2556_v34 = vpop.f32.mrb[121].mxu1  ;;  %2719 = vmatpush1.bf16.msra.mxu0 %v2682_v15  ;;  %v2629_v38 = vmax.f32 %v2442_v25, 0.0 }
 0x46c   : > { %v2448_v35 = vadd.f32 %v2447_v33, %v2287_v23  ;;  %v2557_v36 = vadd.f32 %v2556_v34, %v2282_v18  ;;  %v2558_v37 = vpop.f32.mrb[122].mxu1  ;;  %2759 = vmatprep.subr.bf16.mxu1 %v2685_v27  ;;  %v2630_v42 = vmax.f32 %v2444_v28, 0.0  ;;  %v2307_v19 = vpop.permute.xlu1 %2306 }
 0x46d   : > { %v2633_v39 = vmax.f32 %v2446_v31, 0.0  ;;  %v2559_v40 = vadd.f32 %v2558_v37, %v2287_v23  ;;  %v2560_v41 = vpop.f32.mrb[123].mxu1  ;;  %2760 = vmatpush1.bf16.msra.mxu1 %v2684_v24  ;;  %v2631_v3 = vmax.f32 %v2555_v32, 0.0 }
 0x46e   : > { %v2634_v43 = vmax.f32 %v2448_v35, 0.0  ;;  %v2561_v44 = vadd.f32 %v2560_v41, %v2287_v23  ;;  %v2632_v49 = vmax.f32 %v2557_v36, 0.0 }
 0x46f   : > { %v2686_v45 = vpack.c.bf16 %v2633_v39, %v2629_v38  ;;  %v2635_v46 = vmax.f32 %v2559_v40, 0.0 }
 0x470   : > { %v2687_v48 = vpack.c.bf16 %v2634_v43, %v2630_v42  ;;  %v2636_v50 = vmax.f32 %v2561_v44, 0.0  ;;  %v2451_v51 = vpop.f32.mrb[124].mxu0  ;;  %v2312_v44 = vpop.permute.xlu0 %2311 }
 0x471   : > { %v2688_v53 = vpack.c.bf16 %v2635_v46, %v2631_v3  ;;  %v2452_v54 = vadd.f32 %v2451_v51, %v2292_v47  ;;  %v2453_v55 = vpop.f32.mrb[125].mxu0 }
 0x472   : > { %v2689_v56 = vpack.c.bf16 %v2636_v50, %v2632_v49  ;;  %v2454_v57 = vadd.f32 %v2453_v55, %v2292_v47  ;;  %v2455_v58 = vpop.f32.mrb[126].mxu0  ;;  %v2564_v59 = vpop.f32.mrb[124].mxu1  ;;  %2720 = vmatprep.subr.bf16.mxu0 %v2687_v48 }
 0x473   : > { %v2456_v60 = vadd.f32 %v2455_v58, %v2297_v52  ;;  %v2565_v61 = vadd.f32 %v2564_v59, %v2292_v47  ;;  %v2457_v62 = vpop.f32.mrb[127].mxu0  ;;  %v2566_v63 = vpop.f32.mrb[125].mxu1  ;;  %2721 = vmatpush1.bf16.msra.mxu0 %v2686_v45  ;;  %v2637_v4 = vmax.f32 %v2452_v54, 0.0 }
 0x474   : > { %v2458_v0 = vadd.f32 %v2457_v62, %v2297_v52  ;;  %v2567_v1 = vadd.f32 %v2566_v63, %v2292_v47  ;;  %v2568_v2 = vpop.f32.mrb[126].mxu1  ;;  %2761 = vmatprep.subr.bf16.mxu1 %v2689_v56  ;;  %v2638_v8 = vmax.f32 %v2454_v57, 0.0  ;;  %v2317_v48 = vpop.permute.xlu1 %2316 }
 0x475   : > { %v2641_v5 = vmax.f32 %v2456_v60, 0.0  ;;  %v2569_v6 = vadd.f32 %v2568_v2, %v2297_v52  ;;  %v2570_v7 = vpop.f32.mrb[127].mxu1  ;;  %2762 = vmatpush1.bf16.msra.mxu1 %v2688_v53  ;;  %v2639_v12 = vmax.f32 %v2565_v61, 0.0 }
 0x476   : > { %v2642_v9 = vmax.f32 %v2458_v0, 0.0  ;;  %v2571_v10 = vadd.f32 %v2570_v7, %v2297_v52  ;;  %v2640_v16 = vmax.f32 %v2567_v1, 0.0 }
 0x477   : > { %v2690_v11 = vpack.c.bf16 %v2641_v5, %v2637_v4  ;;  %v2643_v13 = vmax.f32 %v2569_v6, 0.0 }
 0x478   : > { %v2691_v15 = vpack.c.bf16 %v2642_v9, %v2638_v8  ;;  %v2644_v17 = vmax.f32 %v2571_v10, 0.0  ;;  %v2461_v18 = vpop.f32.mrb[128].mxu0  ;;  %v2322_v10 = vpop.permute.xlu0 %2321 }
 0x479   : > { %v2692_v20 = vpack.c.bf16 %v2643_v13, %v2639_v12  ;;  %v2462_v21 = vadd.f32 %v2461_v18, %v2302_v14  ;;  %v2463_v22 = vpop.f32.mrb[129].mxu0 }
 0x47a   : > { %v2693_v23 = vpack.c.bf16 %v2644_v17, %v2640_v16  ;;  %v2464_v24 = vadd.f32 %v2463_v22, %v2302_v14  ;;  %v2465_v25 = vpop.f32.mrb[130].mxu0  ;;  %v2574_v26 = vpop.f32.mrb[128].mxu1  ;;  %2722 = vmatprep.subr.bf16.mxu0 %v2691_v15 }
 0x47b   : > { %v2466_v27 = vadd.f32 %v2465_v25, %v2307_v19  ;;  %v2575_v28 = vadd.f32 %v2574_v26, %v2302_v14  ;;  %v2467_v29 = vpop.f32.mrb[131].mxu0  ;;  %v2576_v30 = vpop.f32.mrb[129].mxu1  ;;  %2723 = vmatpush1.bf16.msra.mxu0 %v2690_v11  ;;  %v2645_v34 = vmax.f32 %v2462_v21, 0.0 }
 0x47c   : > { %v2468_v31 = vadd.f32 %v2467_v29, %v2307_v19  ;;  %v2577_v32 = vadd.f32 %v2576_v30, %v2302_v14  ;;  %v2578_v33 = vpop.f32.mrb[130].mxu1  ;;  %2763 = vmatprep.subr.bf16.mxu1 %v2693_v23  ;;  %v2646_v38 = vmax.f32 %v2464_v24, 0.0  ;;  %v2327_v15 = vpop.permute.xlu1 %2326 }
 0x47d   : > { %v2649_v35 = vmax.f32 %v2466_v27, 0.0  ;;  %v2579_v36 = vadd.f32 %v2578_v33, %v2307_v19  ;;  %v2580_v37 = vpop.f32.mrb[131].mxu1  ;;  %2764 = vmatpush1.bf16.msra.mxu1 %v2692_v20  ;;  %v2647_v42 = vmax.f32 %v2575_v28, 0.0 }
 0x47e   : > { %v2650_v39 = vmax.f32 %v2468_v31, 0.0  ;;  %v2581_v40 = vadd.f32 %v2580_v37, %v2307_v19  ;;  %v2648_v3 = vmax.f32 %v2577_v32, 0.0 }
 0x47f   : > { %v2694_v41 = vpack.c.bf16 %v2649_v35, %v2645_v34  ;;  %v2651_v43 = vmax.f32 %v2579_v36, 0.0 }
 0x480   : > { %v2695_v45 = vpack.c.bf16 %v2650_v39, %v2646_v38  ;;  %v2652_v46 = vmax.f32 %v2581_v40, 0.0  ;;  %v2471_v47 = vpop.f32.mrb[132].mxu0  ;;  %v2332_v40 = vpop.permute.xlu0 %2331 }
 0x481   : > { %v2696_v49 = vpack.c.bf16 %v2651_v43, %v2647_v42  ;;  %v2472_v50 = vadd.f32 %v2471_v47, %v2312_v44  ;;  %v2473_v51 = vpop.f32.mrb[133].mxu0 }
 0x482   : > { %v2697_v52 = vpack.c.bf16 %v2652_v46, %v2648_v3  ;;  %v2474_v53 = vadd.f32 %v2473_v51, %v2312_v44  ;;  %v2475_v54 = vpop.f32.mrb[134].mxu0  ;;  %v2584_v55 = vpop.f32.mrb[132].mxu1  ;;  %2724 = vmatprep.subr.bf16.mxu0 %v2695_v45 }
 0x483   : > { %v2476_v56 = vadd.f32 %v2475_v54, %v2317_v48  ;;  %v2585_v57 = vadd.f32 %v2584_v55, %v2312_v44  ;;  %v2477_v58 = vpop.f32.mrb[135].mxu0  ;;  %v2586_v59 = vpop.f32.mrb[133].mxu1  ;;  %2725 = vmatpush1.bf16.msra.mxu0 %v2694_v41  ;;  %v2653_v63 = vmax.f32 %v2472_v50, 0.0 }
 0x484   : > { %v2478_v60 = vadd.f32 %v2477_v58, %v2317_v48  ;;  %v2587_v61 = vadd.f32 %v2586_v59, %v2312_v44  ;;  %v2588_v62 = vpop.f32.mrb[134].mxu1  ;;  %2765 = vmatprep.subr.bf16.mxu1 %v2697_v52  ;;  %v2654_v4 = vmax.f32 %v2474_v53, 0.0  ;;  %v2337_v45 = vpop.permute.xlu1 %2336 }
 0x485   : > { %v2657_v0 = vmax.f32 %v2476_v56, 0.0  ;;  %v2589_v1 = vadd.f32 %v2588_v62, %v2317_v48  ;;  %v2590_v2 = vpop.f32.mrb[135].mxu1  ;;  %2766 = vmatpush1.bf16.msra.mxu1 %v2696_v49  ;;  %v2655_v8 = vmax.f32 %v2585_v57, 0.0 }
 0x486   : > { %v2658_v5 = vmax.f32 %v2478_v60, 0.0  ;;  %v2591_v6 = vadd.f32 %v2590_v2, %v2317_v48  ;;  %v2656_v12 = vmax.f32 %v2587_v61, 0.0 }
 0x487   : > { %v2698_v7 = vpack.c.bf16 %v2657_v0, %v2653_v63  ;;  %v2659_v9 = vmax.f32 %v2589_v1, 0.0 }
 0x488   : > { %v2699_v11 = vpack.c.bf16 %v2658_v5, %v2654_v4  ;;  %v2660_v13 = vmax.f32 %v2591_v6, 0.0  ;;  %v2481_v14 = vpop.f32.mrb[136].mxu0 }
 0x489   : > { %v2700_v16 = vpack.c.bf16 %v2659_v9, %v2655_v8  ;;  %v2482_v17 = vadd.f32 %v2481_v14, %v2322_v10  ;;  %v2483_v18 = vpop.f32.mrb[137].mxu0 }
 0x48a   : > { %v2701_v19 = vpack.c.bf16 %v2660_v13, %v2656_v12  ;;  %v2484_v20 = vadd.f32 %v2483_v18, %v2322_v10  ;;  %v2485_v21 = vpop.f32.mrb[138].mxu0  ;;  %v2594_v22 = vpop.f32.mrb[136].mxu1  ;;  %2726 = vmatprep.subr.bf16.mxu0 %v2699_v11  ;;  %v2677_v11 = vld [vmem:[%s3764_s9] sm:$0x3] }
 0x48b   : > { %v2486_v23 = vadd.f32 %v2485_v21, %v2327_v15  ;;  %v2595_v24 = vadd.f32 %v2594_v22, %v2322_v10  ;;  %v2487_v25 = vpop.f32.mrb[139].mxu0  ;;  %v2596_v26 = vpop.f32.mrb[137].mxu1  ;;  %2727 = vmatpush1.bf16.msra.mxu0 %v2698_v7  ;;  %v2661_v30 = vmax.f32 %v2482_v17, 0.0 }
 0x48c   : > { %v2488_v27 = vadd.f32 %v2487_v25, %v2327_v15  ;;  %v2597_v28 = vadd.f32 %v2596_v26, %v2322_v10  ;;  %v2598_v29 = vpop.f32.mrb[138].mxu1  ;;  %2767 = vmatprep.subr.bf16.mxu1 %v2701_v19  ;;  %v2662_v34 = vmax.f32 %v2484_v20, 0.0  ;;  %v2714_v12 = vpop.permute.xlu0 %2713 }
 0x48d   : > { %v2665_v31 = vmax.f32 %v2486_v23, 0.0  ;;  %v2599_v32 = vadd.f32 %v2598_v29, %v2327_v15  ;;  %v2600_v33 = vpop.f32.mrb[139].mxu1  ;;  %2768 = vmatpush1.bf16.msra.mxu1 %v2700_v16  ;;  %v2663_v38 = vmax.f32 %v2595_v24, 0.0 }
 0x48e   : > { %v2666_v35 = vmax.f32 %v2488_v27, 0.0  ;;  %v2601_v36 = vadd.f32 %v2600_v33, %v2327_v15  ;;  %v2664_v42 = vmax.f32 %v2597_v28, 0.0 }
 0x48f   : > { %v2702_v37 = vpack.c.bf16 %v2665_v31, %v2661_v30  ;;  %v2667_v39 = vmax.f32 %v2599_v32, 0.0 }
 0x490   : > { %v2703_v41 = vpack.c.bf16 %v2666_v35, %v2662_v34  ;;  %v2668_v43 = vmax.f32 %v2601_v36, 0.0  ;;  %v2491_v44 = vpop.f32.mrb[140].mxu0 }
 0x491   : > { %v2704_v3 = vpack.c.bf16 %v2667_v39, %v2663_v38  ;;  %v2492_v46 = vadd.f32 %v2491_v44, %v2332_v40  ;;  %v2493_v47 = vpop.f32.mrb[141].mxu0 }
 0x492   : > { %v2705_v48 = vpack.c.bf16 %v2668_v43, %v2664_v42  ;;  %v2494_v49 = vadd.f32 %v2493_v47, %v2332_v40  ;;  %v2495_v50 = vpop.f32.mrb[142].mxu0  ;;  %v2604_v51 = vpop.f32.mrb[140].mxu1  ;;  %2728 = vmatprep.subr.bf16.mxu0 %v2703_v41 }
 0x493   : > { %v2496_v52 = vadd.f32 %v2495_v50, %v2337_v45  ;;  %v2605_v53 = vadd.f32 %v2604_v51, %v2332_v40  ;;  %v2497_v54 = vpop.f32.mrb[143].mxu0  ;;  %v2606_v55 = vpop.f32.mrb[141].mxu1  ;;  %2729 = vmatpush1.bf16.msra.mxu0 %v2702_v37  ;;  %v2669_v59 = vmax.f32 %v2492_v46, 0.0 }
 0x494   : > { %v2498_v56 = vadd.f32 %v2497_v54, %v2337_v45  ;;  %v2607_v57 = vadd.f32 %v2606_v55, %v2332_v40  ;;  %v2608_v58 = vpop.f32.mrb[142].mxu1  ;;  %2769 = vmatprep.subr.bf16.mxu1 %v2705_v48  ;;  %v2670_v63 = vmax.f32 %v2494_v49, 0.0 }
 0x495   : > { %v2673_v60 = vmax.f32 %v2496_v52, 0.0  ;;  %v2609_v61 = vadd.f32 %v2608_v58, %v2337_v45  ;;  %v2610_v62 = vpop.f32.mrb[143].mxu1  ;;  %2770 = vmatpush1.bf16.msra.mxu1 %v2704_v3  ;;  %v2671_v4 = vmax.f32 %v2605_v53, 0.0 }
 0x496   : > { %v2674_v0 = vmax.f32 %v2498_v56, 0.0  ;;  %v2611_v1 = vadd.f32 %v2610_v62, %v2337_v45  ;;  %v2672_v7 = vmax.f32 %v2607_v57, 0.0 }
 0x497   : > { %v2706_v2 = vpack.c.bf16 %v2673_v60, %v2669_v59  ;;  %v2675_v5 = vmax.f32 %v2609_v61, 0.0 }
 0x498   : > { %v2707_v6 = vpack.c.bf16 %v2674_v0, %v2670_v63  ;;  %v2676_v8 = vmax.f32 %v2611_v1, 0.0 }
 0x499   : > { %v2708_v9 = vpack.c.bf16 %v2675_v5, %v2671_v4 }
 0x49a   : > { %v2709_v10 = vpack.c.bf16 %v2676_v8, %v2672_v7  ;;  %2730 = vmatprep.subr.bf16.mxu0 %v2707_v6 }
 0x49b   : > { %2731 = vmatpush1.bf16.msra.mxu0 %v2706_v2 }
 0x49c   : > { %2771 = vmatprep.subr.bf16.mxu1 %v2709_v10 }
 0x49d   : > { %2772 = vmatpush1.bf16.msra.mxu1 %v2708_v9 }
 0x49e   : > { %2749 = vmatmul.mubr.bf16.vlgmr.msra.gmra.mrb[144].mxu0 %v2677_v11 }
 0x4a0   : > { %2790 = vmatmul.mubr.bf16.vlgmr.msra.gmra.mrb[144].mxu1 %v2677_v11 }
 0x571   : > { %v2750_v13 = vpop.f32.mrb[144].mxu0 }
 0x572   : > { %v3714_v14 = vadd.f32 %v2750_v13, %v2714_v12  ;;  %v2752_v15 = vpop.f32.mrb[145].mxu0 }
 0x573   : > { %v3716_v16 = vadd.f32 %v2752_v15, %v2714_v12  ;;  %v2791_v17 = vpop.f32.mrb[144].mxu1  ;;  %v2754_v18 = vpop.f32.mrb[146].mxu0 }
 0x574   : > { %v2799_v19 = vsel %vm2798_vm3, %v3714_v14, -inf  ;;  %v3720_v20 = vadd.f32 %v2791_v17, %v2714_v12  ;;  %v2793_v21 = vpop.f32.mrb[145].mxu1  ;;  %v2755_v22 = vpop.f32.mrb[147].mxu0 }
 0x575   : > { %v2800_v23 = vrot.slane %v2799_v19, 4  ;;  %v2806_v24 = vsel %vm2798_vm3, %v3716_v16, -inf  ;;  %v3724_v25 = vadd.f32 %v2793_v21, %v2714_v12  ;;  %v2795_v26 = vpop.f32.mrb[146].mxu1 }
 0x576   : > { %v2807_v27 = vrot.slane %v2806_v24, 4  ;;  %v2813_v28 = vsel %vm2798_vm3, %v3720_v20, -inf  ;;  %v2796_v29 = vpop.f32.mrb[147].mxu1 }
 0x577   : > { %v2801_v30 = vmax.f32 %v2799_v19, %v2800_v23  ;;  %v2814_v31 = vrot.slane %v2813_v28, 4  ;;  %v2820_v32 = vsel %vm2798_vm3, %v3724_v25, -inf }
 0x578   : > { %v2808_v33 = vmax.f32 %v2806_v24, %v2807_v27  ;;  %v2821_v34 = vrot.slane %v2820_v32, 4 }
 0x579   : > { %v2802_v35 = vrot.slane %v2801_v30, 2  ;;  %v2815_v36 = vmax.f32 %v2813_v28, %v2814_v31 }
 0x57a   : > { %v2809_v37 = vrot.slane %v2808_v33, 2  ;;  %v2822_v38 = vmax.f32 %v2820_v32, %v2821_v34 }
 0x57b   : > { %v2803_v39 = vmax.f32 %v2801_v30, %v2802_v35  ;;  %v2816_v40 = vrot.slane %v2815_v36, 2 }
 0x57c   : > { %v2810_v41 = vmax.f32 %v2808_v33, %v2809_v37  ;;  %v2823_v42 = vrot.slane %v2822_v38, 2 }
 0x57d   : > { %v2804_v43 = vrot.slane %v2803_v39, 1  ;;  %v2817_v44 = vmax.f32 %v2815_v36, %v2816_v40 }
 0x57e   : > { %v2811_v45 = vrot.slane %v2810_v41, 1  ;;  %v2824_v3 = vmax.f32 %v2822_v38, %v2823_v42 }
 0x57f   : > { %v2805_v46 = vmax.f32 %v2803_v39, %v2804_v43  ;;  %v2818_v47 = vrot.slane %v2817_v44, 1 }
 0x580   : > { %v2812_v48 = vmax.f32 %v2810_v41, %v2811_v45  ;;  %v2825_v49 = vrot.slane %v2824_v3, 1 }
 0x581   : > { %v2827_v50 = vsub.f32 %v3714_v14, %v2805_v46  ;;  %v2819_v51 = vmax.f32 %v2817_v44, %v2818_v47 }
 0x582   : > { %v2828_v52 = vsub.f32 %v3716_v16, %v2812_v48  ;;  %v2826_v53 = vmax.f32 %v2824_v3, %v2825_v49 }
 0x583   : > { %v2831_v54 = vmul.f32 1.442695, %v2827_v50  ;;  %v2829_v55 = vsub.f32 %v3720_v20, %v2819_v51 }
 0x584   : > { %v2833_v56 = vmul.f32 1.442695, %v2828_v52  ;;  %v2830_v57 = vsub.f32 %v3724_v25, %v2826_v53 }
 0x585   : > { %3190 = vpow2.f32 %v2831_v54  ;;  %v2835_v58 = vmul.f32 1.442695, %v2829_v55 }
 0x586   : > { %3192 = vpow2.f32 %v2833_v56  ;;  %v2837_v59 = vmul.f32 1.442695, %v2830_v57 }
 0x587   : > { %3194 = vpow2.f32 %v2835_v58 }
 0x588   : > { %3196 = vpow2.f32 %v2837_v59 }
 0x58f   : > { %v3191_v60 = vpop.eup %3190 }
 0x590   : > { %v3193_v61 = vpop.eup %3192  ;;  %v2839_v62 = vsel %vm2798_vm3, %v3191_v60, 0.0 }
 0x591   : > { %v3195_v63 = vpop.eup %3194  ;;  %v2840_v0 = vrot.slane %v2839_v62, 4  ;;  %v2846_v1 = vsel %vm2798_vm3, %v3193_v61, 0.0 }
 0x592   : > { %v3197_v2 = vpop.eup %3196  ;;  %v2847_v4 = vrot.slane %v2846_v1, 4  ;;  %v2853_v5 = vsel %vm2798_vm3, %v3195_v63, 0.0 }
 0x593   : > { %v2841_v6 = vadd.f32 %v2840_v0, %v2839_v62  ;;  %v2854_v7 = vrot.slane %v2853_v5, 4  ;;  %v2860_v8 = vsel %vm2798_vm3, %v3197_v2, 0.0 }
 0x594   : > { %v2848_v9 = vadd.f32 %v2847_v4, %v2846_v1  ;;  %v2861_v10 = vrot.slane %v2860_v8, 4 }
 0x595   : > { %v2842_v11 = vrot.slane %v2841_v6, 2  ;;  %v2855_v12 = vadd.f32 %v2854_v7, %v2853_v5 }
 0x596   : > { %v2849_v13 = vrot.slane %v2848_v9, 2  ;;  %v2862_v15 = vadd.f32 %v2861_v10, %v2860_v8 }
 0x597   : > { %v2843_v17 = vadd.f32 %v2842_v11, %v2841_v6  ;;  %v2856_v18 = vrot.slane %v2855_v12, 2 }
 0x598   : > { %v2850_v19 = vadd.f32 %v2849_v13, %v2848_v9  ;;  %v2863_v21 = vrot.slane %v2862_v15, 2 }
 0x599   : > { %v2844_v22 = vrot.slane %v2843_v17, 1  ;;  %v2857_v23 = vadd.f32 %v2856_v18, %v2855_v12 }
 0x59a   : > { %v2851_v24 = vrot.slane %v2850_v19, 1  ;;  %v2864_v26 = vadd.f32 %v2863_v21, %v2862_v15 }
 0x59b   : > { %v2845_v27 = vadd.f32 %v2844_v22, %v2843_v17  ;;  %v2858_v28 = vrot.slane %v2857_v23, 1 }
 0x59c   : > { %v2852_v29 = vadd.f32 %v2851_v24, %v2850_v19  ;;  %v2865_v30 = vrot.slane %v2864_v26, 1 }
 0x59d   : > { %3198 = vlog2.f32 %v2845_v27  ;;  %v2859_v31 = vadd.f32 %v2858_v28, %v2857_v23 }
 0x59e   : > { %3200 = vlog2.f32 %v2852_v29  ;;  %v2866_v32 = vadd.f32 %v2865_v30, %v2864_v26 }
 0x59f   : > { %3202 = vlog2.f32 %v2859_v31 }
 0x5a0   : > { %3204 = vlog2.f32 %v2866_v32 }
 0x5a7   : > { %v3199_v33 = vpop.eup %3198 }
 0x5a8   : > { %v3201_v34 = vpop.eup %3200  ;;  %v2868_v35 = vmul.f32 0.6931472, %v3199_v33 }
 0x5a9   : > { %v3203_v36 = vpop.eup %3202  ;;  %v2870_v37 = vmul.f32 0.6931472, %v3201_v34 }
 0x5aa   : > { %v3205_v38 = vpop.eup %3204  ;;  %v2875_v39 = vadd.f32 %v2868_v35, %v2805_v46  ;;  %v2872_v40 = vmul.f32 0.6931472, %v3203_v36 }
 0x5ab   : > { %v2876_v41 = vadd.f32 %v2870_v37, %v2812_v48  ;;  %v2874_v42 = vmul.f32 0.6931472, %v3205_v38 }
 0x5ac   : > { %v2879_v43 = vsub.f32 %v3714_v14, %v2875_v39  ;;  %v2877_v44 = vadd.f32 %v2872_v40, %v2819_v51 }
 0x5ad   : > { %v2880_v45 = vsub.f32 %v3716_v16, %v2876_v41  ;;  %v2878_v3 = vadd.f32 %v2874_v42, %v2826_v53 }
 0x5ae   : > { %v2881_v47 = vsub.f32 %v3720_v20, %v2877_v44 }
 0x5af   : > { %v2887_v49 = vcombine.low %v2879_v43, %v2880_v45  ;;  %v2882_v50 = vsub.f32 %v3724_v25, %v2878_v3 }
 0x5b1   : > { %2891 = vst [vmem:[%s464_s16] sm:$0xff] %v2887_v49  ;;  %v2888_v46 = vcombine.low %v2881_v47, %v2882_v50 }
 0x5b3   : > { %2892 = vst [vmem:[%s464_s16 + $0x8] sm:$0xff] %v2888_v46 }
 0x5b4 PF: > { %s21_s19 = sadd.s32 1, %s3228_s19   ;;  %s3767_s17 = smov %s3224_s18 }
 0x5b5   : > { %p18_p5 = scmp.ge.s32.totalorder %s21_s19, 4   ;;  %s3768_s18 = smov %s3770_s20 }
 0x5b7   :  { %20 = sbr.rel (!%p18_p5) target bundleno = 2 (0x2), region = 100 }

</bundles_post_ra>
